<compile_context>
chip_gen: v7x
topology: tpu7x:2x2x1
jax: 0.10.0
libtpu: 0.0.40
codegen_flags: <defaults>
</compile_context>

<pallas_src>
import functools
from typing import NamedTuple

import jax
import jax.numpy as jnp
from jax import lax
from jax.experimental import pallas as pl
from jax.experimental.pallas import tpu as pltpu


# ----------------------------------------------------------------------------
# Helpers / tile selection (chip generation is passed in explicitly).
# ----------------------------------------------------------------------------
def _round_up(x, m):
    return ((x + m - 1) // m) * m


def _device_generation():
    try:
        return jax.devices()[0].device_kind.lower()
    except Exception:  # pragma: no cover
        return ""


def _is_v7(generation):
    return "v7" in generation


def _choose_tk(K, generation):
    """Reduction tile (multiple of 128).  Single K step when K is small."""
    cap = 4096 if _is_v7(generation) else 8192   # v7x: 64 MiB physical VMEM
    if K <= cap:
        return _round_up(K, 128)
    return cap


def _choose_tm(M, generation):
    """M tile: multiple of 16 (bf16 sublanes), capped at 512 to fit VMEM while
    amortizing the per-M-tile re-streaming of the weight matrix."""
    return min(_round_up(M, 16), 512)


def _choose_tn(Np, num_m_tiles, generation):
    """Full padded N on single-TC chips.  On dual-TC v7x keep the MXU
    full-width (tn=Np) and split cores on the M axis; only fall back to a
    j-split when there is a single M tile to share."""
    if _is_v7(generation) and num_m_tiles == 1 and Np >= 256:
        return 128
    return Np


def _vmem_limit_bytes(tm, tk, tn, out_itemsize):
    a = 2 * tm * tk * 2            # bf16 A, double-buffered
    b = 2 * tk * tn * 2            # bf16 B, double-buffered
    o = 2 * tm * tn * out_itemsize
    bias = 2 * tn * 4
    acc = tm * tn * 4              # f32 scratch accumulator
    need = a + b + o + bias + acc
    return min(max(int(need * 1.5), 32 << 20), 64 << 20)


class ConvCfg(NamedTuple):
    kh: int
    kw: int
    stride: int
    padding: int
    c_out: int
    k: int    # C_in * kh * kw (unpadded reduction size)
    tk: int   # reduction tile used in the Pallas matmul


# ----------------------------------------------------------------------------
# Pallas kernel: tiled matmul, f32 scratch accumulator, bias + exact-erf GELU
# fused into the last K step.  Grid = (cdiv(M,tm), Np/tn, Kp/tk); K innermost.
# ----------------------------------------------------------------------------
def _matmul_bias_act_kernel(a_ref, b_ref, bias_ref, o_ref, acc_ref, *,
                            apply_gelu, k_total, tk, mask_k):
    k = pl.program_id(2)

    @pl.when(k == 0)
    def _():
        acc_ref[...] = jnp.zeros_like(acc_ref)

    a = a_ref[...]
    if mask_k:
        # A is unpadded in K: zero the K-overhang columns so stale VMEM
        # (possibly NaN) in the out-of-bounds part of the last K block cannot
        # contaminate valid rows (weight overhang rows are zero-padded).
        col = lax.broadcasted_iota(jnp.int32, (1, a.shape[1]), 1) + k * tk
        a = jnp.where(col < k_total, a, jnp.zeros_like(a))

    acc_ref[...] += jnp.dot(a, b_ref[...], preferred_element_type=jnp.float32)

    @pl.when(k == pl.num_programs(2) - 1)
    def _():
        y = acc_ref[...] + bias_ref[...]            # (1, tn) bias broadcasts
        if apply_gelu:
            # v2 = y*0.5 ; v3 = y*0.70710678... ; v4 = erf(v3); v5 = v4+1; v6 = v2*v5
            y = (y * 0.5) * (lax.erf(y * 0.7071067811865476) + 1.0)
        o_ref[...] = y.astype(o_ref.dtype)


def matmul_bias_gelu(a, w_p, bias_p, *, apply_gelu, out_dtype, tm, tn, tk,
                     k_total, vmem_limit):
    """(a @ w_p + bias_p), optionally followed by exact GELU.

    a: (M, K) bf16 (unpadded), w_p: (Kp, Np) bf16 zero-padded, bias_p: (1, Np) f32.
    """
    M, K = a.shape
    Kp, Np = w_p.shape
    assert K == k_total and Kp == _round_up(k_total, tk) and Np % tn == 0

    mask_k = (k_total % tk) != 0
    kernel = functools.partial(_matmul_bias_act_kernel, apply_gelu=apply_gelu,
                               k_total=k_total, tk=tk, mask_k=mask_k)

    return pl.pallas_call(
        kernel,
        out_shape=jax.ShapeDtypeStruct((M, Np), out_dtype),
        grid_spec=pltpu.PrefetchScalarGridSpec(
            num_scalar_prefetch=0,
            grid=(pl.cdiv(M, tm), Np // tn, Kp // tk),
            in_specs=[
                pl.BlockSpec((tm, tk), lambda i, j, k: (i, k)),
                pl.BlockSpec((tk, tn), lambda i, j, k: (k, j)),
                pl.BlockSpec((1, tn), lambda i, j, k: (0, j)),
            ],
            out_specs=pl.BlockSpec((tm, tn), lambda i, j, k: (i, j)),
            scratch_shapes=[pltpu.VMEM((tm, tn), jnp.float32)],
        ),
        compiler_params=pltpu.CompilerParams(
            dimension_semantics=("parallel", "parallel", "arbitrary"),
            vmem_limit_bytes=vmem_limit,
        ),
    )(a, w_p, bias_p)


# ----------------------------------------------------------------------------
# One-time weight preparation (PyTorch (C_out, C_in, kh, kw) layout).
# ----------------------------------------------------------------------------
def prepare_conv_params(weight, bias, *, stride, padding, generation):
    c_out, c_in, kh, kw = weight.shape
    K = c_in * kh * kw
    tk = _choose_tk(K, generation)
    Kp = _round_up(K, tk)
    Np = _round_up(c_out, 128)
    w_mat = weight.reshape(c_out, K).T.astype(jnp.bfloat16)       # (K, C_out)
    w_p = jnp.zeros((Kp, Np), jnp.bfloat16).at[:K, :c_out].set(w_mat)
    b_p = jnp.zeros((1, Np), jnp.float32).at[0, :c_out].set(bias.astype(jnp.float32))
    cfg = ConvCfg(kh=kh, kw=kw, stride=stride, padding=padding,
                  c_out=c_out, k=K, tk=tk)
    return {"w": w_p, "b": b_p}, cfg


def conv2d_gelu(x, arrays, cfg: ConvCfg, *, apply_gelu, out_dtype, generation,
                input_layout):
    """Conv2d (PyTorch semantics) + optional exact-erf GELU.  Returns NHWC.

    Patch extraction is a single fused XLA op producing bf16 patches in
    (N, Ho, Wo, C_in*kh*kw) layout; the feature order (C_in slowest, then
    kh, kw) matches PyTorch's weight.reshape(C_out, -1) flattening.
    """
    if input_layout == "NCHW":
        dn = ("NCHW", "OIHW", "NHWC")
    else:
        dn = ("NHWC", "HWIO", "NHWC")
    patches = lax.conv_general_dilated_patches(
        x.astype(jnp.bfloat16),
        filter_shape=(cfg.kh, cfg.kw),
        window_strides=(cfg.stride, cfg.stride),
        padding=[(cfg.padding, cfg.padding), (cfg.padding, cfg.padding)],
        dimension_numbers=dn,
    )
    n, ho, wo, kf = patches.shape
    assert kf == cfg.k
    M = n * ho * wo
    a = patches.reshape(M, cfg.k)          # NO pad copy: cdiv grid + in-kernel mask

    _, Np = arrays["w"].shape
    tm = _choose_tm(M, generation)
    tn = _choose_tn(Np, pl.cdiv(M, tm), generation)
    vmem_limit = _vmem_limit_bytes(tm, cfg.tk, tn, jnp.dtype(out_dtype).itemsize)

    y = matmul_bias_gelu(a, arrays["w"], arrays["b"], apply_gelu=apply_gelu,
                         out_dtype=out_dtype, tm=tm, tn=tn, tk=cfg.tk,
                         k_total=cfg.k, vmem_limit=vmem_limit)
    return y[:M, :cfg.c_out].reshape(n, ho, wo, cfg.c_out)


# ----------------------------------------------------------------------------
# Pure-JAX f32 reference (correctness check in __main__ only).
# ----------------------------------------------------------------------------
def reference_forward(x, w1, b1, w2, b2):
    def conv(v, w, b, stride, padding):
        y = lax.conv_general_dilated(
            v, w, window_strides=(stride, stride),
            padding=[(padding, padding), (padding, padding)],
            dimension_numbers=("NCHW", "OIHW", "NCHW"),
            precision=lax.Precision.HIGHEST)
        return y + b[None, :, None, None]

    def gelu(v):
        return (v * 0.5) * (lax.erf(v * 0.7071067811865476) + 1.0)

    v6 = gelu(conv(x, w1, b1, 3, 0))
    v12 = gelu(conv(v6, w2, b2, 3, 1))
    return v12


if __name__ == "__main__":
    key = jax.random.PRNGKey(0)
    k1, k2, k3, k4, kx = jax.random.split(key, 5)

    # Channel counts are fixed by the module; small spatial size for the test
    # (the reference used 240x240; W must be >= 33 for conv1's kernel).
    w1 = jax.random.normal(k1, (190, 190, 11, 33), jnp.float32) / jnp.sqrt(190 * 11 * 33)
    b1 = jax.random.normal(k2, (190,), jnp.float32) * 0.01
    w2 = jax.random.normal(k3, (139, 190, 3, 3), jnp.float32) / jnp.sqrt(190 * 3 * 3)
    b2 = jax.random.normal(k4, (139,), jnp.float32) * 0.01
    x = jax.random.normal(kx, (1, 190, 48, 48), jnp.float32)

    gen = _device_generation()   # resolved once, passed explicitly (AOT-safe)

    # One-time weight prep (reshape + transpose + zero-pad + bf16 cast).
    arrays1, cfg1 = prepare_conv_params(w1, b1, stride=3, padding=0, generation=gen)
    arrays2, cfg2 = prepare_conv_params(w2, b2, stride=3, padding=1, generation=gen)

    @jax.jit
    def forward(xx, a1, a2):
        # conv1 + GELU (v1..v6): emit bf16 NHWC straight into conv2.
        v6 = conv2d_gelu(xx, a1, cfg1, apply_gelu=True, out_dtype=jnp.bfloat16,
                         generation=gen, input_layout="NCHW")
        # conv2 + GELU (v7..v12): final result in f32.
        v12 = conv2d_gelu(v6, a2, cfg2, apply_gelu=True, out_dtype=jnp.float32,
                          generation=gen, input_layout="NHWC")
        # TODO(synk): self.conv3 (ConvTranspose2d(202, 113, 12)) cannot consume
        # v12 (139 channels != 202); the reference forward itself errors there,
        # so the translated model stops at v12.
        return jnp.transpose(v12, (0, 3, 1, 2))   # back to NCHW

    out = jax.block_until_ready(forward(x, arrays1, arrays2))

    # conv1: (48-11)//3+1=13, (48-33)//3+1=6 ; conv2: (13+2-3)//3+1=5, (6+2-3)//3+1=2
    assert out.shape == (1, 139, 5, 2), out.shape
    assert bool(jnp.all(jnp.isfinite(out)))

    # Numerical check vs. f32 XLA reference (bf16 operands, f32 accumulation,
    # bf16 intermediate between the convs).
    ref = jax.block_until_ready(reference_forward(x, w1, b1, w2, b2))
    rel_err = float(jnp.max(jnp.abs(out - ref)) / (jnp.max(jnp.abs(ref)) + 1e-6))
    assert rel_err < 0.05, rel_err

    print("KERNEL_OK")
</pallas_src>

<mosaic_0001>
module attributes {stable_mosaic.version = 11 : i64} {
  func.func @_matmul_bias_act_kernel(%arg0: i32, %arg1: i32, %arg2: i32, %arg3: memref<80x8192xbf16, #tpu.memory_space<vmem>>, %arg4: memref<8192x256xbf16, #tpu.memory_space<vmem>>, %arg5: memref<1x256xf32, #tpu.memory_space<vmem>>, %arg6: memref<80x256xbf16, #tpu.memory_space<vmem>>, %arg7: memref<80x256xf32, #tpu.memory_space<vmem>>) attributes {dimension_semantics = [#tpu.dimension_semantics<parallel>, #tpu.dimension_semantics<parallel>, #tpu.dimension_semantics<arbitrary>], iteration_bounds = array<i64: 1, 1, 9>, scalar_prefetch = 0 : i64, scratch_operands = 1 : i64, tpu.core_type = #tpu.core_type<tc>, window_params = [{transform_indices = @transform_0, window_bounds = array<i64: 80, 8192>}, {transform_indices = @transform_1, window_bounds = array<i64: 8192, 256>}, {transform_indices = @transform_2, window_bounds = array<i64: 1, 256>}, {transform_indices = @transform_3, window_bounds = array<i64: 80, 256>}]} {
    %c0_i32 = arith.constant 0 : i32
    %0 = arith.cmpi eq, %arg2, %c0_i32 : i32
    %1 = arith.extui %0 : i1 to i32
    %c0_i32_0 = arith.constant 0 : i32
    %2 = arith.cmpi ne, %1, %c0_i32_0 : i32
    scf.if %2 {
      %cst_10 = arith.constant 0.000000e+00 : f32
      %22 = vector.broadcast %cst_10 : f32 to vector<80x256xf32>
      %c0_11 = arith.constant 0 : index
      %c0_12 = arith.constant 0 : index
      %23 = vector.load %arg7[%c0_11, %c0_12] : memref<80x256xf32, #tpu.memory_space<vmem>>, vector<80x256xf32>
      tpu.vector_store %arg7[%c0_11, %c0_12], %22 {strides = array<i32>} : memref<80x256xf32, #tpu.memory_space<vmem>>, vector<80x256xf32>,
    } else {
    }
    %c0 = arith.constant 0 : index
    %c0_1 = arith.constant 0 : index
    %3 = vector.load %arg3[%c0, %c0_1] : memref<80x8192xbf16, #tpu.memory_space<vmem>>, vector<80x8192xbf16>
    %4 = tpu.iota {dimensions = array<i32: 1>} : vector<1x8192xi32>
    %c8192_i32 = arith.constant 8192 : i32
    %5 = arith.muli %arg2, %c8192_i32 : i32
    %6 = vector.broadcast %5 : i32 to vector<1x8192xi32>
    %7 = arith.addi %4, %6 : vector<1x8192xi32>
    %c68970_i32 = arith.constant 68970 : i32
    %8 = vector.broadcast %c68970_i32 : i32 to vector<1x8192xi32>
    %9 = arith.cmpi slt, %7, %8 : vector<1x8192xi32>
    %cst = arith.constant 0.000000e+00 : bf16
    %10 = vector.broadcast %cst : bf16 to vector<80x8192xbf16>
    %11 = vector.shape_cast %9 : vector<1x8192xi1> to vector<1x8192xi1>
    %12 = vector.broadcast %11 : vector<1x8192xi1> to vector<80x8192xi1>
    %13 = arith.select %12, %3, %10 : vector<80x8192xi1>, vector<80x8192xbf16>
    %c0_2 = arith.constant 0 : index
    %c0_3 = arith.constant 0 : index
    %14 = vector.load %arg7[%c0_2, %c0_3] : memref<80x256xf32, #tpu.memory_space<vmem>>, vector<80x256xf32>
    %c0_4 = arith.constant 0 : index
    %c0_5 = arith.constant 0 : index
    %15 = vector.load %arg4[%c0_4, %c0_5] : memref<8192x256xbf16, #tpu.memory_space<vmem>>, vector<8192x256xbf16>
    %cst_6 = arith.constant dense<0.000000e+00> : vector<80x256xf32>
    %16 = tpu.matmul %13, %15, %cst_6 {dimension_numbers = #tpu.dot_dimension_numbers<[1], [0], [0], [1], [0, 0, 1, 1], [], []>} : vector<80x8192xbf16>, vector<8192x256xbf16>, vector<80x256xf32> -> vector<80x256xf32>
    %17 = arith.addf %14, %16 : vector<80x256xf32>
    %c0_7 = arith.constant 0 : index
    %c0_8 = arith.constant 0 : index
    %18 = vector.load %arg7[%c0_7, %c0_8] : memref<80x256xf32, #tpu.memory_space<vmem>>, vector<80x256xf32>
    tpu.vector_store %arg7[%c0_7, %c0_8], %17 {strides = array<i32>} : memref<80x256xf32, #tpu.memory_space<vmem>>, vector<80x256xf32>,
    %c8_i32 = arith.constant 8 : i32
    %19 = arith.cmpi eq, %arg2, %c8_i32 : i32
    %20 = arith.extui %19 : i1 to i32
    %c0_i32_9 = arith.constant 0 : i32
    %21 = arith.cmpi ne, %20, %c0_i32_9 : i32
    scf.if %21 {
      %c0_10 = arith.constant 0 : index
      %c0_11 = arith.constant 0 : index
      %22 = vector.load %arg7[%c0_10, %c0_11] : memref<80x256xf32, #tpu.memory_space<vmem>>, vector<80x256xf32>
      %c0_12 = arith.constant 0 : index
      %c0_13 = arith.constant 0 : index
      %23 = vector.load %arg5[%c0_12, %c0_13] : memref<1x256xf32, #tpu.memory_space<vmem>>, vector<1x256xf32>
      %24 = vector.broadcast %23 : vector<1x256xf32> to vector<80x256xf32>
      %25 = arith.addf %22, %24 : vector<80x256xf32>
      %cst_14 = arith.constant 5.000000e-01 : f32
      %26 = vector.broadcast %cst_14 : f32 to vector<80x256xf32>
      %27 = arith.mulf %25, %26 : vector<80x256xf32>
      %cst_15 = arith.constant 0.707106769 : f32
      %28 = vector.broadcast %cst_15 : f32 to vector<80x256xf32>
      %29 = arith.mulf %25, %28 : vector<80x256xf32>
      %30 = math.erf %29 : vector<80x256xf32>
      %cst_16 = arith.constant 1.000000e+00 : f32
      %31 = vector.broadcast %cst_16 : f32 to vector<80x256xf32>
      %32 = arith.addf %30, %31 : vector<80x256xf32>
      %33 = arith.mulf %27, %32 : vector<80x256xf32>
      %34 = arith.truncf %33 : vector<80x256xf32> to vector<80x256xbf16>
      %c0_17 = arith.constant 0 : index
      %c0_18 = arith.constant 0 : index
      %35 = vector.load %arg6[%c0_17, %c0_18] : memref<80x256xbf16, #tpu.memory_space<vmem>>, vector<80x256xbf16>
      tpu.vector_store %arg6[%c0_17, %c0_18], %34 {strides = array<i32>} : memref<80x256xbf16, #tpu.memory_space<vmem>>, vector<80x256xbf16>,
    } else {
    }
    return
  }
  func.func @transform_0(%arg0: i32, %arg1: i32, %arg2: i32) -> (i32, i32) {
    %c0_i32 = arith.constant 0 : i32
    return %arg0, %arg2 : i32, i32
  }
  func.func @transform_1(%arg0: i32, %arg1: i32, %arg2: i32) -> (i32, i32) {
    %c0_i32 = arith.constant 0 : i32
    return %arg2, %arg1 : i32, i32
  }
  func.func @transform_2(%arg0: i32, %arg1: i32, %arg2: i32) -> (i32, i32) {
    %c0_i32 = arith.constant 0 : i32
    %c0_i32_0 = arith.constant 0 : i32
    return %c0_i32, %arg1 : i32, i32
  }
  func.func @transform_3(%arg0: i32, %arg1: i32, %arg2: i32) -> (i32, i32) {
    %c0_i32 = arith.constant 0 : i32
    return %arg0, %arg1 : i32, i32
  }
}

module attributes {stable_mosaic.version = 11 : i64} {
  func.func @_matmul_bias_act_kernel(%arg0: i32, %arg1: i32, %arg2: i32, %arg3: memref<16x1792xbf16, #tpu.memory_space<vmem>>, %arg4: memref<1792x256xbf16, #tpu.memory_space<vmem>>, %arg5: memref<1x256xf32, #tpu.memory_space<vmem>>, %arg6: memref<16x256xf32, #tpu.memory_space<vmem>>, %arg7: memref<16x256xf32, #tpu.memory_space<vmem>>) attributes {dimension_semantics = [#tpu.dimension_semantics<parallel>, #tpu.dimension_semantics<parallel>, #tpu.dimension_semantics<arbitrary>], iteration_bounds = array<i64: 1, 1, 1>, scalar_prefetch = 0 : i64, scratch_operands = 1 : i64, tpu.core_type = #tpu.core_type<tc>, window_params = [{transform_indices = @transform_0, window_bounds = array<i64: 16, 1792>}, {transform_indices = @transform_1, window_bounds = array<i64: 1792, 256>}, {transform_indices = @transform_2, window_bounds = array<i64: 1, 256>}, {transform_indices = @transform_3, window_bounds = array<i64: 16, 256>}]} {
    %c0_i32 = arith.constant 0 : i32
    %0 = arith.cmpi eq, %arg2, %c0_i32 : i32
    %1 = arith.extui %0 : i1 to i32
    %c0_i32_0 = arith.constant 0 : i32
    %2 = arith.cmpi ne, %1, %c0_i32_0 : i32
    scf.if %2 {
      %cst_11 = arith.constant 0.000000e+00 : f32
      %22 = vector.broadcast %cst_11 : f32 to vector<16x256xf32>
      %c0_12 = arith.constant 0 : index
      %c0_13 = arith.constant 0 : index
      %23 = vector.load %arg7[%c0_12, %c0_13] : memref<16x256xf32, #tpu.memory_space<vmem>>, vector<16x256xf32>
      tpu.vector_store %arg7[%c0_12, %c0_13], %22 {strides = array<i32>} : memref<16x256xf32, #tpu.memory_space<vmem>>, vector<16x256xf32>,
    } else {
    }
    %c0 = arith.constant 0 : index
    %c0_1 = arith.constant 0 : index
    %3 = vector.load %arg3[%c0, %c0_1] : memref<16x1792xbf16, #tpu.memory_space<vmem>>, vector<16x1792xbf16>
    %4 = tpu.iota {dimensions = array<i32: 1>} : vector<1x1792xi32>
    %c1792_i32 = arith.constant 1792 : i32
    %5 = arith.muli %arg2, %c1792_i32 : i32
    %6 = vector.broadcast %5 : i32 to vector<1x1792xi32>
    %7 = arith.addi %4, %6 : vector<1x1792xi32>
    %c1710_i32 = arith.constant 1710 : i32
    %8 = vector.broadcast %c1710_i32 : i32 to vector<1x1792xi32>
    %9 = arith.cmpi slt, %7, %8 : vector<1x1792xi32>
    %cst = arith.constant 0.000000e+00 : bf16
    %10 = vector.broadcast %cst : bf16 to vector<16x1792xbf16>
    %11 = vector.shape_cast %9 : vector<1x1792xi1> to vector<1x1792xi1>
    %12 = vector.broadcast %11 : vector<1x1792xi1> to vector<16x1792xi1>
    %13 = arith.select %12, %3, %10 : vector<16x1792xi1>, vector<16x1792xbf16>
    %c0_2 = arith.constant 0 : index
    %c0_3 = arith.constant 0 : index
    %14 = vector.load %arg7[%c0_2, %c0_3] : memref<16x256xf32, #tpu.memory_space<vmem>>, vector<16x256xf32>
    %c0_4 = arith.constant 0 : index
    %c0_5 = arith.constant 0 : index
    %15 = vector.load %arg4[%c0_4, %c0_5] : memref<1792x256xbf16, #tpu.memory_space<vmem>>, vector<1792x256xbf16>
    %cst_6 = arith.constant dense<0.000000e+00> : vector<16x256xf32>
    %16 = tpu.matmul %13, %15, %cst_6 {dimension_numbers = #tpu.dot_dimension_numbers<[1], [0], [0], [1], [0, 0, 1, 1], [], []>} : vector<16x1792xbf16>, vector<1792x256xbf16>, vector<16x256xf32> -> vector<16x256xf32>
    %17 = arith.addf %14, %16 : vector<16x256xf32>
    %c0_7 = arith.constant 0 : index
    %c0_8 = arith.constant 0 : index
    %18 = vector.load %arg7[%c0_7, %c0_8] : memref<16x256xf32, #tpu.memory_space<vmem>>, vector<16x256xf32>
    tpu.vector_store %arg7[%c0_7, %c0_8], %17 {strides = array<i32>} : memref<16x256xf32, #tpu.memory_space<vmem>>, vector<16x256xf32>,
    %c0_i32_9 = arith.constant 0 : i32
    %19 = arith.cmpi eq, %arg2, %c0_i32_9 : i32
    %20 = arith.extui %19 : i1 to i32
    %c0_i32_10 = arith.constant 0 : i32
    %21 = arith.cmpi ne, %20, %c0_i32_10 : i32
    scf.if %21 {
      %c0_11 = arith.constant 0 : index
      %c0_12 = arith.constant 0 : index
      %22 = vector.load %arg7[%c0_11, %c0_12] : memref<16x256xf32, #tpu.memory_space<vmem>>, vector<16x256xf32>
      %c0_13 = arith.constant 0 : index
      %c0_14 = arith.constant 0 : index
      %23 = vector.load %arg5[%c0_13, %c0_14] : memref<1x256xf32, #tpu.memory_space<vmem>>, vector<1x256xf32>
      %24 = vector.broadcast %23 : vector<1x256xf32> to vector<16x256xf32>
      %25 = arith.addf %22, %24 : vector<16x256xf32>
      %cst_15 = arith.constant 5.000000e-01 : f32
      %26 = vector.broadcast %cst_15 : f32 to vector<16x256xf32>
      %27 = arith.mulf %25, %26 : vector<16x256xf32>
      %cst_16 = arith.constant 0.707106769 : f32
      %28 = vector.broadcast %cst_16 : f32 to vector<16x256xf32>
      %29 = arith.mulf %25, %28 : vector<16x256xf32>
      %30 = math.erf %29 : vector<16x256xf32>
      %cst_17 = arith.constant 1.000000e+00 : f32
      %31 = vector.broadcast %cst_17 : f32 to vector<16x256xf32>
      %32 = arith.addf %30, %31 : vector<16x256xf32>
      %33 = arith.mulf %27, %32 : vector<16x256xf32>
      %c0_18 = arith.constant 0 : index
      %c0_19 = arith.constant 0 : index
      %34 = vector.load %arg6[%c0_18, %c0_19] : memref<16x256xf32, #tpu.memory_space<vmem>>, vector<16x256xf32>
      tpu.vector_store %arg6[%c0_18, %c0_19], %33 {strides = array<i32>} : memref<16x256xf32, #tpu.memory_space<vmem>>, vector<16x256xf32>,
    } else {
    }
    return
  }
  func.func @transform_0(%arg0: i32, %arg1: i32, %arg2: i32) -> (i32, i32) {
    %c0_i32 = arith.constant 0 : i32
    return %arg0, %arg2 : i32, i32
  }
  func.func @transform_1(%arg0: i32, %arg1: i32, %arg2: i32) -> (i32, i32) {
    %c0_i32 = arith.constant 0 : i32
    return %arg2, %arg1 : i32, i32
  }
  func.func @transform_2(%arg0: i32, %arg1: i32, %arg2: i32) -> (i32, i32) {
    %c0_i32 = arith.constant 0 : i32
    %c0_i32_0 = arith.constant 0 : i32
    return %c0_i32, %arg1 : i32, i32
  }
  func.func @transform_3(%arg0: i32, %arg1: i32, %arg2: i32) -> (i32, i32) {
    %c0_i32 = arith.constant 0 : i32
    return %arg0, %arg1 : i32, i32
  }
}

</mosaic_0001>

<bundles_post_ra>
// kernel: forward.2
= control target key start
LH: loop header
LB: loop body
LE: loop exit
PB: predicated region body
PF: predicated region fallthrough
CT: control target
= control target key end

     0   :  { %s20091_s0 = inlined_call_operand.vmem [shape: bf16[78,68970], index: 0, kind: input, shape index: {}]   ;;  %s20092_s1 = inlined_call_operand.hbm [shape: bf16[73728,256], index: 1, kind: input, shape index: {}]   ;;  %s20093_s2 = inlined_call_operand.vmem [shape: f32[1,256], index: 2, kind: input, shape index: {}]   ;;  %s20094_s3 = inlined_call_operand.vmem [shape: bf16[78,256], index: 3, kind: output, shape index: {}]  }
   0x1   :  { %20096 = sst [smem:[#allocation8_spill]] %s20091_s0 }
   0x2   :  { %8 = vsyncpa [#allocation5], 0 }
   0x3   :  { %10 = vsyncpa [#allocation5 + $0x1], 0  ;;  %s16775_s12 = smov 0   ;;  %s16777_s13 = smov 0  }
   0x4   :  { %s16779_s14 = smov 0   ;;  %s16781_s15 = smov 0  }
   0x5   :  { %s16783_s16 = smov 0   ;;  %s16785_s17 = smov 0  }
   0x6 LB: > { %s12745_s18 = sadd.s32 4294967295, %s16683_s17   ;;  %s28_s19 = sadd.s32 1, %s16679_s16  ;;  %s16683_s17 = sphi %s16785_s17, %s16_s17   ;;  %s16679_s16 = sphi %s16783_s16, %s20186_s16   ;;  %s16675_s15 = sphi %s16781_s15, %s20185_s15   ;;  %s16671_s14 = sphi %s16779_s14, %s20184_s14   ;;  %s16667_s13 = sphi %s16777_s13, %s20183_s13   ;;  %s16663_s12 = sphi %s16775_s12, %s20182_s12  }
   0x7   : > { %p29_p0 = scmp.ge.s32.totalorder %s28_s19, 9  ;;  %s44_s20 = sadd.s32 1, %s16671_s14 }
   0x8   : > { %p51_p1 = scmp.ne.s32.totalorder %s16671_s14, %s16667_s13  ;;  %p52_p2 = scmp.eq.s32.totalorder %s16683_s17, 0 }
   0x9   : > { %s20188_s19 = smov (%p29_p0, %s28_s19), 0  ;;  %p85_p4 = scmp.ne.s32.totalorder %s16667_s13, %s16663_s12 }
   0xa   : > { %20097 = sst [smem:[#allocation7_spill]] %s20188_s19  ;;  %p16811_p3 = por %p52_p2, %p51_p1 }
   0xb   : > { %s40_s22 = ssub.s32 %s16679_s16, %s20188_s19  ;;  %p86_p5 = scmp.eq.s32.totalorder %s12745_s18, 0 }
   0xc   : > { %p42_p6 = scmp.eq.s32.totalorder %s40_s22, 0  ;;  %p12748_p8 = scmp.ge.s32.totalorder %s16683_s17, 9 }
   0xd   : > { %p16818_p7 = por %p86_p5, %p85_p4 }
   0xe   : > { %s16823_s24 = scalar_select %p42_p6, %s16671_s14, %s44_s20  }
   0xf   : > { %167 = sbr.rel (%p12748_p8) target bundleno = 229 (0xe5), region = 20 }
  0x16   : > { %170 = sbr.rel (!%p16811_p3) target bundleno = 203 (0xcb), region = 24  ;;  %s172_s25 = sand.u32 (%p16811_p3), 1, %s16671_s14  }
  0x17   : > { %s12749_s26 = sshll.u32 (%p16811_p3), %s16679_s16, 6  ;;  %s14778_s27 = smul.u32 (%p16811_p3), 2560, %s172_s25 }
  0x18   : > { %s177_s28 = ssub.s32 (%p16811_p3), 539, %s12749_s26  ;;  %s14141_s29 = sshll.u32 (%p16811_p3), %s16679_s16, 8 }
  0x19   : > { %p178_p9 = scmp.lt.s32.totalorder (%p16811_p3), %s177_s28, 64  ;;  %s20100_s0 = sld [smem:[#allocation8_spill]] (%p16811_p3) }
  0x1a   : > { %s16838_s8 = scalar_lea.vmem (%p16811_p3), [#allocation3], %s14778_s27  }
  0x1d   : > { %s20190_s28 = smov (!%p178_p9, %s177_s28), 64 }
  0x1e   : > { %s180_s6 = smul.u32 640, %s20190_s28  ;;  %s16836_s7 = sshll.u32 %s20190_s28, 2 }
  0x1f   : > { %s16834_s5 = scalar_lea.vmem %s20100_s0, %s14141_s29  }
  0x20   : > { %p12753_p10 = scmp.eq.s32.totalorder %s180_s6, 0 }
  0x21   : > { %p190_p11 = scmp.lt.u32.totalorder (!%p12753_p10), %s16836_s7, 8 }
  0x22   : > { %189 = sbr.rel (%p12753_p10) target bundleno = 203 (0xcb), region = 28 }
  0x29   : > { %193 = sbr.rel (%p190_p11) target bundleno = 190 (0xbe), region = 32  ;;  %s16842_s9 = sand.u32 (!%p190_p11), 7, %s16836_s7  }
  0x2a   : > { %p227_p12 = scmp.eq.s32.totalorder (!%p190_p11), %s16842_s9, 0  ;;  %p12754_p13 = scmp.ne.s32.totalorder (!%p190_p11), %s16842_s9, 0 }
  0x30   : > { %230 = sbr.rel (%p12754_p13) target bundleno = 113 (0x71), region = 47  ;;  %s231_s10 = sshrl.u32 (!%p12754_p13), %s16836_s7, 3 }
  0x31   : > { %s16849_s11 = sshrl.u32 (!%p12754_p13), %s231_s10, 3  ;;  %s20101_s12 = smov (!%p12754_p13), %s16838_s8 }
  0x32   : > { %s20102_s18 = smov (!%p12754_p13), %s16834_s5  ;;  %s16857_s20 = smov (!%p12754_p13), 0  }
  0x33   : > { %s16859_s22 = smov (!%p12754_p13), 0  }
  0x37 LB: >> { %v244_v0 = vld [vmem:[%s16691_s18] sm:$0xff]  ;;  %v246_v1 = vld [vmem:[%s16691_s18 + $0x8] sm:$0xff]  ;;  %v248_v2 = vld [vmem:[%s16691_s18 + $0x10] sm:$0xff]  ;;  %s404_s25 = sadd.s32 1, %s16695_s20  ;;  %s238_s22 = sadd.s32 1, %s16699_s22   ;;  %s16699_s22 = sphi %s16859_s22, %s238_s22   ;;  %s16695_s20 = sphi %s16857_s20, %s20105_s20   ;;  %s16691_s18 = sphi %s20102_s18, %s20104_s18   ;;  %s16687_s12 = sphi %s20101_s12, %s20103_s12  }
  0x38   : >> { %245 = vst [vmem:[%s16687_s12] sm:$0xff] %v244_v0  ;;  %247 = vst [vmem:[%s16687_s12 + $0x8] sm:$0xff] %v246_v1  ;;  %v250_v3 = vld [vmem:[%s16691_s18 + $0x18] sm:$0xff]  ;;  %v252_v4 = vld [vmem:[%s16691_s18 + $0x20] sm:$0xff]  ;;  %p405_p0 = scmp.ge.s32.totalorder %s404_s25, %s16849_s11  ;;  %p237_p1 = scmp.ge.s32.totalorder %s238_s22, %s16849_s11 }
  0x39   : >> { %249 = vst [vmem:[%s16687_s12 + $0x10] sm:$0xff] %v248_v2  ;;  %v254_v5 = vld [vmem:[%s16691_s18 + $0x28] sm:$0xff]  ;;  %251 = vst [vmem:[%s16687_s12 + $0x18] sm:$0xff] %v250_v3  ;;  %v256_v6 = vld [vmem:[%s16691_s18 + $0x30] sm:$0xff]  ;;  %s17056_s29 = sand.u32 (%p237_p1), 7, %s231_s10   ;;  %s14142_s30 = sshll.u32 (%p237_p1), %s16849_s11, 10 }
  0x3a   : >> { %253 = vst [vmem:[%s16687_s12 + $0x20] sm:$0xff] %v252_v4  ;;  %255 = vst [vmem:[%s16687_s12 + $0x28] sm:$0xff] %v254_v5  ;;  %v258_v7 = vld [vmem:[%s16691_s18 + $0x38] sm:$0xff]  ;;  %v260_v8 = vld [vmem:[%s16691_s18 + $0x86c] sm:$0xff]  ;;  %s20192_s25 = smov (%p405_p0, %s404_s25), 0  ;;  %s415_s4 = sshra.s32 (%p237_p1), %s14142_s30, 4 }
  0x3b   : >> { %257 = vst [vmem:[%s16687_s12 + $0x30] sm:$0xff] %v256_v6  ;;  %259 = vst [vmem:[%s16687_s12 + $0x38] sm:$0xff] %v258_v7  ;;  %v262_v9 = vld [vmem:[%s16691_s18 + $0x874] sm:$0xff]  ;;  %v264_v10 = vld [vmem:[%s16691_s18 + $0x87c] sm:$0xff]  ;;  %s12756_s26 = sshll.u32 %s20192_s25, 6  ;;  %s20105_s20 = smov %s20192_s25 }
  0x3c   : >> { %261 = vst [vmem:[%s16687_s12 + $0x100] sm:$0xff] %v260_v8  ;;  %v266_v11 = vld [vmem:[%s16691_s18 + $0x884] sm:$0xff]  ;;  %263 = vst [vmem:[%s16687_s12 + $0x108] sm:$0xff] %v262_v9  ;;  %v268_v12 = vld [vmem:[%s16691_s18 + $0x88c] sm:$0xff]  ;;  %s16915_s27 = scalar_lea.vmem %s16834_s5, %s12756_s26   ;;  %s16918_s28 = scalar_lea.vmem %s16838_s8, %s12756_s26 [#allocation3]  }
  0x3d   : >> { %265 = vst [vmem:[%s16687_s12 + $0x110] sm:$0xff] %v264_v10  ;;  %267 = vst [vmem:[%s16687_s12 + $0x118] sm:$0xff] %v266_v11  ;;  %v270_v13 = vld [vmem:[%s16691_s18 + $0x894] sm:$0xff]  ;;  %v272_v14 = vld [vmem:[%s16691_s18 + $0x89c] sm:$0xff]  ;;  %s17060_s6 = scalar_lea.vmem (%p237_p1), %s16834_s5, %s415_s4   ;;  %s17063_s26 = scalar_lea.vmem (%p237_p1), %s16838_s8, %s415_s4 [#allocation3]  }
  0x3e   : >> { %269 = vst [vmem:[%s16687_s12 + $0x120] sm:$0xff] %v268_v12  ;;  %271 = vst [vmem:[%s16687_s12 + $0x128] sm:$0xff] %v270_v13  ;;  %v274_v15 = vld [vmem:[%s16691_s18 + $0x8a4] sm:$0xff]  ;;  %v276_v16 = vld [vmem:[%s16691_s18 + $0x10d8] sm:$0xff]  ;;  %p12761_p2 = scmp.le.s32.totalorder (%p237_p1), %s17056_s29, 0 }
  0x3f   : >> { %273 = vst [vmem:[%s16687_s12 + $0x130] sm:$0xff] %v272_v14  ;;  %v278_v17 = vld [vmem:[%s16691_s18 + $0x10e0] sm:$0xff]  ;;  %275 = vst [vmem:[%s16687_s12 + $0x138] sm:$0xff] %v274_v15  ;;  %v280_v18 = vld [vmem:[%s16691_s18 + $0x10e8] sm:$0xff] }
  0x40   : >> { %277 = vst [vmem:[%s16687_s12 + $0x200] sm:$0xff] %v276_v16  ;;  %279 = vst [vmem:[%s16687_s12 + $0x208] sm:$0xff] %v278_v17  ;;  %v282_v19 = vld [vmem:[%s16691_s18 + $0x10f0] sm:$0xff]  ;;  %v284_v20 = vld [vmem:[%s16691_s18 + $0x10f8] sm:$0xff] }
  0x41   : >> { %281 = vst [vmem:[%s16687_s12 + $0x210] sm:$0xff] %v280_v18  ;;  %283 = vst [vmem:[%s16687_s12 + $0x218] sm:$0xff] %v282_v19  ;;  %v286_v21 = vld [vmem:[%s16691_s18 + $0x1100] sm:$0xff]  ;;  %v288_v22 = vld [vmem:[%s16691_s18 + $0x1108] sm:$0xff] }
  0x42   : >> { %285 = vst [vmem:[%s16687_s12 + $0x220] sm:$0xff] %v284_v20  ;;  %v290_v23 = vld [vmem:[%s16691_s18 + $0x1110] sm:$0xff]  ;;  %287 = vst [vmem:[%s16687_s12 + $0x228] sm:$0xff] %v286_v21  ;;  %v292_v24 = vld [vmem:[%s16691_s18 + $0x1944] sm:$0xff] }
  0x43   : >> { %289 = vst [vmem:[%s16687_s12 + $0x230] sm:$0xff] %v288_v22  ;;  %291 = vst [vmem:[%s16687_s12 + $0x238] sm:$0xff] %v290_v23  ;;  %v294_v25 = vld [vmem:[%s16691_s18 + $0x194c] sm:$0xff]  ;;  %v296_v26 = vld [vmem:[%s16691_s18 + $0x1954] sm:$0xff] }
  0x44   : >> { %293 = vst [vmem:[%s16687_s12 + $0x300] sm:$0xff] %v292_v24  ;;  %295 = vst [vmem:[%s16687_s12 + $0x308] sm:$0xff] %v294_v25  ;;  %v298_v27 = vld [vmem:[%s16691_s18 + $0x195c] sm:$0xff]  ;;  %v300_v28 = vld [vmem:[%s16691_s18 + $0x1964] sm:$0xff] }
  0x45   : >> { %297 = vst [vmem:[%s16687_s12 + $0x310] sm:$0xff] %v296_v26  ;;  %v302_v29 = vld [vmem:[%s16691_s18 + $0x196c] sm:$0xff]  ;;  %299 = vst [vmem:[%s16687_s12 + $0x318] sm:$0xff] %v298_v27  ;;  %v304_v30 = vld [vmem:[%s16691_s18 + $0x1974] sm:$0xff] }
  0x46   : >> { %301 = vst [vmem:[%s16687_s12 + $0x320] sm:$0xff] %v300_v28  ;;  %303 = vst [vmem:[%s16687_s12 + $0x328] sm:$0xff] %v302_v29  ;;  %v306_v31 = vld [vmem:[%s16691_s18 + $0x197c] sm:$0xff]  ;;  %v308_v32 = vld [vmem:[%s16691_s18 + $0x21b0] sm:$0xff] }
  0x47   : >> { %305 = vst [vmem:[%s16687_s12 + $0x330] sm:$0xff] %v304_v30  ;;  %307 = vst [vmem:[%s16687_s12 + $0x338] sm:$0xff] %v306_v31  ;;  %v310_v33 = vld [vmem:[%s16691_s18 + $0x21b8] sm:$0xff]  ;;  %v312_v34 = vld [vmem:[%s16691_s18 + $0x21c0] sm:$0xff] }
  0x48   : >> { %309 = vst [vmem:[%s16687_s12 + $0x400] sm:$0xff] %v308_v32  ;;  %v314_v35 = vld [vmem:[%s16691_s18 + $0x21c8] sm:$0xff]  ;;  %311 = vst [vmem:[%s16687_s12 + $0x408] sm:$0xff] %v310_v33  ;;  %v316_v36 = vld [vmem:[%s16691_s18 + $0x21d0] sm:$0xff] }
  0x49   : >> { %313 = vst [vmem:[%s16687_s12 + $0x410] sm:$0xff] %v312_v34  ;;  %315 = vst [vmem:[%s16687_s12 + $0x418] sm:$0xff] %v314_v35  ;;  %v318_v37 = vld [vmem:[%s16691_s18 + $0x21d8] sm:$0xff]  ;;  %v320_v38 = vld [vmem:[%s16691_s18 + $0x21e0] sm:$0xff] }
  0x4a   : >> { %317 = vst [vmem:[%s16687_s12 + $0x420] sm:$0xff] %v316_v36  ;;  %319 = vst [vmem:[%s16687_s12 + $0x428] sm:$0xff] %v318_v37  ;;  %v322_v39 = vld [vmem:[%s16691_s18 + $0x21e8] sm:$0xff]  ;;  %v324_v40 = vld [vmem:[%s16691_s18 + $0x2a1c] sm:$0xff] }
  0x4b   : >> { %321 = vst [vmem:[%s16687_s12 + $0x430] sm:$0xff] %v320_v38  ;;  %v326_v41 = vld [vmem:[%s16691_s18 + $0x2a24] sm:$0xff]  ;;  %323 = vst [vmem:[%s16687_s12 + $0x438] sm:$0xff] %v322_v39  ;;  %v328_v42 = vld [vmem:[%s16691_s18 + $0x2a2c] sm:$0xff] }
  0x4c   : >> { %325 = vst [vmem:[%s16687_s12 + $0x500] sm:$0xff] %v324_v40  ;;  %327 = vst [vmem:[%s16687_s12 + $0x508] sm:$0xff] %v326_v41  ;;  %v330_v43 = vld [vmem:[%s16691_s18 + $0x2a34] sm:$0xff]  ;;  %v332_v44 = vld [vmem:[%s16691_s18 + $0x2a3c] sm:$0xff] }
  0x4d   : >> { %329 = vst [vmem:[%s16687_s12 + $0x510] sm:$0xff] %v328_v42  ;;  %331 = vst [vmem:[%s16687_s12 + $0x518] sm:$0xff] %v330_v43  ;;  %v334_v45 = vld [vmem:[%s16691_s18 + $0x2a44] sm:$0xff]  ;;  %v336_v46 = vld [vmem:[%s16691_s18 + $0x2a4c] sm:$0xff] }
  0x4e   : >> { %333 = vst [vmem:[%s16687_s12 + $0x520] sm:$0xff] %v332_v44  ;;  %v338_v47 = vld [vmem:[%s16691_s18 + $0x2a54] sm:$0xff]  ;;  %335 = vst [vmem:[%s16687_s12 + $0x528] sm:$0xff] %v334_v45  ;;  %v340_v48 = vld [vmem:[%s16691_s18 + $0x3288] sm:$0xff] }
  0x4f   : >> { %337 = vst [vmem:[%s16687_s12 + $0x530] sm:$0xff] %v336_v46  ;;  %339 = vst [vmem:[%s16687_s12 + $0x538] sm:$0xff] %v338_v47  ;;  %v342_v49 = vld [vmem:[%s16691_s18 + $0x3290] sm:$0xff]  ;;  %v344_v50 = vld [vmem:[%s16691_s18 + $0x3298] sm:$0xff] }
  0x50   : >> { %341 = vst [vmem:[%s16687_s12 + $0x600] sm:$0xff] %v340_v48  ;;  %343 = vst [vmem:[%s16687_s12 + $0x608] sm:$0xff] %v342_v49  ;;  %v346_v51 = vld [vmem:[%s16691_s18 + $0x32a0] sm:$0xff]  ;;  %v348_v52 = vld [vmem:[%s16691_s18 + $0x32a8] sm:$0xff] }
  0x51   : >> { %345 = vst [vmem:[%s16687_s12 + $0x610] sm:$0xff] %v344_v50  ;;  %v350_v53 = vld [vmem:[%s16691_s18 + $0x32b0] sm:$0xff]  ;;  %347 = vst [vmem:[%s16687_s12 + $0x618] sm:$0xff] %v346_v51  ;;  %v352_v54 = vld [vmem:[%s16691_s18 + $0x32b8] sm:$0xff] }
  0x52   : >> { %349 = vst [vmem:[%s16687_s12 + $0x620] sm:$0xff] %v348_v52  ;;  %351 = vst [vmem:[%s16687_s12 + $0x628] sm:$0xff] %v350_v53  ;;  %v354_v55 = vld [vmem:[%s16691_s18 + $0x32c0] sm:$0xff]  ;;  %v356_v56 = vld [vmem:[%s16691_s18 + $0x3af4] sm:$0xff] }
  0x53   : >> { %353 = vst [vmem:[%s16687_s12 + $0x630] sm:$0xff] %v352_v54  ;;  %355 = vst [vmem:[%s16687_s12 + $0x638] sm:$0xff] %v354_v55  ;;  %v358_v57 = vld [vmem:[%s16691_s18 + $0x3afc] sm:$0xff]  ;;  %v360_v58 = vld [vmem:[%s16691_s18 + $0x3b04] sm:$0xff] }
  0x54   : >> { %357 = vst [vmem:[%s16687_s12 + $0x700] sm:$0xff] %v356_v56  ;;  %v362_v59 = vld [vmem:[%s16691_s18 + $0x3b0c] sm:$0xff]  ;;  %359 = vst [vmem:[%s16687_s12 + $0x708] sm:$0xff] %v358_v57  ;;  %v364_v60 = vld [vmem:[%s16691_s18 + $0x3b14] sm:$0xff] }
  0x55   : >> { %361 = vst [vmem:[%s16687_s12 + $0x710] sm:$0xff] %v360_v58  ;;  %363 = vst [vmem:[%s16687_s12 + $0x718] sm:$0xff] %v362_v59  ;;  %v366_v61 = vld [vmem:[%s16691_s18 + $0x3b1c] sm:$0xff]  ;;  %v368_v62 = vld [vmem:[%s16691_s18 + $0x3b24] sm:$0xff] }
  0x56   : >> { %365 = vst [vmem:[%s16687_s12 + $0x720] sm:$0xff] %v364_v60  ;;  %367 = vst [vmem:[%s16687_s12 + $0x728] sm:$0xff] %v366_v61  ;;  %v370_v63 = vld [vmem:[%s16691_s18 + $0x3b2c] sm:$0xff]  ;;  %v372_v0 = vld [vmem:[%s16691_s18 + $0x4360] sm:$0xff] }
  0x57   : >> { %369 = vst [vmem:[%s16687_s12 + $0x730] sm:$0xff] %v368_v62  ;;  %v374_v1 = vld [vmem:[%s16691_s18 + $0x4368] sm:$0xff]  ;;  %371 = vst [vmem:[%s16687_s12 + $0x738] sm:$0xff] %v370_v63  ;;  %v376_v2 = vld [vmem:[%s16691_s18 + $0x4370] sm:$0xff] }
  0x58   : >> { %373 = vst [vmem:[%s16687_s12 + $0x800] sm:$0xff] %v372_v0  ;;  %375 = vst [vmem:[%s16687_s12 + $0x808] sm:$0xff] %v374_v1  ;;  %v378_v3 = vld [vmem:[%s16691_s18 + $0x4378] sm:$0xff]  ;;  %v380_v4 = vld [vmem:[%s16691_s18 + $0x4380] sm:$0xff] }
  0x59   : >> { %377 = vst [vmem:[%s16687_s12 + $0x810] sm:$0xff] %v376_v2  ;;  %379 = vst [vmem:[%s16687_s12 + $0x818] sm:$0xff] %v378_v3  ;;  %v382_v5 = vld [vmem:[%s16691_s18 + $0x4388] sm:$0xff]  ;;  %v384_v6 = vld [vmem:[%s16691_s18 + $0x4390] sm:$0xff]  ;;  %240 = sbr.rel (!%p237_p1) target bundleno = 55 (0x37), region = 175 }
  0x5a   : >> { %381 = vst [vmem:[%s16687_s12 + $0x820] sm:$0xff] %v380_v4  ;;  %v386_v7 = vld [vmem:[%s16691_s18 + $0x4398] sm:$0xff]  ;;  %383 = vst [vmem:[%s16687_s12 + $0x828] sm:$0xff] %v382_v5  ;;  %v388_v8 = vld [vmem:[%s16691_s18 + $0x4bcc] sm:$0xff] }
  0x5b   : >> { %385 = vst [vmem:[%s16687_s12 + $0x830] sm:$0xff] %v384_v6  ;;  %387 = vst [vmem:[%s16687_s12 + $0x838] sm:$0xff] %v386_v7  ;;  %v390_v9 = vld [vmem:[%s16691_s18 + $0x4bd4] sm:$0xff]  ;;  %v392_v10 = vld [vmem:[%s16691_s18 + $0x4bdc] sm:$0xff] }
  0x5c   : >> { %389 = vst [vmem:[%s16687_s12 + $0x900] sm:$0xff] %v388_v8  ;;  %391 = vst [vmem:[%s16687_s12 + $0x908] sm:$0xff] %v390_v9  ;;  %v394_v11 = vld [vmem:[%s16691_s18 + $0x4be4] sm:$0xff]  ;;  %v396_v12 = vld [vmem:[%s16691_s18 + $0x4bec] sm:$0xff] }
  0x5d   : >> { %393 = vst [vmem:[%s16687_s12 + $0x910] sm:$0xff] %v392_v10  ;;  %v398_v13 = vld [vmem:[%s16691_s18 + $0x4bf4] sm:$0xff]  ;;  %395 = vst [vmem:[%s16687_s12 + $0x918] sm:$0xff] %v394_v11  ;;  %v400_v14 = vld [vmem:[%s16691_s18 + $0x4bfc] sm:$0xff] }
  0x5e   : >> { %397 = vst [vmem:[%s16687_s12 + $0x920] sm:$0xff] %v396_v12  ;;  %399 = vst [vmem:[%s16687_s12 + $0x928] sm:$0xff] %v398_v13  ;;  %v402_v15 = vld [vmem:[%s16691_s18 + $0x4c04] sm:$0xff]  ;;  %s20104_s18 = smov %s16915_s27 }
  0x5f   : >> { %401 = vst [vmem:[%s16687_s12 + $0x930] sm:$0xff] %v400_v14  ;;  %403 = vst [vmem:[%s16687_s12 + $0x938] sm:$0xff] %v402_v15  ;;  %s20103_s12 = smov %s16918_s28 }
  0x60   : > { %12661 = sbr.rel (%p12761_p2) target bundleno = 113 (0x71), region = 180  ;;  %s20106_s22 = smov (!%p12761_p2), %s17063_s26 }
  0x61   : > { %s20107_s12 = smov (!%p12761_p2), %s17060_s6  ;;  %s17072_s18 = smov (!%p12761_p2), 0  }
  0x62   : > { %s17074_s20 = smov (!%p12761_p2), 0  }
  0x67 LB: >> { %v431_v16 = vld [vmem:[%s16707_s12] sm:$0xff]  ;;  %v433_v17 = vld [vmem:[%s16707_s12 + $0x86c] sm:$0xff]  ;;  %v435_v18 = vld [vmem:[%s16707_s12 + $0x10d8] sm:$0xff]  ;;  %s451_s10 = sadd.s32 1, %s16711_s18  ;;  %s425_s20 = sadd.s32 1, %s16715_s20   ;;  %s16715_s20 = sphi %s17074_s20, %s425_s20   ;;  %s16711_s18 = sphi %s17072_s18, %s20108_s18   ;;  %s16707_s12 = sphi %s20107_s12, %s456_s12   ;;  %s16703_s22 = sphi %s20106_s22, %s457_s22  }
  0x68   : >> { %432 = vst [vmem:[%s16703_s22] sm:$0xff] %v431_v16  ;;  %434 = vst [vmem:[%s16703_s22 + $0x100] sm:$0xff] %v433_v17  ;;  %v437_v19 = vld [vmem:[%s16707_s12 + $0x1944] sm:$0xff]  ;;  %v439_v20 = vld [vmem:[%s16707_s12 + $0x21b0] sm:$0xff]  ;;  %p452_p4 = scmp.ge.s32.totalorder %s451_s10, %s17056_s29  ;;  %p424_p5 = scmp.ge.s32.totalorder %s425_s20, %s17056_s29 }
  0x69   : >> { %436 = vst [vmem:[%s16703_s22 + $0x200] sm:$0xff] %v435_v18  ;;  %v441_v21 = vld [vmem:[%s16707_s12 + $0x2a1c] sm:$0xff]  ;;  %438 = vst [vmem:[%s16703_s22 + $0x300] sm:$0xff] %v437_v19  ;;  %v443_v22 = vld [vmem:[%s16707_s12 + $0x3288] sm:$0xff] }
  0x6a   : >> { %440 = vst [vmem:[%s16703_s22 + $0x400] sm:$0xff] %v439_v20  ;;  %442 = vst [vmem:[%s16703_s22 + $0x500] sm:$0xff] %v441_v21  ;;  %v445_v23 = vld [vmem:[%s16707_s12 + $0x3af4] sm:$0xff]  ;;  %v447_v24 = vld [vmem:[%s16707_s12 + $0x4360] sm:$0xff]  ;;  %s20194_s10 = smov (%p452_p4, %s451_s10), 0  ;;  %427 = sbr.rel (!%p424_p5) target bundleno = 103 (0x67), region = 186 }
  0x6b   : >> { %444 = vst [vmem:[%s16703_s22 + $0x600] sm:$0xff] %v443_v22  ;;  %446 = vst [vmem:[%s16703_s22 + $0x700] sm:$0xff] %v445_v23  ;;  %v449_v25 = vld [vmem:[%s16707_s12 + $0x4bcc] sm:$0xff]  ;;  %s12762_s11 = sshll.u32 %s20194_s10, 3  ;;  %s20108_s18 = smov %s20194_s10 }
  0x6c   : >> { %448 = vst [vmem:[%s16703_s22 + $0x800] sm:$0xff] %v447_v24  ;;  %450 = vst [vmem:[%s16703_s22 + $0x900] sm:$0xff] %v449_v25  ;;  %s456_s12 = scalar_lea.vmem %s17060_s6, %s12762_s11   ;;  %s457_s22 = scalar_lea.vmem %s17063_s26, %s12762_s11 [#allocation3]  }
  0x71 PF: > { %460 = sbr.rel (%p227_p12) target bundleno = 190 (0xbe), region = 65  ;;  %s462_s25 = ssub.s32 (!%p227_p12), %s16836_s7, %s16842_s9 }
  0x72   : > { %s466_s27 = sshrl.u32 (!%p227_p12), %s16836_s7, 3  ;;  %s17101_s28 = scalar_lea.vmem (!%p227_p12), %s16834_s5, %s462_s25 }
  0x73   : > { %s17104_s30 = scalar_lea.vmem (!%p227_p12), %s16838_s8, %s462_s25 [#allocation3]  ;;  %s17108_s4 = sshrl.u32 (!%p227_p12), %s466_s27, 3 }
  0x74   : > { %s20109_s29 = smov (!%p227_p12), %s16838_s8  ;;  %s20110_s6 = smov (!%p227_p12), %s16834_s5 }
  0x75   : > { %s17116_s26 = smov (!%p227_p12), 0   ;;  %s17118_s22 = smov (!%p227_p12), 0  }
  0x78 LB: >> { %v479_v26 = vld [vmem:[%s16723_s6] sm:$0xff]  ;;  %v481_v27 = vld [vmem:[%s16723_s6 + $0x8] sm:$0xff]  ;;  %v483_v28 = vld [vmem:[%s16723_s6 + $0x10] sm:$0xff]  ;;  %s639_s12 = sadd.s32 1, %s16727_s26  ;;  %s473_s22 = sadd.s32 1, %s16731_s22   ;;  %s16731_s22 = sphi %s17118_s22, %s473_s22   ;;  %s16727_s26 = sphi %s17116_s26, %s20113_s26   ;;  %s16723_s6 = sphi %s20110_s6, %s20112_s6   ;;  %s16719_s29 = sphi %s20109_s29, %s20111_s29  }
  0x79   : >> { %480 = vst [vmem:[%s16719_s29] sm:$0xff] %v479_v26  ;;  %482 = vst [vmem:[%s16719_s29 + $0x8] sm:$0xff] %v481_v27  ;;  %v485_v29 = vld [vmem:[%s16723_s6 + $0x18] sm:$0xff]  ;;  %v487_v30 = vld [vmem:[%s16723_s6 + $0x20] sm:$0xff]  ;;  %p640_p6 = scmp.ge.s32.totalorder %s639_s12, %s17108_s4  ;;  %p472_p8 = scmp.ge.s32.totalorder %s473_s22, %s17108_s4 }
  0x7a   : >> { %484 = vst [vmem:[%s16719_s29 + $0x10] sm:$0xff] %v483_v28  ;;  %v489_v31 = vld [vmem:[%s16723_s6 + $0x28] sm:$0xff]  ;;  %486 = vst [vmem:[%s16719_s29 + $0x18] sm:$0xff] %v485_v29  ;;  %v491_v32 = vld [vmem:[%s16723_s6 + $0x30] sm:$0xff]  ;;  %s17315_s11 = sand.u32 (%p472_p8), 7, %s466_s27   ;;  %s14144_s25 = sshll.u32 (%p472_p8), %s17108_s4, 10 }
  0x7b   : >> { %488 = vst [vmem:[%s16719_s29 + $0x20] sm:$0xff] %v487_v30  ;;  %490 = vst [vmem:[%s16719_s29 + $0x28] sm:$0xff] %v489_v31  ;;  %v493_v33 = vld [vmem:[%s16723_s6 + $0x38] sm:$0xff]  ;;  %v495_v34 = vld [vmem:[%s16723_s6 + $0x86c] sm:$0xff]  ;;  %s20196_s12 = smov (%p640_p6, %s639_s12), 0  ;;  %p12770_p9 = scmp.le.s32.totalorder (%p472_p8), %s17315_s11, 0 }
  0x7c   : >> { %492 = vst [vmem:[%s16719_s29 + $0x30] sm:$0xff] %v491_v32  ;;  %494 = vst [vmem:[%s16719_s29 + $0x38] sm:$0xff] %v493_v33  ;;  %v497_v35 = vld [vmem:[%s16723_s6 + $0x874] sm:$0xff]  ;;  %v499_v36 = vld [vmem:[%s16723_s6 + $0x87c] sm:$0xff]  ;;  %s12765_s18 = sshll.u32 %s20196_s12, 6  ;;  %s20113_s26 = smov %s20196_s12 }
  0x7d   : >> { %496 = vst [vmem:[%s16719_s29 + $0x100] sm:$0xff] %v495_v34  ;;  %v501_v37 = vld [vmem:[%s16723_s6 + $0x884] sm:$0xff]  ;;  %498 = vst [vmem:[%s16719_s29 + $0x108] sm:$0xff] %v497_v35  ;;  %v503_v38 = vld [vmem:[%s16723_s6 + $0x88c] sm:$0xff]  ;;  %s17174_s20 = scalar_lea.vmem %s16834_s5, %s12765_s18   ;;  %s17177_s10 = scalar_lea.vmem %s16838_s8, %s12765_s18 [#allocation3]  }
  0x7e   : >> { %500 = vst [vmem:[%s16719_s29 + $0x110] sm:$0xff] %v499_v36  ;;  %502 = vst [vmem:[%s16719_s29 + $0x118] sm:$0xff] %v501_v37  ;;  %v505_v39 = vld [vmem:[%s16723_s6 + $0x894] sm:$0xff]  ;;  %v507_v40 = vld [vmem:[%s16723_s6 + $0x89c] sm:$0xff]  ;;  %s650_s18 = sshra.s32 (%p472_p8), %s14144_s25, 4 }
  0x7f   : >> { %504 = vst [vmem:[%s16719_s29 + $0x120] sm:$0xff] %v503_v38  ;;  %506 = vst [vmem:[%s16719_s29 + $0x128] sm:$0xff] %v505_v39  ;;  %v509_v41 = vld [vmem:[%s16723_s6 + $0x8a4] sm:$0xff]  ;;  %v511_v42 = vld [vmem:[%s16723_s6 + $0x10d8] sm:$0xff]  ;;  %s17319_s0 = scalar_lea.vmem (%p472_p8), %s16834_s5, %s650_s18   ;;  %s17322_s19 = scalar_lea.vmem (%p472_p8), %s16838_s8, %s650_s18 [#allocation3]  }
  0x80   : >> { %508 = vst [vmem:[%s16719_s29 + $0x130] sm:$0xff] %v507_v40  ;;  %v513_v43 = vld [vmem:[%s16723_s6 + $0x10e0] sm:$0xff]  ;;  %510 = vst [vmem:[%s16719_s29 + $0x138] sm:$0xff] %v509_v41  ;;  %v515_v44 = vld [vmem:[%s16723_s6 + $0x10e8] sm:$0xff] }
  0x81   : >> { %512 = vst [vmem:[%s16719_s29 + $0x200] sm:$0xff] %v511_v42  ;;  %514 = vst [vmem:[%s16719_s29 + $0x208] sm:$0xff] %v513_v43  ;;  %v517_v45 = vld [vmem:[%s16723_s6 + $0x10f0] sm:$0xff]  ;;  %v519_v46 = vld [vmem:[%s16723_s6 + $0x10f8] sm:$0xff] }
  0x82   : >> { %516 = vst [vmem:[%s16719_s29 + $0x210] sm:$0xff] %v515_v44  ;;  %518 = vst [vmem:[%s16719_s29 + $0x218] sm:$0xff] %v517_v45  ;;  %v521_v47 = vld [vmem:[%s16723_s6 + $0x1100] sm:$0xff]  ;;  %v523_v48 = vld [vmem:[%s16723_s6 + $0x1108] sm:$0xff] }
  0x83   : >> { %520 = vst [vmem:[%s16719_s29 + $0x220] sm:$0xff] %v519_v46  ;;  %v525_v49 = vld [vmem:[%s16723_s6 + $0x1110] sm:$0xff]  ;;  %522 = vst [vmem:[%s16719_s29 + $0x228] sm:$0xff] %v521_v47  ;;  %v527_v50 = vld [vmem:[%s16723_s6 + $0x1944] sm:$0xff] }
  0x84   : >> { %524 = vst [vmem:[%s16719_s29 + $0x230] sm:$0xff] %v523_v48  ;;  %526 = vst [vmem:[%s16719_s29 + $0x238] sm:$0xff] %v525_v49  ;;  %v529_v51 = vld [vmem:[%s16723_s6 + $0x194c] sm:$0xff]  ;;  %v531_v52 = vld [vmem:[%s16723_s6 + $0x1954] sm:$0xff] }
  0x85   : >> { %528 = vst [vmem:[%s16719_s29 + $0x300] sm:$0xff] %v527_v50  ;;  %530 = vst [vmem:[%s16719_s29 + $0x308] sm:$0xff] %v529_v51  ;;  %v533_v53 = vld [vmem:[%s16723_s6 + $0x195c] sm:$0xff]  ;;  %v535_v54 = vld [vmem:[%s16723_s6 + $0x1964] sm:$0xff] }
  0x86   : >> { %532 = vst [vmem:[%s16719_s29 + $0x310] sm:$0xff] %v531_v52  ;;  %v537_v55 = vld [vmem:[%s16723_s6 + $0x196c] sm:$0xff]  ;;  %534 = vst [vmem:[%s16719_s29 + $0x318] sm:$0xff] %v533_v53  ;;  %v539_v56 = vld [vmem:[%s16723_s6 + $0x1974] sm:$0xff] }
  0x87   : >> { %536 = vst [vmem:[%s16719_s29 + $0x320] sm:$0xff] %v535_v54  ;;  %538 = vst [vmem:[%s16719_s29 + $0x328] sm:$0xff] %v537_v55  ;;  %v541_v57 = vld [vmem:[%s16723_s6 + $0x197c] sm:$0xff]  ;;  %v543_v58 = vld [vmem:[%s16723_s6 + $0x21b0] sm:$0xff] }
  0x88   : >> { %540 = vst [vmem:[%s16719_s29 + $0x330] sm:$0xff] %v539_v56  ;;  %542 = vst [vmem:[%s16719_s29 + $0x338] sm:$0xff] %v541_v57  ;;  %v545_v59 = vld [vmem:[%s16723_s6 + $0x21b8] sm:$0xff]  ;;  %v547_v60 = vld [vmem:[%s16723_s6 + $0x21c0] sm:$0xff] }
  0x89   : >> { %544 = vst [vmem:[%s16719_s29 + $0x400] sm:$0xff] %v543_v58  ;;  %v549_v61 = vld [vmem:[%s16723_s6 + $0x21c8] sm:$0xff]  ;;  %546 = vst [vmem:[%s16719_s29 + $0x408] sm:$0xff] %v545_v59  ;;  %v551_v62 = vld [vmem:[%s16723_s6 + $0x21d0] sm:$0xff] }
  0x8a   : >> { %548 = vst [vmem:[%s16719_s29 + $0x410] sm:$0xff] %v547_v60  ;;  %550 = vst [vmem:[%s16719_s29 + $0x418] sm:$0xff] %v549_v61  ;;  %v553_v63 = vld [vmem:[%s16723_s6 + $0x21d8] sm:$0xff]  ;;  %v555_v0 = vld [vmem:[%s16723_s6 + $0x21e0] sm:$0xff] }
  0x8b   : >> { %552 = vst [vmem:[%s16719_s29 + $0x420] sm:$0xff] %v551_v62  ;;  %554 = vst [vmem:[%s16719_s29 + $0x428] sm:$0xff] %v553_v63  ;;  %v557_v1 = vld [vmem:[%s16723_s6 + $0x21e8] sm:$0xff]  ;;  %v559_v2 = vld [vmem:[%s16723_s6 + $0x2a1c] sm:$0xff] }
  0x8c   : >> { %556 = vst [vmem:[%s16719_s29 + $0x430] sm:$0xff] %v555_v0  ;;  %v561_v3 = vld [vmem:[%s16723_s6 + $0x2a24] sm:$0xff]  ;;  %558 = vst [vmem:[%s16719_s29 + $0x438] sm:$0xff] %v557_v1  ;;  %v563_v4 = vld [vmem:[%s16723_s6 + $0x2a2c] sm:$0xff] }
  0x8d   : >> { %560 = vst [vmem:[%s16719_s29 + $0x500] sm:$0xff] %v559_v2  ;;  %562 = vst [vmem:[%s16719_s29 + $0x508] sm:$0xff] %v561_v3  ;;  %v565_v5 = vld [vmem:[%s16723_s6 + $0x2a34] sm:$0xff]  ;;  %v567_v6 = vld [vmem:[%s16723_s6 + $0x2a3c] sm:$0xff] }
  0x8e   : >> { %564 = vst [vmem:[%s16719_s29 + $0x510] sm:$0xff] %v563_v4  ;;  %566 = vst [vmem:[%s16719_s29 + $0x518] sm:$0xff] %v565_v5  ;;  %v569_v7 = vld [vmem:[%s16723_s6 + $0x2a44] sm:$0xff]  ;;  %v571_v8 = vld [vmem:[%s16723_s6 + $0x2a4c] sm:$0xff] }
  0x8f   : >> { %568 = vst [vmem:[%s16719_s29 + $0x520] sm:$0xff] %v567_v6  ;;  %v573_v9 = vld [vmem:[%s16723_s6 + $0x2a54] sm:$0xff]  ;;  %570 = vst [vmem:[%s16719_s29 + $0x528] sm:$0xff] %v569_v7  ;;  %v575_v10 = vld [vmem:[%s16723_s6 + $0x3288] sm:$0xff] }
  0x90   : >> { %572 = vst [vmem:[%s16719_s29 + $0x530] sm:$0xff] %v571_v8  ;;  %574 = vst [vmem:[%s16719_s29 + $0x538] sm:$0xff] %v573_v9  ;;  %v577_v11 = vld [vmem:[%s16723_s6 + $0x3290] sm:$0xff]  ;;  %v579_v12 = vld [vmem:[%s16723_s6 + $0x3298] sm:$0xff] }
  0x91   : >> { %576 = vst [vmem:[%s16719_s29 + $0x600] sm:$0xff] %v575_v10  ;;  %578 = vst [vmem:[%s16719_s29 + $0x608] sm:$0xff] %v577_v11  ;;  %v581_v13 = vld [vmem:[%s16723_s6 + $0x32a0] sm:$0xff]  ;;  %v583_v14 = vld [vmem:[%s16723_s6 + $0x32a8] sm:$0xff] }
  0x92   : >> { %580 = vst [vmem:[%s16719_s29 + $0x610] sm:$0xff] %v579_v12  ;;  %v585_v15 = vld [vmem:[%s16723_s6 + $0x32b0] sm:$0xff]  ;;  %582 = vst [vmem:[%s16719_s29 + $0x618] sm:$0xff] %v581_v13  ;;  %v587_v16 = vld [vmem:[%s16723_s6 + $0x32b8] sm:$0xff] }
  0x93   : >> { %584 = vst [vmem:[%s16719_s29 + $0x620] sm:$0xff] %v583_v14  ;;  %586 = vst [vmem:[%s16719_s29 + $0x628] sm:$0xff] %v585_v15  ;;  %v589_v17 = vld [vmem:[%s16723_s6 + $0x32c0] sm:$0xff]  ;;  %v591_v18 = vld [vmem:[%s16723_s6 + $0x3af4] sm:$0xff] }
  0x94   : >> { %588 = vst [vmem:[%s16719_s29 + $0x630] sm:$0xff] %v587_v16  ;;  %590 = vst [vmem:[%s16719_s29 + $0x638] sm:$0xff] %v589_v17  ;;  %v593_v19 = vld [vmem:[%s16723_s6 + $0x3afc] sm:$0xff]  ;;  %v595_v20 = vld [vmem:[%s16723_s6 + $0x3b04] sm:$0xff] }
  0x95   : >> { %592 = vst [vmem:[%s16719_s29 + $0x700] sm:$0xff] %v591_v18  ;;  %v597_v21 = vld [vmem:[%s16723_s6 + $0x3b0c] sm:$0xff]  ;;  %594 = vst [vmem:[%s16719_s29 + $0x708] sm:$0xff] %v593_v19  ;;  %v599_v22 = vld [vmem:[%s16723_s6 + $0x3b14] sm:$0xff] }
  0x96   : >> { %596 = vst [vmem:[%s16719_s29 + $0x710] sm:$0xff] %v595_v20  ;;  %598 = vst [vmem:[%s16719_s29 + $0x718] sm:$0xff] %v597_v21  ;;  %v601_v23 = vld [vmem:[%s16723_s6 + $0x3b1c] sm:$0xff]  ;;  %v603_v24 = vld [vmem:[%s16723_s6 + $0x3b24] sm:$0xff] }
  0x97   : >> { %600 = vst [vmem:[%s16719_s29 + $0x720] sm:$0xff] %v599_v22  ;;  %602 = vst [vmem:[%s16719_s29 + $0x728] sm:$0xff] %v601_v23  ;;  %v605_v25 = vld [vmem:[%s16723_s6 + $0x3b2c] sm:$0xff]  ;;  %v607_v26 = vld [vmem:[%s16723_s6 + $0x4360] sm:$0xff] }
  0x98   : >> { %604 = vst [vmem:[%s16719_s29 + $0x730] sm:$0xff] %v603_v24  ;;  %v609_v27 = vld [vmem:[%s16723_s6 + $0x4368] sm:$0xff]  ;;  %606 = vst [vmem:[%s16719_s29 + $0x738] sm:$0xff] %v605_v25  ;;  %v611_v28 = vld [vmem:[%s16723_s6 + $0x4370] sm:$0xff] }
  0x99   : >> { %608 = vst [vmem:[%s16719_s29 + $0x800] sm:$0xff] %v607_v26  ;;  %610 = vst [vmem:[%s16719_s29 + $0x808] sm:$0xff] %v609_v27  ;;  %v613_v29 = vld [vmem:[%s16723_s6 + $0x4378] sm:$0xff]  ;;  %v615_v30 = vld [vmem:[%s16723_s6 + $0x4380] sm:$0xff] }
  0x9a   : >> { %612 = vst [vmem:[%s16719_s29 + $0x810] sm:$0xff] %v611_v28  ;;  %614 = vst [vmem:[%s16719_s29 + $0x818] sm:$0xff] %v613_v29  ;;  %v617_v31 = vld [vmem:[%s16723_s6 + $0x4388] sm:$0xff]  ;;  %v619_v32 = vld [vmem:[%s16723_s6 + $0x4390] sm:$0xff]  ;;  %475 = sbr.rel (!%p472_p8) target bundleno = 120 (0x78), region = 197 }
  0x9b   : >> { %616 = vst [vmem:[%s16719_s29 + $0x820] sm:$0xff] %v615_v30  ;;  %v621_v33 = vld [vmem:[%s16723_s6 + $0x4398] sm:$0xff]  ;;  %618 = vst [vmem:[%s16719_s29 + $0x828] sm:$0xff] %v617_v31  ;;  %v623_v34 = vld [vmem:[%s16723_s6 + $0x4bcc] sm:$0xff] }
  0x9c   : >> { %620 = vst [vmem:[%s16719_s29 + $0x830] sm:$0xff] %v619_v32  ;;  %622 = vst [vmem:[%s16719_s29 + $0x838] sm:$0xff] %v621_v33  ;;  %v625_v35 = vld [vmem:[%s16723_s6 + $0x4bd4] sm:$0xff]  ;;  %v627_v36 = vld [vmem:[%s16723_s6 + $0x4bdc] sm:$0xff] }
  0x9d   : >> { %624 = vst [vmem:[%s16719_s29 + $0x900] sm:$0xff] %v623_v34  ;;  %626 = vst [vmem:[%s16719_s29 + $0x908] sm:$0xff] %v625_v35  ;;  %v629_v37 = vld [vmem:[%s16723_s6 + $0x4be4] sm:$0xff]  ;;  %v631_v38 = vld [vmem:[%s16723_s6 + $0x4bec] sm:$0xff] }
  0x9e   : >> { %628 = vst [vmem:[%s16719_s29 + $0x910] sm:$0xff] %v627_v36  ;;  %v633_v39 = vld [vmem:[%s16723_s6 + $0x4bf4] sm:$0xff]  ;;  %630 = vst [vmem:[%s16719_s29 + $0x918] sm:$0xff] %v629_v37  ;;  %v635_v40 = vld [vmem:[%s16723_s6 + $0x4bfc] sm:$0xff] }
  0x9f   : >> { %632 = vst [vmem:[%s16719_s29 + $0x920] sm:$0xff] %v631_v38  ;;  %634 = vst [vmem:[%s16719_s29 + $0x928] sm:$0xff] %v633_v39  ;;  %v637_v41 = vld [vmem:[%s16723_s6 + $0x4c04] sm:$0xff]  ;;  %s20112_s6 = smov %s17174_s20 }
  0xa0   : >> { %636 = vst [vmem:[%s16719_s29 + $0x930] sm:$0xff] %v635_v40  ;;  %638 = vst [vmem:[%s16719_s29 + $0x938] sm:$0xff] %v637_v41  ;;  %s20111_s29 = smov %s17177_s10 }
  0xa1   : > { %12689 = sbr.rel (%p12770_p9) target bundleno = 178 (0xb2), region = 202  ;;  %s20114_s22 = smov (!%p12770_p9), %s17322_s19 }
  0xa2   : > { %s20115_s29 = smov (!%p12770_p9), %s17319_s0  ;;  %s17331_s6 = smov (!%p12770_p9), 0  }
  0xa3   : > { %s17333_s26 = smov (!%p12770_p9), 0  }
  0xa8 LB: >> { %v666_v42 = vld [vmem:[%s16739_s29] sm:$0xff]  ;;  %v668_v43 = vld [vmem:[%s16739_s29 + $0x86c] sm:$0xff]  ;;  %v670_v44 = vld [vmem:[%s16739_s29 + $0x10d8] sm:$0xff]  ;;  %s686_s27 = sadd.s32 1, %s16743_s6  ;;  %s660_s26 = sadd.s32 1, %s16747_s26   ;;  %s16747_s26 = sphi %s17333_s26, %s660_s26   ;;  %s16743_s6 = sphi %s17331_s6, %s20116_s6   ;;  %s16739_s29 = sphi %s20115_s29, %s691_s29   ;;  %s16735_s22 = sphi %s20114_s22, %s692_s22  }
  0xa9   : >> { %667 = vst [vmem:[%s16735_s22] sm:$0xff] %v666_v42  ;;  %669 = vst [vmem:[%s16735_s22 + $0x100] sm:$0xff] %v668_v43  ;;  %v672_v45 = vld [vmem:[%s16739_s29 + $0x1944] sm:$0xff]  ;;  %v674_v46 = vld [vmem:[%s16739_s29 + $0x21b0] sm:$0xff]  ;;  %p687_p10 = scmp.ge.s32.totalorder %s686_s27, %s17315_s11  ;;  %p659_p11 = scmp.ge.s32.totalorder %s660_s26, %s17315_s11 }
  0xaa   : >> { %671 = vst [vmem:[%s16735_s22 + $0x200] sm:$0xff] %v670_v44  ;;  %v676_v47 = vld [vmem:[%s16739_s29 + $0x2a1c] sm:$0xff]  ;;  %673 = vst [vmem:[%s16735_s22 + $0x300] sm:$0xff] %v672_v45  ;;  %v678_v48 = vld [vmem:[%s16739_s29 + $0x3288] sm:$0xff] }
  0xab   : >> { %675 = vst [vmem:[%s16735_s22 + $0x400] sm:$0xff] %v674_v46  ;;  %677 = vst [vmem:[%s16735_s22 + $0x500] sm:$0xff] %v676_v47  ;;  %v680_v49 = vld [vmem:[%s16739_s29 + $0x3af4] sm:$0xff]  ;;  %v682_v50 = vld [vmem:[%s16739_s29 + $0x4360] sm:$0xff]  ;;  %s20198_s27 = smov (%p687_p10, %s686_s27), 0  ;;  %662 = sbr.rel (!%p659_p11) target bundleno = 168 (0xa8), region = 208 }
  0xac   : >> { %679 = vst [vmem:[%s16735_s22 + $0x600] sm:$0xff] %v678_v48  ;;  %681 = vst [vmem:[%s16735_s22 + $0x700] sm:$0xff] %v680_v49  ;;  %v684_v51 = vld [vmem:[%s16739_s29 + $0x4bcc] sm:$0xff]  ;;  %s12771_s4 = sshll.u32 %s20198_s27, 3  ;;  %s20116_s6 = smov %s20198_s27 }
  0xad   : >> { %683 = vst [vmem:[%s16735_s22 + $0x800] sm:$0xff] %v682_v50  ;;  %685 = vst [vmem:[%s16735_s22 + $0x900] sm:$0xff] %v684_v51  ;;  %s691_s29 = scalar_lea.vmem %s17319_s0, %s12771_s4   ;;  %s692_s22 = scalar_lea.vmem %s17322_s19, %s12771_s4 [#allocation3]  }
  0xb2 PF: > { %s16749_s12 = smov 0  }
  0xb3   : > { %s693_s20 = sshllo.u32 %s16749_s12, %s16842_s9 }
  0xb4   : > { %v702_v52 = vld [vmem:[%s17101_s28] sm:%s693_s20]  ;;  %v704_v53 = vld [vmem:[%s17101_s28 + $0x86c] sm:%s693_s20] }
  0xb5   : > { %703 = vst [vmem:[%s17104_s30] sm:%s693_s20] %v702_v52  ;;  %705 = vst [vmem:[%s17104_s30 + $0x100] sm:%s693_s20] %v704_v53 }
  0xb6   : > { %v706_v54 = vld [vmem:[%s17101_s28 + $0x10d8] sm:%s693_s20]  ;;  %v708_v55 = vld [vmem:[%s17101_s28 + $0x1944] sm:%s693_s20] }
  0xb7   : > { %707 = vst [vmem:[%s17104_s30 + $0x200] sm:%s693_s20] %v706_v54  ;;  %709 = vst [vmem:[%s17104_s30 + $0x300] sm:%s693_s20] %v708_v55 }
  0xb8   : > { %v710_v56 = vld [vmem:[%s17101_s28 + $0x21b0] sm:%s693_s20]  ;;  %v712_v57 = vld [vmem:[%s17101_s28 + $0x2a1c] sm:%s693_s20] }
  0xb9   : > { %711 = vst [vmem:[%s17104_s30 + $0x400] sm:%s693_s20] %v710_v56  ;;  %713 = vst [vmem:[%s17104_s30 + $0x500] sm:%s693_s20] %v712_v57 }
  0xba   : > { %v714_v58 = vld [vmem:[%s17101_s28 + $0x3288] sm:%s693_s20]  ;;  %v716_v59 = vld [vmem:[%s17101_s28 + $0x3af4] sm:%s693_s20] }
  0xbb   : > { %715 = vst [vmem:[%s17104_s30 + $0x600] sm:%s693_s20] %v714_v58  ;;  %717 = vst [vmem:[%s17104_s30 + $0x700] sm:%s693_s20] %v716_v59 }
  0xbc   : > { %v718_v60 = vld [vmem:[%s17101_s28 + $0x4360] sm:%s693_s20]  ;;  %v720_v61 = vld [vmem:[%s17101_s28 + $0x4bcc] sm:%s693_s20] }
  0xbd   : > { %719 = vst [vmem:[%s17104_s30 + $0x800] sm:%s693_s20] %v718_v60  ;;  %721 = vst [vmem:[%s17104_s30 + $0x900] sm:%s693_s20] %v720_v61 }
  0xbe PF: > { %p12773_p12 = scmp.ge.u32.totalorder %s16836_s7, 8 }
  0xbf   : > { %s16750_s0 = smov (!%p12773_p12), 0  }
  0xc0   : > { %196 = sbr.rel (%p12773_p12) target bundleno = 203 (0xcb), region = 36  ;;  %s197_s19 = sshllo.u32 (!%p12773_p12), %s16750_s0, %s16836_s7 }
  0xc1   : > { %v206_v62 = vld [vmem:[%s16834_s5] sm:%s197_s19] (!%p12773_p12)  ;;  %v208_v63 = vld [vmem:[%s16834_s5 + $0x86c] sm:%s197_s19] (!%p12773_p12) }
  0xc2   : > { %207 = vst [vmem:[%s16838_s8] sm:%s197_s19] (!%p12773_p12), %v206_v62  ;;  %209 = vst [vmem:[%s16838_s8 + $0x100] sm:%s197_s19] (!%p12773_p12), %v208_v63 }
  0xc3   : > { %v210_v0 = vld [vmem:[%s16834_s5 + $0x10d8] sm:%s197_s19] (!%p12773_p12)  ;;  %v212_v1 = vld [vmem:[%s16834_s5 + $0x1944] sm:%s197_s19] (!%p12773_p12) }
  0xc4   : > { %211 = vst [vmem:[%s16838_s8 + $0x200] sm:%s197_s19] (!%p12773_p12), %v210_v0  ;;  %213 = vst [vmem:[%s16838_s8 + $0x300] sm:%s197_s19] (!%p12773_p12), %v212_v1 }
  0xc5   : > { %v214_v2 = vld [vmem:[%s16834_s5 + $0x21b0] sm:%s197_s19] (!%p12773_p12)  ;;  %v216_v3 = vld [vmem:[%s16834_s5 + $0x2a1c] sm:%s197_s19] (!%p12773_p12) }
  0xc6   : > { %215 = vst [vmem:[%s16838_s8 + $0x400] sm:%s197_s19] (!%p12773_p12), %v214_v2  ;;  %217 = vst [vmem:[%s16838_s8 + $0x500] sm:%s197_s19] (!%p12773_p12), %v216_v3 }
  0xc7   : > { %v218_v4 = vld [vmem:[%s16834_s5 + $0x3288] sm:%s197_s19]  ;;  %v220_v5 = vld [vmem:[%s16834_s5 + $0x3af4] sm:%s197_s19] }
  0xc8   : > { %219 = vst [vmem:[%s16838_s8 + $0x600] sm:%s197_s19] %v218_v4  ;;  %221 = vst [vmem:[%s16838_s8 + $0x700] sm:%s197_s19] %v220_v5 }
  0xc9   : > { %v222_v6 = vld [vmem:[%s16834_s5 + $0x4360] sm:%s197_s19]  ;;  %v224_v7 = vld [vmem:[%s16834_s5 + $0x4bcc] sm:%s197_s19] }
  0xca   : > { %223 = vst [vmem:[%s16838_s8 + $0x800] sm:%s197_s19] %v222_v6  ;;  %225 = vst [vmem:[%s16838_s8 + $0x900] sm:%s197_s19] %v224_v7 }
  0xcb PF: > { %s726_s7 = sand.u32 1, %s16671_s14   ;;  %s14147_s9 = sshll.u32 %s16679_s16, 17 }
  0xcc   : > { %s12774_s28 = sshll.u32 %s726_s7, 13  ;;  %s17402_s11 = scalar_lea.hbm %s20092_s1, %s14147_s9 }
  0xcd   : > { %s730_s5 = scalar_lea.vmem [#allocation4], %s12774_s28  ;;  %s17406_s25 = scalar_lea.sflag [#allocation5], %s726_s7 }
  0xce   : > { %s740_s8 = sshll.u32 %s730_s5, 4  ;;  %s16539_s18 = scalar_lea.hbm %s17402_s11, 131072  ;;  %s17404_s8 = int_to_ptr.vmem [resolvable:$true] %s740_s8 }
  0xcf   : > { %p16540_p13 = scmp.ne.s32.totalorder %s17402_s11, %s16539_s18  ;;  %s16543_s6 = scalar_lea.hbm %s20092_s1, 1179648 }
  0xd0   : > { %p16544_p2 = scmp.lt.u32.totalorder %s17402_s11, %s20092_s1  ;;  %p16545_p4 = scmp.lt.u32.totalorder %s16543_s6, %s16539_s18 }
  0xd1   : > { %p16541_p0 = pnand %p16540_p13, %p16811_p3  ;;  %p16547_p6 = scmp.lt.u32.totalorder %s16539_s18, %s17402_s11 }
  0xd2   : > { %p16546_p5 = por %p16545_p4, %p16544_p2 }
  0xd3   : > { %p16542_p1 = pneg %p16541_p0 }
  0xd4   : > { %p16548_p8 = por %p16547_p6, %p16546_p5 }
  0xd6   : > { %p16549_p9 = pnand %p16548_p8, %p16542_p1 }
  0xd8   : > { %16552 = shalt.err (!%p16549_p9)
}
  0xd9   : > { %s16553_s4 = scalar_lea.vmem %s17404_s8, 131072  ;;  %s16751_s12 = smov [#allocation4]  }
  0xda   : > { %p16554_p10 = scmp.ne.s32.totalorder %s17404_s8, %s16553_s4  ;;  %s16557_s20 = sshll.u32 %s16751_s12, 4  ;;  %s16558_s20 = int_to_ptr.vmem [resolvable:$false] %s16557_s20 }
  0xdb   : > { %s16559_s0 = scalar_lea.vmem %s16558_s20, 262144  ;;  %p16560_p13 = scmp.lt.s32.totalorder %s17404_s8, %s16558_s20 }
  0xdc   : > { %p16555_p11 = pnand %p16554_p10, %p16811_p3  ;;  %p16561_p0 = scmp.lt.s32.totalorder %s16559_s0, %s16553_s4 }
  0xde   : > { %p16556_p12 = pneg %p16555_p11  ;;  %p16562_p2 = por %p16561_p0, %p16560_p13 }
  0xe0   : > { %p16563_p4 = pnand %p16562_p2, %p16556_p12 }
  0xe2   : > { %16566 = shalt.err (!%p16563_p4)
}
  0xe3   : > { %s16752_s19 = smov 128   ;;  %s16753_s7 = smov 8  }
  0xe4   : > { %14780 = dma.hbm_to_vmem [thread:$0]  (%p16811_p3), %s17402_s11, 131072, %s17404_s8, %s17406_s25, %s16752_s19, %s16752_s19, %s16753_s7  }
  0xe5 PF: > { %p12778_p1 = scmp.ge.s32.totalorder %s16683_s17, 1  ;;  %p748_p5 = scmp.lt.s32.totalorder %s16683_s17, 10 }
  0xe7   : > { %p749_p6 = pnand %p12778_p1, %p748_p5 }
  0xe8   : > { %s755_s9 = sand.u32 (!%p749_p6), 1, %s16667_s13  }
  0xe9   : > { %752 = sbr.rel (%p749_p6) target bundleno = 1560 (0x618), region = 94  ;;  %s12779_s30 = sshll.u32 (!%p749_p6), %s755_s9, 13 }
  0xea   : > { %s14779_s28 = smul.u32 (!%p749_p6), 2560, %s755_s9  ;;  %s762_s5 = scalar_lea.sflag (!%p749_p6), [#allocation5], %s755_s9 }
  0xeb   : > { %s17435_s18 = scalar_lea.vmem (!%p749_p6), [#allocation4], %s12779_s30 }
  0xec   : > { %s17433_s10 = scalar_lea.vmem (!%p749_p6), [#allocation3], %s14779_s28 }
  0xf0   : > { %16658 = dma.done.wait (%p16818_p7), %s762_s5, 131072  }
  0xf1   : > { %16660 = vsyncadd (%p16818_p7), %s762_s5, 4294836224  ;;  %p12780_p3 = scmp.ne.s32.totalorder %s16675_s15, 0 }
  0xf2   : > { %v16754_v8 = vmov (!%p12780_p3), 0.0  }
  0xf3   : > { %830 = sbr.rel (%p12780_p3) target bundleno = 253 (0xfd), region = 106  ;;  %831 = vst [vmem:[#allocation2] sm:$0xff] (!%p12780_p3), %v16754_v8  ;;  %832 = vst [vmem:[#allocation2 + $0x8] sm:$0xff] (!%p12780_p3), %v16754_v8 }
  0xf4   : > { %833 = vst [vmem:[#allocation2 + $0x10] sm:$0xff] (!%p12780_p3), %v16754_v8  ;;  %834 = vst [vmem:[#allocation2 + $0x18] sm:$0xff] (!%p12780_p3), %v16754_v8 }
  0xf5   : > { %835 = vst [vmem:[#allocation2 + $0x20] sm:$0xff] (!%p12780_p3), %v16754_v8  ;;  %836 = vst [vmem:[#allocation2 + $0x28] sm:$0xff] (!%p12780_p3), %v16754_v8 }
  0xf6   : > { %837 = vst [vmem:[#allocation2 + $0x30] sm:$0xff] (!%p12780_p3), %v16754_v8  ;;  %838 = vst [vmem:[#allocation2 + $0x38] sm:$0xff] (!%p12780_p3), %v16754_v8 }
  0xf7   : > { %839 = vst [vmem:[#allocation2 + $0x40] sm:$0xff] (!%p12780_p3), %v16754_v8  ;;  %840 = vst [vmem:[#allocation2 + $0x48] sm:$0xff] (!%p12780_p3), %v16754_v8 }
  0xf8   : > { %841 = vst [vmem:[#allocation2 + $0x50] sm:$0xff] (!%p12780_p3), %v16754_v8  ;;  %842 = vst [vmem:[#allocation2 + $0x58] sm:$0xff] (!%p12780_p3), %v16754_v8 }
  0xf9   : > { %843 = vst [vmem:[#allocation2 + $0x60] sm:$0xff] (!%p12780_p3), %v16754_v8  ;;  %844 = vst [vmem:[#allocation2 + $0x68] sm:$0xff] (!%p12780_p3), %v16754_v8 }
  0xfa   : > { %845 = vst [vmem:[#allocation2 + $0x70] sm:$0xff] %v16754_v8  ;;  %846 = vst [vmem:[#allocation2 + $0x78] sm:$0xff] %v16754_v8 }
  0xfb   : > { %847 = vst [vmem:[#allocation2 + $0x80] sm:$0xff] %v16754_v8  ;;  %848 = vst [vmem:[#allocation2 + $0x88] sm:$0xff] %v16754_v8 }
  0xfc   : > { %849 = vst [vmem:[#allocation2 + $0x90] sm:$0xff] %v16754_v8  ;;  %850 = vst [vmem:[#allocation2 + $0x98] sm:$0xff] %v16754_v8 }
  0xfd PF: > { %v14963_v9 = vld [vmem:[%s17435_s18 + $0x4] ss:$8 sps:$4 sm:$0xff]   ;;  %v14967_v11 = vld [vmem:[%s17435_s18] ss:$8 sps:$4 sm:$0xff]   ;;  %v14969_v13 = vld [vmem:[%s17435_s18 + $0x14] ss:$8 sps:$4 sm:$0xff]   ;;  %v1171_v38 = vlaneseq }
  0xfe   : > { %v14965_v10 = vld [vmem:[%s17435_s18 + $0x1004] ss:$8 sps:$4 sm:$0xff]   ;;  %9610 = vmatprep.subr.bf16.mxu1 %v14963_v9  ;;  %v14968_v12 = vld [vmem:[%s17435_s18 + $0x1000] ss:$8 sps:$4 sm:$0xff]   ;;  %v14971_v14 = vld [vmem:[%s17435_s18 + $0x1014] ss:$8 sps:$4 sm:$0xff]  }
  0xff   : > { %10938 = vmatprep.subr.bf16.mxu0 %v14965_v10  ;;  %9611 = vmatpush1.bf16.msra.mxu1 %v14967_v11  ;;  %v14973_v15 = vld [vmem:[%s17435_s18 + $0x10] ss:$8 sps:$4 sm:$0xff]   ;;  %v14975_v17 = vld [vmem:[%s17435_s18 + $0x24] ss:$8 sps:$4 sm:$0xff]   ;;  %v14979_v19 = vld [vmem:[%s17435_s18 + $0x20] ss:$8 sps:$4 sm:$0xff]  }
 0x100   : > { %10939 = vmatpush1.bf16.msra.mxu0 %v14968_v12  ;;  %9612 = vmatprep.subr.bf16.mxu1 %v14969_v13  ;;  %v14974_v16 = vld [vmem:[%s17435_s18 + $0x1010] ss:$8 sps:$4 sm:$0xff]   ;;  %v14977_v18 = vld [vmem:[%s17435_s18 + $0x1024] ss:$8 sps:$4 sm:$0xff]   ;;  %v14980_v20 = vld [vmem:[%s17435_s18 + $0x1020] ss:$8 sps:$4 sm:$0xff]  }
 0x101   : > { %10940 = vmatprep.subr.bf16.mxu0 %v14971_v14  ;;  %v14981_v21 = vld [vmem:[%s17435_s18 + $0x34] ss:$8 sps:$4 sm:$0xff]   ;;  %v14985_v23 = vld [vmem:[%s17435_s18 + $0x30] ss:$8 sps:$4 sm:$0xff]   ;;  %v14987_v25 = vld [vmem:[%s17435_s18 + $0x44] ss:$8 sps:$4 sm:$0xff]  }
 0x102   : > { %v14983_v22 = vld [vmem:[%s17435_s18 + $0x1034] ss:$8 sps:$4 sm:$0xff]   ;;  %v14986_v24 = vld [vmem:[%s17435_s18 + $0x1030] ss:$8 sps:$4 sm:$0xff]   ;;  %v14989_v26 = vld [vmem:[%s17435_s18 + $0x1044] ss:$8 sps:$4 sm:$0xff]  }
 0x103   : > { %9613 = vmatpush1.bf16.msra.mxu1 %v14973_v15  ;;  %v14991_v27 = vld [vmem:[%s17435_s18 + $0x40] ss:$8 sps:$4 sm:$0xff]   ;;  %v14993_v29 = vld [vmem:[%s17435_s18 + $0x54] ss:$8 sps:$4 sm:$0xff]   ;;  %v14997_v31 = vld [vmem:[%s17435_s18 + $0x50] ss:$8 sps:$4 sm:$0xff]  }
 0x104   : > { %10941 = vmatpush1.bf16.msra.mxu0 %v14974_v16  ;;  %9614 = vmatprep.subr.bf16.mxu1 %v14975_v17  ;;  %v14992_v28 = vld [vmem:[%s17435_s18 + $0x1040] ss:$8 sps:$4 sm:$0xff]   ;;  %v14995_v30 = vld [vmem:[%s17435_s18 + $0x1054] ss:$8 sps:$4 sm:$0xff]   ;;  %v14998_v32 = vld [vmem:[%s17435_s18 + $0x1050] ss:$8 sps:$4 sm:$0xff]  }
 0x105   : > { %10942 = vmatprep.subr.bf16.mxu0 %v14977_v18  ;;  %v14999_v33 = vld [vmem:[%s17435_s18 + $0x64] ss:$8 sps:$4 sm:$0xff]   ;;  %v15003_v35 = vld [vmem:[%s17435_s18 + $0x60] ss:$8 sps:$4 sm:$0xff]   ;;  %v15005_v37 = vld [vmem:[%s17435_s18 + $0x74] ss:$8 sps:$4 sm:$0xff]  }
 0x106   : > { %v15001_v34 = vld [vmem:[%s17435_s18 + $0x1064] ss:$8 sps:$4 sm:$0xff]   ;;  %v15004_v36 = vld [vmem:[%s17435_s18 + $0x1060] ss:$8 sps:$4 sm:$0xff]   ;;  %v15007_v39 = vld [vmem:[%s17435_s18 + $0x1074] ss:$8 sps:$4 sm:$0xff]  }
 0x107   : > { %9615 = vmatpush1.bf16.msra.mxu1 %v14979_v19  ;;  %v15009_v40 = vld [vmem:[%s17435_s18 + $0x70] ss:$8 sps:$4 sm:$0xff]   ;;  %v15011_v42 = vld [vmem:[%s17435_s18 + $0x84] ss:$8 sps:$4 sm:$0xff]   ;;  %v17476_v43 = vand.u32 127, %v1171_v38  ;;  %s12781_s21 = sshll.u32 %s16675_s15, 13 }
 0x108   : > { %10943 = vmatpush1.bf16.msra.mxu0 %v14980_v20  ;;  %9616 = vmatprep.subr.bf16.mxu1 %v14981_v21  ;;  %v15010_v41 = vld [vmem:[%s17435_s18 + $0x1070] ss:$8 sps:$4 sm:$0xff]   ;;  %v15013_v44 = vld [vmem:[%s17435_s18 + $0x1084] ss:$8 sps:$4 sm:$0xff]   ;;  %v15015_v45 = vld [vmem:[%s17435_s18 + $0x80] ss:$8 sps:$4 sm:$0xff]   ;;  %v17485_v50 = vstv %s12781_s21 }
 0x109   : > { %10944 = vmatprep.subr.bf16.mxu0 %v14983_v22  ;;  %v15016_v46 = vld [vmem:[%s17435_s18 + $0x1080] ss:$8 sps:$4 sm:$0xff]   ;;  %v15017_v47 = vld [vmem:[%s17435_s18 + $0x94] ss:$8 sps:$4 sm:$0xff]   ;;  %v1173_v48 = vadd.s32 128, %v17476_v43  ;;  %v1204_v51 = vadd.s32 4096, %v17476_v43  ;;  %v1238_v56 = vadd.s32 %v17485_v50, %v17476_v43 }
 0x10a   : > { %v15019_v49 = vld [vmem:[%s17435_s18 + $0x1094] ss:$8 sps:$4 sm:$0xff]   ;;  %v1205_v52 = vadd.s32 4224, %v17476_v43  ;;  %v15021_v53 = vld [vmem:[%s17435_s18 + $0x90] ss:$8 sps:$4 sm:$0xff]   ;;  %v851_v3 = vld [vmem:[%s17433_s10] sm:$0xff] }
 0x10b   : > { %9617 = vmatpush1.bf16.msra.mxu1 %v14985_v23  ;;  %v15022_v54 = vld [vmem:[%s17435_s18 + $0x1090] ss:$8 sps:$4 sm:$0xff]   ;;  %v15023_v55 = vld [vmem:[%s17435_s18 + $0xa4] ss:$8 sps:$4 sm:$0xff]   ;;  %v1239_v57 = vadd.s32 %v17485_v50, %v1173_v48  ;;  %v1270_v59 = vadd.s32 %v17485_v50, %v1204_v51  ;;  %v15027_v61 = vld [vmem:[%s17435_s18 + $0xa0] ss:$8 sps:$4 sm:$0xff]  }
 0x10c   : > { %10945 = vmatpush1.bf16.msra.mxu0 %v14986_v24  ;;  %9618 = vmatprep.subr.bf16.mxu1 %v14987_v25  ;;  %v15025_v58 = vld [vmem:[%s17435_s18 + $0x10a4] ss:$8 sps:$4 sm:$0xff]   ;;  %v1271_v60 = vadd.s32 %v17485_v50, %v1205_v52  ;;  %v15028_v62 = vld [vmem:[%s17435_s18 + $0x10a0] ss:$8 sps:$4 sm:$0xff]   ;;  %v15029_v63 = vld [vmem:[%s17435_s18 + $0xb4] ss:$8 sps:$4 sm:$0xff]  }
 0x10d   : > { %10946 = vmatprep.subr.bf16.mxu0 %v14989_v26  ;;  %vm1302_vm0 = vcmp.lt.s32.totalorder %v1238_v56, 68970  ;;  %vm1303_vm1 = vcmp.lt.s32.totalorder %v1239_v57, 68970  ;;  %v15031_v0 = vld [vmem:[%s17435_s18 + $0x10b4] ss:$8 sps:$4 sm:$0xff]   ;;  %vm1334_vm2 = vcmp.lt.s32.totalorder %v1270_v59, 68970  ;;  %v883_v4 = vld [vmem:[%s17433_s10 + $0x100] sm:$0xff] }
 0x10e   : > { %v15033_v1 = vld [vmem:[%s17435_s18 + $0xb0] ss:$8 sps:$4 sm:$0xff]   ;;  %vm1335_vm3 = vcmp.lt.s32.totalorder %v1271_v60, 68970  ;;  %vm17506_vm4 = vmpackc.low %vm1303_vm1, %vm1302_vm0  ;;  %v15035_v6 = vld [vmem:[%s17435_s18 + $0xc4] ss:$8 sps:$4 sm:$0xff]   ;;  %p14126_p7 = scmp.ne.s32.totalorder %s16675_s15, 8 }
 0x10f   : > { %9619 = vmatpush1.bf16.msra.mxu1 %v14991_v27  ;;  %v15034_v2 = vld [vmem:[%s17435_s18 + $0x10b0] ss:$8 sps:$4 sm:$0xff]   ;;  %v1526_v7 = vsel %vm17506_vm4, %v851_v3, 0  ;;  %v1558_v8 = vsel %vm17506_vm4, %v883_v4, 0  ;;  %v867_v9 = vld [vmem:[%s17433_s10 + $0x80] sm:$0xff]  ;;  %vm17519_vm5 = vmpackc.low %vm1335_vm3, %vm1334_vm2 }
 0x110   : > { %10947 = vmatpush1.bf16.msra.mxu0 %v14992_v28  ;;  %9620 = vmatprep.subr.bf16.mxu1 %v14993_v29  ;;  %v15037_v10 = vld [vmem:[%s17435_s18 + $0x10c4] ss:$8 sps:$4 sm:$0xff]   ;;  %v12783_v11 = vcombine.high %v1526_v7, %v1558_v8  ;;  %v1542_v14 = vsel %vm17519_vm5, %v867_v9, 0  ;;  %v15039_v17 = vld [vmem:[%s17435_s18 + $0xc0] ss:$8 sps:$4 sm:$0xff]  }
 0x111   : > { %10948 = vmatprep.subr.bf16.mxu0 %v14995_v30  ;;  %v899_v12 = vld [vmem:[%s17433_s10 + $0x180] sm:$0xff]  ;;  %v15041_v19 = vld [vmem:[%s17435_s18 + $0xd4] ss:$8 sps:$4 sm:$0xff]   ;;  %v15045_v21 = vld [vmem:[%s17435_s18 + $0xd0] ss:$8 sps:$4 sm:$0xff]  }
 0x112   : > { %v1574_v15 = vsel %vm17519_vm5, %v899_v12, 0  ;;  %9642 = vmatprep.mubr.bf16.mxu1 %v12783_v11  ;;  %v15040_v18 = vld [vmem:[%s17435_s18 + $0x10c0] ss:$8 sps:$4 sm:$0xff]   ;;  %v15043_v20 = vld [vmem:[%s17435_s18 + $0x10d4] ss:$8 sps:$4 sm:$0xff]  }
 0x113   : > { %9621 = vmatpush1.bf16.msra.mxu1 %v14997_v31  ;;  %v12815_v16 = vcombine.high %v1542_v14, %v1574_v15  ;;  %v15046_v22 = vld [vmem:[%s17435_s18 + $0x10d0] ss:$8 sps:$4 sm:$0xff]   ;;  %v15047_v23 = vld [vmem:[%s17435_s18 + $0xe4] ss:$8 sps:$4 sm:$0xff]   ;;  %v15051_v25 = vld [vmem:[%s17435_s18 + $0xe0] ss:$8 sps:$4 sm:$0xff]  }
 0x114   : > { %10949 = vmatpush1.bf16.msra.mxu0 %v14998_v32  ;;  %9622 = vmatprep.subr.bf16.mxu1 %v14999_v33  ;;  %v15049_v24 = vld [vmem:[%s17435_s18 + $0x10e4] ss:$8 sps:$4 sm:$0xff]   ;;  %v15052_v26 = vld [vmem:[%s17435_s18 + $0x10e0] ss:$8 sps:$4 sm:$0xff]   ;;  %v15053_v27 = vld [vmem:[%s17435_s18 + $0xf4] ss:$8 sps:$4 sm:$0xff]   ;;  %v12782_v33 = vcombine.low %v1526_v7, %v1558_v8 }
 0x115   : > { %10950 = vmatprep.subr.bf16.mxu0 %v15001_v34  ;;  %10970 = vmatprep.mubr.bf16.mxu0 %v12815_v16  ;;  %v15055_v28 = vld [vmem:[%s17435_s18 + $0x10f4] ss:$8 sps:$4 sm:$0xff]   ;;  %v15057_v29 = vld [vmem:[%s17435_s18 + $0xf0] ss:$8 sps:$4 sm:$0xff]   ;;  %v15061_v31 = vld [vmem:[%s17435_s18 + $0x104] ss:$8 sps:$4 sm:$0xff]   ;;  %v12814_v34 = vcombine.low %v1542_v14, %v1574_v15 }
 0x116   : > { %v15058_v30 = vld [vmem:[%s17435_s18 + $0x10f0] ss:$8 sps:$4 sm:$0xff]   ;;  %v15064_v32 = vld [vmem:[%s17435_s18 + $0x1104] ss:$8 sps:$4 sm:$0xff]   ;;  %v15074_v57 = vld [vmem:[%s17435_s18 + $0x1120] ss:$8 sps:$4 sm:$0xff]  }
 0x117   : > { %9623 = vmatpush1.bf16.msra.mxu1 %v15003_v35  ;;  %v15059_v35 = vld [vmem:[%s17435_s18 + $0x100] ss:$8 sps:$4 sm:$0xff]   ;;  %v15073_v52 = vld [vmem:[%s17435_s18 + $0x124] ss:$8 sps:$4 sm:$0xff]   ;;  %v15079_v60 = vld [vmem:[%s17435_s18 + $0x134] ss:$8 sps:$4 sm:$0xff]  }
 0x118   : > { %10951 = vmatpush1.bf16.msra.mxu0 %v15004_v36  ;;  %9624 = vmatprep.subr.bf16.mxu1 %v15005_v37  ;;  %v15062_v36 = vld [vmem:[%s17435_s18 + $0x1100] ss:$8 sps:$4 sm:$0xff]   ;;  %v15067_v37 = vld [vmem:[%s17435_s18 + $0x114] ss:$8 sps:$4 sm:$0xff]   ;;  %v15077_v7 = vld [vmem:[%s17435_s18 + $0x130] ss:$8 sps:$4 sm:$0xff]  }
 0x119   : > { %10952 = vmatprep.subr.bf16.mxu0 %v15007_v39  ;;  %v15070_v39 = vld [vmem:[%s17435_s18 + $0x1114] ss:$8 sps:$4 sm:$0xff]   ;;  %v1027_v4 = vld [vmem:[%s17433_s10 + $0x580] sm:$0xff]  ;;  %v15080_v8 = vld [vmem:[%s17435_s18 + $0x1130] ss:$8 sps:$4 sm:$0xff]  }
 0x11a   : > { %v1702_v9 = vsel %vm17519_vm5, %v1027_v4, 0  ;;  %v15088_v11 = vld [vmem:[%s17435_s18 + $0x1144] ss:$8 sps:$4 sm:$0xff]   ;;  %v15083_v14 = vld [vmem:[%s17435_s18 + $0x140] ss:$8 sps:$4 sm:$0xff]  }
 0x11b   : > { %9625 = vmatpush1.bf16.msra.mxu1 %v15009_v40  ;;  %v915_v40 = vld [vmem:[%s17433_s10 + $0x200] sm:$0xff]  ;;  %v852_v13 = vld [vmem:[%s17433_s10 + $0x8] sm:$0xff] }
 0x11c   : > { %10953 = vmatpush1.bf16.msra.mxu0 %v15010_v41  ;;  %9626 = vmatprep.subr.bf16.mxu1 %v15011_v42  ;;  %v947_v41 = vld [vmem:[%s17433_s10 + $0x300] sm:$0xff]  ;;  %v15065_v42 = vld [vmem:[%s17435_s18 + $0x110] ss:$8 sps:$4 sm:$0xff]  }
 0x11d   : > { %10954 = vmatprep.subr.bf16.mxu0 %v15013_v44  ;;  %v1590_v44 = vsel %vm17506_vm4, %v915_v40, 0  ;;  %v15086_v15 = vld [vmem:[%s17435_s18 + $0x1140] ss:$8 sps:$4 sm:$0xff]  }
 0x11e   : > { %v1139_v40 = vld [vmem:[%s17433_s10 + $0x900] sm:$0xff] }
 0x11f   : > { %9627 = vmatpush1.bf16.msra.mxu1 %v15015_v45  ;;  %v1622_v45 = vsel %vm17506_vm4, %v947_v41, 0  ;;  %v15110_v4 = vld [vmem:[%s17435_s18 + $0x1180] ss:$8 sps:$4 sm:$0xff]  }
 0x120   : > { %10955 = vmatpush1.bf16.msra.mxu0 %v15016_v46  ;;  %9628 = vmatprep.subr.bf16.mxu1 %v15017_v47  ;;  %v931_v46 = vld [vmem:[%s17433_s10 + $0x280] sm:$0xff]  ;;  %v15068_v47 = vld [vmem:[%s17435_s18 + $0x1110] ss:$8 sps:$4 sm:$0xff]   ;;  %v12847_v48 = vcombine.high %v1590_v44, %v1622_v45 }
 0x121   : > { %10956 = vmatprep.subr.bf16.mxu0 %v15019_v49  ;;  %v963_v49 = vld [vmem:[%s17433_s10 + $0x380] sm:$0xff]  ;;  %v1606_v51 = vsel %vm17519_vm5, %v931_v46, 0 }
 0x123   : > { %9629 = vmatpush1.bf16.msra.mxu1 %v15021_v53  ;;  %v15076_v53 = vld [vmem:[%s17435_s18 + $0x1124] ss:$8 sps:$4 sm:$0xff]  }
 0x124   : > { %10957 = vmatpush1.bf16.msra.mxu0 %v15022_v54  ;;  %9630 = vmatprep.subr.bf16.mxu1 %v15023_v55  ;;  %v1638_v54 = vsel %vm17519_vm5, %v963_v49, 0  ;;  %v15071_v55 = vld [vmem:[%s17435_s18 + $0x120] ss:$8 sps:$4 sm:$0xff]   ;;  %v1814_v49 = vsel %vm17506_vm4, %v1139_v40, 0 }
 0x125   : > { %10958 = vmatprep.subr.bf16.mxu0 %v15025_v58  ;;  %v12879_v56 = vcombine.high %v1606_v51, %v1638_v54  ;;  %v12846_v58 = vcombine.low %v1590_v44, %v1622_v45  ;;  %v12878_v59 = vcombine.low %v1606_v51, %v1638_v54  ;;  %v15095_v45 = vld [vmem:[%s17435_s18 + $0x160] ss:$8 sps:$4 sm:$0xff]  }
 0x126   : > { %v1123_v51 = vld [vmem:[%s17433_s10 + $0x880] sm:$0xff] }
 0x127   : > { %9631 = vmatpush1.bf16.msra.mxu1 %v15027_v61  ;;  %v15082_v61 = vld [vmem:[%s17435_s18 + $0x1134] ss:$8 sps:$4 sm:$0xff]   ;;  %v1798_v54 = vsel %vm17519_vm5, %v1123_v51, 0  ;;  %v15143_v40 = vld [vmem:[%s17435_s18 + $0x1e0] ss:$8 sps:$4 sm:$0xff]  }
 0x128   : > { %10959 = vmatpush1.bf16.msra.mxu0 %v15028_v62  ;;  %9632 = vmatprep.subr.bf16.mxu1 %v15029_v63  ;;  %v979_v62 = vld [vmem:[%s17433_s10 + $0x400] sm:$0xff]  ;;  %v932_v51 = vld [vmem:[%s17433_s10 + $0x288] sm:$0xff] }
 0x129   : > { %10960 = vmatprep.subr.bf16.mxu0 %v15031_v0  ;;  %v1011_v63 = vld [vmem:[%s17433_s10 + $0x500] sm:$0xff]  ;;  %v1654_v0 = vsel %vm17506_vm4, %v979_v62, 0 }
 0x12a   : > { %v15109_v62 = vld [vmem:[%s17435_s18 + $0x184] ss:$8 sps:$4 sm:$0xff]  }
 0x12b   : > { %9633 = vmatpush1.bf16.msra.mxu1 %v15033_v1  ;;  %v1686_v1 = vsel %vm17506_vm4, %v1011_v63, 0  ;;  %v15112_v63 = vld [vmem:[%s17435_s18 + $0x1184] ss:$8 sps:$4 sm:$0xff]  }
 0x12c   : > { %10961 = vmatpush1.bf16.msra.mxu0 %v15034_v2  ;;  %9634 = vmatprep.subr.bf16.mxu1 %v15035_v6  ;;  %v995_v2 = vld [vmem:[%s17433_s10 + $0x480] sm:$0xff]  ;;  %v12911_v3 = vcombine.high %v1654_v0, %v1686_v1  ;;  %v12910_v16 = vcombine.low %v1654_v0, %v1686_v1  ;;  %v884_v0 = vld [vmem:[%s17433_s10 + $0x108] sm:$0xff]  ;;  %v15202_v1 = vld [vmem:[%s17435_s18 + $0x1274] ss:$8 sps:$4 sm:$0xff]  }
 0x12d   : > { %10962 = vmatprep.subr.bf16.mxu0 %v15037_v10  ;;  %v1670_v6 = vsel %vm17519_vm5, %v995_v2, 0  ;;  %v15085_v10 = vld [vmem:[%s17435_s18 + $0x144] ss:$8 sps:$4 sm:$0xff]   ;;  %v15107_v2 = vld [vmem:[%s17435_s18 + $0x180] ss:$8 sps:$4 sm:$0xff]  }
 0x12e   : > { %v12943_v12 = vcombine.high %v1670_v6, %v1702_v9 }
 0x12f   : > { %9635 = vmatpush1.bf16.msra.mxu1 %v15039_v17  ;;  %v12942_v17 = vcombine.low %v1670_v6, %v1702_v9 }
 0x130   : > { %10963 = vmatpush1.bf16.msra.mxu0 %v15040_v18  ;;  %9636 = vmatprep.subr.bf16.mxu1 %v15041_v19  ;;  %v1043_v18 = vld [vmem:[%s17433_s10 + $0x600] sm:$0xff] }
 0x131   : > { %10964 = vmatprep.subr.bf16.mxu0 %v15043_v20  ;;  %v1075_v19 = vld [vmem:[%s17433_s10 + $0x700] sm:$0xff]  ;;  %v15091_v20 = vld [vmem:[%s17435_s18 + $0x154] ss:$8 sps:$4 sm:$0xff]  }
 0x133   : > { %9637 = vmatpush1.bf16.msra.mxu1 %v15045_v21  ;;  %v1718_v21 = vsel %vm17506_vm4, %v1043_v18, 0 }
 0x134   : > { %10965 = vmatpush1.bf16.msra.mxu0 %v15046_v22  ;;  %9638 = vmatprep.subr.bf16.mxu1 %v15047_v23  ;;  %v1750_v22 = vsel %vm17506_vm4, %v1075_v19, 0  ;;  %v15094_v23 = vld [vmem:[%s17435_s18 + $0x1154] ss:$8 sps:$4 sm:$0xff]   ;;  %v15113_v19 = vld [vmem:[%s17435_s18 + $0x190] ss:$8 sps:$4 sm:$0xff]  }
 0x135   : > { %10966 = vmatprep.subr.bf16.mxu0 %v15049_v24  ;;  %v1059_v24 = vld [vmem:[%s17433_s10 + $0x680] sm:$0xff]  ;;  %v12974_v46 = vcombine.low %v1718_v21, %v1750_v22 }
 0x137   : > { %9639 = vmatpush1.bf16.msra.mxu1 %v15051_v25  ;;  %v1091_v25 = vld [vmem:[%s17433_s10 + $0x780] sm:$0xff] }
 0x138   : > { %10967 = vmatpush1.bf16.msra.mxu0 %v15052_v26  ;;  %9640 = vmatprep.subr.bf16.mxu1 %v15053_v27  ;;  %v1174_v26 = vadd.s32 256, %v17476_v43  ;;  %v1175_v27 = vadd.s32 384, %v17476_v43 }
 0x139   : > { %10968 = vmatprep.subr.bf16.mxu0 %v15055_v28  ;;  %v12975_v28 = vcombine.high %v1718_v21, %v1750_v22  ;;  %v15121_v21 = vld [vmem:[%s17435_s18 + $0x1a4] ss:$8 sps:$4 sm:$0xff]  }
 0x13a   : > { %v1240_v41 = vadd.s32 %v17485_v50, %v1174_v26  ;;  %v15124_v22 = vld [vmem:[%s17435_s18 + $0x11a4] ss:$8 sps:$4 sm:$0xff]   ;;  %v15130_v26 = vld [vmem:[%s17435_s18 + $0x11b4] ss:$8 sps:$4 sm:$0xff]  }
 0x13b   : > { %9641 = vmatpush1.bf16.msra.mxu1 %v15057_v29  ;;  %v1734_v29 = vsel %vm17519_vm5, %v1059_v24, 0  ;;  %v15122_v24 = vld [vmem:[%s17435_s18 + $0x11a0] ss:$8 sps:$4 sm:$0xff]  }
 0x13c   : > { %10969 = vmatpush1.bf16.msra.mxu0 %v15058_v30  ;;  %9693 = vmatprep.subr.bf16.mxu1 %v15061_v31  ;;  %v1766_v30 = vsel %vm17519_vm5, %v1091_v25, 0  ;;  %v1206_v31 = vadd.s32 4352, %v17476_v43  ;;  %vm1304_vm6 = vcmp.lt.s32.totalorder %v1240_v41, 68970  ;;  %v15127_v25 = vld [vmem:[%s17435_s18 + $0x1b4] ss:$8 sps:$4 sm:$0xff]  }
 0x13d   : > { %11021 = vmatprep.subr.bf16.mxu0 %v15064_v32  ;;  %v13007_v32 = vcombine.high %v1734_v29, %v1766_v30  ;;  %v15146_v41 = vld [vmem:[%s17435_s18 + $0x11e0] ss:$8 sps:$4 sm:$0xff]  }
 0x13e   : > { %9643 = vmatmul.mubr.bf16.vlgmr.msra.gmra.mrb[0].mxu1 %v12782_v33  ;;  %v15089_v33 = vld [vmem:[%s17435_s18 + $0x150] ss:$8 sps:$4 sm:$0xff]   ;;  %v1272_v44 = vadd.s32 %v17485_v50, %v1206_v31  ;;  %v15131_v31 = vld [vmem:[%s17435_s18 + $0x1c0] ss:$8 sps:$4 sm:$0xff]  }
 0x13f   : > { %10971 = vmatmul.mubr.bf16.vlgmr.msra.gmra.mrb[0].mxu0 %v12814_v34  ;;  %9694 = vmatpush1.bf16.msra.mxu1 %v15059_v35  ;;  %v15092_v34 = vld [vmem:[%s17435_s18 + $0x1150] ss:$8 sps:$4 sm:$0xff]   ;;  %v1207_v35 = vadd.s32 4480, %v17476_v43 }
 0x140   : > { %11022 = vmatpush1.bf16.msra.mxu0 %v15062_v36  ;;  %9695 = vmatprep.subr.bf16.mxu1 %v15067_v37  ;;  %v15097_v36 = vld [vmem:[%s17435_s18 + $0x164] ss:$8 sps:$4 sm:$0xff]   ;;  %vm1336_vm8 = vcmp.lt.s32.totalorder %v1272_v44, 68970  ;;  %v15154_v44 = vld [vmem:[%s17435_s18 + $0x11f4] ss:$8 sps:$4 sm:$0xff]  }
 0x141   : > { %11023 = vmatprep.subr.bf16.mxu0 %v15070_v39  ;;  %9652 = vmatprep.mubr.bf16.mxu1 %v12847_v48  ;;  %v15100_v37 = vld [vmem:[%s17435_s18 + $0x1164] ss:$8 sps:$4 sm:$0xff]  }
 0x142   : > { %10980 = vmatprep.mubr.bf16.mxu0 %v12879_v56  ;;  %v1107_v39 = vld [vmem:[%s17433_s10 + $0x800] sm:$0xff]  ;;  %v15103_v56 = vld [vmem:[%s17435_s18 + $0x174] ss:$8 sps:$4 sm:$0xff]  }
 0x143   : > { %9696 = vmatpush1.bf16.msra.mxu1 %v15065_v42  ;;  %v1241_v42 = vadd.s32 %v17485_v50, %v1175_v27  ;;  %v1782_v48 = vsel %vm17506_vm4, %v1107_v39, 0  ;;  %v15125_v27 = vld [vmem:[%s17435_s18 + $0x1b0] ss:$8 sps:$4 sm:$0xff]   ;;  %v15148_v39 = vld [vmem:[%s17435_s18 + $0x11e4] ss:$8 sps:$4 sm:$0xff]  }
 0x144   : > { %11024 = vmatpush1.bf16.msra.mxu0 %v15068_v47  ;;  %9697 = vmatprep.subr.bf16.mxu1 %v15073_v52  ;;  %v13006_v47 = vcombine.low %v1734_v29, %v1766_v30  ;;  %v15098_v52 = vld [vmem:[%s17435_s18 + $0x1160] ss:$8 sps:$4 sm:$0xff]   ;;  %v13038_v6 = vcombine.low %v1782_v48, %v1814_v49  ;;  %v15133_v29 = vld [vmem:[%s17435_s18 + $0x1c4] ss:$8 sps:$4 sm:$0xff]  }
 0x145   : > { %11025 = vmatprep.subr.bf16.mxu0 %v15076_v53  ;;  %v1155_v53 = vld [vmem:[%s17433_s10 + $0x980] sm:$0xff]  ;;  %vm1305_vm7 = vcmp.lt.s32.totalorder %v1241_v42, 68970  ;;  %v15151_v42 = vld [vmem:[%s17435_s18 + $0x1f4] ss:$8 sps:$4 sm:$0xff]  }
 0x146   : > { %9653 = vmatmul.mubr.bf16.gmra.mrb[4].mxu1 %v12846_v58  ;;  %v1830_v5 = vsel %vm17519_vm5, %v1155_v53, 0  ;;  %v15101_v58 = vld [vmem:[%s17435_s18 + $0x170] ss:$8 sps:$4 sm:$0xff]   ;;  %vm17634_vm10 = vmpackc.low %vm1305_vm7, %vm1304_vm6  ;;  %v15136_v30 = vld [vmem:[%s17435_s18 + $0x11c4] ss:$8 sps:$4 sm:$0xff]  }
 0x147   : > { %10981 = vmatmul.mubr.bf16.gmra.mrb[4].mxu0 %v12878_v59  ;;  %9698 = vmatpush1.bf16.msra.mxu1 %v15071_v55  ;;  %v1273_v55 = vadd.s32 %v17485_v50, %v1207_v35  ;;  %v13039_v59 = vcombine.high %v1782_v48, %v1814_v49  ;;  %v17647_v9 = vsel %vm17634_vm10, %v884_v0, 0  ;;  %v15137_v35 = vld [vmem:[%s17435_s18 + $0x1d0] ss:$8 sps:$4 sm:$0xff]   ;;  %v916_v48 = vld [vmem:[%s17433_s10 + $0x208] sm:$0xff] }
 0x148   : > { %11026 = vmatpush1.bf16.msra.mxu0 %v15074_v57  ;;  %9699 = vmatprep.subr.bf16.mxu1 %v15079_v60  ;;  %v15106_v57 = vld [vmem:[%s17435_s18 + $0x1174] ss:$8 sps:$4 sm:$0xff]   ;;  %v13071_v60 = vcombine.high %v1798_v54, %v1830_v5  ;;  %v948_v49 = vld [vmem:[%s17433_s10 + $0x308] sm:$0xff] }
 0x149   : > { %11027 = vmatprep.subr.bf16.mxu0 %v15082_v61  ;;  %9662 = vmatprep.mubr.bf16.mxu1 %v12911_v3  ;;  %v15104_v61 = vld [vmem:[%s17435_s18 + $0x1170] ss:$8 sps:$4 sm:$0xff]   ;;  %vm1337_vm9 = vcmp.lt.s32.totalorder %v1273_v55, 68970  ;;  %v868_v3 = vld [vmem:[%s17433_s10 + $0x88] sm:$0xff] }
 0x14a   : > { %10990 = vmatprep.mubr.bf16.mxu0 %v12943_v12  ;;  %vm17652_vm11 = vmpackc.low %vm1337_vm9, %vm1336_vm8  ;;  %v15115_v12 = vld [vmem:[%s17435_s18 + $0x194] ss:$8 sps:$4 sm:$0xff]   ;;  %v15160_v53 = vld [vmem:[%s17435_s18 + $0x1204] ss:$8 sps:$4 sm:$0xff]  }
 0x14b   : > { %9700 = vmatpush1.bf16.msra.mxu1 %v15077_v7  ;;  %v13070_v7 = vcombine.low %v1798_v54, %v1830_v5  ;;  %v15155_v55 = vld [vmem:[%s17435_s18 + $0x200] ss:$8 sps:$4 sm:$0xff]   ;;  %v1623_v5 = vsel %vm17634_vm10, %v948_v49, 0  ;;  %v15188_v49 = vld [vmem:[%s17435_s18 + $0x1250] ss:$8 sps:$4 sm:$0xff]  }
 0x14c   : > { %11028 = vmatpush1.bf16.msra.mxu0 %v15080_v8  ;;  %9701 = vmatprep.subr.bf16.mxu1 %v15085_v10  ;;  %v17643_v8 = vsel %vm17634_vm10, %v852_v13, 0  ;;  %v900_v10 = vld [vmem:[%s17433_s10 + $0x188] sm:$0xff]  ;;  %v15164_v13 = vld [vmem:[%s17435_s18 + $0x1210] ss:$8 sps:$4 sm:$0xff]  }
 0x14d   : > { %11029 = vmatprep.subr.bf16.mxu0 %v15088_v11  ;;  %v12784_v54 = vcombine.low %v17643_v8, %v17647_v9 }
 0x14e   : > { %9663 = vmatmul.mubr.bf16.gmra.mrb[8].mxu1 %v12910_v16  ;;  %v15118_v16 = vld [vmem:[%s17435_s18 + $0x1194] ss:$8 sps:$4 sm:$0xff]  }
 0x14f   : > { %10991 = vmatmul.mubr.bf16.gmra.mrb[8].mxu0 %v12942_v17  ;;  %9702 = vmatpush1.bf16.msra.mxu1 %v15083_v14  ;;  %v17659_v14 = vsel %vm17652_vm11, %v868_v3, 0  ;;  %v12785_v17 = vcombine.high %v17643_v8, %v17647_v9  ;;  %v15169_v3 = vld [vmem:[%s17435_s18 + $0x224] ss:$8 sps:$4 sm:$0xff]  }
 0x150   : > { %11030 = vmatpush1.bf16.msra.mxu0 %v15086_v15  ;;  %9703 = vmatprep.subr.bf16.mxu1 %v15091_v20  ;;  %v17663_v15 = vsel %vm17652_vm11, %v900_v10, 0  ;;  %v15116_v20 = vld [vmem:[%s17435_s18 + $0x1190] ss:$8 sps:$4 sm:$0xff]   ;;  %v1028_v8 = vld [vmem:[%s17433_s10 + $0x588] sm:$0xff] }
 0x151   : > { %11031 = vmatprep.subr.bf16.mxu0 %v15094_v23  ;;  %9672 = vmatprep.mubr.bf16.mxu1 %v12975_v28  ;;  %v12817_v18 = vcombine.high %v17659_v14, %v17663_v15  ;;  %v15119_v23 = vld [vmem:[%s17435_s18 + $0x1a0] ss:$8 sps:$4 sm:$0xff]   ;;  %v15128_v28 = vld [vmem:[%s17435_s18 + $0x11b0] ss:$8 sps:$4 sm:$0xff]   ;;  %v15172_v9 = vld [vmem:[%s17435_s18 + $0x1224] ss:$8 sps:$4 sm:$0xff]  }
 0x152   : > { %11000 = vmatprep.mubr.bf16.mxu0 %v13007_v32  ;;  %v15134_v32 = vld [vmem:[%s17435_s18 + $0x11c0] ss:$8 sps:$4 sm:$0xff]  }
 0x153   : > { %9704 = vmatpush1.bf16.msra.mxu1 %v15089_v33  ;;  %v15139_v33 = vld [vmem:[%s17435_s18 + $0x1d4] ss:$8 sps:$4 sm:$0xff]  }
 0x154   : > { %11032 = vmatpush1.bf16.msra.mxu0 %v15092_v34  ;;  %9705 = vmatprep.subr.bf16.mxu1 %v15097_v36  ;;  %v15142_v34 = vld [vmem:[%s17435_s18 + $0x11d4] ss:$8 sps:$4 sm:$0xff]   ;;  %v15140_v36 = vld [vmem:[%s17435_s18 + $0x11d0] ss:$8 sps:$4 sm:$0xff]  }
 0x155   : > { %11033 = vmatprep.subr.bf16.mxu0 %v15100_v37  ;;  %v15145_v37 = vld [vmem:[%s17435_s18 + $0x1e4] ss:$8 sps:$4 sm:$0xff]  }
 0x156   : > { %9673 = vmatmul.mubr.bf16.gmra.mrb[12].mxu1 %v12974_v46  ;;  %v15152_v46 = vld [vmem:[%s17435_s18 + $0x11f0] ss:$8 sps:$4 sm:$0xff]  }
 0x157   : > { %11001 = vmatmul.mubr.bf16.gmra.mrb[12].mxu0 %v13006_v47  ;;  %9706 = vmatpush1.bf16.msra.mxu1 %v15095_v45  ;;  %v15149_v45 = vld [vmem:[%s17435_s18 + $0x1f0] ss:$8 sps:$4 sm:$0xff]   ;;  %v15157_v47 = vld [vmem:[%s17435_s18 + $0x204] ss:$8 sps:$4 sm:$0xff]  }
 0x158   : > { %11034 = vmatpush1.bf16.msra.mxu0 %v15098_v52  ;;  %9707 = vmatprep.subr.bf16.mxu1 %v15103_v56  ;;  %v964_v52 = vld [vmem:[%s17433_s10 + $0x388] sm:$0xff]  ;;  %v12816_v56 = vcombine.low %v17659_v14, %v17663_v15 }
 0x159   : > { %11035 = vmatprep.subr.bf16.mxu0 %v15106_v57  ;;  %9682 = vmatprep.mubr.bf16.mxu1 %v13039_v59  ;;  %v1591_v57 = vsel %vm17634_vm10, %v916_v48, 0  ;;  %v1639_v59 = vsel %vm17652_vm11, %v964_v52, 0  ;;  %v15185_v48 = vld [vmem:[%s17435_s18 + $0x250] ss:$8 sps:$4 sm:$0xff]  }
 0x15a   : > { %11010 = vmatprep.mubr.bf16.mxu0 %v13071_v60  ;;  %v15158_v60 = vld [vmem:[%s17435_s18 + $0x1200] ss:$8 sps:$4 sm:$0xff]   ;;  %v12849_v0 = vcombine.high %v1591_v57, %v1623_v5  ;;  %v12848_v10 = vcombine.low %v1591_v57, %v1623_v5 }
 0x15b   : > { %9708 = vmatpush1.bf16.msra.mxu1 %v15101_v58  ;;  %v1607_v58 = vsel %vm17652_vm11, %v932_v51, 0  ;;  %v1124_v57 = vld [vmem:[%s17433_s10 + $0x888] sm:$0xff] }
 0x15c   : > { %11036 = vmatpush1.bf16.msra.mxu0 %v15104_v61  ;;  %9709 = vmatprep.subr.bf16.mxu1 %v15109_v62  ;;  %v15163_v61 = vld [vmem:[%s17435_s18 + $0x214] ss:$8 sps:$4 sm:$0xff]   ;;  %v1156_v5 = vld [vmem:[%s17433_s10 + $0x988] sm:$0xff] }
 0x15d   : > { %11037 = vmatprep.subr.bf16.mxu0 %v15112_v63  ;;  %v15166_v62 = vld [vmem:[%s17435_s18 + $0x1214] ss:$8 sps:$4 sm:$0xff]   ;;  %v15161_v63 = vld [vmem:[%s17435_s18 + $0x210] ss:$8 sps:$4 sm:$0xff]  }
 0x15e   : > { %9683 = vmatmul.mubr.bf16.gmra.mrb[16].mxu1 %v13038_v6  ;;  %v1012_v6 = vld [vmem:[%s17433_s10 + $0x508] sm:$0xff] }
 0x15f   : > { %11011 = vmatmul.mubr.bf16.gmra.mrb[16].mxu0 %v13070_v7  ;;  %9710 = vmatpush1.bf16.msra.mxu1 %v15107_v2  ;;  %v12881_v2 = vcombine.high %v1607_v58, %v1639_v59  ;;  %v996_v7 = vld [vmem:[%s17433_s10 + $0x488] sm:$0xff]  ;;  %v1687_v15 = vsel %vm17634_vm10, %v1012_v6, 0 }
 0x160   : > { %11038 = vmatpush1.bf16.msra.mxu0 %v15110_v4  ;;  %9711 = vmatprep.subr.bf16.mxu1 %v15115_v12  ;;  %v980_v4 = vld [vmem:[%s17433_s10 + $0x408] sm:$0xff]  ;;  %v12880_v12 = vcombine.low %v1607_v58, %v1639_v59 }
 0x161   : > { %11039 = vmatprep.subr.bf16.mxu0 %v15118_v16  ;;  %9725 = vmatprep.mubr.bf16.mxu1 %v12785_v17  ;;  %v1655_v14 = vsel %vm17634_vm10, %v980_v4, 0  ;;  %v1671_v16 = vsel %vm17652_vm11, %v996_v7, 0  ;;  %v1703_v17 = vsel %vm17652_vm11, %v1028_v8, 0  ;;  %v15193_v59 = vld [vmem:[%s17435_s18 + $0x264] ss:$8 sps:$4 sm:$0xff]  }
 0x162   : > { %11053 = vmatprep.mubr.bf16.mxu0 %v12817_v18  ;;  %v15167_v18 = vld [vmem:[%s17435_s18 + $0x220] ss:$8 sps:$4 sm:$0xff]   ;;  %v15199_v7 = vld [vmem:[%s17435_s18 + $0x274] ss:$8 sps:$4 sm:$0xff]   ;;  %v15197_v8 = vld [vmem:[%s17435_s18 + $0x270] ss:$8 sps:$4 sm:$0xff]  }
 0x163   : > { %9712 = vmatpush1.bf16.msra.mxu1 %v15113_v19  ;;  %v15170_v19 = vld [vmem:[%s17435_s18 + $0x1220] ss:$8 sps:$4 sm:$0xff]  }
 0x164   : > { %11040 = vmatpush1.bf16.msra.mxu0 %v15116_v20  ;;  %9713 = vmatprep.subr.bf16.mxu1 %v15121_v21  ;;  %v15175_v20 = vld [vmem:[%s17435_s18 + $0x234] ss:$8 sps:$4 sm:$0xff]   ;;  %v15191_v4 = vld [vmem:[%s17435_s18 + $0x260] ss:$8 sps:$4 sm:$0xff]  }
 0x165   : > { %11041 = vmatprep.subr.bf16.mxu0 %v15124_v22  ;;  %v15178_v21 = vld [vmem:[%s17435_s18 + $0x1234] ss:$8 sps:$4 sm:$0xff]   ;;  %v15173_v22 = vld [vmem:[%s17435_s18 + $0x230] ss:$8 sps:$4 sm:$0xff]   ;;  %v15194_v6 = vld [vmem:[%s17435_s18 + $0x1260] ss:$8 sps:$4 sm:$0xff]  }
 0x167   : > { %9714 = vmatpush1.bf16.msra.mxu1 %v15119_v23  ;;  %v15176_v23 = vld [vmem:[%s17435_s18 + $0x1230] ss:$8 sps:$4 sm:$0xff]  }
 0x168   : > { %11042 = vmatpush1.bf16.msra.mxu0 %v15122_v24  ;;  %9715 = vmatprep.subr.bf16.mxu1 %v15127_v25  ;;  %v12913_v24 = vcombine.high %v1655_v14, %v1687_v15  ;;  %v12945_v25 = vcombine.high %v1671_v16, %v1703_v17 }
 0x169   : > { %11043 = vmatprep.subr.bf16.mxu0 %v15130_v26  ;;  %v1044_v26 = vld [vmem:[%s17433_s10 + $0x608] sm:$0xff] }
 0x16b   : > { %9716 = vmatpush1.bf16.msra.mxu1 %v15125_v27  ;;  %v15181_v27 = vld [vmem:[%s17435_s18 + $0x244] ss:$8 sps:$4 sm:$0xff]  }
 0x16c   : > { %11044 = vmatpush1.bf16.msra.mxu0 %v15128_v28  ;;  %9717 = vmatprep.subr.bf16.mxu1 %v15133_v29  ;;  %v1076_v28 = vld [vmem:[%s17433_s10 + $0x708] sm:$0xff] }
 0x16d   : > { %11045 = vmatprep.subr.bf16.mxu0 %v15136_v30  ;;  %v1060_v29 = vld [vmem:[%s17433_s10 + $0x688] sm:$0xff] }
 0x16e   : > { %v1092_v30 = vld [vmem:[%s17433_s10 + $0x788] sm:$0xff] }
 0x16f   : > { %9718 = vmatpush1.bf16.msra.mxu1 %v15131_v31  ;;  %v15184_v31 = vld [vmem:[%s17435_s18 + $0x1244] ss:$8 sps:$4 sm:$0xff]  }
 0x170   : > { %11046 = vmatpush1.bf16.msra.mxu0 %v15134_v32  ;;  %9719 = vmatprep.subr.bf16.mxu1 %v15139_v33  ;;  %v12912_v32 = vcombine.low %v1655_v14, %v1687_v15  ;;  %v12944_v33 = vcombine.low %v1671_v16, %v1703_v17  ;;  %v885_v14 = vld [vmem:[%s17433_s10 + $0x110] sm:$0xff] }
 0x171   : > { %11047 = vmatprep.subr.bf16.mxu0 %v15142_v34  ;;  %v1176_v34 = vadd.s32 512, %v17476_v43  ;;  %v869_v16 = vld [vmem:[%s17433_s10 + $0x90] sm:$0xff] }
 0x172   : > { %v901_v17 = vld [vmem:[%s17433_s10 + $0x190] sm:$0xff] }
 0x173   : > { %9720 = vmatpush1.bf16.msra.mxu1 %v15137_v35  ;;  %v1177_v35 = vadd.s32 640, %v17476_v43  ;;  %v15295_v15 = vld [vmem:[%s17435_s18 + $0x374] ss:$8 sps:$4 sm:$0xff]  }
 0x174   : > { %11048 = vmatpush1.bf16.msra.mxu0 %v15140_v36  ;;  %9721 = vmatprep.subr.bf16.mxu1 %v15145_v37  ;;  %v1719_v36 = vsel %vm17634_vm10, %v1044_v26, 0  ;;  %v1751_v37 = vsel %vm17634_vm10, %v1076_v28, 0  ;;  %v15206_v28 = vld [vmem:[%s17435_s18 + $0x1280] ss:$8 sps:$4 sm:$0xff]  }
 0x175   : > { %11049 = vmatprep.subr.bf16.mxu0 %v15148_v39  ;;  %v1735_v39 = vsel %vm17652_vm11, %v1060_v29, 0  ;;  %v12977_v51 = vcombine.high %v1719_v36, %v1751_v37  ;;  %v15211_v29 = vld [vmem:[%s17435_s18 + $0x294] ss:$8 sps:$4 sm:$0xff]  }
 0x177   : > { %9722 = vmatpush1.bf16.msra.mxu1 %v15143_v40  ;;  %v1767_v40 = vsel %vm17652_vm11, %v1092_v30, 0  ;;  %v15214_v30 = vld [vmem:[%s17435_s18 + $0x1294] ss:$8 sps:$4 sm:$0xff]  }
 0x178   : > { %11050 = vmatpush1.bf16.msra.mxu0 %v15146_v41  ;;  %9723 = vmatprep.subr.bf16.mxu1 %v15151_v42  ;;  %v15179_v41 = vld [vmem:[%s17435_s18 + $0x240] ss:$8 sps:$4 sm:$0xff]   ;;  %v13009_v52 = vcombine.high %v1735_v39, %v1767_v40 }
 0x179   : > { %11051 = vmatprep.subr.bf16.mxu0 %v15154_v44  ;;  %v15182_v42 = vld [vmem:[%s17435_s18 + $0x1240] ss:$8 sps:$4 sm:$0xff]   ;;  %v1208_v44 = vadd.s32 4608, %v17476_v43 }
 0x17b   : > { %9724 = vmatpush1.bf16.msra.mxu1 %v15149_v45  ;;  %v15187_v45 = vld [vmem:[%s17435_s18 + $0x254] ss:$8 sps:$4 sm:$0xff]   ;;  %v1274_v58 = vadd.s32 %v17485_v50, %v1208_v44  ;;  %v15224_v44 = vld [vmem:[%s17435_s18 + $0x12b0] ss:$8 sps:$4 sm:$0xff]  }
 0x17c   : > { %11052 = vmatpush1.bf16.msra.mxu0 %v15152_v46  ;;  %9776 = vmatprep.subr.bf16.mxu1 %v15157_v47  ;;  %v15190_v46 = vld [vmem:[%s17435_s18 + $0x1254] ss:$8 sps:$4 sm:$0xff]   ;;  %v1209_v47 = vadd.s32 4736, %v17476_v43 }
 0x17d   : > { %11104 = vmatprep.subr.bf16.mxu0 %v15160_v53  ;;  %v1108_v53 = vld [vmem:[%s17433_s10 + $0x808] sm:$0xff]  ;;  %vm1338_vm14 = vcmp.lt.s32.totalorder %v1274_v58, 68970  ;;  %v15250_v58 = vld [vmem:[%s17435_s18 + $0x12f4] ss:$8 sps:$4 sm:$0xff]  }
 0x17e   : > { %9726 = vmatmul.mubr.bf16.vlgmr.msra.gmra.mrb[0].mxu1 %v12784_v54  ;;  %v1242_v54 = vadd.s32 %v17485_v50, %v1176_v34  ;;  %v15212_v34 = vld [vmem:[%s17435_s18 + $0x1290] ss:$8 sps:$4 sm:$0xff]  }
 0x17f   : > { %11054 = vmatmul.mubr.bf16.vlgmr.msra.gmra.mrb[0].mxu0 %v12816_v56  ;;  %9777 = vmatpush1.bf16.msra.mxu1 %v15155_v55  ;;  %v1243_v55 = vadd.s32 %v17485_v50, %v1177_v35  ;;  %v1140_v56 = vld [vmem:[%s17433_s10 + $0x908] sm:$0xff] }
 0x180   : > { %11105 = vmatpush1.bf16.msra.mxu0 %v15158_v60  ;;  %9778 = vmatprep.subr.bf16.mxu1 %v15163_v61  ;;  %v15196_v60 = vld [vmem:[%s17435_s18 + $0x1264] ss:$8 sps:$4 sm:$0xff]   ;;  %v1275_v61 = vadd.s32 %v17485_v50, %v1209_v47  ;;  %vm1306_vm12 = vcmp.lt.s32.totalorder %v1242_v54, 68970  ;;  %v15227_v47 = vld [vmem:[%s17435_s18 + $0x2c0] ss:$8 sps:$4 sm:$0xff]  }
 0x181   : > { %11106 = vmatprep.subr.bf16.mxu0 %v15166_v62  ;;  %9735 = vmatprep.mubr.bf16.mxu1 %v12849_v0  ;;  %v12976_v62 = vcombine.low %v1719_v36, %v1751_v37  ;;  %vm1307_vm13 = vcmp.lt.s32.totalorder %v1243_v55, 68970  ;;  %v1815_v0 = vsel %vm17634_vm10, %v1140_v56, 0  ;;  %v15217_v35 = vld [vmem:[%s17435_s18 + $0x2a4] ss:$8 sps:$4 sm:$0xff]   ;;  %v15215_v37 = vld [vmem:[%s17435_s18 + $0x2a0] ss:$8 sps:$4 sm:$0xff]  }
 0x182   : > { %11063 = vmatprep.mubr.bf16.mxu0 %v12881_v2  ;;  %v1799_v2 = vsel %vm17652_vm11, %v1124_v57, 0  ;;  %vm1339_vm15 = vcmp.lt.s32.totalorder %v1275_v61, 68970  ;;  %vm17792_vm0 = vmpackc.low %vm1307_vm13, %vm1306_vm12  ;;  %v15220_v36 = vld [vmem:[%s17435_s18 + $0x12a4] ss:$8 sps:$4 sm:$0xff]   ;;  %v15239_v56 = vld [vmem:[%s17435_s18 + $0x2e0] ss:$8 sps:$4 sm:$0xff]  }
 0x183   : > { %9779 = vmatpush1.bf16.msra.mxu1 %v15161_v63  ;;  %v13008_v63 = vcombine.low %v1735_v39, %v1767_v40  ;;  %vm17799_vm1 = vmpackc.low %vm1339_vm15, %vm1338_vm14  ;;  %v15218_v39 = vld [vmem:[%s17435_s18 + $0x12a0] ss:$8 sps:$4 sm:$0xff]   ;;  %v15223_v40 = vld [vmem:[%s17435_s18 + $0x2b4] ss:$8 sps:$4 sm:$0xff]  }
 0x184   : > { %11107 = vmatpush1.bf16.msra.mxu0 %v15164_v13  ;;  %9780 = vmatprep.subr.bf16.mxu1 %v15169_v3  ;;  %v1783_v13 = vsel %vm17634_vm10, %v1108_v53, 0  ;;  %v1831_v3 = vsel %vm17652_vm11, %v1156_v5, 0  ;;  %v17819_v26 = vsel %vm17799_vm1, %v901_v17, 0  ;;  %v15236_v53 = vld [vmem:[%s17435_s18 + $0x12d0] ss:$8 sps:$4 sm:$0xff]  }
 0x185   : > { %11108 = vmatprep.subr.bf16.mxu0 %v15172_v9  ;;  %v15200_v9 = vld [vmem:[%s17435_s18 + $0x1270] ss:$8 sps:$4 sm:$0xff]   ;;  %v13041_v11 = vcombine.high %v1783_v13, %v1815_v0  ;;  %v15241_v54 = vld [vmem:[%s17435_s18 + $0x2e4] ss:$8 sps:$4 sm:$0xff]   ;;  %v15242_v57 = vld [vmem:[%s17435_s18 + $0x12e0] ss:$8 sps:$4 sm:$0xff]  }
 0x186   : > { %9736 = vmatmul.mubr.bf16.gmra.mrb[4].mxu1 %v12848_v10  ;;  %v13073_v10 = vcombine.high %v1799_v2, %v1831_v3  ;;  %v15244_v55 = vld [vmem:[%s17435_s18 + $0x12e4] ss:$8 sps:$4 sm:$0xff]   ;;  %v15247_v5 = vld [vmem:[%s17435_s18 + $0x2f4] ss:$8 sps:$4 sm:$0xff]  }
 0x187   : > { %11064 = vmatmul.mubr.bf16.gmra.mrb[4].mxu0 %v12880_v12  ;;  %9781 = vmatpush1.bf16.msra.mxu1 %v15167_v18  ;;  %v853_v12 = vld [vmem:[%s17433_s10 + $0x10] sm:$0xff] }
 0x188   : > { %11109 = vmatpush1.bf16.msra.mxu0 %v15170_v19  ;;  %9782 = vmatprep.subr.bf16.mxu1 %v15175_v20  ;;  %v15205_v19 = vld [vmem:[%s17435_s18 + $0x284] ss:$8 sps:$4 sm:$0xff]   ;;  %v917_v61 = vld [vmem:[%s17433_s10 + $0x210] sm:$0xff] }
 0x189   : > { %11110 = vmatprep.subr.bf16.mxu0 %v15178_v21  ;;  %9745 = vmatprep.mubr.bf16.mxu1 %v12913_v24  ;;  %v15208_v20 = vld [vmem:[%s17435_s18 + $0x1284] ss:$8 sps:$4 sm:$0xff]   ;;  %v13040_v21 = vcombine.low %v1783_v13, %v1815_v0  ;;  %v17811_v24 = vsel %vm17792_vm0, %v885_v14, 0  ;;  %v965_v13 = vld [vmem:[%s17433_s10 + $0x390] sm:$0xff] }
 0x18a   : > { %11073 = vmatprep.mubr.bf16.mxu0 %v12945_v25  ;;  %v17815_v25 = vsel %vm17799_vm1, %v869_v16, 0  ;;  %v15253_v0 = vld [vmem:[%s17435_s18 + $0x304] ss:$8 sps:$4 sm:$0xff]   ;;  %v15257_v14 = vld [vmem:[%s17435_s18 + $0x310] ss:$8 sps:$4 sm:$0xff]  }
 0x18b   : > { %9783 = vmatpush1.bf16.msra.mxu1 %v15173_v22  ;;  %v13072_v22 = vcombine.low %v1799_v2, %v1831_v3  ;;  %v15256_v2 = vld [vmem:[%s17435_s18 + $0x1304] ss:$8 sps:$4 sm:$0xff]   ;;  %v15260_v16 = vld [vmem:[%s17435_s18 + $0x1310] ss:$8 sps:$4 sm:$0xff]  }
 0x18c   : > { %11111 = vmatpush1.bf16.msra.mxu0 %v15176_v23  ;;  %9784 = vmatprep.subr.bf16.mxu1 %v15181_v27  ;;  %v17807_v23 = vsel %vm17792_vm0, %v853_v12, 0  ;;  %v15203_v27 = vld [vmem:[%s17435_s18 + $0x280] ss:$8 sps:$4 sm:$0xff]   ;;  %v15262_v12 = vld [vmem:[%s17435_s18 + $0x1314] ss:$8 sps:$4 sm:$0xff]  }
 0x18d   : > { %11112 = vmatprep.subr.bf16.mxu0 %v15184_v31  ;;  %v12787_v31 = vcombine.high %v17807_v23, %v17811_v24  ;;  %v12786_v3 = vcombine.low %v17807_v23, %v17811_v24  ;;  %v997_v23 = vld [vmem:[%s17433_s10 + $0x490] sm:$0xff] }
 0x18e   : > { %9746 = vmatmul.mubr.bf16.gmra.mrb[8].mxu1 %v12912_v32  ;;  %v12819_v32 = vcombine.high %v17815_v25, %v17819_v26  ;;  %v1029_v24 = vld [vmem:[%s17433_s10 + $0x590] sm:$0xff] }
 0x18f   : > { %11074 = vmatmul.mubr.bf16.gmra.mrb[8].mxu0 %v12944_v33  ;;  %9785 = vmatpush1.bf16.msra.mxu1 %v15179_v41  ;;  %v15209_v33 = vld [vmem:[%s17435_s18 + $0x290] ss:$8 sps:$4 sm:$0xff]   ;;  %v15226_v41 = vld [vmem:[%s17435_s18 + $0x12b4] ss:$8 sps:$4 sm:$0xff]  }
 0x190   : > { %11113 = vmatpush1.bf16.msra.mxu0 %v15182_v42  ;;  %9786 = vmatprep.subr.bf16.mxu1 %v15187_v45  ;;  %v15221_v42 = vld [vmem:[%s17435_s18 + $0x2b0] ss:$8 sps:$4 sm:$0xff]   ;;  %v15229_v45 = vld [vmem:[%s17435_s18 + $0x2c4] ss:$8 sps:$4 sm:$0xff]  }
 0x191   : > { %11114 = vmatprep.subr.bf16.mxu0 %v15190_v46  ;;  %9755 = vmatprep.mubr.bf16.mxu1 %v12977_v51  ;;  %v15232_v46 = vld [vmem:[%s17435_s18 + $0x12c4] ss:$8 sps:$4 sm:$0xff]   ;;  %v15238_v51 = vld [vmem:[%s17435_s18 + $0x12d4] ss:$8 sps:$4 sm:$0xff]  }
 0x192   : > { %11083 = vmatprep.mubr.bf16.mxu0 %v13009_v52  ;;  %v15233_v52 = vld [vmem:[%s17435_s18 + $0x2d0] ss:$8 sps:$4 sm:$0xff]  }
 0x193   : > { %9787 = vmatpush1.bf16.msra.mxu1 %v15185_v48  ;;  %v15230_v48 = vld [vmem:[%s17435_s18 + $0x12c0] ss:$8 sps:$4 sm:$0xff]  }
 0x194   : > { %11115 = vmatpush1.bf16.msra.mxu0 %v15188_v49  ;;  %9788 = vmatprep.subr.bf16.mxu1 %v15193_v59  ;;  %v15235_v49 = vld [vmem:[%s17435_s18 + $0x2d4] ss:$8 sps:$4 sm:$0xff]   ;;  %v15245_v59 = vld [vmem:[%s17435_s18 + $0x2f0] ss:$8 sps:$4 sm:$0xff]  }
 0x195   : > { %11116 = vmatprep.subr.bf16.mxu0 %v15196_v60  ;;  %v15248_v60 = vld [vmem:[%s17435_s18 + $0x12f0] ss:$8 sps:$4 sm:$0xff]  }
 0x196   : > { %9756 = vmatmul.mubr.bf16.gmra.mrb[12].mxu1 %v12976_v62  ;;  %v949_v62 = vld [vmem:[%s17433_s10 + $0x310] sm:$0xff] }
 0x197   : > { %11084 = vmatmul.mubr.bf16.gmra.mrb[12].mxu0 %v13008_v63  ;;  %9789 = vmatpush1.bf16.msra.mxu1 %v15191_v4  ;;  %v933_v63 = vld [vmem:[%s17433_s10 + $0x290] sm:$0xff]  ;;  %v12818_v4 = vcombine.low %v17815_v25, %v17819_v26  ;;  %v15268_v25 = vld [vmem:[%s17435_s18 + $0x1324] ss:$8 sps:$4 sm:$0xff]   ;;  %v15263_v26 = vld [vmem:[%s17435_s18 + $0x320] ss:$8 sps:$4 sm:$0xff]  }
 0x198   : > { %11117 = vmatpush1.bf16.msra.mxu0 %v15194_v6  ;;  %9790 = vmatprep.subr.bf16.mxu1 %v15199_v7  ;;  %v1592_v6 = vsel %vm17792_vm0, %v917_v61, 0  ;;  %v1624_v7 = vsel %vm17792_vm0, %v949_v62, 0  ;;  %v1211_v61 = vadd.s32 4992, %v17476_v43  ;;  %v15281_v62 = vld [vmem:[%s17435_s18 + $0x350] ss:$8 sps:$4 sm:$0xff]  }
 0x199   : > { %11118 = vmatprep.subr.bf16.mxu0 %v15202_v1  ;;  %9765 = vmatprep.mubr.bf16.mxu1 %v13041_v11  ;;  %v1608_v1 = vsel %vm17799_vm1, %v933_v63, 0  ;;  %v15254_v11 = vld [vmem:[%s17435_s18 + $0x1300] ss:$8 sps:$4 sm:$0xff]   ;;  %v12851_v17 = vcombine.high %v1592_v6, %v1624_v7  ;;  %v15284_v63 = vld [vmem:[%s17435_s18 + $0x1350] ss:$8 sps:$4 sm:$0xff]  }
 0x19a   : > { %11093 = vmatprep.mubr.bf16.mxu0 %v13073_v10  ;;  %v15259_v10 = vld [vmem:[%s17435_s18 + $0x314] ss:$8 sps:$4 sm:$0xff]  }
 0x19b   : > { %9791 = vmatpush1.bf16.msra.mxu1 %v15197_v8  ;;  %v1640_v8 = vsel %vm17799_vm1, %v965_v13, 0 }
 0x19c   : > { %11119 = vmatpush1.bf16.msra.mxu0 %v15200_v9  ;;  %9792 = vmatprep.subr.bf16.mxu1 %v15205_v19  ;;  %v15251_v9 = vld [vmem:[%s17435_s18 + $0x300] ss:$8 sps:$4 sm:$0xff]   ;;  %v12883_v19 = vcombine.high %v1608_v1, %v1640_v8 }
 0x19d   : > { %11120 = vmatprep.subr.bf16.mxu0 %v15208_v20  ;;  %v15265_v20 = vld [vmem:[%s17435_s18 + $0x324] ss:$8 sps:$4 sm:$0xff]  }
 0x19e   : > { %9766 = vmatmul.mubr.bf16.gmra.mrb[16].mxu1 %v13040_v21  ;;  %v981_v21 = vld [vmem:[%s17433_s10 + $0x410] sm:$0xff] }
 0x19f   : > { %11094 = vmatmul.mubr.bf16.gmra.mrb[16].mxu0 %v13072_v22  ;;  %9793 = vmatpush1.bf16.msra.mxu1 %v15203_v27  ;;  %v1013_v22 = vld [vmem:[%s17433_s10 + $0x510] sm:$0xff]  ;;  %v15266_v27 = vld [vmem:[%s17435_s18 + $0x1320] ss:$8 sps:$4 sm:$0xff]  }
 0x1a0   : > { %11121 = vmatpush1.bf16.msra.mxu0 %v15206_v28  ;;  %9794 = vmatprep.subr.bf16.mxu1 %v15211_v29  ;;  %v12850_v28 = vcombine.low %v1592_v6, %v1624_v7  ;;  %v12882_v29 = vcombine.low %v1608_v1, %v1640_v8  ;;  %v15289_v6 = vld [vmem:[%s17435_s18 + $0x364] ss:$8 sps:$4 sm:$0xff]   ;;  %v1141_v7 = vld [vmem:[%s17433_s10 + $0x910] sm:$0xff] }
 0x1a1   : > { %11122 = vmatprep.subr.bf16.mxu0 %v15214_v30  ;;  %9808 = vmatprep.mubr.bf16.mxu1 %v12787_v31  ;;  %v1656_v30 = vsel %vm17792_vm0, %v981_v21, 0  ;;  %v1688_v31 = vsel %vm17792_vm0, %v1013_v22, 0  ;;  %v1125_v1 = vld [vmem:[%s17433_s10 + $0x890] sm:$0xff]  ;;  %v15287_v21 = vld [vmem:[%s17435_s18 + $0x360] ss:$8 sps:$4 sm:$0xff]  }
 0x1a2   : > { %11136 = vmatprep.mubr.bf16.mxu0 %v12819_v32  ;;  %v1672_v32 = vsel %vm17799_vm1, %v997_v23, 0  ;;  %v1157_v8 = vld [vmem:[%s17433_s10 + $0x990] sm:$0xff]  ;;  %v15290_v22 = vld [vmem:[%s17435_s18 + $0x1360] ss:$8 sps:$4 sm:$0xff]  }
 0x1a3   : > { %9795 = vmatpush1.bf16.msra.mxu1 %v15209_v33  ;;  %v1704_v33 = vsel %vm17799_vm1, %v1029_v24, 0  ;;  %v15298_v23 = vld [vmem:[%s17435_s18 + $0x1374] ss:$8 sps:$4 sm:$0xff]   ;;  %v15293_v24 = vld [vmem:[%s17435_s18 + $0x370] ss:$8 sps:$4 sm:$0xff]  }
 0x1a4   : > { %11123 = vmatpush1.bf16.msra.mxu0 %v15212_v34  ;;  %9796 = vmatprep.subr.bf16.mxu1 %v15217_v35  ;;  %v15271_v34 = vld [vmem:[%s17435_s18 + $0x334] ss:$8 sps:$4 sm:$0xff]  }
 0x1a5   : > { %11124 = vmatprep.subr.bf16.mxu0 %v15220_v36  ;;  %v15274_v35 = vld [vmem:[%s17435_s18 + $0x1334] ss:$8 sps:$4 sm:$0xff]   ;;  %v15269_v36 = vld [vmem:[%s17435_s18 + $0x330] ss:$8 sps:$4 sm:$0xff]  }
 0x1a7   : > { %9797 = vmatpush1.bf16.msra.mxu1 %v15215_v37  ;;  %v15272_v37 = vld [vmem:[%s17435_s18 + $0x1330] ss:$8 sps:$4 sm:$0xff]  }
 0x1a8   : > { %11125 = vmatpush1.bf16.msra.mxu0 %v15218_v39  ;;  %9798 = vmatprep.subr.bf16.mxu1 %v15223_v40  ;;  %v12915_v39 = vcombine.high %v1656_v30, %v1688_v31  ;;  %v12947_v40 = vcombine.high %v1672_v32, %v1704_v33 }
 0x1a9   : > { %11126 = vmatprep.subr.bf16.mxu0 %v15226_v41  ;;  %v1045_v41 = vld [vmem:[%s17433_s10 + $0x610] sm:$0xff] }
 0x1ab   : > { %9799 = vmatpush1.bf16.msra.mxu1 %v15221_v42  ;;  %v15277_v42 = vld [vmem:[%s17435_s18 + $0x344] ss:$8 sps:$4 sm:$0xff]  }
 0x1ac   : > { %11127 = vmatpush1.bf16.msra.mxu0 %v15224_v44  ;;  %9800 = vmatprep.subr.bf16.mxu1 %v15229_v45  ;;  %v1077_v44 = vld [vmem:[%s17433_s10 + $0x710] sm:$0xff] }
 0x1ad   : > { %11128 = vmatprep.subr.bf16.mxu0 %v15232_v46  ;;  %v1061_v45 = vld [vmem:[%s17433_s10 + $0x690] sm:$0xff] }
 0x1ae   : > { %v1093_v46 = vld [vmem:[%s17433_s10 + $0x790] sm:$0xff] }
 0x1af   : > { %9801 = vmatpush1.bf16.msra.mxu1 %v15227_v47  ;;  %v15280_v47 = vld [vmem:[%s17435_s18 + $0x1344] ss:$8 sps:$4 sm:$0xff]  }
 0x1b0   : > { %11129 = vmatpush1.bf16.msra.mxu0 %v15230_v48  ;;  %9802 = vmatprep.subr.bf16.mxu1 %v15235_v49  ;;  %v1178_v48 = vadd.s32 768, %v17476_v43  ;;  %v15275_v49 = vld [vmem:[%s17435_s18 + $0x340] ss:$8 sps:$4 sm:$0xff]  }
 0x1b1   : > { %11130 = vmatprep.subr.bf16.mxu0 %v15238_v51  ;;  %v15278_v51 = vld [vmem:[%s17435_s18 + $0x1340] ss:$8 sps:$4 sm:$0xff]  }
 0x1b3   : > { %9803 = vmatpush1.bf16.msra.mxu1 %v15233_v52  ;;  %v12914_v52 = vcombine.low %v1656_v30, %v1688_v31  ;;  %v15301_v30 = vld [vmem:[%s17435_s18 + $0x384] ss:$8 sps:$4 sm:$0xff]   ;;  %v870_v31 = vld [vmem:[%s17433_s10 + $0x98] sm:$0xff] }
 0x1b4   : > { %11131 = vmatpush1.bf16.msra.mxu0 %v15236_v53  ;;  %9804 = vmatprep.subr.bf16.mxu1 %v15241_v54  ;;  %v12946_v53 = vcombine.low %v1672_v32, %v1704_v33  ;;  %v1179_v54 = vadd.s32 896, %v17476_v43  ;;  %v902_v32 = vld [vmem:[%s17433_s10 + $0x198] sm:$0xff]  ;;  %v855_v33 = vld [vmem:[%s17433_s10 + $0x20] sm:$0xff] }
 0x1b5   : > { %11132 = vmatprep.subr.bf16.mxu0 %v15244_v55  ;;  %v1720_v55 = vsel %vm17792_vm0, %v1045_v41, 0 }
 0x1b7   : > { %9805 = vmatpush1.bf16.msra.mxu1 %v15239_v56  ;;  %v1752_v56 = vsel %vm17792_vm0, %v1077_v44, 0  ;;  %v15302_v44 = vld [vmem:[%s17435_s18 + $0x1380] ss:$8 sps:$4 sm:$0xff]  }
 0x1b8   : > { %11133 = vmatpush1.bf16.msra.mxu0 %v15242_v57  ;;  %9806 = vmatprep.subr.bf16.mxu1 %v15247_v5  ;;  %v1736_v57 = vsel %vm17799_vm1, %v1061_v45, 0  ;;  %v1768_v5 = vsel %vm17799_vm1, %v1093_v46, 0  ;;  %v12979_v13 = vcombine.high %v1720_v55, %v1752_v56  ;;  %v15307_v45 = vld [vmem:[%s17435_s18 + $0x394] ss:$8 sps:$4 sm:$0xff]  }
 0x1b9   : > { %11134 = vmatprep.subr.bf16.mxu0 %v15250_v58  ;;  %v15283_v58 = vld [vmem:[%s17435_s18 + $0x354] ss:$8 sps:$4 sm:$0xff]  }
 0x1ba   : > { %v15310_v46 = vld [vmem:[%s17435_s18 + $0x1394] ss:$8 sps:$4 sm:$0xff]  }
 0x1bb   : > { %9807 = vmatpush1.bf16.msra.mxu1 %v15245_v59  ;;  %v1210_v59 = vadd.s32 4864, %v17476_v43 }
 0x1bc   : > { %11135 = vmatpush1.bf16.msra.mxu0 %v15248_v60  ;;  %9859 = vmatprep.subr.bf16.mxu1 %v15253_v0  ;;  %v15286_v60 = vld [vmem:[%s17435_s18 + $0x1354] ss:$8 sps:$4 sm:$0xff]   ;;  %v13011_v0 = vcombine.high %v1736_v57, %v1768_v5 }
 0x1bd   : > { %11187 = vmatprep.subr.bf16.mxu0 %v15256_v2  ;;  %v1109_v2 = vld [vmem:[%s17433_s10 + $0x810] sm:$0xff] }
 0x1be   : > { %9809 = vmatmul.mubr.bf16.vlgmr.msra.gmra.mrb[0].mxu1 %v12786_v3  ;;  %v1244_v3 = vadd.s32 %v17485_v50, %v1178_v48 }
 0x1bf   : > { %11137 = vmatmul.mubr.bf16.vlgmr.msra.gmra.mrb[0].mxu0 %v12818_v4  ;;  %9860 = vmatpush1.bf16.msra.mxu1 %v15251_v9  ;;  %v1245_v4 = vadd.s32 %v17485_v50, %v1179_v54  ;;  %v1276_v9 = vadd.s32 %v17485_v50, %v1210_v59  ;;  %v15311_v54 = vld [vmem:[%s17435_s18 + $0x3a0] ss:$8 sps:$4 sm:$0xff]   ;;  %v15325_v59 = vld [vmem:[%s17435_s18 + $0x3c4] ss:$8 sps:$4 sm:$0xff]  }
 0x1c0   : > { %11188 = vmatpush1.bf16.msra.mxu0 %v15254_v11  ;;  %9861 = vmatprep.subr.bf16.mxu1 %v15259_v10  ;;  %v15292_v11 = vld [vmem:[%s17435_s18 + $0x1364] ss:$8 sps:$4 sm:$0xff]   ;;  %v1277_v10 = vadd.s32 %v17485_v50, %v1211_v61  ;;  %vm1308_vm2 = vcmp.lt.s32.totalorder %v1244_v3, 68970  ;;  %v15323_v61 = vld [vmem:[%s17435_s18 + $0x3c0] ss:$8 sps:$4 sm:$0xff]  }
 0x1c1   : > { %11189 = vmatprep.subr.bf16.mxu0 %v15262_v12  ;;  %9818 = vmatprep.mubr.bf16.mxu1 %v12851_v17  ;;  %v12978_v12 = vcombine.low %v1720_v55, %v1752_v56  ;;  %vm1309_vm3 = vcmp.lt.s32.totalorder %v1245_v4, 68970  ;;  %v1816_v17 = vsel %vm17792_vm0, %v1141_v7, 0  ;;  %vm1340_vm4 = vcmp.lt.s32.totalorder %v1276_v9, 68970  ;;  %v15314_v55 = vld [vmem:[%s17435_s18 + $0x13a0] ss:$8 sps:$4 sm:$0xff]  }
 0x1c2   : > { %11146 = vmatprep.mubr.bf16.mxu0 %v12883_v19  ;;  %v1800_v19 = vsel %vm17799_vm1, %v1125_v1, 0  ;;  %vm1341_vm5 = vcmp.lt.s32.totalorder %v1277_v10, 68970  ;;  %vm17951_vm6 = vmpackc.low %vm1309_vm3, %vm1308_vm2  ;;  %v15319_v56 = vld [vmem:[%s17435_s18 + $0x3b4] ss:$8 sps:$4 sm:$0xff]   ;;  %v15337_v3 = vld [vmem:[%s17435_s18 + $0x3e4] ss:$8 sps:$4 sm:$0xff]  }
 0x1c3   : > { %9862 = vmatpush1.bf16.msra.mxu1 %v15257_v14  ;;  %v13010_v14 = vcombine.low %v1736_v57, %v1768_v5  ;;  %vm17960_vm7 = vmpackc.low %vm1341_vm5, %vm1340_vm4  ;;  %v15322_v57 = vld [vmem:[%s17435_s18 + $0x13b4] ss:$8 sps:$4 sm:$0xff]   ;;  %v15317_v5 = vld [vmem:[%s17435_s18 + $0x3b0] ss:$8 sps:$4 sm:$0xff]  }
 0x1c4   : > { %11190 = vmatpush1.bf16.msra.mxu0 %v15260_v16  ;;  %9863 = vmatprep.subr.bf16.mxu1 %v15265_v20  ;;  %v1784_v16 = vsel %vm17792_vm0, %v1109_v2, 0  ;;  %v1832_v20 = vsel %vm17799_vm1, %v1157_v8, 0  ;;  %v17979_v41 = vsel %vm17960_vm7, %v902_v32, 0  ;;  %v15332_v2 = vld [vmem:[%s17435_s18 + $0x13d0] ss:$8 sps:$4 sm:$0xff]  }
 0x1c5   : > { %11191 = vmatprep.subr.bf16.mxu0 %v15268_v25  ;;  %v15296_v25 = vld [vmem:[%s17435_s18 + $0x1370] ss:$8 sps:$4 sm:$0xff]   ;;  %v13043_v18 = vcombine.high %v1784_v16, %v1816_v17  ;;  %v15340_v4 = vld [vmem:[%s17435_s18 + $0x13e4] ss:$8 sps:$4 sm:$0xff]   ;;  %v15338_v7 = vld [vmem:[%s17435_s18 + $0x13e0] ss:$8 sps:$4 sm:$0xff]  }
 0x1c6   : > { %9819 = vmatmul.mubr.bf16.gmra.mrb[4].mxu1 %v12850_v28  ;;  %v886_v28 = vld [vmem:[%s17433_s10 + $0x118] sm:$0xff] }
 0x1c7   : > { %11147 = vmatmul.mubr.bf16.gmra.mrb[4].mxu0 %v12882_v29  ;;  %9864 = vmatpush1.bf16.msra.mxu1 %v15263_v26  ;;  %v13075_v26 = vcombine.high %v1800_v19, %v1832_v20  ;;  %v15343_v1 = vld [vmem:[%s17435_s18 + $0x3f4] ss:$8 sps:$4 sm:$0xff]   ;;  %v15341_v9 = vld [vmem:[%s17435_s18 + $0x3f0] ss:$8 sps:$4 sm:$0xff]  }
 0x1c8   : > { %11192 = vmatpush1.bf16.msra.mxu0 %v15266_v27  ;;  %9865 = vmatprep.subr.bf16.mxu1 %v15271_v34  ;;  %v854_v27 = vld [vmem:[%s17433_s10 + $0x18] sm:$0xff]  ;;  %v15304_v34 = vld [vmem:[%s17435_s18 + $0x1384] ss:$8 sps:$4 sm:$0xff]  }
 0x1c9   : > { %11193 = vmatprep.subr.bf16.mxu0 %v15274_v35  ;;  %9828 = vmatprep.mubr.bf16.mxu1 %v12915_v39  ;;  %v13042_v35 = vcombine.low %v1784_v16, %v1816_v17  ;;  %v17971_v39 = vsel %vm17951_vm6, %v886_v28, 0  ;;  %v15346_v8 = vld [vmem:[%s17435_s18 + $0x13f4] ss:$8 sps:$4 sm:$0xff]   ;;  %v15349_v17 = vld [vmem:[%s17435_s18 + $0x404] ss:$8 sps:$4 sm:$0xff]  }
 0x1ca   : > { %11156 = vmatprep.mubr.bf16.mxu0 %v12947_v40  ;;  %v17975_v40 = vsel %vm17960_vm7, %v870_v31, 0  ;;  %v918_v10 = vld [vmem:[%s17433_s10 + $0x218] sm:$0xff] }
 0x1cb   : > { %9866 = vmatpush1.bf16.msra.mxu1 %v15269_v36  ;;  %v13074_v36 = vcombine.low %v1800_v19, %v1832_v20  ;;  %v12821_v48 = vcombine.high %v17975_v40, %v17979_v41  ;;  %v966_v16 = vld [vmem:[%s17433_s10 + $0x398] sm:$0xff]  ;;  %v15352_v19 = vld [vmem:[%s17435_s18 + $0x1404] ss:$8 sps:$4 sm:$0xff]  }
 0x1cc   : > { %11194 = vmatpush1.bf16.msra.mxu0 %v15272_v37  ;;  %9867 = vmatprep.subr.bf16.mxu1 %v15277_v42  ;;  %v17967_v37 = vsel %vm17951_vm6, %v854_v27, 0  ;;  %v15299_v42 = vld [vmem:[%s17435_s18 + $0x380] ss:$8 sps:$4 sm:$0xff]   ;;  %v15358_v27 = vld [vmem:[%s17435_s18 + $0x1414] ss:$8 sps:$4 sm:$0xff]  }
 0x1cd   : > { %11195 = vmatprep.subr.bf16.mxu0 %v15280_v47  ;;  %v12789_v47 = vcombine.high %v17967_v37, %v17971_v39  ;;  %v12788_v20 = vcombine.low %v17967_v37, %v17971_v39  ;;  %v15353_v28 = vld [vmem:[%s17435_s18 + $0x410] ss:$8 sps:$4 sm:$0xff]   ;;  %v15361_v39 = vld [vmem:[%s17435_s18 + $0x424] ss:$8 sps:$4 sm:$0xff]  }
 0x1ce   : > { %9829 = vmatmul.mubr.bf16.gmra.mrb[8].mxu1 %v12914_v52  ;;  %v15313_v52 = vld [vmem:[%s17435_s18 + $0x3a4] ss:$8 sps:$4 sm:$0xff]   ;;  %v1030_v37 = vld [vmem:[%s17433_s10 + $0x598] sm:$0xff] }
 0x1cf   : > { %11157 = vmatmul.mubr.bf16.gmra.mrb[8].mxu0 %v12946_v53  ;;  %9868 = vmatpush1.bf16.msra.mxu1 %v15275_v49  ;;  %v15305_v49 = vld [vmem:[%s17435_s18 + $0x390] ss:$8 sps:$4 sm:$0xff]   ;;  %v15316_v53 = vld [vmem:[%s17435_s18 + $0x13a4] ss:$8 sps:$4 sm:$0xff]  }
 0x1d0   : > { %11196 = vmatpush1.bf16.msra.mxu0 %v15278_v51  ;;  %9869 = vmatprep.subr.bf16.mxu1 %v15283_v58  ;;  %v15308_v51 = vld [vmem:[%s17435_s18 + $0x1390] ss:$8 sps:$4 sm:$0xff]  }
 0x1d1   : > { %11197 = vmatprep.subr.bf16.mxu0 %v15286_v60  ;;  %9838 = vmatprep.mubr.bf16.mxu1 %v12979_v13  ;;  %v15320_v58 = vld [vmem:[%s17435_s18 + $0x13b0] ss:$8 sps:$4 sm:$0xff]   ;;  %v15328_v60 = vld [vmem:[%s17435_s18 + $0x13c4] ss:$8 sps:$4 sm:$0xff]   ;;  %v15334_v13 = vld [vmem:[%s17435_s18 + $0x13d4] ss:$8 sps:$4 sm:$0xff]  }
 0x1d2   : > { %11166 = vmatprep.mubr.bf16.mxu0 %v13011_v0  ;;  %v15329_v0 = vld [vmem:[%s17435_s18 + $0x3d0] ss:$8 sps:$4 sm:$0xff]  }
 0x1d3   : > { %9870 = vmatpush1.bf16.msra.mxu1 %v15281_v62  ;;  %v15326_v62 = vld [vmem:[%s17435_s18 + $0x13c0] ss:$8 sps:$4 sm:$0xff]   ;;  %v15389_v29 = vld [vmem:[%s17435_s18 + $0x470] ss:$8 sps:$4 sm:$0xff]  }
 0x1d4   : > { %11198 = vmatpush1.bf16.msra.mxu0 %v15284_v63  ;;  %9871 = vmatprep.subr.bf16.mxu1 %v15289_v6  ;;  %v15331_v63 = vld [vmem:[%s17435_s18 + $0x3d4] ss:$8 sps:$4 sm:$0xff]   ;;  %v15335_v6 = vld [vmem:[%s17435_s18 + $0x3e0] ss:$8 sps:$4 sm:$0xff]  }
 0x1d5   : > { %11199 = vmatprep.subr.bf16.mxu0 %v15292_v11  ;;  %v15344_v11 = vld [vmem:[%s17435_s18 + $0x13f0] ss:$8 sps:$4 sm:$0xff]  }
 0x1d6   : > { %9839 = vmatmul.mubr.bf16.gmra.mrb[12].mxu1 %v12978_v12  ;;  %v950_v12 = vld [vmem:[%s17433_s10 + $0x318] sm:$0xff] }
 0x1d7   : > { %11167 = vmatmul.mubr.bf16.gmra.mrb[12].mxu0 %v13010_v14  ;;  %9872 = vmatpush1.bf16.msra.mxu1 %v15287_v21  ;;  %v934_v14 = vld [vmem:[%s17433_s10 + $0x298] sm:$0xff]  ;;  %v12820_v21 = vcombine.low %v17975_v40, %v17979_v41  ;;  %v15364_v40 = vld [vmem:[%s17435_s18 + $0x1424] ss:$8 sps:$4 sm:$0xff]  }
 0x1d8   : > { %11200 = vmatpush1.bf16.msra.mxu0 %v15290_v22  ;;  %9873 = vmatprep.subr.bf16.mxu1 %v15295_v15  ;;  %v1593_v22 = vsel %vm17951_vm6, %v918_v10, 0  ;;  %v1625_v15 = vsel %vm17951_vm6, %v950_v12, 0  ;;  %v1213_v10 = vadd.s32 5248, %v17476_v43  ;;  %v15377_v12 = vld [vmem:[%s17435_s18 + $0x450] ss:$8 sps:$4 sm:$0xff]  }
 0x1d9   : > { %11201 = vmatprep.subr.bf16.mxu0 %v15298_v23  ;;  %9848 = vmatprep.mubr.bf16.mxu1 %v13043_v18  ;;  %v1609_v23 = vsel %vm17960_vm7, %v934_v14, 0  ;;  %v15350_v18 = vld [vmem:[%s17435_s18 + $0x1400] ss:$8 sps:$4 sm:$0xff]   ;;  %v12853_v31 = vcombine.high %v1593_v22, %v1625_v15  ;;  %v12852_v41 = vcombine.low %v1593_v22, %v1625_v15  ;;  %v15380_v14 = vld [vmem:[%s17435_s18 + $0x1450] ss:$8 sps:$4 sm:$0xff]  }
 0x1da   : > { %11176 = vmatprep.mubr.bf16.mxu0 %v13075_v26  ;;  %v15355_v26 = vld [vmem:[%s17435_s18 + $0x414] ss:$8 sps:$4 sm:$0xff]  }
 0x1db   : > { %9874 = vmatpush1.bf16.msra.mxu1 %v15293_v24  ;;  %v1641_v24 = vsel %vm17960_vm7, %v966_v16, 0  ;;  %v1142_v22 = vld [vmem:[%s17433_s10 + $0x918] sm:$0xff] }
 0x1dc   : > { %11202 = vmatpush1.bf16.msra.mxu0 %v15296_v25  ;;  %9875 = vmatprep.subr.bf16.mxu1 %v15301_v30  ;;  %v15347_v25 = vld [vmem:[%s17435_s18 + $0x400] ss:$8 sps:$4 sm:$0xff]   ;;  %v15356_v30 = vld [vmem:[%s17435_s18 + $0x1410] ss:$8 sps:$4 sm:$0xff]   ;;  %v12885_v32 = vcombine.high %v1609_v23, %v1641_v24 }
 0x1dd   : > { %11203 = vmatprep.subr.bf16.mxu0 %v15304_v34  ;;  %v982_v34 = vld [vmem:[%s17433_s10 + $0x418] sm:$0xff] }
 0x1de   : > { %9849 = vmatmul.mubr.bf16.gmra.mrb[16].mxu1 %v13042_v35  ;;  %v1014_v35 = vld [vmem:[%s17433_s10 + $0x518] sm:$0xff] }
 0x1df   : > { %11177 = vmatmul.mubr.bf16.gmra.mrb[16].mxu0 %v13074_v36  ;;  %9876 = vmatpush1.bf16.msra.mxu1 %v15299_v42  ;;  %v998_v36 = vld [vmem:[%s17433_s10 + $0x498] sm:$0xff]  ;;  %v12884_v42 = vcombine.low %v1609_v23, %v1641_v24  ;;  %v15385_v24 = vld [vmem:[%s17435_s18 + $0x464] ss:$8 sps:$4 sm:$0xff]  }
 0x1e0   : > { %11204 = vmatpush1.bf16.msra.mxu0 %v15302_v44  ;;  %9877 = vmatprep.subr.bf16.mxu1 %v15307_v45  ;;  %v1657_v44 = vsel %vm17951_vm6, %v982_v34, 0  ;;  %v1689_v45 = vsel %vm17951_vm6, %v1014_v35, 0  ;;  %v1126_v15 = vld [vmem:[%s17433_s10 + $0x898] sm:$0xff] }
 0x1e1   : > { %11205 = vmatprep.subr.bf16.mxu0 %v15310_v46  ;;  %9891 = vmatprep.mubr.bf16.mxu1 %v12789_v47  ;;  %v1673_v46 = vsel %vm17960_vm7, %v998_v36, 0  ;;  %v1705_v47 = vsel %vm17960_vm7, %v1030_v37, 0  ;;  %v1158_v23 = vld [vmem:[%s17433_s10 + $0x998] sm:$0xff]  ;;  %v1801_v34 = vsel %vm17960_vm7, %v1126_v15, 0  ;;  %v15386_v36 = vld [vmem:[%s17435_s18 + $0x1460] ss:$8 sps:$4 sm:$0xff]  }
 0x1e2   : > { %11219 = vmatprep.mubr.bf16.mxu0 %v12821_v48  ;;  %v15359_v48 = vld [vmem:[%s17435_s18 + $0x420] ss:$8 sps:$4 sm:$0xff]   ;;  %v1833_v35 = vsel %vm17960_vm7, %v1158_v23, 0  ;;  %v15391_v37 = vld [vmem:[%s17435_s18 + $0x474] ss:$8 sps:$4 sm:$0xff]  }
 0x1e3   : > { %9878 = vmatpush1.bf16.msra.mxu1 %v15305_v49  ;;  %v15362_v49 = vld [vmem:[%s17435_s18 + $0x1420] ss:$8 sps:$4 sm:$0xff]   ;;  %v15439_v23 = vld [vmem:[%s17435_s18 + $0x4f4] ss:$8 sps:$4 sm:$0xff]  }
 0x1e4   : > { %11206 = vmatpush1.bf16.msra.mxu0 %v15308_v51  ;;  %9879 = vmatprep.subr.bf16.mxu1 %v15313_v52  ;;  %v15367_v51 = vld [vmem:[%s17435_s18 + $0x434] ss:$8 sps:$4 sm:$0xff]   ;;  %v15434_v15 = vld [vmem:[%s17435_s18 + $0x14e0] ss:$8 sps:$4 sm:$0xff]  }
 0x1e5   : > { %11207 = vmatprep.subr.bf16.mxu0 %v15316_v53  ;;  %v15370_v52 = vld [vmem:[%s17435_s18 + $0x1434] ss:$8 sps:$4 sm:$0xff]   ;;  %v15365_v53 = vld [vmem:[%s17435_s18 + $0x430] ss:$8 sps:$4 sm:$0xff]  }
 0x1e7   : > { %9880 = vmatpush1.bf16.msra.mxu1 %v15311_v54  ;;  %v15368_v54 = vld [vmem:[%s17435_s18 + $0x1430] ss:$8 sps:$4 sm:$0xff]  }
 0x1e8   : > { %11208 = vmatpush1.bf16.msra.mxu0 %v15314_v55  ;;  %9881 = vmatprep.subr.bf16.mxu1 %v15319_v56  ;;  %v12917_v55 = vcombine.high %v1657_v44, %v1689_v45  ;;  %v12949_v56 = vcombine.high %v1673_v46, %v1705_v47 }
 0x1e9   : > { %11209 = vmatprep.subr.bf16.mxu0 %v15322_v57  ;;  %v1046_v57 = vld [vmem:[%s17433_s10 + $0x618] sm:$0xff] }
 0x1eb   : > { %9882 = vmatpush1.bf16.msra.mxu1 %v15317_v5  ;;  %v1078_v5 = vld [vmem:[%s17433_s10 + $0x718] sm:$0xff] }
 0x1ec   : > { %11210 = vmatpush1.bf16.msra.mxu0 %v15320_v58  ;;  %9883 = vmatprep.subr.bf16.mxu1 %v15325_v59  ;;  %v1062_v58 = vld [vmem:[%s17433_s10 + $0x698] sm:$0xff] }
 0x1ed   : > { %11211 = vmatprep.subr.bf16.mxu0 %v15328_v60  ;;  %v1094_v59 = vld [vmem:[%s17433_s10 + $0x798] sm:$0xff]  ;;  %v15373_v60 = vld [vmem:[%s17435_s18 + $0x444] ss:$8 sps:$4 sm:$0xff]  }
 0x1ef   : > { %9884 = vmatpush1.bf16.msra.mxu1 %v15323_v61  ;;  %v15376_v61 = vld [vmem:[%s17435_s18 + $0x1444] ss:$8 sps:$4 sm:$0xff]  }
 0x1f0   : > { %11212 = vmatpush1.bf16.msra.mxu0 %v15326_v62  ;;  %9885 = vmatprep.subr.bf16.mxu1 %v15331_v63  ;;  %v12916_v62 = vcombine.low %v1657_v44, %v1689_v45  ;;  %v12948_v63 = vcombine.low %v1673_v46, %v1705_v47  ;;  %v887_v44 = vld [vmem:[%s17433_s10 + $0x120] sm:$0xff]  ;;  %v15485_v45 = vld [vmem:[%s17435_s18 + $0x570] ss:$8 sps:$4 sm:$0xff]  }
 0x1f1   : > { %11213 = vmatprep.subr.bf16.mxu0 %v15334_v13  ;;  %v1180_v13 = vadd.s32 1024, %v17476_v43  ;;  %v871_v46 = vld [vmem:[%s17433_s10 + $0xa0] sm:$0xff] }
 0x1f2   : > { %v903_v47 = vld [vmem:[%s17433_s10 + $0x1a0] sm:$0xff] }
 0x1f3   : > { %9886 = vmatpush1.bf16.msra.mxu1 %v15329_v0  ;;  %v1181_v0 = vadd.s32 1152, %v17476_v43 }
 0x1f4   : > { %11214 = vmatpush1.bf16.msra.mxu0 %v15332_v2  ;;  %9887 = vmatprep.subr.bf16.mxu1 %v15337_v3  ;;  %v1721_v2 = vsel %vm17951_vm6, %v1046_v57, 0  ;;  %v1753_v3 = vsel %vm17951_vm6, %v1078_v5, 0  ;;  %v15395_v5 = vld [vmem:[%s17435_s18 + $0x480] ss:$8 sps:$4 sm:$0xff]  }
 0x1f5   : > { %11215 = vmatprep.subr.bf16.mxu0 %v15340_v4  ;;  %v1737_v4 = vsel %vm17960_vm7, %v1062_v58, 0  ;;  %v12981_v16 = vcombine.high %v1721_v2, %v1753_v3  ;;  %v15398_v58 = vld [vmem:[%s17435_s18 + $0x1480] ss:$8 sps:$4 sm:$0xff]  }
 0x1f7   : > { %9888 = vmatpush1.bf16.msra.mxu1 %v15335_v6  ;;  %v1769_v6 = vsel %vm17960_vm7, %v1094_v59, 0  ;;  %v15403_v59 = vld [vmem:[%s17435_s18 + $0x494] ss:$8 sps:$4 sm:$0xff]  }
 0x1f8   : > { %11216 = vmatpush1.bf16.msra.mxu0 %v15338_v7  ;;  %9889 = vmatprep.subr.bf16.mxu1 %v15343_v1  ;;  %v15371_v7 = vld [vmem:[%s17435_s18 + $0x440] ss:$8 sps:$4 sm:$0xff]  }
 0x1f9   : > { %11217 = vmatprep.subr.bf16.mxu0 %v15346_v8  ;;  %v15374_v1 = vld [vmem:[%s17435_s18 + $0x1440] ss:$8 sps:$4 sm:$0xff]   ;;  %v15379_v8 = vld [vmem:[%s17435_s18 + $0x454] ss:$8 sps:$4 sm:$0xff]  }
 0x1fb   : > { %9890 = vmatpush1.bf16.msra.mxu1 %v15341_v9  ;;  %v15382_v9 = vld [vmem:[%s17435_s18 + $0x1454] ss:$8 sps:$4 sm:$0xff]  }
 0x1fc   : > { %11218 = vmatpush1.bf16.msra.mxu0 %v15344_v11  ;;  %9942 = vmatprep.subr.bf16.mxu1 %v15349_v17  ;;  %v1212_v11 = vadd.s32 5120, %v17476_v43  ;;  %v13013_v17 = vcombine.high %v1737_v4, %v1769_v6 }
 0x1fd   : > { %11270 = vmatprep.subr.bf16.mxu0 %v15352_v19  ;;  %v1110_v19 = vld [vmem:[%s17433_s10 + $0x818] sm:$0xff] }
 0x1fe   : > { %9892 = vmatmul.mubr.bf16.vlgmr.msra.gmra.mrb[0].mxu1 %v12788_v20  ;;  %v1246_v20 = vadd.s32 %v17485_v50, %v1180_v13  ;;  %v15404_v13 = vld [vmem:[%s17435_s18 + $0x1490] ss:$8 sps:$4 sm:$0xff]  }
 0x1ff   : > { %11220 = vmatmul.mubr.bf16.vlgmr.msra.gmra.mrb[0].mxu0 %v12820_v21  ;;  %9943 = vmatpush1.bf16.msra.mxu1 %v15347_v25  ;;  %v1247_v21 = vadd.s32 %v17485_v50, %v1181_v0  ;;  %v15388_v25 = vld [vmem:[%s17435_s18 + $0x1464] ss:$8 sps:$4 sm:$0xff]  }
 0x200   : > { %11271 = vmatpush1.bf16.msra.mxu0 %v15350_v18  ;;  %9944 = vmatprep.subr.bf16.mxu1 %v15355_v26  ;;  %v1278_v18 = vadd.s32 %v17485_v50, %v1212_v11  ;;  %v1279_v26 = vadd.s32 %v17485_v50, %v1213_v10  ;;  %vm1310_vm8 = vcmp.lt.s32.totalorder %v1246_v20, 68970  ;;  %v15409_v0 = vld [vmem:[%s17435_s18 + $0x4a4] ss:$8 sps:$4 sm:$0xff]   ;;  %v15419_v10 = vld [vmem:[%s17435_s18 + $0x4c0] ss:$8 sps:$4 sm:$0xff]  }
 0x201   : > { %11272 = vmatprep.subr.bf16.mxu0 %v15358_v27  ;;  %9901 = vmatprep.mubr.bf16.mxu1 %v12853_v31  ;;  %v12980_v27 = vcombine.low %v1721_v2, %v1753_v3  ;;  %vm1311_vm9 = vcmp.lt.s32.totalorder %v1247_v21, 68970  ;;  %v1785_v31 = vsel %vm17951_vm6, %v1110_v19, 0  ;;  %v15412_v2 = vld [vmem:[%s17435_s18 + $0x14a4] ss:$8 sps:$4 sm:$0xff]   ;;  %v15407_v3 = vld [vmem:[%s17435_s18 + $0x4a0] ss:$8 sps:$4 sm:$0xff]  }
 0x202   : > { %11229 = vmatprep.mubr.bf16.mxu0 %v12885_v32  ;;  %v1817_v32 = vsel %vm17951_vm6, %v1142_v22, 0  ;;  %vm1342_vm10 = vcmp.lt.s32.totalorder %v1278_v18, 68970  ;;  %vm1343_vm11 = vcmp.lt.s32.totalorder %v1279_v26, 68970  ;;  %vm18111_vm12 = vmpackc.low %vm1311_vm9, %vm1310_vm8  ;;  %v15424_v11 = vld [vmem:[%s17435_s18 + $0x14c4] ss:$8 sps:$4 sm:$0xff]  }
 0x203   : > { %9945 = vmatpush1.bf16.msra.mxu1 %v15353_v28  ;;  %v13012_v28 = vcombine.low %v1737_v4, %v1769_v6  ;;  %vm18118_vm13 = vmpackc.low %vm1343_vm11, %vm1342_vm10  ;;  %v15410_v4 = vld [vmem:[%s17435_s18 + $0x14a0] ss:$8 sps:$4 sm:$0xff]   ;;  %v15415_v6 = vld [vmem:[%s17435_s18 + $0x4b4] ss:$8 sps:$4 sm:$0xff]  }
 0x204   : > { %11273 = vmatpush1.bf16.msra.mxu0 %v15356_v30  ;;  %9946 = vmatprep.subr.bf16.mxu1 %v15361_v39  ;;  %v15383_v30 = vld [vmem:[%s17435_s18 + $0x460] ss:$8 sps:$4 sm:$0xff]   ;;  %v15394_v39 = vld [vmem:[%s17435_s18 + $0x1474] ss:$8 sps:$4 sm:$0xff]   ;;  %v18138_v57 = vsel %vm18118_vm13, %v903_v47, 0 }
 0x205   : > { %11274 = vmatprep.subr.bf16.mxu0 %v15364_v40  ;;  %v15392_v40 = vld [vmem:[%s17435_s18 + $0x1470] ss:$8 sps:$4 sm:$0xff]   ;;  %v15433_v20 = vld [vmem:[%s17435_s18 + $0x4e4] ss:$8 sps:$4 sm:$0xff]   ;;  %v15431_v22 = vld [vmem:[%s17435_s18 + $0x4e0] ss:$8 sps:$4 sm:$0xff]  }
 0x206   : > { %9902 = vmatmul.mubr.bf16.gmra.mrb[4].mxu1 %v12852_v41  ;;  %v13045_v41 = vcombine.high %v1785_v31, %v1817_v32  ;;  %v15428_v19 = vld [vmem:[%s17435_s18 + $0x14d0] ss:$8 sps:$4 sm:$0xff]   ;;  %v15436_v21 = vld [vmem:[%s17435_s18 + $0x14e4] ss:$8 sps:$4 sm:$0xff]  }
 0x207   : > { %11230 = vmatmul.mubr.bf16.gmra.mrb[4].mxu0 %v12884_v42  ;;  %9947 = vmatpush1.bf16.msra.mxu1 %v15359_v48  ;;  %v13077_v42 = vcombine.high %v1801_v34, %v1833_v35  ;;  %v15440_v18 = vld [vmem:[%s17435_s18 + $0x14f0] ss:$8 sps:$4 sm:$0xff]   ;;  %v919_v26 = vld [vmem:[%s17433_s10 + $0x220] sm:$0xff] }
 0x208   : > { %11275 = vmatpush1.bf16.msra.mxu0 %v15362_v49  ;;  %9948 = vmatprep.subr.bf16.mxu1 %v15367_v51  ;;  %v15397_v49 = vld [vmem:[%s17435_s18 + $0x484] ss:$8 sps:$4 sm:$0xff]  }
 0x209   : > { %11276 = vmatprep.subr.bf16.mxu0 %v15370_v52  ;;  %9911 = vmatprep.mubr.bf16.mxu1 %v12917_v55  ;;  %v15400_v51 = vld [vmem:[%s17435_s18 + $0x1484] ss:$8 sps:$4 sm:$0xff]   ;;  %v13044_v52 = vcombine.low %v1785_v31, %v1817_v32  ;;  %v18130_v55 = vsel %vm18111_vm12, %v887_v44, 0  ;;  %v15449_v44 = vld [vmem:[%s17435_s18 + $0x510] ss:$8 sps:$4 sm:$0xff]  }
 0x20a   : > { %11239 = vmatprep.mubr.bf16.mxu0 %v12949_v56  ;;  %v18134_v56 = vsel %vm18118_vm13, %v871_v46, 0  ;;  %v15445_v31 = vld [vmem:[%s17435_s18 + $0x504] ss:$8 sps:$4 sm:$0xff]   ;;  %v15452_v46 = vld [vmem:[%s17435_s18 + $0x1510] ss:$8 sps:$4 sm:$0xff]  }
 0x20b   : > { %9949 = vmatpush1.bf16.msra.mxu1 %v15365_v53  ;;  %v13076_v53 = vcombine.low %v1801_v34, %v1833_v35  ;;  %v15448_v32 = vld [vmem:[%s17435_s18 + $0x1504] ss:$8 sps:$4 sm:$0xff]   ;;  %v15443_v35 = vld [vmem:[%s17435_s18 + $0x500] ss:$8 sps:$4 sm:$0xff]  }
 0x20c   : > { %11277 = vmatpush1.bf16.msra.mxu0 %v15368_v54  ;;  %9950 = vmatprep.subr.bf16.mxu1 %v15373_v60  ;;  %v18126_v54 = vsel %vm18111_vm12, %v855_v33, 0  ;;  %v15406_v60 = vld [vmem:[%s17435_s18 + $0x1494] ss:$8 sps:$4 sm:$0xff]  }
 0x20d   : > { %11278 = vmatprep.subr.bf16.mxu0 %v15376_v61  ;;  %v12791_v61 = vcombine.high %v18126_v54, %v18130_v55  ;;  %v12790_v34 = vcombine.low %v18126_v54, %v18130_v55  ;;  %v15454_v33 = vld [vmem:[%s17435_s18 + $0x1514] ss:$8 sps:$4 sm:$0xff]   ;;  %v999_v54 = vld [vmem:[%s17433_s10 + $0x4a0] sm:$0xff] }
 0x20e   : > { %9912 = vmatmul.mubr.bf16.gmra.mrb[8].mxu1 %v12916_v62  ;;  %v12823_v62 = vcombine.high %v18134_v56, %v18138_v57  ;;  %v1031_v55 = vld [vmem:[%s17433_s10 + $0x5a0] sm:$0xff] }
 0x20f   : > { %11240 = vmatmul.mubr.bf16.gmra.mrb[8].mxu0 %v12948_v63  ;;  %9951 = vmatpush1.bf16.msra.mxu1 %v15371_v7  ;;  %v15401_v63 = vld [vmem:[%s17435_s18 + $0x490] ss:$8 sps:$4 sm:$0xff]   ;;  %v15418_v7 = vld [vmem:[%s17435_s18 + $0x14b4] ss:$8 sps:$4 sm:$0xff]  }
 0x210   : > { %11279 = vmatpush1.bf16.msra.mxu0 %v15374_v1  ;;  %9952 = vmatprep.subr.bf16.mxu1 %v15379_v8  ;;  %v15413_v1 = vld [vmem:[%s17435_s18 + $0x4b0] ss:$8 sps:$4 sm:$0xff]  }
 0x211   : > { %11280 = vmatprep.subr.bf16.mxu0 %v15382_v9  ;;  %9921 = vmatprep.mubr.bf16.mxu1 %v12981_v16  ;;  %v15416_v8 = vld [vmem:[%s17435_s18 + $0x14b0] ss:$8 sps:$4 sm:$0xff]   ;;  %v15421_v9 = vld [vmem:[%s17435_s18 + $0x4c4] ss:$8 sps:$4 sm:$0xff]   ;;  %v15430_v16 = vld [vmem:[%s17435_s18 + $0x14d4] ss:$8 sps:$4 sm:$0xff]  }
 0x212   : > { %11249 = vmatprep.mubr.bf16.mxu0 %v13013_v17  ;;  %v15425_v17 = vld [vmem:[%s17435_s18 + $0x4d0] ss:$8 sps:$4 sm:$0xff]  }
 0x213   : > { %9953 = vmatpush1.bf16.msra.mxu1 %v15377_v12  ;;  %v15422_v12 = vld [vmem:[%s17435_s18 + $0x14c0] ss:$8 sps:$4 sm:$0xff]  }
 0x214   : > { %11281 = vmatpush1.bf16.msra.mxu0 %v15380_v14  ;;  %9954 = vmatprep.subr.bf16.mxu1 %v15385_v24  ;;  %v15427_v14 = vld [vmem:[%s17435_s18 + $0x4d4] ss:$8 sps:$4 sm:$0xff]  }
 0x215   : > { %11282 = vmatprep.subr.bf16.mxu0 %v15388_v25  ;;  %v15442_v24 = vld [vmem:[%s17435_s18 + $0x14f4] ss:$8 sps:$4 sm:$0xff]   ;;  %v15437_v25 = vld [vmem:[%s17435_s18 + $0x4f0] ss:$8 sps:$4 sm:$0xff]  }
 0x216   : > { %9922 = vmatmul.mubr.bf16.gmra.mrb[12].mxu1 %v12980_v27  ;;  %v951_v27 = vld [vmem:[%s17433_s10 + $0x320] sm:$0xff] }
 0x217   : > { %11250 = vmatmul.mubr.bf16.gmra.mrb[12].mxu0 %v13012_v28  ;;  %9955 = vmatpush1.bf16.msra.mxu1 %v15383_v30  ;;  %v935_v28 = vld [vmem:[%s17433_s10 + $0x2a0] sm:$0xff] }
 0x218   : > { %11283 = vmatpush1.bf16.msra.mxu0 %v15386_v36  ;;  %9956 = vmatprep.subr.bf16.mxu1 %v15391_v37  ;;  %v967_v30 = vld [vmem:[%s17433_s10 + $0x3a0] sm:$0xff]  ;;  %v12822_v36 = vcombine.low %v18134_v56, %v18138_v57 }
 0x219   : > { %11284 = vmatprep.subr.bf16.mxu0 %v15394_v39  ;;  %9931 = vmatprep.mubr.bf16.mxu1 %v13045_v41  ;;  %v15446_v37 = vld [vmem:[%s17435_s18 + $0x1500] ss:$8 sps:$4 sm:$0xff]   ;;  %v1594_v39 = vsel %vm18111_vm12, %v919_v26, 0  ;;  %v1642_v41 = vsel %vm18118_vm13, %v967_v30, 0  ;;  %v15460_v56 = vld [vmem:[%s17435_s18 + $0x1524] ss:$8 sps:$4 sm:$0xff]  }
 0x21a   : > { %11259 = vmatprep.mubr.bf16.mxu0 %v13077_v42  ;;  %v15451_v42 = vld [vmem:[%s17435_s18 + $0x514] ss:$8 sps:$4 sm:$0xff]   ;;  %v15455_v57 = vld [vmem:[%s17435_s18 + $0x520] ss:$8 sps:$4 sm:$0xff]   ;;  %v1215_v26 = vadd.s32 5504, %v17476_v43 }
 0x21b   : > { %9957 = vmatpush1.bf16.msra.mxu1 %v15389_v29  ;;  %v1626_v29 = vsel %vm18111_vm12, %v951_v27, 0  ;;  %v15473_v27 = vld [vmem:[%s17435_s18 + $0x550] ss:$8 sps:$4 sm:$0xff]  }
 0x21c   : > { %11285 = vmatpush1.bf16.msra.mxu0 %v15392_v40  ;;  %9958 = vmatprep.subr.bf16.mxu1 %v15397_v49  ;;  %v1610_v40 = vsel %vm18118_vm13, %v935_v28, 0  ;;  %v12855_v47 = vcombine.high %v1594_v39, %v1626_v29  ;;  %v15476_v28 = vld [vmem:[%s17435_s18 + $0x1550] ss:$8 sps:$4 sm:$0xff]  }
 0x21d   : > { %11286 = vmatprep.subr.bf16.mxu0 %v15400_v51  ;;  %v12887_v49 = vcombine.high %v1610_v40, %v1642_v41  ;;  %v15457_v51 = vld [vmem:[%s17435_s18 + $0x524] ss:$8 sps:$4 sm:$0xff]  }
 0x21e   : > { %9932 = vmatmul.mubr.bf16.gmra.mrb[16].mxu1 %v13044_v52  ;;  %v983_v52 = vld [vmem:[%s17433_s10 + $0x420] sm:$0xff] }
 0x21f   : > { %11260 = vmatmul.mubr.bf16.gmra.mrb[16].mxu0 %v13076_v53  ;;  %9959 = vmatpush1.bf16.msra.mxu1 %v15395_v5  ;;  %v1015_v53 = vld [vmem:[%s17433_s10 + $0x520] sm:$0xff]  ;;  %v12854_v5 = vcombine.low %v1594_v39, %v1626_v29 }
 0x220   : > { %11287 = vmatpush1.bf16.msra.mxu0 %v15398_v58  ;;  %9960 = vmatprep.subr.bf16.mxu1 %v15403_v59  ;;  %v12886_v58 = vcombine.low %v1610_v40, %v1642_v41  ;;  %v1658_v59 = vsel %vm18111_vm12, %v983_v52, 0  ;;  %v1127_v39 = vld [vmem:[%s17433_s10 + $0x8a0] sm:$0xff] }
 0x221   : > { %11288 = vmatprep.subr.bf16.mxu0 %v15406_v60  ;;  %9974 = vmatprep.mubr.bf16.mxu1 %v12791_v61  ;;  %v1690_v60 = vsel %vm18111_vm12, %v1015_v53, 0  ;;  %v1674_v61 = vsel %vm18118_vm13, %v999_v54, 0  ;;  %v1159_v29 = vld [vmem:[%s17433_s10 + $0x9a0] sm:$0xff]  ;;  %v15487_v54 = vld [vmem:[%s17435_s18 + $0x574] ss:$8 sps:$4 sm:$0xff]  }
 0x222   : > { %11302 = vmatprep.mubr.bf16.mxu0 %v12823_v62  ;;  %v1706_v62 = vsel %vm18118_vm13, %v1031_v55, 0  ;;  %v15484_v40 = vld [vmem:[%s17435_s18 + $0x1564] ss:$8 sps:$4 sm:$0xff]   ;;  %v15479_v52 = vld [vmem:[%s17435_s18 + $0x560] ss:$8 sps:$4 sm:$0xff]  }
 0x223   : > { %9961 = vmatpush1.bf16.msra.mxu1 %v15401_v63  ;;  %v15458_v63 = vld [vmem:[%s17435_s18 + $0x1520] ss:$8 sps:$4 sm:$0xff]   ;;  %v15490_v55 = vld [vmem:[%s17435_s18 + $0x1574] ss:$8 sps:$4 sm:$0xff]  }
 0x224   : > { %11289 = vmatpush1.bf16.msra.mxu0 %v15404_v13  ;;  %9962 = vmatprep.subr.bf16.mxu1 %v15409_v0  ;;  %v15463_v13 = vld [vmem:[%s17435_s18 + $0x534] ss:$8 sps:$4 sm:$0xff]   ;;  %v15482_v53 = vld [vmem:[%s17435_s18 + $0x1560] ss:$8 sps:$4 sm:$0xff]  }
 0x225   : > { %11290 = vmatprep.subr.bf16.mxu0 %v15412_v2  ;;  %v15466_v0 = vld [vmem:[%s17435_s18 + $0x1534] ss:$8 sps:$4 sm:$0xff]   ;;  %v15461_v2 = vld [vmem:[%s17435_s18 + $0x530] ss:$8 sps:$4 sm:$0xff]  }
 0x227   : > { %9963 = vmatpush1.bf16.msra.mxu1 %v15407_v3  ;;  %v15464_v3 = vld [vmem:[%s17435_s18 + $0x1530] ss:$8 sps:$4 sm:$0xff]  }
 0x228   : > { %11291 = vmatpush1.bf16.msra.mxu0 %v15410_v4  ;;  %9964 = vmatprep.subr.bf16.mxu1 %v15415_v6  ;;  %v12919_v4 = vcombine.high %v1658_v59, %v1690_v60  ;;  %v12951_v6 = vcombine.high %v1674_v61, %v1706_v62 }
 0x229   : > { %11292 = vmatprep.subr.bf16.mxu0 %v15418_v7  ;;  %v15469_v7 = vld [vmem:[%s17435_s18 + $0x544] ss:$8 sps:$4 sm:$0xff]  }
 0x22b   : > { %9965 = vmatpush1.bf16.msra.mxu1 %v15413_v1  ;;  %v1047_v1 = vld [vmem:[%s17433_s10 + $0x620] sm:$0xff] }
 0x22c   : > { %11293 = vmatpush1.bf16.msra.mxu0 %v15416_v8  ;;  %9966 = vmatprep.subr.bf16.mxu1 %v15421_v9  ;;  %v1079_v8 = vld [vmem:[%s17433_s10 + $0x720] sm:$0xff] }
 0x22d   : > { %11294 = vmatprep.subr.bf16.mxu0 %v15424_v11  ;;  %v1063_v9 = vld [vmem:[%s17433_s10 + $0x6a0] sm:$0xff] }
 0x22e   : > { %v1095_v11 = vld [vmem:[%s17433_s10 + $0x7a0] sm:$0xff] }
 0x22f   : > { %9967 = vmatpush1.bf16.msra.mxu1 %v15419_v10  ;;  %v15472_v10 = vld [vmem:[%s17435_s18 + $0x1544] ss:$8 sps:$4 sm:$0xff]  }
 0x230   : > { %11295 = vmatpush1.bf16.msra.mxu0 %v15422_v12  ;;  %9968 = vmatprep.subr.bf16.mxu1 %v15427_v14  ;;  %v12918_v12 = vcombine.low %v1658_v59, %v1690_v60  ;;  %v12950_v14 = vcombine.low %v1674_v61, %v1706_v62  ;;  %v872_v60 = vld [vmem:[%s17433_s10 + $0xa8] sm:$0xff]  ;;  %v15581_v59 = vld [vmem:[%s17435_s18 + $0x670] ss:$8 sps:$4 sm:$0xff]   ;;  %v15778_v62 = vld [vmem:[%s17435_s18 + $0x1874] ss:$8 sps:$4 sm:$0xff]  }
 0x231   : > { %11296 = vmatprep.subr.bf16.mxu0 %v15430_v16  ;;  %v1182_v16 = vadd.s32 1280, %v17476_v43  ;;  %v904_v61 = vld [vmem:[%s17433_s10 + $0x1a8] sm:$0xff] }
 0x233   : > { %9969 = vmatpush1.bf16.msra.mxu1 %v15425_v17  ;;  %v1183_v17 = vadd.s32 1408, %v17476_v43 }
 0x234   : > { %11297 = vmatpush1.bf16.msra.mxu0 %v15428_v19  ;;  %9970 = vmatprep.subr.bf16.mxu1 %v15433_v20  ;;  %v1722_v19 = vsel %vm18111_vm12, %v1047_v1, 0  ;;  %v1754_v20 = vsel %vm18111_vm12, %v1079_v8, 0  ;;  %v15491_v1 = vld [vmem:[%s17435_s18 + $0x580] ss:$8 sps:$4 sm:$0xff]  }
 0x235   : > { %11298 = vmatprep.subr.bf16.mxu0 %v15436_v21  ;;  %v1738_v21 = vsel %vm18118_vm13, %v1063_v9, 0  ;;  %v12983_v30 = vcombine.high %v1722_v19, %v1754_v20  ;;  %v15494_v8 = vld [vmem:[%s17435_s18 + $0x1580] ss:$8 sps:$4 sm:$0xff]   ;;  %v15499_v9 = vld [vmem:[%s17435_s18 + $0x594] ss:$8 sps:$4 sm:$0xff]  }
 0x237   : > { %9971 = vmatpush1.bf16.msra.mxu1 %v15431_v22  ;;  %v1770_v22 = vsel %vm18118_vm13, %v1095_v11, 0  ;;  %v15502_v11 = vld [vmem:[%s17435_s18 + $0x1594] ss:$8 sps:$4 sm:$0xff]  }
 0x238   : > { %11299 = vmatpush1.bf16.msra.mxu0 %v15434_v15  ;;  %9972 = vmatprep.subr.bf16.mxu1 %v15439_v23  ;;  %v15467_v15 = vld [vmem:[%s17435_s18 + $0x540] ss:$8 sps:$4 sm:$0xff]  }
 0x239   : > { %11300 = vmatprep.subr.bf16.mxu0 %v15442_v24  ;;  %v15470_v23 = vld [vmem:[%s17435_s18 + $0x1540] ss:$8 sps:$4 sm:$0xff]   ;;  %v1214_v24 = vadd.s32 5376, %v17476_v43 }
 0x23b   : > { %9973 = vmatpush1.bf16.msra.mxu1 %v15437_v25  ;;  %v15475_v25 = vld [vmem:[%s17435_s18 + $0x554] ss:$8 sps:$4 sm:$0xff]   ;;  %v1280_v41 = vadd.s32 %v17485_v50, %v1214_v24  ;;  %v15512_v24 = vld [vmem:[%s17435_s18 + $0x15b0] ss:$8 sps:$4 sm:$0xff]  }
 0x23c   : > { %11301 = vmatpush1.bf16.msra.mxu0 %v15440_v18  ;;  %10025 = vmatprep.subr.bf16.mxu1 %v15445_v31  ;;  %v15478_v18 = vld [vmem:[%s17435_s18 + $0x1554] ss:$8 sps:$4 sm:$0xff]   ;;  %v13015_v31 = vcombine.high %v1738_v21, %v1770_v22 }
 0x23d   : > { %11353 = vmatprep.subr.bf16.mxu0 %v15448_v32  ;;  %v1111_v32 = vld [vmem:[%s17433_s10 + $0x820] sm:$0xff]  ;;  %vm1344_vm0 = vcmp.lt.s32.totalorder %v1280_v41, 68970  ;;  %v15536_v41 = vld [vmem:[%s17435_s18 + $0x15f0] ss:$8 sps:$4 sm:$0xff]  }
 0x23e   : > { %9975 = vmatmul.mubr.bf16.vlgmr.msra.gmra.mrb[0].mxu1 %v12790_v34  ;;  %v1248_v34 = vadd.s32 %v17485_v50, %v1182_v16  ;;  %v15500_v16 = vld [vmem:[%s17435_s18 + $0x1590] ss:$8 sps:$4 sm:$0xff]  }
 0x23f   : > { %11303 = vmatmul.mubr.bf16.vlgmr.msra.gmra.mrb[0].mxu0 %v12822_v36  ;;  %10026 = vmatpush1.bf16.msra.mxu1 %v15443_v35  ;;  %v1249_v35 = vadd.s32 %v17485_v50, %v1183_v17  ;;  %v15481_v36 = vld [vmem:[%s17435_s18 + $0x564] ss:$8 sps:$4 sm:$0xff]  }
 0x240   : > { %11354 = vmatpush1.bf16.msra.mxu0 %v15446_v37  ;;  %10027 = vmatprep.subr.bf16.mxu1 %v15451_v42  ;;  %v1143_v37 = vld [vmem:[%s17433_s10 + $0x920] sm:$0xff]  ;;  %v1281_v42 = vadd.s32 %v17485_v50, %v1215_v26  ;;  %vm1312_vm14 = vcmp.lt.s32.totalorder %v1248_v34, 68970 }
 0x241   : > { %11355 = vmatprep.subr.bf16.mxu0 %v15454_v33  ;;  %9984 = vmatprep.mubr.bf16.mxu1 %v12855_v47  ;;  %v12982_v33 = vcombine.low %v1722_v19, %v1754_v20  ;;  %vm1313_vm15 = vcmp.lt.s32.totalorder %v1249_v35, 68970  ;;  %v1818_v47 = vsel %vm18111_vm12, %v1143_v37, 0  ;;  %v15505_v17 = vld [vmem:[%s17435_s18 + $0x5a4] ss:$8 sps:$4 sm:$0xff]   ;;  %v15503_v20 = vld [vmem:[%s17435_s18 + $0x5a0] ss:$8 sps:$4 sm:$0xff]  }
 0x242   : > { %11312 = vmatprep.mubr.bf16.mxu0 %v12887_v49  ;;  %v1802_v49 = vsel %vm18118_vm13, %v1127_v39, 0  ;;  %vm1345_vm1 = vcmp.lt.s32.totalorder %v1281_v42, 68970  ;;  %vm18270_vm2 = vmpackc.low %vm1313_vm15, %vm1312_vm14  ;;  %v15508_v19 = vld [vmem:[%s17435_s18 + $0x15a4] ss:$8 sps:$4 sm:$0xff]   ;;  %v15515_v26 = vld [vmem:[%s17435_s18 + $0x5c0] ss:$8 sps:$4 sm:$0xff]  }
 0x243   : > { %10028 = vmatpush1.bf16.msra.mxu1 %v15449_v44  ;;  %v13014_v44 = vcombine.low %v1738_v21, %v1770_v22  ;;  %vm18277_vm3 = vmpackc.low %vm1345_vm1, %vm1344_vm0  ;;  %v15506_v21 = vld [vmem:[%s17435_s18 + $0x15a0] ss:$8 sps:$4 sm:$0xff]   ;;  %v15511_v22 = vld [vmem:[%s17435_s18 + $0x5b4] ss:$8 sps:$4 sm:$0xff]  }
 0x244   : > { %11356 = vmatpush1.bf16.msra.mxu0 %v15452_v46  ;;  %10029 = vmatprep.subr.bf16.mxu1 %v15457_v51  ;;  %v1786_v46 = vsel %vm18111_vm12, %v1111_v32, 0  ;;  %v1834_v51 = vsel %vm18118_vm13, %v1159_v29, 0  ;;  %v15524_v32 = vld [vmem:[%s17435_s18 + $0x15d0] ss:$8 sps:$4 sm:$0xff]   ;;  %v15529_v34 = vld [vmem:[%s17435_s18 + $0x5e4] ss:$8 sps:$4 sm:$0xff]  }
 0x245   : > { %11357 = vmatprep.subr.bf16.mxu0 %v15460_v56  ;;  %v15488_v56 = vld [vmem:[%s17435_s18 + $0x1570] ss:$8 sps:$4 sm:$0xff]   ;;  %v13047_v48 = vcombine.high %v1786_v46, %v1818_v47  ;;  %v15532_v35 = vld [vmem:[%s17435_s18 + $0x15e4] ss:$8 sps:$4 sm:$0xff]   ;;  %v15530_v37 = vld [vmem:[%s17435_s18 + $0x15e0] ss:$8 sps:$4 sm:$0xff]  }
 0x246   : > { %9985 = vmatmul.mubr.bf16.gmra.mrb[4].mxu1 %v12854_v5  ;;  %v856_v5 = vld [vmem:[%s17433_s10 + $0x28] sm:$0xff]  ;;  %v15535_v39 = vld [vmem:[%s17435_s18 + $0x5f4] ss:$8 sps:$4 sm:$0xff]  }
 0x247   : > { %11313 = vmatmul.mubr.bf16.gmra.mrb[4].mxu0 %v12886_v58  ;;  %10030 = vmatpush1.bf16.msra.mxu1 %v15455_v57  ;;  %v13079_v57 = vcombine.high %v1802_v49, %v1834_v51  ;;  %v888_v58 = vld [vmem:[%s17433_s10 + $0x128] sm:$0xff]  ;;  %v15538_v29 = vld [vmem:[%s17435_s18 + $0x15f4] ss:$8 sps:$4 sm:$0xff]  }
 0x248   : > { %11358 = vmatpush1.bf16.msra.mxu0 %v15458_v63  ;;  %10031 = vmatprep.subr.bf16.mxu1 %v15463_v13  ;;  %v15493_v63 = vld [vmem:[%s17435_s18 + $0x584] ss:$8 sps:$4 sm:$0xff]  }
 0x249   : > { %11359 = vmatprep.subr.bf16.mxu0 %v15466_v0  ;;  %9994 = vmatprep.mubr.bf16.mxu1 %v12919_v4  ;;  %v15496_v13 = vld [vmem:[%s17435_s18 + $0x1584] ss:$8 sps:$4 sm:$0xff]   ;;  %v13046_v0 = vcombine.low %v1786_v46, %v1818_v47  ;;  %v18289_v4 = vsel %vm18270_vm2, %v888_v58, 0  ;;  %v15545_v58 = vld [vmem:[%s17435_s18 + $0x610] ss:$8 sps:$4 sm:$0xff]  }
 0x24a   : > { %11322 = vmatprep.mubr.bf16.mxu0 %v12951_v6  ;;  %v18293_v6 = vsel %vm18277_vm3, %v872_v60, 0  ;;  %v920_v42 = vld [vmem:[%s17433_s10 + $0x228] sm:$0xff]  ;;  %v15548_v60 = vld [vmem:[%s17435_s18 + $0x1610] ss:$8 sps:$4 sm:$0xff]  }
 0x24b   : > { %10032 = vmatpush1.bf16.msra.mxu1 %v15461_v2  ;;  %v13078_v2 = vcombine.low %v1802_v49, %v1834_v51  ;;  %v968_v46 = vld [vmem:[%s17433_s10 + $0x3a8] sm:$0xff] }
 0x24c   : > { %11360 = vmatpush1.bf16.msra.mxu0 %v15464_v3  ;;  %10033 = vmatprep.subr.bf16.mxu1 %v15469_v7  ;;  %v18285_v3 = vsel %vm18270_vm2, %v856_v5, 0  ;;  %v18297_v7 = vsel %vm18277_vm3, %v904_v61, 0  ;;  %v15541_v47 = vld [vmem:[%s17435_s18 + $0x604] ss:$8 sps:$4 sm:$0xff]   ;;  %v15550_v5 = vld [vmem:[%s17435_s18 + $0x1614] ss:$8 sps:$4 sm:$0xff]  }
 0x24d   : > { %11361 = vmatprep.subr.bf16.mxu0 %v15472_v10  ;;  %v12793_v10 = vcombine.high %v18285_v3, %v18289_v4  ;;  %v15544_v49 = vld [vmem:[%s17435_s18 + $0x1604] ss:$8 sps:$4 sm:$0xff]   ;;  %v12792_v51 = vcombine.low %v18285_v3, %v18289_v4 }
 0x24e   : > { %9995 = vmatmul.mubr.bf16.gmra.mrb[8].mxu1 %v12918_v12  ;;  %v12825_v12 = vcombine.high %v18293_v6, %v18297_v7  ;;  %v1032_v3 = vld [vmem:[%s17433_s10 + $0x5a8] sm:$0xff] }
 0x24f   : > { %11323 = vmatmul.mubr.bf16.gmra.mrb[8].mxu0 %v12950_v14  ;;  %10034 = vmatpush1.bf16.msra.mxu1 %v15467_v15  ;;  %v15497_v14 = vld [vmem:[%s17435_s18 + $0x590] ss:$8 sps:$4 sm:$0xff]   ;;  %v15514_v15 = vld [vmem:[%s17435_s18 + $0x15b4] ss:$8 sps:$4 sm:$0xff]   ;;  %v15553_v4 = vld [vmem:[%s17435_s18 + $0x624] ss:$8 sps:$4 sm:$0xff]  }
 0x250   : > { %11362 = vmatpush1.bf16.msra.mxu0 %v15470_v23  ;;  %10035 = vmatprep.subr.bf16.mxu1 %v15475_v25  ;;  %v15509_v23 = vld [vmem:[%s17435_s18 + $0x5b0] ss:$8 sps:$4 sm:$0xff]   ;;  %v15517_v25 = vld [vmem:[%s17435_s18 + $0x5c4] ss:$8 sps:$4 sm:$0xff]  }
 0x251   : > { %11363 = vmatprep.subr.bf16.mxu0 %v15478_v18  ;;  %10004 = vmatprep.mubr.bf16.mxu1 %v12983_v30  ;;  %v15520_v18 = vld [vmem:[%s17435_s18 + $0x15c4] ss:$8 sps:$4 sm:$0xff]   ;;  %v15526_v30 = vld [vmem:[%s17435_s18 + $0x15d4] ss:$8 sps:$4 sm:$0xff]  }
 0x252   : > { %11332 = vmatprep.mubr.bf16.mxu0 %v13015_v31  ;;  %v15521_v31 = vld [vmem:[%s17435_s18 + $0x5d0] ss:$8 sps:$4 sm:$0xff]  }
 0x253   : > { %10036 = vmatpush1.bf16.msra.mxu1 %v15473_v27  ;;  %v15518_v27 = vld [vmem:[%s17435_s18 + $0x15c0] ss:$8 sps:$4 sm:$0xff]  }
 0x254   : > { %11364 = vmatpush1.bf16.msra.mxu0 %v15476_v28  ;;  %10037 = vmatprep.subr.bf16.mxu1 %v15481_v36  ;;  %v15523_v28 = vld [vmem:[%s17435_s18 + $0x5d4] ss:$8 sps:$4 sm:$0xff]   ;;  %v15527_v36 = vld [vmem:[%s17435_s18 + $0x5e0] ss:$8 sps:$4 sm:$0xff]  }
 0x255   : > { %11365 = vmatprep.subr.bf16.mxu0 %v15484_v40  ;;  %v15533_v40 = vld [vmem:[%s17435_s18 + $0x5f0] ss:$8 sps:$4 sm:$0xff]  }
 0x256   : > { %10005 = vmatmul.mubr.bf16.gmra.mrb[12].mxu1 %v12982_v33  ;;  %v952_v33 = vld [vmem:[%s17433_s10 + $0x328] sm:$0xff] }
 0x257   : > { %11333 = vmatmul.mubr.bf16.gmra.mrb[12].mxu0 %v13014_v44  ;;  %10038 = vmatpush1.bf16.msra.mxu1 %v15479_v52  ;;  %v936_v44 = vld [vmem:[%s17433_s10 + $0x2a8] sm:$0xff]  ;;  %v12824_v52 = vcombine.low %v18293_v6, %v18297_v7 }
 0x258   : > { %11366 = vmatpush1.bf16.msra.mxu0 %v15482_v53  ;;  %10039 = vmatprep.subr.bf16.mxu1 %v15487_v54  ;;  %v1595_v53 = vsel %vm18270_vm2, %v920_v42, 0  ;;  %v1627_v54 = vsel %vm18270_vm2, %v952_v33, 0  ;;  %v15556_v6 = vld [vmem:[%s17435_s18 + $0x1624] ss:$8 sps:$4 sm:$0xff]   ;;  %v1217_v42 = vadd.s32 5760, %v17476_v43 }
 0x259   : > { %11367 = vmatprep.subr.bf16.mxu0 %v15490_v55  ;;  %10014 = vmatprep.mubr.bf16.mxu1 %v13047_v48  ;;  %v1611_v55 = vsel %vm18277_vm3, %v936_v44, 0  ;;  %v15542_v48 = vld [vmem:[%s17435_s18 + $0x1600] ss:$8 sps:$4 sm:$0xff]   ;;  %v12857_v61 = vcombine.high %v1595_v53, %v1627_v54  ;;  %v12856_v7 = vcombine.low %v1595_v53, %v1627_v54  ;;  %v15569_v33 = vld [vmem:[%s17435_s18 + $0x650] ss:$8 sps:$4 sm:$0xff]  }
 0x25a   : > { %11342 = vmatprep.mubr.bf16.mxu0 %v13079_v57  ;;  %v15547_v57 = vld [vmem:[%s17435_s18 + $0x614] ss:$8 sps:$4 sm:$0xff]   ;;  %v15572_v44 = vld [vmem:[%s17435_s18 + $0x1650] ss:$8 sps:$4 sm:$0xff]   ;;  %v15577_v53 = vld [vmem:[%s17435_s18 + $0x664] ss:$8 sps:$4 sm:$0xff]  }
 0x25b   : > { %10040 = vmatpush1.bf16.msra.mxu1 %v15485_v45  ;;  %v1643_v45 = vsel %vm18277_vm3, %v968_v46, 0  ;;  %v1144_v54 = vld [vmem:[%s17433_s10 + $0x928] sm:$0xff] }
 0x25c   : > { %11368 = vmatpush1.bf16.msra.mxu0 %v15488_v56  ;;  %10041 = vmatprep.subr.bf16.mxu1 %v15493_v63  ;;  %v15539_v56 = vld [vmem:[%s17435_s18 + $0x600] ss:$8 sps:$4 sm:$0xff]   ;;  %v12889_v63 = vcombine.high %v1611_v55, %v1643_v45 }
 0x25d   : > { %11369 = vmatprep.subr.bf16.mxu0 %v15496_v13  ;;  %v984_v13 = vld [vmem:[%s17433_s10 + $0x428] sm:$0xff] }
 0x25e   : > { %10015 = vmatmul.mubr.bf16.gmra.mrb[16].mxu1 %v13046_v0  ;;  %v1016_v0 = vld [vmem:[%s17433_s10 + $0x528] sm:$0xff] }
 0x25f   : > { %11343 = vmatmul.mubr.bf16.gmra.mrb[16].mxu0 %v13078_v2  ;;  %10042 = vmatpush1.bf16.msra.mxu1 %v15491_v1  ;;  %v1000_v2 = vld [vmem:[%s17433_s10 + $0x4a8] sm:$0xff]  ;;  %v12888_v1 = vcombine.low %v1611_v55, %v1643_v45 }
 0x260   : > { %11370 = vmatpush1.bf16.msra.mxu0 %v15494_v8  ;;  %10043 = vmatprep.subr.bf16.mxu1 %v15499_v9  ;;  %v1659_v8 = vsel %vm18270_vm2, %v984_v13, 0  ;;  %v1691_v9 = vsel %vm18270_vm2, %v1016_v0, 0  ;;  %v1128_v55 = vld [vmem:[%s17433_s10 + $0x8a8] sm:$0xff]  ;;  %v1819_v13 = vsel %vm18270_vm2, %v1144_v54, 0 }
 0x261   : > { %11371 = vmatprep.subr.bf16.mxu0 %v15502_v11  ;;  %10057 = vmatprep.mubr.bf16.mxu1 %v12793_v10  ;;  %v1675_v11 = vsel %vm18277_vm3, %v1000_v2, 0  ;;  %v1707_v10 = vsel %vm18277_vm3, %v1032_v3, 0  ;;  %v1160_v45 = vld [vmem:[%s17433_s10 + $0x9a8] sm:$0xff]  ;;  %v1803_v0 = vsel %vm18277_vm3, %v1128_v55, 0  ;;  %v15583_v3 = vld [vmem:[%s17435_s18 + $0x674] ss:$8 sps:$4 sm:$0xff]  }
 0x262   : > { %11385 = vmatprep.mubr.bf16.mxu0 %v12825_v12  ;;  %v15551_v12 = vld [vmem:[%s17435_s18 + $0x620] ss:$8 sps:$4 sm:$0xff]   ;;  %v1835_v2 = vsel %vm18277_vm3, %v1160_v45, 0  ;;  %v15631_v55 = vld [vmem:[%s17435_s18 + $0x6f4] ss:$8 sps:$4 sm:$0xff]  }
 0x263   : > { %10044 = vmatpush1.bf16.msra.mxu1 %v15497_v14  ;;  %v15554_v14 = vld [vmem:[%s17435_s18 + $0x1620] ss:$8 sps:$4 sm:$0xff]   ;;  %v15634_v45 = vld [vmem:[%s17435_s18 + $0x16f4] ss:$8 sps:$4 sm:$0xff]  }
 0x264   : > { %11372 = vmatpush1.bf16.msra.mxu0 %v15500_v16  ;;  %10045 = vmatprep.subr.bf16.mxu1 %v15505_v17  ;;  %v15559_v16 = vld [vmem:[%s17435_s18 + $0x634] ss:$8 sps:$4 sm:$0xff]   ;;  %v15626_v54 = vld [vmem:[%s17435_s18 + $0x16e0] ss:$8 sps:$4 sm:$0xff]  }
 0x265   : > { %11373 = vmatprep.subr.bf16.mxu0 %v15508_v19  ;;  %v15562_v17 = vld [vmem:[%s17435_s18 + $0x1634] ss:$8 sps:$4 sm:$0xff]   ;;  %v15557_v19 = vld [vmem:[%s17435_s18 + $0x630] ss:$8 sps:$4 sm:$0xff]  }
 0x267   : > { %10046 = vmatpush1.bf16.msra.mxu1 %v15503_v20  ;;  %v15560_v20 = vld [vmem:[%s17435_s18 + $0x1630] ss:$8 sps:$4 sm:$0xff]  }
 0x268   : > { %11374 = vmatpush1.bf16.msra.mxu0 %v15506_v21  ;;  %10047 = vmatprep.subr.bf16.mxu1 %v15511_v22  ;;  %v12921_v21 = vcombine.high %v1659_v8, %v1691_v9  ;;  %v12953_v22 = vcombine.high %v1675_v11, %v1707_v10 }
 0x269   : > { %11375 = vmatprep.subr.bf16.mxu0 %v15514_v15  ;;  %v15565_v15 = vld [vmem:[%s17435_s18 + $0x644] ss:$8 sps:$4 sm:$0xff]  }
 0x26b   : > { %10048 = vmatpush1.bf16.msra.mxu1 %v15509_v23  ;;  %v1048_v23 = vld [vmem:[%s17433_s10 + $0x628] sm:$0xff] }
 0x26c   : > { %11376 = vmatpush1.bf16.msra.mxu0 %v15512_v24  ;;  %10049 = vmatprep.subr.bf16.mxu1 %v15517_v25  ;;  %v1080_v24 = vld [vmem:[%s17433_s10 + $0x728] sm:$0xff] }
 0x26d   : > { %11377 = vmatprep.subr.bf16.mxu0 %v15520_v18  ;;  %v1064_v25 = vld [vmem:[%s17433_s10 + $0x6a8] sm:$0xff] }
 0x26e   : > { %v1096_v18 = vld [vmem:[%s17433_s10 + $0x7a8] sm:$0xff] }
 0x26f   : > { %10050 = vmatpush1.bf16.msra.mxu1 %v15515_v26  ;;  %v15568_v26 = vld [vmem:[%s17435_s18 + $0x1644] ss:$8 sps:$4 sm:$0xff]  }
 0x270   : > { %11378 = vmatpush1.bf16.msra.mxu0 %v15518_v27  ;;  %10051 = vmatprep.subr.bf16.mxu1 %v15523_v28  ;;  %v15563_v27 = vld [vmem:[%s17435_s18 + $0x640] ss:$8 sps:$4 sm:$0xff]  }
 0x271   : > { %11379 = vmatprep.subr.bf16.mxu0 %v15526_v30  ;;  %v15566_v28 = vld [vmem:[%s17435_s18 + $0x1640] ss:$8 sps:$4 sm:$0xff]   ;;  %v12920_v30 = vcombine.low %v1659_v8, %v1691_v9  ;;  %v857_v8 = vld [vmem:[%s17433_s10 + $0x30] sm:$0xff] }
 0x272   : > { %v889_v9 = vld [vmem:[%s17433_s10 + $0x130] sm:$0xff] }
 0x273   : > { %10052 = vmatpush1.bf16.msra.mxu1 %v15521_v31  ;;  %v12952_v31 = vcombine.low %v1675_v11, %v1707_v10  ;;  %v15589_v11 = vld [vmem:[%s17435_s18 + $0x684] ss:$8 sps:$4 sm:$0xff]   ;;  %v873_v10 = vld [vmem:[%s17433_s10 + $0xb0] sm:$0xff] }
 0x274   : > { %11380 = vmatpush1.bf16.msra.mxu0 %v15524_v32  ;;  %10053 = vmatprep.subr.bf16.mxu1 %v15529_v34  ;;  %v1184_v32 = vadd.s32 1536, %v17476_v43  ;;  %v1185_v34 = vadd.s32 1664, %v17476_v43 }
 0x275   : > { %11381 = vmatprep.subr.bf16.mxu0 %v15532_v35  ;;  %v1723_v35 = vsel %vm18270_vm2, %v1048_v23, 0  ;;  %v15587_v23 = vld [vmem:[%s17435_s18 + $0x680] ss:$8 sps:$4 sm:$0xff]  }
 0x277   : > { %10054 = vmatpush1.bf16.msra.mxu1 %v15527_v36  ;;  %v1755_v36 = vsel %vm18270_vm2, %v1080_v24, 0  ;;  %v15590_v24 = vld [vmem:[%s17435_s18 + $0x1680] ss:$8 sps:$4 sm:$0xff]  }
 0x278   : > { %11382 = vmatpush1.bf16.msra.mxu0 %v15530_v37  ;;  %10055 = vmatprep.subr.bf16.mxu1 %v15535_v39  ;;  %v1739_v37 = vsel %vm18277_vm3, %v1064_v25, 0  ;;  %v1771_v39 = vsel %vm18277_vm3, %v1096_v18, 0  ;;  %v12985_v46 = vcombine.high %v1723_v35, %v1755_v36  ;;  %v15595_v25 = vld [vmem:[%s17435_s18 + $0x694] ss:$8 sps:$4 sm:$0xff]  }
 0x279   : > { %11383 = vmatprep.subr.bf16.mxu0 %v15538_v29  ;;  %v15571_v29 = vld [vmem:[%s17435_s18 + $0x654] ss:$8 sps:$4 sm:$0xff]  }
 0x27a   : > { %v15598_v18 = vld [vmem:[%s17435_s18 + $0x1694] ss:$8 sps:$4 sm:$0xff]  }
 0x27b   : > { %10056 = vmatpush1.bf16.msra.mxu1 %v15533_v40  ;;  %v15574_v40 = vld [vmem:[%s17435_s18 + $0x1654] ss:$8 sps:$4 sm:$0xff]  }
 0x27c   : > { %11384 = vmatpush1.bf16.msra.mxu0 %v15536_v41  ;;  %10108 = vmatprep.subr.bf16.mxu1 %v15541_v47  ;;  %v1216_v41 = vadd.s32 5632, %v17476_v43  ;;  %v13017_v47 = vcombine.high %v1739_v37, %v1771_v39 }
 0x27d   : > { %11436 = vmatprep.subr.bf16.mxu0 %v15544_v49  ;;  %v1112_v49 = vld [vmem:[%s17433_s10 + $0x828] sm:$0xff] }
 0x27e   : > { %10058 = vmatmul.mubr.bf16.vlgmr.msra.gmra.mrb[0].mxu1 %v12792_v51  ;;  %v1250_v51 = vadd.s32 %v17485_v50, %v1184_v32  ;;  %v15604_v32 = vld [vmem:[%s17435_s18 + $0x16a4] ss:$8 sps:$4 sm:$0xff]  }
 0x27f   : > { %11386 = vmatmul.mubr.bf16.vlgmr.msra.gmra.mrb[0].mxu0 %v12824_v52  ;;  %10109 = vmatpush1.bf16.msra.mxu1 %v15539_v56  ;;  %v1251_v52 = vadd.s32 %v17485_v50, %v1185_v34  ;;  %v15580_v56 = vld [vmem:[%s17435_s18 + $0x1664] ss:$8 sps:$4 sm:$0xff]   ;;  %v15599_v34 = vld [vmem:[%s17435_s18 + $0x6a0] ss:$8 sps:$4 sm:$0xff]  }
 0x280   : > { %11437 = vmatpush1.bf16.msra.mxu0 %v15542_v48  ;;  %10110 = vmatprep.subr.bf16.mxu1 %v15547_v57  ;;  %v1282_v48 = vadd.s32 %v17485_v50, %v1216_v41  ;;  %v1283_v57 = vadd.s32 %v17485_v50, %v1217_v42  ;;  %vm1314_vm4 = vcmp.lt.s32.totalorder %v1250_v51, 68970  ;;  %v15616_v41 = vld [vmem:[%s17435_s18 + $0x16c4] ss:$8 sps:$4 sm:$0xff]   ;;  %v15611_v42 = vld [vmem:[%s17435_s18 + $0x6c0] ss:$8 sps:$4 sm:$0xff]  }
 0x281   : > { %11438 = vmatprep.subr.bf16.mxu0 %v15550_v5  ;;  %10067 = vmatprep.mubr.bf16.mxu1 %v12857_v61  ;;  %v15575_v5 = vld [vmem:[%s17435_s18 + $0x660] ss:$8 sps:$4 sm:$0xff]   ;;  %v13016_v61 = vcombine.low %v1739_v37, %v1771_v39  ;;  %vm1315_vm5 = vcmp.lt.s32.totalorder %v1251_v52, 68970  ;;  %v15610_v37 = vld [vmem:[%s17435_s18 + $0x16b4] ss:$8 sps:$4 sm:$0xff]  }
 0x282   : > { %11395 = vmatprep.mubr.bf16.mxu0 %v12889_v63  ;;  %v1787_v63 = vsel %vm18270_vm2, %v1112_v49, 0  ;;  %vm1346_vm6 = vcmp.lt.s32.totalorder %v1282_v48, 68970  ;;  %vm1347_vm7 = vcmp.lt.s32.totalorder %v1283_v57, 68970  ;;  %vm18429_vm8 = vmpackc.low %vm1315_vm5, %vm1314_vm4  ;;  %v15605_v39 = vld [vmem:[%s17435_s18 + $0x6b0] ss:$8 sps:$4 sm:$0xff]  }
 0x283   : > { %10111 = vmatpush1.bf16.msra.mxu1 %v15545_v58  ;;  %v15578_v58 = vld [vmem:[%s17435_s18 + $0x1660] ss:$8 sps:$4 sm:$0xff]   ;;  %vm18438_vm9 = vmpackc.low %vm1347_vm7, %vm1346_vm6  ;;  %v15620_v49 = vld [vmem:[%s17435_s18 + $0x16d0] ss:$8 sps:$4 sm:$0xff]  }
 0x284   : > { %11439 = vmatpush1.bf16.msra.mxu0 %v15548_v60  ;;  %10112 = vmatprep.subr.bf16.mxu1 %v15553_v4  ;;  %v12984_v60 = vcombine.low %v1723_v35, %v1755_v36  ;;  %v15586_v4 = vld [vmem:[%s17435_s18 + $0x1674] ss:$8 sps:$4 sm:$0xff]   ;;  %v15602_v35 = vld [vmem:[%s17435_s18 + $0x16a0] ss:$8 sps:$4 sm:$0xff]   ;;  %v15625_v51 = vld [vmem:[%s17435_s18 + $0x6e4] ss:$8 sps:$4 sm:$0xff]  }
 0x285   : > { %11440 = vmatprep.subr.bf16.mxu0 %v15556_v6  ;;  %v15584_v6 = vld [vmem:[%s17435_s18 + $0x1670] ss:$8 sps:$4 sm:$0xff]   ;;  %v15607_v36 = vld [vmem:[%s17435_s18 + $0x6b4] ss:$8 sps:$4 sm:$0xff]   ;;  %v15628_v52 = vld [vmem:[%s17435_s18 + $0x16e4] ss:$8 sps:$4 sm:$0xff]  }
 0x286   : > { %10068 = vmatmul.mubr.bf16.gmra.mrb[4].mxu1 %v12856_v7  ;;  %v13049_v7 = vcombine.high %v1787_v63, %v1819_v13  ;;  %v15632_v48 = vld [vmem:[%s17435_s18 + $0x16f0] ss:$8 sps:$4 sm:$0xff]  }
 0x287   : > { %11396 = vmatmul.mubr.bf16.gmra.mrb[4].mxu0 %v12888_v1  ;;  %10113 = vmatpush1.bf16.msra.mxu1 %v15551_v12  ;;  %v13081_v1 = vcombine.high %v1803_v0, %v1835_v2  ;;  %v905_v12 = vld [vmem:[%s17433_s10 + $0x1b0] sm:$0xff] }
 0x288   : > { %11441 = vmatpush1.bf16.msra.mxu0 %v15554_v14  ;;  %10114 = vmatprep.subr.bf16.mxu1 %v15559_v16  ;;  %v15592_v16 = vld [vmem:[%s17435_s18 + $0x1684] ss:$8 sps:$4 sm:$0xff]   ;;  %v921_v57 = vld [vmem:[%s17433_s10 + $0x230] sm:$0xff] }
 0x289   : > { %11442 = vmatprep.subr.bf16.mxu0 %v15562_v17  ;;  %10077 = vmatprep.mubr.bf16.mxu1 %v12921_v21  ;;  %v13048_v17 = vcombine.low %v1787_v63, %v1819_v13  ;;  %v18449_v21 = vsel %vm18429_vm8, %v889_v9, 0  ;;  %v15640_v63 = vld [vmem:[%s17435_s18 + $0x1704] ss:$8 sps:$4 sm:$0xff]   ;;  %v985_v9 = vld [vmem:[%s17433_s10 + $0x430] sm:$0xff] }
 0x28a   : > { %11405 = vmatprep.mubr.bf16.mxu0 %v12953_v22  ;;  %v18453_v22 = vsel %vm18438_vm9, %v873_v10, 0  ;;  %v15644_v10 = vld [vmem:[%s17435_s18 + $0x1710] ss:$8 sps:$4 sm:$0xff]  }
 0x28b   : > { %10115 = vmatpush1.bf16.msra.mxu1 %v15557_v19  ;;  %v13080_v19 = vcombine.low %v1803_v0, %v1835_v2  ;;  %v1596_v2 = vsel %vm18429_vm8, %v921_v57, 0  ;;  %v1218_v57 = vadd.s32 5888, %v17476_v43  ;;  %v15677_v14 = vld [vmem:[%s17435_s18 + $0x770] ss:$8 sps:$4 sm:$0xff]  }
 0x28c   : > { %11443 = vmatpush1.bf16.msra.mxu0 %v15560_v20  ;;  %10116 = vmatprep.subr.bf16.mxu1 %v15565_v15  ;;  %v18445_v20 = vsel %vm18429_vm8, %v857_v8, 0  ;;  %v18457_v15 = vsel %vm18438_vm9, %v905_v12, 0  ;;  %v15646_v8 = vld [vmem:[%s17435_s18 + $0x1714] ss:$8 sps:$4 sm:$0xff]  }
 0x28d   : > { %11444 = vmatprep.subr.bf16.mxu0 %v15568_v26  ;;  %v12795_v26 = vcombine.high %v18445_v20, %v18449_v21  ;;  %v12794_v13 = vcombine.low %v18445_v20, %v18449_v21  ;;  %v12826_v0 = vcombine.low %v18453_v22, %v18457_v15  ;;  %v1033_v20 = vld [vmem:[%s17433_s10 + $0x5b0] sm:$0xff]  ;;  %v15649_v21 = vld [vmem:[%s17435_s18 + $0x724] ss:$8 sps:$4 sm:$0xff]  }
 0x28e   : > { %10078 = vmatmul.mubr.bf16.gmra.mrb[8].mxu1 %v12920_v30  ;;  %v15596_v30 = vld [vmem:[%s17435_s18 + $0x1690] ss:$8 sps:$4 sm:$0xff]  }
 0x28f   : > { %11406 = vmatmul.mubr.bf16.gmra.mrb[8].mxu0 %v12952_v31  ;;  %10117 = vmatpush1.bf16.msra.mxu1 %v15563_v27  ;;  %v12827_v27 = vcombine.high %v18453_v22, %v18457_v15  ;;  %v15601_v31 = vld [vmem:[%s17435_s18 + $0x6a4] ss:$8 sps:$4 sm:$0xff]   ;;  %v15647_v15 = vld [vmem:[%s17435_s18 + $0x720] ss:$8 sps:$4 sm:$0xff]  }
 0x290   : > { %11445 = vmatpush1.bf16.msra.mxu0 %v15566_v28  ;;  %10118 = vmatprep.subr.bf16.mxu1 %v15571_v29  ;;  %v15593_v28 = vld [vmem:[%s17435_s18 + $0x690] ss:$8 sps:$4 sm:$0xff]   ;;  %v15652_v22 = vld [vmem:[%s17435_s18 + $0x1724] ss:$8 sps:$4 sm:$0xff]  }
 0x291   : > { %11446 = vmatprep.subr.bf16.mxu0 %v15574_v40  ;;  %10087 = vmatprep.mubr.bf16.mxu1 %v12985_v46  ;;  %v15608_v29 = vld [vmem:[%s17435_s18 + $0x16b0] ss:$8 sps:$4 sm:$0xff]   ;;  %v15613_v40 = vld [vmem:[%s17435_s18 + $0x6c4] ss:$8 sps:$4 sm:$0xff]   ;;  %v15622_v46 = vld [vmem:[%s17435_s18 + $0x16d4] ss:$8 sps:$4 sm:$0xff]  }
 0x292   : > { %11415 = vmatprep.mubr.bf16.mxu0 %v13017_v47  ;;  %v15617_v47 = vld [vmem:[%s17435_s18 + $0x6d0] ss:$8 sps:$4 sm:$0xff]  }
 0x293   : > { %10119 = vmatpush1.bf16.msra.mxu1 %v15569_v33  ;;  %v15614_v33 = vld [vmem:[%s17435_s18 + $0x16c0] ss:$8 sps:$4 sm:$0xff]  }
 0x294   : > { %11447 = vmatpush1.bf16.msra.mxu0 %v15572_v44  ;;  %10120 = vmatprep.subr.bf16.mxu1 %v15577_v53  ;;  %v15619_v44 = vld [vmem:[%s17435_s18 + $0x6d4] ss:$8 sps:$4 sm:$0xff]   ;;  %v15623_v53 = vld [vmem:[%s17435_s18 + $0x6e0] ss:$8 sps:$4 sm:$0xff]  }
 0x295   : > { %11448 = vmatprep.subr.bf16.mxu0 %v15580_v56  ;;  %v15629_v56 = vld [vmem:[%s17435_s18 + $0x6f0] ss:$8 sps:$4 sm:$0xff]  }
 0x296   : > { %10088 = vmatmul.mubr.bf16.gmra.mrb[12].mxu1 %v12984_v60  ;;  %v969_v60 = vld [vmem:[%s17433_s10 + $0x3b0] sm:$0xff] }
 0x297   : > { %11416 = vmatmul.mubr.bf16.gmra.mrb[12].mxu0 %v13016_v61  ;;  %10121 = vmatpush1.bf16.msra.mxu1 %v15575_v5  ;;  %v953_v5 = vld [vmem:[%s17433_s10 + $0x330] sm:$0xff]  ;;  %v15637_v61 = vld [vmem:[%s17435_s18 + $0x704] ss:$8 sps:$4 sm:$0xff]  }
 0x298   : > { %11449 = vmatpush1.bf16.msra.mxu0 %v15578_v58  ;;  %10122 = vmatprep.subr.bf16.mxu1 %v15583_v3  ;;  %v937_v58 = vld [vmem:[%s17433_s10 + $0x2b0] sm:$0xff]  ;;  %v1628_v3 = vsel %vm18429_vm8, %v953_v5, 0  ;;  %v1219_v5 = vadd.s32 6016, %v17476_v43 }
 0x299   : > { %11450 = vmatprep.subr.bf16.mxu0 %v15586_v4  ;;  %10097 = vmatprep.mubr.bf16.mxu1 %v13049_v7  ;;  %v1612_v4 = vsel %vm18438_vm9, %v937_v58, 0  ;;  %v15638_v7 = vld [vmem:[%s17435_s18 + $0x1700] ss:$8 sps:$4 sm:$0xff]   ;;  %v12859_v12 = vcombine.high %v1596_v2, %v1628_v3  ;;  %v15665_v58 = vld [vmem:[%s17435_s18 + $0x750] ss:$8 sps:$4 sm:$0xff]  }
 0x29a   : > { %11425 = vmatprep.mubr.bf16.mxu0 %v13081_v1  ;;  %v15643_v1 = vld [vmem:[%s17435_s18 + $0x714] ss:$8 sps:$4 sm:$0xff]  }
 0x29b   : > { %10123 = vmatpush1.bf16.msra.mxu1 %v15581_v59  ;;  %v1644_v59 = vsel %vm18438_vm9, %v969_v60, 0  ;;  %v15668_v60 = vld [vmem:[%s17435_s18 + $0x1750] ss:$8 sps:$4 sm:$0xff]  }
 0x29c   : > { %11451 = vmatpush1.bf16.msra.mxu0 %v15584_v6  ;;  %10124 = vmatprep.subr.bf16.mxu1 %v15589_v11  ;;  %v15635_v6 = vld [vmem:[%s17435_s18 + $0x700] ss:$8 sps:$4 sm:$0xff]   ;;  %v15641_v11 = vld [vmem:[%s17435_s18 + $0x710] ss:$8 sps:$4 sm:$0xff]  }
 0x29d   : > { %11452 = vmatprep.subr.bf16.mxu0 %v15592_v16  ;;  %v12891_v16 = vcombine.high %v1612_v4, %v1644_v59 }
 0x29e   : > { %10098 = vmatmul.mubr.bf16.gmra.mrb[16].mxu1 %v13048_v17  ;;  %v1017_v17 = vld [vmem:[%s17433_s10 + $0x530] sm:$0xff] }
 0x29f   : > { %11426 = vmatmul.mubr.bf16.gmra.mrb[16].mxu0 %v13080_v19  ;;  %10125 = vmatpush1.bf16.msra.mxu1 %v15587_v23  ;;  %v1001_v19 = vld [vmem:[%s17433_s10 + $0x4b0] sm:$0xff]  ;;  %v12858_v23 = vcombine.low %v1596_v2, %v1628_v3 }
 0x2a0   : > { %11453 = vmatpush1.bf16.msra.mxu0 %v15590_v24  ;;  %10126 = vmatprep.subr.bf16.mxu1 %v15595_v25  ;;  %v1660_v24 = vsel %vm18429_vm8, %v985_v9, 0  ;;  %v12890_v25 = vcombine.low %v1612_v4, %v1644_v59  ;;  %v1129_v3 = vld [vmem:[%s17433_s10 + $0x8b0] sm:$0xff]  ;;  %v15673_v59 = vld [vmem:[%s17435_s18 + $0x764] ss:$8 sps:$4 sm:$0xff]  }
 0x2a1   : > { %11454 = vmatprep.subr.bf16.mxu0 %v15598_v18  ;;  %10140 = vmatprep.mubr.bf16.mxu1 %v12795_v26  ;;  %v1692_v18 = vsel %vm18429_vm8, %v1017_v17, 0  ;;  %v1676_v26 = vsel %vm18438_vm9, %v1001_v19, 0  ;;  %v1161_v4 = vld [vmem:[%s17433_s10 + $0x9b0] sm:$0xff]  ;;  %v15674_v19 = vld [vmem:[%s17435_s18 + $0x1760] ss:$8 sps:$4 sm:$0xff]  }
 0x2a2   : > { %11468 = vmatprep.mubr.bf16.mxu0 %v12827_v27  ;;  %v1708_v27 = vsel %vm18438_vm9, %v1033_v20, 0  ;;  %v1836_v17 = vsel %vm18438_vm9, %v1161_v4, 0  ;;  %v15679_v20 = vld [vmem:[%s17435_s18 + $0x774] ss:$8 sps:$4 sm:$0xff]  }
 0x2a3   : > { %10127 = vmatpush1.bf16.msra.mxu1 %v15593_v28  ;;  %v15650_v28 = vld [vmem:[%s17435_s18 + $0x1720] ss:$8 sps:$4 sm:$0xff]   ;;  %v15727_v4 = vld [vmem:[%s17435_s18 + $0x7f4] ss:$8 sps:$4 sm:$0xff]  }
 0x2a4   : > { %11455 = vmatpush1.bf16.msra.mxu0 %v15596_v30  ;;  %10128 = vmatprep.subr.bf16.mxu1 %v15601_v31  ;;  %v15655_v30 = vld [vmem:[%s17435_s18 + $0x734] ss:$8 sps:$4 sm:$0xff]  }
 0x2a5   : > { %11456 = vmatprep.subr.bf16.mxu0 %v15604_v32  ;;  %v15658_v31 = vld [vmem:[%s17435_s18 + $0x1734] ss:$8 sps:$4 sm:$0xff]  }
 0x2a6   : > { %v1049_v32 = vld [vmem:[%s17433_s10 + $0x630] sm:$0xff] }
 0x2a7   : > { %10129 = vmatpush1.bf16.msra.mxu1 %v15599_v34  ;;  %v15653_v34 = vld [vmem:[%s17435_s18 + $0x730] ss:$8 sps:$4 sm:$0xff]  }
 0x2a8   : > { %11457 = vmatpush1.bf16.msra.mxu0 %v15602_v35  ;;  %10130 = vmatprep.subr.bf16.mxu1 %v15607_v36  ;;  %v15656_v35 = vld [vmem:[%s17435_s18 + $0x1730] ss:$8 sps:$4 sm:$0xff]   ;;  %v12923_v36 = vcombine.high %v1660_v24, %v1692_v18 }
 0x2a9   : > { %11458 = vmatprep.subr.bf16.mxu0 %v15610_v37  ;;  %v12955_v37 = vcombine.high %v1676_v26, %v1708_v27 }
 0x2ab   : > { %10131 = vmatpush1.bf16.msra.mxu1 %v15605_v39  ;;  %v1081_v39 = vld [vmem:[%s17433_s10 + $0x730] sm:$0xff] }
 0x2ac   : > { %11459 = vmatpush1.bf16.msra.mxu0 %v15608_v29  ;;  %10132 = vmatprep.subr.bf16.mxu1 %v15613_v40  ;;  %v1065_v29 = vld [vmem:[%s17433_s10 + $0x6b0] sm:$0xff] }
 0x2ad   : > { %11460 = vmatprep.subr.bf16.mxu0 %v15616_v41  ;;  %v1097_v40 = vld [vmem:[%s17433_s10 + $0x7b0] sm:$0xff]  ;;  %v15661_v41 = vld [vmem:[%s17435_s18 + $0x744] ss:$8 sps:$4 sm:$0xff]  }
 0x2af   : > { %10133 = vmatpush1.bf16.msra.mxu1 %v15611_v42  ;;  %v15664_v42 = vld [vmem:[%s17435_s18 + $0x1744] ss:$8 sps:$4 sm:$0xff]  }
 0x2b0   : > { %11461 = vmatpush1.bf16.msra.mxu0 %v15614_v33  ;;  %10134 = vmatprep.subr.bf16.mxu1 %v15619_v44  ;;  %v15659_v33 = vld [vmem:[%s17435_s18 + $0x740] ss:$8 sps:$4 sm:$0xff]   ;;  %v12922_v44 = vcombine.low %v1660_v24, %v1692_v18  ;;  %v858_v24 = vld [vmem:[%s17433_s10 + $0x38] sm:$0xff] }
 0x2b1   : > { %11462 = vmatprep.subr.bf16.mxu0 %v15622_v46  ;;  %v18546_v46 = vsel %vm18429_vm8, %v1049_v32, 0  ;;  %v874_v18 = vld [vmem:[%s17433_s10 + $0xb8] sm:$0xff] }
 0x2b3   : > { %10135 = vmatpush1.bf16.msra.mxu1 %v15617_v47  ;;  %v1186_v47 = vadd.s32 1792, %v17476_v43 }
 0x2b4   : > { %11463 = vmatpush1.bf16.msra.mxu0 %v15620_v49  ;;  %10136 = vmatprep.subr.bf16.mxu1 %v15625_v51  ;;  %v1187_v49 = vadd.s32 1920, %v17476_v43  ;;  %v12954_v51 = vcombine.low %v1676_v26, %v1708_v27  ;;  %v906_v26 = vld [vmem:[%s17433_s10 + $0x1b8] sm:$0xff] }
 0x2b5   : > { %11464 = vmatprep.subr.bf16.mxu0 %v15628_v52  ;;  %v1756_v52 = vsel %vm18429_vm8, %v1081_v39, 0  ;;  %v15683_v39 = vld [vmem:[%s17435_s18 + $0x780] ss:$8 sps:$4 sm:$0xff]   ;;  %v15773_v27 = vld [vmem:[%s17435_s18 + $0x870] ss:$8 sps:$4 sm:$0xff]  }
 0x2b6   : > { %v1253_v2 = vadd.s32 %v17485_v50, %v1187_v49  ;;  %v12986_v9 = vcombine.low %v18546_v46, %v1756_v52  ;;  %v15700_v49 = vld [vmem:[%s17435_s18 + $0x17a4] ss:$8 sps:$4 sm:$0xff]  }
 0x2b7   : > { %10137 = vmatpush1.bf16.msra.mxu1 %v15623_v53  ;;  %v1740_v53 = vsel %vm18438_vm9, %v1065_v29, 0  ;;  %v15686_v29 = vld [vmem:[%s17435_s18 + $0x1780] ss:$8 sps:$4 sm:$0xff]  }
 0x2b8   : > { %11465 = vmatpush1.bf16.msra.mxu0 %v15626_v54  ;;  %10138 = vmatprep.subr.bf16.mxu1 %v15631_v55  ;;  %v1772_v54 = vsel %vm18438_vm9, %v1097_v40, 0  ;;  %v15662_v55 = vld [vmem:[%s17435_s18 + $0x1740] ss:$8 sps:$4 sm:$0xff]   ;;  %vm1317_vm11 = vcmp.lt.s32.totalorder %v1253_v2, 68970  ;;  %v15691_v40 = vld [vmem:[%s17435_s18 + $0x794] ss:$8 sps:$4 sm:$0xff]  }
 0x2b9   : > { %11466 = vmatprep.subr.bf16.mxu0 %v15634_v45  ;;  %v15667_v45 = vld [vmem:[%s17435_s18 + $0x754] ss:$8 sps:$4 sm:$0xff]   ;;  %v15719_v2 = vld [vmem:[%s17435_s18 + $0x7e0] ss:$8 sps:$4 sm:$0xff]  }
 0x2bb   : > { %10139 = vmatpush1.bf16.msra.mxu1 %v15629_v56  ;;  %v15670_v56 = vld [vmem:[%s17435_s18 + $0x1754] ss:$8 sps:$4 sm:$0xff]  }
 0x2bc   : > { %11467 = vmatpush1.bf16.msra.mxu0 %v15632_v48  ;;  %10191 = vmatprep.subr.bf16.mxu1 %v15637_v61  ;;  %v1113_v48 = vld [vmem:[%s17433_s10 + $0x830] sm:$0xff]  ;;  %v12987_v61 = vcombine.high %v18546_v46, %v1756_v52  ;;  %v15698_v52 = vld [vmem:[%s17435_s18 + $0x17a0] ss:$8 sps:$4 sm:$0xff]  }
 0x2bd   : > { %11519 = vmatprep.subr.bf16.mxu0 %v15640_v63  ;;  %v13019_v63 = vcombine.high %v1740_v53, %v1772_v54  ;;  %v15692_v46 = vld [vmem:[%s17435_s18 + $0x1790] ss:$8 sps:$4 sm:$0xff]  }
 0x2be   : > { %10141 = vmatmul.mubr.bf16.vlgmr.msra.gmra.mrb[0].mxu1 %v12794_v13  ;;  %v1145_v13 = vld [vmem:[%s17433_s10 + $0x930] sm:$0xff] }
 0x2bf   : > { %11469 = vmatmul.mubr.bf16.vlgmr.msra.gmra.mrb[0].mxu0 %v12826_v0  ;;  %10192 = vmatpush1.bf16.msra.mxu1 %v15635_v6  ;;  %v1252_v0 = vadd.s32 %v17485_v50, %v1186_v47  ;;  %v15676_v6 = vld [vmem:[%s17435_s18 + $0x1764] ss:$8 sps:$4 sm:$0xff]  }
 0x2c0   : > { %11520 = vmatpush1.bf16.msra.mxu0 %v15638_v7  ;;  %10193 = vmatprep.subr.bf16.mxu1 %v15643_v1  ;;  %v1284_v7 = vadd.s32 %v17485_v50, %v1218_v57  ;;  %v1285_v1 = vadd.s32 %v17485_v50, %v1219_v5  ;;  %v15697_v47 = vld [vmem:[%s17435_s18 + $0x7a4] ss:$8 sps:$4 sm:$0xff]   ;;  %v15707_v57 = vld [vmem:[%s17435_s18 + $0x7c0] ss:$8 sps:$4 sm:$0xff]  }
 0x2c1   : > { %11521 = vmatprep.subr.bf16.mxu0 %v15646_v8  ;;  %10150 = vmatprep.mubr.bf16.mxu1 %v12859_v12  ;;  %v15671_v8 = vld [vmem:[%s17435_s18 + $0x760] ss:$8 sps:$4 sm:$0xff]   ;;  %vm1316_vm10 = vcmp.lt.s32.totalorder %v1252_v0, 68970  ;;  %v1820_v12 = vsel %vm18429_vm8, %v1145_v13, 0  ;;  %v15721_v13 = vld [vmem:[%s17435_s18 + $0x7e4] ss:$8 sps:$4 sm:$0xff]  }
 0x2c2   : > { %11478 = vmatprep.mubr.bf16.mxu0 %v12891_v16  ;;  %v1804_v16 = vsel %vm18438_vm9, %v1129_v3, 0  ;;  %vm18587_vm12 = vmpackc.low %vm1317_vm11, %vm1316_vm10  ;;  %vm1348_vm13 = vcmp.lt.s32.totalorder %v1284_v7, 68970  ;;  %vm1349_vm14 = vcmp.lt.s32.totalorder %v1285_v1, 68970  ;;  %v15710_v5 = vld [vmem:[%s17435_s18 + $0x17c0] ss:$8 sps:$4 sm:$0xff]   ;;  %v922_v1 = vld [vmem:[%s17433_s10 + $0x238] sm:$0xff] }
 0x2c3   : > { %10194 = vmatpush1.bf16.msra.mxu1 %v15641_v11  ;;  %v1788_v11 = vsel %vm18429_vm8, %v1113_v48, 0  ;;  %vm18597_vm15 = vmpackc.low %vm1349_vm14, %vm1348_vm13  ;;  %v13082_v32 = vcombine.low %v1804_v16, %v1836_v17  ;;  %v15712_v48 = vld [vmem:[%s17435_s18 + $0x17c4] ss:$8 sps:$4 sm:$0xff]   ;;  %v15722_v3 = vld [vmem:[%s17435_s18 + $0x17e0] ss:$8 sps:$4 sm:$0xff]  }
 0x2c4   : > { %11522 = vmatpush1.bf16.msra.mxu0 %v15644_v10  ;;  %10195 = vmatprep.subr.bf16.mxu1 %v15649_v21  ;;  %v13018_v10 = vcombine.low %v1740_v53, %v1772_v54  ;;  %v15682_v21 = vld [vmem:[%s17435_s18 + $0x1774] ss:$8 sps:$4 sm:$0xff]   ;;  %v15724_v0 = vld [vmem:[%s17435_s18 + $0x17e4] ss:$8 sps:$4 sm:$0xff]   ;;  %v15728_v7 = vld [vmem:[%s17435_s18 + $0x17f0] ss:$8 sps:$4 sm:$0xff]  }
 0x2c5   : > { %11523 = vmatprep.subr.bf16.mxu0 %v15652_v22  ;;  %v15680_v22 = vld [vmem:[%s17435_s18 + $0x1770] ss:$8 sps:$4 sm:$0xff]   ;;  %v15703_v53 = vld [vmem:[%s17435_s18 + $0x7b4] ss:$8 sps:$4 sm:$0xff]  }
 0x2c6   : > { %10151 = vmatmul.mubr.bf16.gmra.mrb[4].mxu1 %v12858_v23  ;;  %v13083_v23 = vcombine.high %v1804_v16, %v1836_v17  ;;  %v15706_v54 = vld [vmem:[%s17435_s18 + $0x17b4] ss:$8 sps:$4 sm:$0xff]  }
 0x2c7   : > { %11479 = vmatmul.mubr.bf16.gmra.mrb[4].mxu0 %v12890_v25  ;;  %10196 = vmatpush1.bf16.msra.mxu1 %v15647_v15  ;;  %v13051_v15 = vcombine.high %v1788_v11, %v1820_v12  ;;  %v890_v25 = vld [vmem:[%s17433_s10 + $0x138] sm:$0xff] }
 0x2c8   : > { %11524 = vmatpush1.bf16.msra.mxu0 %v15650_v28  ;;  %10197 = vmatprep.subr.bf16.mxu1 %v15655_v30  ;;  %v15685_v28 = vld [vmem:[%s17435_s18 + $0x784] ss:$8 sps:$4 sm:$0xff]  }
 0x2c9   : > { %11525 = vmatprep.subr.bf16.mxu0 %v15658_v31  ;;  %10160 = vmatprep.mubr.bf16.mxu1 %v12923_v36  ;;  %v15688_v30 = vld [vmem:[%s17435_s18 + $0x1784] ss:$8 sps:$4 sm:$0xff]   ;;  %v13050_v31 = vcombine.low %v1788_v11, %v1820_v12  ;;  %v18613_v36 = vsel %vm18597_vm15, %v874_v18, 0  ;;  %v970_v11 = vld [vmem:[%s17433_s10 + $0x3b8] sm:$0xff] }
 0x2ca   : > { %11488 = vmatprep.mubr.bf16.mxu0 %v12955_v37  ;;  %v18617_v37 = vsel %vm18597_vm15, %v906_v26, 0  ;;  %v15736_v12 = vld [vmem:[%s17435_s18 + $0x1804] ss:$8 sps:$4 sm:$0xff]   ;;  %v15737_v18 = vld [vmem:[%s17435_s18 + $0x810] ss:$8 sps:$4 sm:$0xff]  }
 0x2cb   : > { %10198 = vmatpush1.bf16.msra.mxu1 %v15653_v34  ;;  %v18605_v34 = vsel %vm18587_vm12, %v858_v24, 0  ;;  %v12828_v17 = vcombine.low %v18613_v36, %v18617_v37  ;;  %v15742_v24 = vld [vmem:[%s17435_s18 + $0x1814] ss:$8 sps:$4 sm:$0xff]   ;;  %v15740_v26 = vld [vmem:[%s17435_s18 + $0x1810] ss:$8 sps:$4 sm:$0xff]  }
 0x2cc   : > { %11526 = vmatpush1.bf16.msra.mxu0 %v15656_v35  ;;  %10199 = vmatprep.subr.bf16.mxu1 %v15661_v41  ;;  %v18609_v35 = vsel %vm18587_vm12, %v890_v25, 0  ;;  %v15694_v41 = vld [vmem:[%s17435_s18 + $0x1794] ss:$8 sps:$4 sm:$0xff]  }
 0x2cd   : > { %11527 = vmatprep.subr.bf16.mxu0 %v15664_v42  ;;  %v12797_v42 = vcombine.high %v18605_v34, %v18609_v35  ;;  %v12796_v16 = vcombine.low %v18605_v34, %v18609_v35  ;;  %v986_v25 = vld [vmem:[%s17433_s10 + $0x438] sm:$0xff]  ;;  %v15745_v35 = vld [vmem:[%s17435_s18 + $0x824] ss:$8 sps:$4 sm:$0xff]  }
 0x2ce   : > { %10161 = vmatmul.mubr.bf16.gmra.mrb[8].mxu1 %v12922_v44  ;;  %v15689_v44 = vld [vmem:[%s17435_s18 + $0x790] ss:$8 sps:$4 sm:$0xff]  }
 0x2cf   : > { %11489 = vmatmul.mubr.bf16.gmra.mrb[8].mxu0 %v12954_v51  ;;  %10200 = vmatpush1.bf16.msra.mxu1 %v15659_v33  ;;  %v12829_v33 = vcombine.high %v18613_v36, %v18617_v37  ;;  %v15695_v51 = vld [vmem:[%s17435_s18 + $0x7a0] ss:$8 sps:$4 sm:$0xff]   ;;  %v1034_v34 = vld [vmem:[%s17433_s10 + $0x5b8] sm:$0xff]  ;;  %v15748_v36 = vld [vmem:[%s17435_s18 + $0x1824] ss:$8 sps:$4 sm:$0xff]  }
 0x2d0   : > { %11528 = vmatpush1.bf16.msra.mxu0 %v15662_v55  ;;  %10201 = vmatprep.subr.bf16.mxu1 %v15667_v45  ;;  %v15701_v55 = vld [vmem:[%s17435_s18 + $0x7b0] ss:$8 sps:$4 sm:$0xff]   ;;  %v15743_v37 = vld [vmem:[%s17435_s18 + $0x820] ss:$8 sps:$4 sm:$0xff]  }
 0x2d1   : > { %11529 = vmatprep.subr.bf16.mxu0 %v15670_v56  ;;  %10170 = vmatprep.mubr.bf16.mxu1 %v12987_v61  ;;  %v15704_v45 = vld [vmem:[%s17435_s18 + $0x17b0] ss:$8 sps:$4 sm:$0xff]   ;;  %v15709_v56 = vld [vmem:[%s17435_s18 + $0x7c4] ss:$8 sps:$4 sm:$0xff]  }
 0x2d2   : > { %11498 = vmatprep.mubr.bf16.mxu0 %v13019_v63  ;;  %v15713_v61 = vld [vmem:[%s17435_s18 + $0x7d0] ss:$8 sps:$4 sm:$0xff]  }
 0x2d3   : > { %10202 = vmatpush1.bf16.msra.mxu1 %v15665_v58  ;;  %v15715_v58 = vld [vmem:[%s17435_s18 + $0x7d4] ss:$8 sps:$4 sm:$0xff]   ;;  %v15716_v63 = vld [vmem:[%s17435_s18 + $0x17d0] ss:$8 sps:$4 sm:$0xff]  }
 0x2d4   : > { %11530 = vmatpush1.bf16.msra.mxu0 %v15668_v60  ;;  %10203 = vmatprep.subr.bf16.mxu1 %v15673_v59  ;;  %v15718_v60 = vld [vmem:[%s17435_s18 + $0x17d4] ss:$8 sps:$4 sm:$0xff]  }
 0x2d5   : > { %11531 = vmatprep.subr.bf16.mxu0 %v15676_v6  ;;  %v15730_v59 = vld [vmem:[%s17435_s18 + $0x17f4] ss:$8 sps:$4 sm:$0xff]   ;;  %v15725_v6 = vld [vmem:[%s17435_s18 + $0x7f0] ss:$8 sps:$4 sm:$0xff]  }
 0x2d6   : > { %10171 = vmatmul.mubr.bf16.gmra.mrb[12].mxu1 %v12986_v9  ;;  %v938_v9 = vld [vmem:[%s17433_s10 + $0x2b8] sm:$0xff] }
 0x2d7   : > { %11499 = vmatmul.mubr.bf16.gmra.mrb[12].mxu0 %v13018_v10  ;;  %10204 = vmatpush1.bf16.msra.mxu1 %v15671_v8  ;;  %v954_v8 = vld [vmem:[%s17433_s10 + $0x338] sm:$0xff]  ;;  %v15733_v10 = vld [vmem:[%s17435_s18 + $0x804] ss:$8 sps:$4 sm:$0xff]  }
 0x2d8   : > { %11532 = vmatpush1.bf16.msra.mxu0 %v15674_v19  ;;  %10205 = vmatprep.subr.bf16.mxu1 %v15679_v20  ;;  %v1597_v19 = vsel %vm18587_vm12, %v922_v1, 0  ;;  %v1629_v20 = vsel %vm18587_vm12, %v954_v8, 0  ;;  %v15766_v1 = vld [vmem:[%s17435_s18 + $0x1854] ss:$8 sps:$4 sm:$0xff]  }
 0x2d9   : > { %11533 = vmatprep.subr.bf16.mxu0 %v15682_v21  ;;  %10180 = vmatprep.mubr.bf16.mxu1 %v13051_v15  ;;  %v1613_v21 = vsel %vm18597_vm15, %v938_v9, 0  ;;  %v15734_v15 = vld [vmem:[%s17435_s18 + $0x1800] ss:$8 sps:$4 sm:$0xff]   ;;  %v1114_v8 = vld [vmem:[%s17433_s10 + $0x838] sm:$0xff] }
 0x2da   : > { %11508 = vmatprep.mubr.bf16.mxu0 %v13083_v23  ;;  %v15739_v23 = vld [vmem:[%s17435_s18 + $0x814] ss:$8 sps:$4 sm:$0xff]  }
 0x2db   : > { %10206 = vmatpush1.bf16.msra.mxu1 %v15677_v14  ;;  %v1645_v14 = vsel %vm18597_vm15, %v970_v11, 0 }
 0x2dc   : > { %11534 = vmatpush1.bf16.msra.mxu0 %v15680_v22  ;;  %10207 = vmatprep.subr.bf16.mxu1 %v15685_v28  ;;  %v15731_v22 = vld [vmem:[%s17435_s18 + $0x800] ss:$8 sps:$4 sm:$0xff]   ;;  %v12861_v28 = vcombine.high %v1597_v19, %v1629_v20 }
 0x2dd   : > { %11535 = vmatprep.subr.bf16.mxu0 %v15688_v30  ;;  %v12893_v30 = vcombine.high %v1613_v21, %v1645_v14 }
 0x2de   : > { %10181 = vmatmul.mubr.bf16.gmra.mrb[16].mxu1 %v13050_v31  ;;  %v1018_v31 = vld [vmem:[%s17433_s10 + $0x538] sm:$0xff] }
 0x2df   : > { %11509 = vmatmul.mubr.bf16.gmra.mrb[16].mxu0 %v13082_v32  ;;  %10208 = vmatpush1.bf16.msra.mxu1 %v15683_v39  ;;  %v1002_v32 = vld [vmem:[%s17433_s10 + $0x4b8] sm:$0xff]  ;;  %v12860_v39 = vcombine.low %v1597_v19, %v1629_v20 }
 0x2e0   : > { %11536 = vmatpush1.bf16.msra.mxu0 %v15686_v29  ;;  %10209 = vmatprep.subr.bf16.mxu1 %v15691_v40  ;;  %v1661_v29 = vsel %vm18587_vm12, %v986_v25, 0  ;;  %v12892_v40 = vcombine.low %v1613_v21, %v1645_v14  ;;  %v1146_v19 = vld [vmem:[%s17433_s10 + $0x938] sm:$0xff]  ;;  %v15769_v14 = vld [vmem:[%s17435_s18 + $0x864] ss:$8 sps:$4 sm:$0xff]   ;;  %v15770_v25 = vld [vmem:[%s17435_s18 + $0x1860] ss:$8 sps:$4 sm:$0xff]  }
 0x2e1   : > { %11537 = vmatprep.subr.bf16.mxu0 %v15694_v41  ;;  %10223 = vmatprep.mubr.bf16.mxu1 %v12797_v42  ;;  %v1693_v41 = vsel %vm18587_vm12, %v1018_v31, 0  ;;  %v1677_v42 = vsel %vm18597_vm15, %v1002_v32, 0 }
 0x2e2   : > { %11551 = vmatprep.mubr.bf16.mxu0 %v12829_v33  ;;  %v1709_v33 = vsel %vm18597_vm15, %v1034_v34, 0  ;;  %v15775_v34 = vld [vmem:[%s17435_s18 + $0x874] ss:$8 sps:$4 sm:$0xff]  }
 0x2e3   : > { %10210 = vmatpush1.bf16.msra.mxu1 %v15689_v44  ;;  %v15746_v44 = vld [vmem:[%s17435_s18 + $0x1820] ss:$8 sps:$4 sm:$0xff]  }
 0x2e4   : > { %11538 = vmatpush1.bf16.msra.mxu0 %v15692_v46  ;;  %10211 = vmatprep.subr.bf16.mxu1 %v15697_v47  ;;  %v15751_v46 = vld [vmem:[%s17435_s18 + $0x834] ss:$8 sps:$4 sm:$0xff]  }
 0x2e5   : > { %11539 = vmatprep.subr.bf16.mxu0 %v15700_v49  ;;  %v15754_v47 = vld [vmem:[%s17435_s18 + $0x1834] ss:$8 sps:$4 sm:$0xff]  }
 0x2e6   : > { %v1050_v49 = vld [vmem:[%s17433_s10 + $0x638] sm:$0xff] }
 0x2e7   : > { %10212 = vmatpush1.bf16.msra.mxu1 %v15695_v51  ;;  %v15749_v51 = vld [vmem:[%s17435_s18 + $0x830] ss:$8 sps:$4 sm:$0xff]  }
 0x2e8   : > { %11540 = vmatpush1.bf16.msra.mxu0 %v15698_v52  ;;  %10213 = vmatprep.subr.bf16.mxu1 %v15703_v53  ;;  %v15752_v52 = vld [vmem:[%s17435_s18 + $0x1830] ss:$8 sps:$4 sm:$0xff]   ;;  %v12925_v53 = vcombine.high %v1661_v29, %v1693_v41 }
 0x2e9   : > { %11541 = vmatprep.subr.bf16.mxu0 %v15706_v54  ;;  %v12957_v54 = vcombine.high %v1677_v42, %v1709_v33 }
 0x2eb   : > { %10214 = vmatpush1.bf16.msra.mxu1 %v15701_v55  ;;  %v1082_v55 = vld [vmem:[%s17433_s10 + $0x738] sm:$0xff] }
 0x2ec   : > { %11542 = vmatpush1.bf16.msra.mxu0 %v15704_v45  ;;  %10215 = vmatprep.subr.bf16.mxu1 %v15709_v56  ;;  %v15757_v45 = vld [vmem:[%s17435_s18 + $0x844] ss:$8 sps:$4 sm:$0xff]   ;;  %v1066_v56 = vld [vmem:[%s17433_s10 + $0x6b8] sm:$0xff] }
 0x2ed   : > { %11543 = vmatprep.subr.bf16.mxu0 %v15712_v48  ;;  %v1098_v48 = vld [vmem:[%s17433_s10 + $0x7b8] sm:$0xff] }
 0x2ef   : > { %10216 = vmatpush1.bf16.msra.mxu1 %v15707_v57  ;;  %v15760_v57 = vld [vmem:[%s17435_s18 + $0x1844] ss:$8 sps:$4 sm:$0xff]  }
 0x2f0   : > { %11544 = vmatpush1.bf16.msra.mxu0 %v15710_v5  ;;  %10217 = vmatprep.subr.bf16.mxu1 %v15715_v58  ;;  %v1188_v5 = vadd.s32 2048, %v17476_v43  ;;  %v1189_v58 = vadd.s32 2176, %v17476_v43 }
 0x2f1   : > { %11545 = vmatprep.subr.bf16.mxu0 %v15718_v60  ;;  %v15755_v60 = vld [vmem:[%s17435_s18 + $0x840] ss:$8 sps:$4 sm:$0xff]  }
 0x2f2   : > { %v1254_v9 = vadd.s32 %v17485_v50, %v1188_v5  ;;  %v1255_v11 = vadd.s32 %v17485_v50, %v1189_v58  ;;  %v15785_v58 = vld [vmem:[%s17435_s18 + $0x890] ss:$8 sps:$4 sm:$0xff]  }
 0x2f3   : > { %10218 = vmatpush1.bf16.msra.mxu1 %v15713_v61  ;;  %v12924_v61 = vcombine.low %v1661_v29, %v1693_v41  ;;  %v891_v41 = vld [vmem:[%s17433_s10 + $0x140] sm:$0xff] }
 0x2f4   : > { %11546 = vmatpush1.bf16.msra.mxu0 %v15716_v63  ;;  %10219 = vmatprep.subr.bf16.mxu1 %v15721_v13  ;;  %v1725_v63 = vsel %vm18587_vm12, %v1050_v49, 0  ;;  %v1220_v13 = vadd.s32 6144, %v17476_v43  ;;  %vm1318_vm0 = vcmp.lt.s32.totalorder %v1254_v9, 68970  ;;  %vm1319_vm1 = vcmp.lt.s32.totalorder %v1255_v11, 68970  ;;  %v15811_v9 = vld [vmem:[%s17435_s18 + $0x8d4] ss:$8 sps:$4 sm:$0xff]  }
 0x2f5   : > { %11547 = vmatprep.subr.bf16.mxu0 %v15724_v0  ;;  %v1221_v0 = vadd.s32 6272, %v17476_v43  ;;  %vm18744_vm4 = vmpackc.low %vm1319_vm1, %vm1318_vm0  ;;  %v15814_v11 = vld [vmem:[%s17435_s18 + $0x18d4] ss:$8 sps:$4 sm:$0xff]  }
 0x2f6   : > { %v1286_v20 = vadd.s32 %v17485_v50, %v1220_v13  ;;  %v15791_v13 = vld [vmem:[%s17435_s18 + $0x8a0] ss:$8 sps:$4 sm:$0xff]  }
 0x2f7   : > { %10220 = vmatpush1.bf16.msra.mxu1 %v15719_v2  ;;  %v12956_v2 = vcombine.low %v1677_v42, %v1709_v33  ;;  %v1287_v21 = vadd.s32 %v17485_v50, %v1221_v0  ;;  %v875_v42 = vld [vmem:[%s17433_s10 + $0xc0] sm:$0xff] }
 0x2f8   : > { %11548 = vmatpush1.bf16.msra.mxu0 %v15722_v3  ;;  %10221 = vmatprep.subr.bf16.mxu1 %v15727_v4  ;;  %v1757_v3 = vsel %vm18587_vm12, %v1082_v55, 0  ;;  %v1741_v4 = vsel %vm18597_vm15, %v1066_v56, 0  ;;  %vm1350_vm2 = vcmp.lt.s32.totalorder %v1286_v20, 68970  ;;  %v907_v33 = vld [vmem:[%s17433_s10 + $0x1c0] sm:$0xff]  ;;  %v15787_v56 = vld [vmem:[%s17435_s18 + $0x894] ss:$8 sps:$4 sm:$0xff]  }
 0x2f9   : > { %11549 = vmatprep.subr.bf16.mxu0 %v15730_v59  ;;  %v1773_v59 = vsel %vm18597_vm15, %v1098_v48, 0  ;;  %vm1351_vm3 = vcmp.lt.s32.totalorder %v1287_v21, 68970  ;;  %v15779_v55 = vld [vmem:[%s17435_s18 + $0x880] ss:$8 sps:$4 sm:$0xff]   ;;  %v15790_v48 = vld [vmem:[%s17435_s18 + $0x1894] ss:$8 sps:$4 sm:$0xff]  }
 0x2fa   : > { %vm18749_vm5 = vmpackc.low %vm1351_vm3, %vm1350_vm2  ;;  %v15794_v0 = vld [vmem:[%s17435_s18 + $0x18a0] ss:$8 sps:$4 sm:$0xff]   ;;  %v15823_v21 = vld [vmem:[%s17435_s18 + $0x8f4] ss:$8 sps:$4 sm:$0xff]  }
 0x2fb   : > { %10222 = vmatpush1.bf16.msra.mxu1 %v15725_v6  ;;  %v15758_v6 = vld [vmem:[%s17435_s18 + $0x1840] ss:$8 sps:$4 sm:$0xff]  }
 0x2fc   : > { %11550 = vmatpush1.bf16.msra.mxu0 %v15728_v7  ;;  %10274 = vmatprep.subr.bf16.mxu1 %v15733_v10  ;;  %v15763_v7 = vld [vmem:[%s17435_s18 + $0x854] ss:$8 sps:$4 sm:$0xff]   ;;  %v15761_v10 = vld [vmem:[%s17435_s18 + $0x850] ss:$8 sps:$4 sm:$0xff]   ;;  %v15818_v20 = vld [vmem:[%s17435_s18 + $0x18e0] ss:$8 sps:$4 sm:$0xff]  }
 0x2fd   : > { %11602 = vmatprep.subr.bf16.mxu0 %v15736_v12  ;;  %v15764_v12 = vld [vmem:[%s17435_s18 + $0x1850] ss:$8 sps:$4 sm:$0xff]  }
 0x2fe   : > { %10224 = vmatmul.mubr.bf16.vlgmr.msra.gmra.mrb[0].mxu1 %v12796_v16  ;;  %v12989_v16 = vcombine.high %v1725_v63, %v1757_v3 }
 0x2ff   : > { %11552 = vmatmul.mubr.bf16.vlgmr.msra.gmra.mrb[0].mxu0 %v12828_v17  ;;  %10275 = vmatpush1.bf16.msra.mxu1 %v15731_v22  ;;  %v13021_v17 = vcombine.high %v1741_v4, %v1773_v59  ;;  %v1130_v22 = vld [vmem:[%s17433_s10 + $0x8b8] sm:$0xff] }
 0x300   : > { %11603 = vmatpush1.bf16.msra.mxu0 %v15734_v15  ;;  %10276 = vmatprep.subr.bf16.mxu1 %v15739_v23  ;;  %v1162_v15 = vld [vmem:[%s17433_s10 + $0x9b8] sm:$0xff]  ;;  %v15772_v23 = vld [vmem:[%s17435_s18 + $0x1864] ss:$8 sps:$4 sm:$0xff]   ;;  %v1805_v31 = vsel %vm18597_vm15, %v1130_v22, 0 }
 0x301   : > { %11604 = vmatprep.subr.bf16.mxu0 %v15742_v24  ;;  %10233 = vmatprep.mubr.bf16.mxu1 %v12861_v28  ;;  %v15767_v24 = vld [vmem:[%s17435_s18 + $0x860] ss:$8 sps:$4 sm:$0xff]   ;;  %v13020_v28 = vcombine.low %v1741_v4, %v1773_v59  ;;  %v1837_v32 = vsel %vm18597_vm15, %v1162_v15, 0  ;;  %v15797_v4 = vld [vmem:[%s17435_s18 + $0x8b0] ss:$8 sps:$4 sm:$0xff]  }
 0x302   : > { %11561 = vmatprep.mubr.bf16.mxu0 %v12893_v30  ;;  %v1821_v30 = vsel %vm18587_vm12, %v1146_v19, 0  ;;  %v13085_v29 = vcombine.high %v1805_v31, %v1837_v32  ;;  %v13084_v49 = vcombine.low %v1805_v31, %v1837_v32  ;;  %v15800_v59 = vld [vmem:[%s17435_s18 + $0x18b0] ss:$8 sps:$4 sm:$0xff]   ;;  %v15815_v19 = vld [vmem:[%s17435_s18 + $0x8e0] ss:$8 sps:$4 sm:$0xff]  }
 0x303   : > { %10277 = vmatpush1.bf16.msra.mxu1 %v15737_v18  ;;  %v12988_v18 = vcombine.low %v1725_v63, %v1757_v3  ;;  %v15796_v63 = vld [vmem:[%s17435_s18 + $0x18a4] ss:$8 sps:$4 sm:$0xff]   ;;  %v15802_v3 = vld [vmem:[%s17435_s18 + $0x18b4] ss:$8 sps:$4 sm:$0xff]   ;;  %v15821_v22 = vld [vmem:[%s17435_s18 + $0x8f0] ss:$8 sps:$4 sm:$0xff]  }
 0x304   : > { %11605 = vmatpush1.bf16.msra.mxu0 %v15740_v26  ;;  %10278 = vmatprep.subr.bf16.mxu1 %v15745_v35  ;;  %v1789_v26 = vsel %vm18587_vm12, %v1114_v8, 0  ;;  %v15806_v8 = vld [vmem:[%s17435_s18 + $0x18c0] ss:$8 sps:$4 sm:$0xff]   ;;  %v15824_v15 = vld [vmem:[%s17435_s18 + $0x18f0] ss:$8 sps:$4 sm:$0xff]  }
 0x305   : > { %11606 = vmatprep.subr.bf16.mxu0 %v15748_v36  ;;  %v15874_v35 = vld [vmem:[%s17435_s18 + $0x1974] ss:$8 sps:$4 sm:$0xff]   ;;  %v15869_v36 = vld [vmem:[%s17435_s18 + $0x970] ss:$8 sps:$4 sm:$0xff]  }
 0x306   : > { %10234 = vmatmul.mubr.bf16.gmra.mrb[4].mxu1 %v12860_v39  ;;  %v13053_v39 = vcombine.high %v1789_v26, %v1821_v30 }
 0x307   : > { %11562 = vmatmul.mubr.bf16.gmra.mrb[4].mxu0 %v12892_v40  ;;  %10279 = vmatpush1.bf16.msra.mxu1 %v15743_v37  ;;  %v15776_v37 = vld [vmem:[%s17435_s18 + $0x1870] ss:$8 sps:$4 sm:$0xff]   ;;  %v859_v40 = vld [vmem:[%s17433_s10 + $0x40] sm:$0xff] }
 0x308   : > { %11607 = vmatpush1.bf16.msra.mxu0 %v15746_v44  ;;  %10280 = vmatprep.subr.bf16.mxu1 %v15751_v46  ;;  %v15781_v44 = vld [vmem:[%s17435_s18 + $0x884] ss:$8 sps:$4 sm:$0xff]  }
 0x309   : > { %11608 = vmatprep.subr.bf16.mxu0 %v15754_v47  ;;  %10243 = vmatprep.mubr.bf16.mxu1 %v12925_v53  ;;  %v15784_v46 = vld [vmem:[%s17435_s18 + $0x1884] ss:$8 sps:$4 sm:$0xff]   ;;  %v13052_v47 = vcombine.low %v1789_v26, %v1821_v30  ;;  %v18771_v53 = vsel %vm18749_vm5, %v875_v42, 0  ;;  %v15833_v42 = vld [vmem:[%s17435_s18 + $0x910] ss:$8 sps:$4 sm:$0xff]  }
 0x30a   : > { %11571 = vmatprep.mubr.bf16.mxu0 %v12957_v54  ;;  %v18775_v54 = vsel %vm18749_vm5, %v907_v33, 0  ;;  %v15829_v26 = vld [vmem:[%s17435_s18 + $0x904] ss:$8 sps:$4 sm:$0xff]   ;;  %v15836_v33 = vld [vmem:[%s17435_s18 + $0x1910] ss:$8 sps:$4 sm:$0xff]  }
 0x30b   : > { %10281 = vmatpush1.bf16.msra.mxu1 %v15749_v51  ;;  %v18763_v51 = vsel %vm18744_vm4, %v859_v40, 0  ;;  %v12831_v5 = vcombine.high %v18771_v53, %v18775_v54  ;;  %v12830_v31 = vcombine.low %v18771_v53, %v18775_v54  ;;  %v15838_v40 = vld [vmem:[%s17435_s18 + $0x1914] ss:$8 sps:$4 sm:$0xff]   ;;  %v15844_v53 = vld [vmem:[%s17435_s18 + $0x1924] ss:$8 sps:$4 sm:$0xff]  }
 0x30c   : > { %11609 = vmatpush1.bf16.msra.mxu0 %v15752_v52  ;;  %10282 = vmatprep.subr.bf16.mxu1 %v15757_v45  ;;  %v18767_v52 = vsel %vm18744_vm4, %v891_v41, 0  ;;  %v15782_v45 = vld [vmem:[%s17435_s18 + $0x1880] ss:$8 sps:$4 sm:$0xff]  }
 0x30d   : > { %11610 = vmatprep.subr.bf16.mxu0 %v15760_v57  ;;  %v12799_v57 = vcombine.high %v18763_v51, %v18767_v52  ;;  %v12798_v30 = vcombine.low %v18763_v51, %v18767_v52  ;;  %v987_v41 = vld [vmem:[%s17433_s10 + $0x440] sm:$0xff] }
 0x30e   : > { %10244 = vmatmul.mubr.bf16.gmra.mrb[8].mxu1 %v12924_v61  ;;  %v15793_v61 = vld [vmem:[%s17435_s18 + $0x8a4] ss:$8 sps:$4 sm:$0xff]   ;;  %v15839_v54 = vld [vmem:[%s17435_s18 + $0x920] ss:$8 sps:$4 sm:$0xff]  }
 0x30f   : > { %11572 = vmatmul.mubr.bf16.gmra.mrb[8].mxu0 %v12956_v2  ;;  %10283 = vmatpush1.bf16.msra.mxu1 %v15755_v60  ;;  %v15788_v60 = vld [vmem:[%s17435_s18 + $0x1890] ss:$8 sps:$4 sm:$0xff]   ;;  %v15799_v2 = vld [vmem:[%s17435_s18 + $0x8b4] ss:$8 sps:$4 sm:$0xff]   ;;  %v1035_v51 = vld [vmem:[%s17433_s10 + $0x5c0] sm:$0xff] }
 0x310   : > { %11611 = vmatpush1.bf16.msra.mxu0 %v15758_v6  ;;  %10284 = vmatprep.subr.bf16.mxu1 %v15763_v7  ;;  %v15805_v6 = vld [vmem:[%s17435_s18 + $0x8c4] ss:$8 sps:$4 sm:$0xff]  }
 0x311   : > { %11612 = vmatprep.subr.bf16.mxu0 %v15766_v1  ;;  %10253 = vmatprep.mubr.bf16.mxu1 %v12989_v16  ;;  %v15808_v7 = vld [vmem:[%s17435_s18 + $0x18c4] ss:$8 sps:$4 sm:$0xff]   ;;  %v15803_v1 = vld [vmem:[%s17435_s18 + $0x8c0] ss:$8 sps:$4 sm:$0xff]  }
 0x312   : > { %11581 = vmatprep.mubr.bf16.mxu0 %v13021_v17  ;;  %v15817_v16 = vld [vmem:[%s17435_s18 + $0x8e4] ss:$8 sps:$4 sm:$0xff]  }
 0x313   : > { %10285 = vmatpush1.bf16.msra.mxu1 %v15761_v10  ;;  %v15809_v10 = vld [vmem:[%s17435_s18 + $0x8d0] ss:$8 sps:$4 sm:$0xff]   ;;  %v15820_v17 = vld [vmem:[%s17435_s18 + $0x18e4] ss:$8 sps:$4 sm:$0xff]  }
 0x314   : > { %11613 = vmatpush1.bf16.msra.mxu0 %v15764_v12  ;;  %10286 = vmatprep.subr.bf16.mxu1 %v15769_v14  ;;  %v15812_v12 = vld [vmem:[%s17435_s18 + $0x18d0] ss:$8 sps:$4 sm:$0xff]   ;;  %v15826_v14 = vld [vmem:[%s17435_s18 + $0x18f4] ss:$8 sps:$4 sm:$0xff]   ;;  %v15841_v52 = vld [vmem:[%s17435_s18 + $0x924] ss:$8 sps:$4 sm:$0xff]  }
 0x315   : > { %11614 = vmatprep.subr.bf16.mxu0 %v15772_v23  ;;  %v923_v23 = vld [vmem:[%s17433_s10 + $0x240] sm:$0xff] }
 0x316   : > { %10254 = vmatmul.mubr.bf16.gmra.mrb[12].mxu1 %v12988_v18  ;;  %v971_v18 = vld [vmem:[%s17433_s10 + $0x3c0] sm:$0xff]  ;;  %v1598_v32 = vsel %vm18744_vm4, %v923_v23, 0  ;;  %v15862_v23 = vld [vmem:[%s17435_s18 + $0x1954] ss:$8 sps:$4 sm:$0xff]  }
 0x317   : > { %11582 = vmatmul.mubr.bf16.gmra.mrb[12].mxu0 %v13020_v28  ;;  %10287 = vmatpush1.bf16.msra.mxu1 %v15767_v24  ;;  %v955_v24 = vld [vmem:[%s17433_s10 + $0x340] sm:$0xff] }
 0x318   : > { %11615 = vmatpush1.bf16.msra.mxu0 %v15770_v25  ;;  %10288 = vmatprep.subr.bf16.mxu1 %v15775_v34  ;;  %v939_v25 = vld [vmem:[%s17433_s10 + $0x2c0] sm:$0xff]  ;;  %v1630_v34 = vsel %vm18744_vm4, %v955_v24, 0 }
 0x319   : > { %11616 = vmatprep.subr.bf16.mxu0 %v15778_v62  ;;  %10263 = vmatprep.mubr.bf16.mxu1 %v13053_v39  ;;  %v15832_v28 = vld [vmem:[%s17435_s18 + $0x1904] ss:$8 sps:$4 sm:$0xff]   ;;  %v1614_v62 = vsel %vm18749_vm5, %v939_v25, 0  ;;  %v15830_v39 = vld [vmem:[%s17435_s18 + $0x1900] ss:$8 sps:$4 sm:$0xff]  }
 0x31a   : > { %11591 = vmatprep.mubr.bf16.mxu0 %v13085_v29  ;;  %v15835_v29 = vld [vmem:[%s17435_s18 + $0x914] ss:$8 sps:$4 sm:$0xff]   ;;  %v1115_v24 = vld [vmem:[%s17433_s10 + $0x840] sm:$0xff] }
 0x31b   : > { %10289 = vmatpush1.bf16.msra.mxu1 %v15773_v27  ;;  %v1646_v27 = vsel %vm18749_vm5, %v971_v18, 0 }
 0x31c   : > { %11617 = vmatpush1.bf16.msra.mxu0 %v15776_v37  ;;  %10290 = vmatprep.subr.bf16.mxu1 %v15781_v44  ;;  %v15827_v37 = vld [vmem:[%s17435_s18 + $0x900] ss:$8 sps:$4 sm:$0xff]   ;;  %v12863_v44 = vcombine.high %v1598_v32, %v1630_v34 }
 0x31d   : > { %11618 = vmatprep.subr.bf16.mxu0 %v15784_v46  ;;  %v12895_v46 = vcombine.high %v1614_v62, %v1646_v27 }
 0x31e   : > { %10264 = vmatmul.mubr.bf16.gmra.mrb[16].mxu1 %v13052_v47  ;;  %v1019_v47 = vld [vmem:[%s17433_s10 + $0x540] sm:$0xff] }
 0x31f   : > { %11592 = vmatmul.mubr.bf16.gmra.mrb[16].mxu0 %v13084_v49  ;;  %10291 = vmatpush1.bf16.msra.mxu1 %v15779_v55  ;;  %v1003_v49 = vld [vmem:[%s17433_s10 + $0x4c0] sm:$0xff]  ;;  %v12862_v55 = vcombine.low %v1598_v32, %v1630_v34 }
 0x320   : > { %11619 = vmatpush1.bf16.msra.mxu0 %v15782_v45  ;;  %10292 = vmatprep.subr.bf16.mxu1 %v15787_v56  ;;  %v1662_v45 = vsel %vm18744_vm4, %v987_v41, 0  ;;  %v12894_v56 = vcombine.low %v1614_v62, %v1646_v27  ;;  %v1147_v32 = vld [vmem:[%s17433_s10 + $0x940] sm:$0xff] }
 0x321   : > { %11620 = vmatprep.subr.bf16.mxu0 %v15790_v48  ;;  %10306 = vmatprep.mubr.bf16.mxu1 %v12799_v57  ;;  %v1694_v48 = vsel %vm18744_vm4, %v1019_v47, 0  ;;  %v1678_v57 = vsel %vm18749_vm5, %v1003_v49, 0  ;;  %v15865_v27 = vld [vmem:[%s17435_s18 + $0x964] ss:$8 sps:$4 sm:$0xff]   ;;  %v15866_v41 = vld [vmem:[%s17435_s18 + $0x1960] ss:$8 sps:$4 sm:$0xff]  }
 0x322   : > { %11634 = vmatprep.mubr.bf16.mxu0 %v12831_v5  ;;  %v1710_v5 = vsel %vm18749_vm5, %v1035_v51, 0  ;;  %v15871_v51 = vld [vmem:[%s17435_s18 + $0x974] ss:$8 sps:$4 sm:$0xff]  }
 0x323   : > { %10293 = vmatpush1.bf16.msra.mxu1 %v15785_v58  ;;  %v15842_v58 = vld [vmem:[%s17435_s18 + $0x1920] ss:$8 sps:$4 sm:$0xff]  }
 0x324   : > { %11621 = vmatpush1.bf16.msra.mxu0 %v15788_v60  ;;  %10294 = vmatprep.subr.bf16.mxu1 %v15793_v61  ;;  %v15847_v60 = vld [vmem:[%s17435_s18 + $0x934] ss:$8 sps:$4 sm:$0xff]  }
 0x325   : > { %11622 = vmatprep.subr.bf16.mxu0 %v15796_v63  ;;  %v15850_v61 = vld [vmem:[%s17435_s18 + $0x1934] ss:$8 sps:$4 sm:$0xff]   ;;  %v1051_v63 = vld [vmem:[%s17433_s10 + $0x640] sm:$0xff] }
 0x327   : > { %10295 = vmatpush1.bf16.msra.mxu1 %v15791_v13  ;;  %v15845_v13 = vld [vmem:[%s17435_s18 + $0x930] ss:$8 sps:$4 sm:$0xff]  }
 0x328   : > { %11623 = vmatpush1.bf16.msra.mxu0 %v15794_v0  ;;  %10296 = vmatprep.subr.bf16.mxu1 %v15799_v2  ;;  %v15848_v0 = vld [vmem:[%s17435_s18 + $0x1930] ss:$8 sps:$4 sm:$0xff]   ;;  %v12927_v2 = vcombine.high %v1662_v45, %v1694_v48 }
 0x329   : > { %11624 = vmatprep.subr.bf16.mxu0 %v15802_v3  ;;  %v12959_v3 = vcombine.high %v1678_v57, %v1710_v5 }
 0x32b   : > { %10297 = vmatpush1.bf16.msra.mxu1 %v15797_v4  ;;  %v1083_v4 = vld [vmem:[%s17433_s10 + $0x740] sm:$0xff] }
 0x32c   : > { %11625 = vmatpush1.bf16.msra.mxu0 %v15800_v59  ;;  %10298 = vmatprep.subr.bf16.mxu1 %v15805_v6  ;;  %v15853_v59 = vld [vmem:[%s17435_s18 + $0x944] ss:$8 sps:$4 sm:$0xff]  }
 0x32d   : > { %11626 = vmatprep.subr.bf16.mxu0 %v15808_v7  ;;  %v1067_v6 = vld [vmem:[%s17433_s10 + $0x6c0] sm:$0xff] }
 0x32e   : > { %v1099_v7 = vld [vmem:[%s17433_s10 + $0x7c0] sm:$0xff] }
 0x32f   : > { %10299 = vmatpush1.bf16.msra.mxu1 %v15803_v1  ;;  %v15856_v1 = vld [vmem:[%s17435_s18 + $0x1944] ss:$8 sps:$4 sm:$0xff]  }
 0x330   : > { %11627 = vmatpush1.bf16.msra.mxu0 %v15806_v8  ;;  %10300 = vmatprep.subr.bf16.mxu1 %v15811_v9  ;;  %v1190_v8 = vadd.s32 2304, %v17476_v43  ;;  %v1191_v9 = vadd.s32 2432, %v17476_v43 }
 0x331   : > { %11628 = vmatprep.subr.bf16.mxu0 %v15814_v11  ;;  %v15851_v11 = vld [vmem:[%s17435_s18 + $0x940] ss:$8 sps:$4 sm:$0xff]  }
 0x332   : > { %v1256_v25 = vadd.s32 %v17485_v50, %v1190_v8  ;;  %v1257_v18 = vadd.s32 %v17485_v50, %v1191_v9  ;;  %v15881_v9 = vld [vmem:[%s17435_s18 + $0x990] ss:$8 sps:$4 sm:$0xff]  }
 0x333   : > { %10301 = vmatpush1.bf16.msra.mxu1 %v15809_v10  ;;  %v12926_v10 = vcombine.low %v1662_v45, %v1694_v48  ;;  %v892_v48 = vld [vmem:[%s17433_s10 + $0x148] sm:$0xff] }
 0x334   : > { %11629 = vmatpush1.bf16.msra.mxu0 %v15812_v12  ;;  %10302 = vmatprep.subr.bf16.mxu1 %v15817_v16  ;;  %v1726_v12 = vsel %vm18744_vm4, %v1051_v63, 0  ;;  %v1222_v16 = vadd.s32 6400, %v17476_v43  ;;  %vm1320_vm6 = vcmp.lt.s32.totalorder %v1256_v25, 68970  ;;  %vm1321_vm7 = vcmp.lt.s32.totalorder %v1257_v18, 68970  ;;  %v15907_v25 = vld [vmem:[%s17435_s18 + $0x9d4] ss:$8 sps:$4 sm:$0xff]  }
 0x335   : > { %11630 = vmatprep.subr.bf16.mxu0 %v15820_v17  ;;  %v1223_v17 = vadd.s32 6528, %v17476_v43  ;;  %vm18902_vm10 = vmpackc.low %vm1321_vm7, %vm1320_vm6  ;;  %v15910_v18 = vld [vmem:[%s17435_s18 + $0x19d4] ss:$8 sps:$4 sm:$0xff]  }
 0x336   : > { %v1288_v34 = vadd.s32 %v17485_v50, %v1222_v16  ;;  %v15887_v16 = vld [vmem:[%s17435_s18 + $0x9a0] ss:$8 sps:$4 sm:$0xff]  }
 0x337   : > { %10303 = vmatpush1.bf16.msra.mxu1 %v15815_v19  ;;  %v12958_v19 = vcombine.low %v1678_v57, %v1710_v5  ;;  %v1289_v62 = vadd.s32 %v17485_v50, %v1223_v17  ;;  %v876_v57 = vld [vmem:[%s17433_s10 + $0xc8] sm:$0xff] }
 0x338   : > { %11631 = vmatpush1.bf16.msra.mxu0 %v15818_v20  ;;  %10304 = vmatprep.subr.bf16.mxu1 %v15823_v21  ;;  %v1758_v20 = vsel %vm18744_vm4, %v1083_v4, 0  ;;  %v1742_v21 = vsel %vm18749_vm5, %v1067_v6, 0  ;;  %vm1352_vm8 = vcmp.lt.s32.totalorder %v1288_v34, 68970  ;;  %v908_v5 = vld [vmem:[%s17433_s10 + $0x1c8] sm:$0xff]  ;;  %v15883_v6 = vld [vmem:[%s17435_s18 + $0x994] ss:$8 sps:$4 sm:$0xff]  }
 0x339   : > { %11632 = vmatprep.subr.bf16.mxu0 %v15826_v14  ;;  %v1774_v14 = vsel %vm18749_vm5, %v1099_v7, 0  ;;  %vm1353_vm9 = vcmp.lt.s32.totalorder %v1289_v62, 68970  ;;  %v15875_v4 = vld [vmem:[%s17435_s18 + $0x980] ss:$8 sps:$4 sm:$0xff]   ;;  %v15886_v7 = vld [vmem:[%s17435_s18 + $0x1994] ss:$8 sps:$4 sm:$0xff]  }
 0x33a   : > { %vm18907_vm11 = vmpackc.low %vm1353_vm9, %vm1352_vm8  ;;  %v15890_v17 = vld [vmem:[%s17435_s18 + $0x19a0] ss:$8 sps:$4 sm:$0xff]   ;;  %v15919_v62 = vld [vmem:[%s17435_s18 + $0x9f4] ss:$8 sps:$4 sm:$0xff]  }
 0x33b   : > { %10305 = vmatpush1.bf16.msra.mxu1 %v15821_v22  ;;  %v15854_v22 = vld [vmem:[%s17435_s18 + $0x1940] ss:$8 sps:$4 sm:$0xff]  }
 0x33c   : > { %11633 = vmatpush1.bf16.msra.mxu0 %v15824_v15  ;;  %10357 = vmatprep.subr.bf16.mxu1 %v15829_v26  ;;  %v15859_v15 = vld [vmem:[%s17435_s18 + $0x954] ss:$8 sps:$4 sm:$0xff]   ;;  %v15857_v26 = vld [vmem:[%s17435_s18 + $0x950] ss:$8 sps:$4 sm:$0xff]   ;;  %v15914_v34 = vld [vmem:[%s17435_s18 + $0x19e0] ss:$8 sps:$4 sm:$0xff]  }
 0x33d   : > { %11685 = vmatprep.subr.bf16.mxu0 %v15832_v28  ;;  %v15860_v28 = vld [vmem:[%s17435_s18 + $0x1950] ss:$8 sps:$4 sm:$0xff]  }
 0x33e   : > { %10307 = vmatmul.mubr.bf16.vlgmr.msra.gmra.mrb[0].mxu1 %v12798_v30  ;;  %v12991_v30 = vcombine.high %v1726_v12, %v1758_v20 }
 0x33f   : > { %11635 = vmatmul.mubr.bf16.vlgmr.msra.gmra.mrb[0].mxu0 %v12830_v31  ;;  %10358 = vmatpush1.bf16.msra.mxu1 %v15827_v37  ;;  %v13023_v31 = vcombine.high %v1742_v21, %v1774_v14  ;;  %v1131_v37 = vld [vmem:[%s17433_s10 + $0x8c0] sm:$0xff] }
 0x340   : > { %11686 = vmatpush1.bf16.msra.mxu0 %v15830_v39  ;;  %10359 = vmatprep.subr.bf16.mxu1 %v15835_v29  ;;  %v1163_v39 = vld [vmem:[%s17433_s10 + $0x9c0] sm:$0xff]  ;;  %v1806_v47 = vsel %vm18749_vm5, %v1131_v37, 0  ;;  %v15917_v37 = vld [vmem:[%s17435_s18 + $0x9f0] ss:$8 sps:$4 sm:$0xff]  }
 0x341   : > { %11687 = vmatprep.subr.bf16.mxu0 %v15838_v40  ;;  %10316 = vmatprep.mubr.bf16.mxu1 %v12863_v44  ;;  %v15868_v29 = vld [vmem:[%s17435_s18 + $0x1964] ss:$8 sps:$4 sm:$0xff]   ;;  %v15863_v40 = vld [vmem:[%s17435_s18 + $0x960] ss:$8 sps:$4 sm:$0xff]   ;;  %v13022_v44 = vcombine.low %v1742_v21, %v1774_v14  ;;  %v1838_v49 = vsel %vm18749_vm5, %v1163_v39, 0 }
 0x342   : > { %11644 = vmatprep.mubr.bf16.mxu0 %v12895_v46  ;;  %v1822_v46 = vsel %vm18744_vm4, %v1147_v32, 0  ;;  %v13087_v45 = vcombine.high %v1806_v47, %v1838_v49  ;;  %v13086_v63 = vcombine.low %v1806_v47, %v1838_v49  ;;  %v15893_v21 = vld [vmem:[%s17435_s18 + $0x9b0] ss:$8 sps:$4 sm:$0xff]   ;;  %v15911_v32 = vld [vmem:[%s17435_s18 + $0x9e0] ss:$8 sps:$4 sm:$0xff]  }
 0x343   : > { %10360 = vmatpush1.bf16.msra.mxu1 %v15833_v42  ;;  %v12990_v42 = vcombine.low %v1726_v12, %v1758_v20  ;;  %v15892_v12 = vld [vmem:[%s17435_s18 + $0x19a4] ss:$8 sps:$4 sm:$0xff]   ;;  %v15898_v20 = vld [vmem:[%s17435_s18 + $0x19b4] ss:$8 sps:$4 sm:$0xff]   ;;  %v15896_v14 = vld [vmem:[%s17435_s18 + $0x19b0] ss:$8 sps:$4 sm:$0xff]  }
 0x344   : > { %11688 = vmatpush1.bf16.msra.mxu0 %v15836_v33  ;;  %10361 = vmatprep.subr.bf16.mxu1 %v15841_v52  ;;  %v1790_v33 = vsel %vm18744_vm4, %v1115_v24, 0  ;;  %v15902_v24 = vld [vmem:[%s17435_s18 + $0x19c0] ss:$8 sps:$4 sm:$0xff]   ;;  %v15920_v39 = vld [vmem:[%s17435_s18 + $0x19f0] ss:$8 sps:$4 sm:$0xff]  }
 0x345   : > { %11689 = vmatprep.subr.bf16.mxu0 %v15844_v53  ;;  %v15970_v52 = vld [vmem:[%s17435_s18 + $0x1a74] ss:$8 sps:$4 sm:$0xff]   ;;  %v15965_v53 = vld [vmem:[%s17435_s18 + $0xa70] ss:$8 sps:$4 sm:$0xff]  }
 0x346   : > { %10317 = vmatmul.mubr.bf16.gmra.mrb[4].mxu1 %v12862_v55  ;;  %v13055_v55 = vcombine.high %v1790_v33, %v1822_v46 }
 0x347   : > { %11645 = vmatmul.mubr.bf16.gmra.mrb[4].mxu0 %v12894_v56  ;;  %10362 = vmatpush1.bf16.msra.mxu1 %v15839_v54  ;;  %v15872_v54 = vld [vmem:[%s17435_s18 + $0x1970] ss:$8 sps:$4 sm:$0xff]   ;;  %v860_v56 = vld [vmem:[%s17433_s10 + $0x48] sm:$0xff] }
 0x348   : > { %11690 = vmatpush1.bf16.msra.mxu0 %v15842_v58  ;;  %10363 = vmatprep.subr.bf16.mxu1 %v15847_v60  ;;  %v15877_v58 = vld [vmem:[%s17435_s18 + $0x984] ss:$8 sps:$4 sm:$0xff]  }
 0x349   : > { %11691 = vmatprep.subr.bf16.mxu0 %v15850_v61  ;;  %10326 = vmatprep.mubr.bf16.mxu1 %v12927_v2  ;;  %v15880_v60 = vld [vmem:[%s17435_s18 + $0x1984] ss:$8 sps:$4 sm:$0xff]   ;;  %v13054_v61 = vcombine.low %v1790_v33, %v1822_v46  ;;  %v18929_v2 = vsel %vm18907_vm11, %v876_v57, 0  ;;  %v15929_v57 = vld [vmem:[%s17435_s18 + $0xa10] ss:$8 sps:$4 sm:$0xff]  }
 0x34a   : > { %11654 = vmatprep.mubr.bf16.mxu0 %v12959_v3  ;;  %v18933_v3 = vsel %vm18907_vm11, %v908_v5, 0  ;;  %v15925_v33 = vld [vmem:[%s17435_s18 + $0xa04] ss:$8 sps:$4 sm:$0xff]   ;;  %v15932_v5 = vld [vmem:[%s17435_s18 + $0x1a10] ss:$8 sps:$4 sm:$0xff]  }
 0x34b   : > { %10364 = vmatpush1.bf16.msra.mxu1 %v15845_v13  ;;  %v18921_v13 = vsel %vm18902_vm10, %v860_v56, 0  ;;  %v12833_v8 = vcombine.high %v18929_v2, %v18933_v3  ;;  %v12832_v47 = vcombine.low %v18929_v2, %v18933_v3  ;;  %v15934_v56 = vld [vmem:[%s17435_s18 + $0x1a14] ss:$8 sps:$4 sm:$0xff]   ;;  %v15940_v2 = vld [vmem:[%s17435_s18 + $0x1a24] ss:$8 sps:$4 sm:$0xff]  }
 0x34c   : > { %11692 = vmatpush1.bf16.msra.mxu0 %v15848_v0  ;;  %10365 = vmatprep.subr.bf16.mxu1 %v15853_v59  ;;  %v18925_v0 = vsel %vm18902_vm10, %v892_v48, 0  ;;  %v15878_v59 = vld [vmem:[%s17435_s18 + $0x1980] ss:$8 sps:$4 sm:$0xff]  }
 0x34d   : > { %11693 = vmatprep.subr.bf16.mxu0 %v15856_v1  ;;  %v12801_v1 = vcombine.high %v18921_v13, %v18925_v0  ;;  %v12800_v46 = vcombine.low %v18921_v13, %v18925_v0  ;;  %v988_v48 = vld [vmem:[%s17433_s10 + $0x448] sm:$0xff] }
 0x34e   : > { %10327 = vmatmul.mubr.bf16.gmra.mrb[8].mxu1 %v12926_v10  ;;  %v15889_v10 = vld [vmem:[%s17435_s18 + $0x9a4] ss:$8 sps:$4 sm:$0xff]   ;;  %v15935_v3 = vld [vmem:[%s17435_s18 + $0xa20] ss:$8 sps:$4 sm:$0xff]  }
 0x34f   : > { %11655 = vmatmul.mubr.bf16.gmra.mrb[8].mxu0 %v12958_v19  ;;  %10366 = vmatpush1.bf16.msra.mxu1 %v15851_v11  ;;  %v15884_v11 = vld [vmem:[%s17435_s18 + $0x1990] ss:$8 sps:$4 sm:$0xff]   ;;  %v15895_v19 = vld [vmem:[%s17435_s18 + $0x9b4] ss:$8 sps:$4 sm:$0xff]   ;;  %v1036_v13 = vld [vmem:[%s17433_s10 + $0x5c8] sm:$0xff] }
 0x350   : > { %11694 = vmatpush1.bf16.msra.mxu0 %v15854_v22  ;;  %10367 = vmatprep.subr.bf16.mxu1 %v15859_v15  ;;  %v15901_v22 = vld [vmem:[%s17435_s18 + $0x9c4] ss:$8 sps:$4 sm:$0xff]  }
 0x351   : > { %11695 = vmatprep.subr.bf16.mxu0 %v15862_v23  ;;  %10336 = vmatprep.mubr.bf16.mxu1 %v12991_v30  ;;  %v15904_v15 = vld [vmem:[%s17435_s18 + $0x19c4] ss:$8 sps:$4 sm:$0xff]   ;;  %v15899_v23 = vld [vmem:[%s17435_s18 + $0x9c0] ss:$8 sps:$4 sm:$0xff]  }
 0x352   : > { %11664 = vmatprep.mubr.bf16.mxu0 %v13023_v31  ;;  %v15913_v30 = vld [vmem:[%s17435_s18 + $0x9e4] ss:$8 sps:$4 sm:$0xff]  }
 0x353   : > { %10368 = vmatpush1.bf16.msra.mxu1 %v15857_v26  ;;  %v15905_v26 = vld [vmem:[%s17435_s18 + $0x9d0] ss:$8 sps:$4 sm:$0xff]   ;;  %v15916_v31 = vld [vmem:[%s17435_s18 + $0x19e4] ss:$8 sps:$4 sm:$0xff]  }
 0x354   : > { %11696 = vmatpush1.bf16.msra.mxu0 %v15860_v28  ;;  %10369 = vmatprep.subr.bf16.mxu1 %v15865_v27  ;;  %v15908_v28 = vld [vmem:[%s17435_s18 + $0x19d0] ss:$8 sps:$4 sm:$0xff]   ;;  %v15922_v27 = vld [vmem:[%s17435_s18 + $0x19f4] ss:$8 sps:$4 sm:$0xff]   ;;  %v15937_v0 = vld [vmem:[%s17435_s18 + $0xa24] ss:$8 sps:$4 sm:$0xff]  }
 0x355   : > { %11697 = vmatprep.subr.bf16.mxu0 %v15868_v29  ;;  %v924_v29 = vld [vmem:[%s17433_s10 + $0x248] sm:$0xff] }
 0x356   : > { %10337 = vmatmul.mubr.bf16.gmra.mrb[12].mxu1 %v12990_v42  ;;  %v972_v42 = vld [vmem:[%s17433_s10 + $0x3c8] sm:$0xff]  ;;  %v1599_v49 = vsel %vm18902_vm10, %v924_v29, 0  ;;  %v15958_v29 = vld [vmem:[%s17435_s18 + $0x1a54] ss:$8 sps:$4 sm:$0xff]  }
 0x357   : > { %11665 = vmatmul.mubr.bf16.gmra.mrb[12].mxu0 %v13022_v44  ;;  %10370 = vmatpush1.bf16.msra.mxu1 %v15863_v40  ;;  %v956_v40 = vld [vmem:[%s17433_s10 + $0x348] sm:$0xff] }
 0x358   : > { %11698 = vmatpush1.bf16.msra.mxu0 %v15866_v41  ;;  %10371 = vmatprep.subr.bf16.mxu1 %v15871_v51  ;;  %v940_v41 = vld [vmem:[%s17433_s10 + $0x2c8] sm:$0xff]  ;;  %v1631_v51 = vsel %vm18902_vm10, %v956_v40, 0 }
 0x359   : > { %11699 = vmatprep.subr.bf16.mxu0 %v15874_v35  ;;  %10346 = vmatprep.mubr.bf16.mxu1 %v13055_v55  ;;  %v15928_v44 = vld [vmem:[%s17435_s18 + $0x1a04] ss:$8 sps:$4 sm:$0xff]   ;;  %v1615_v35 = vsel %vm18907_vm11, %v940_v41, 0  ;;  %v15926_v55 = vld [vmem:[%s17435_s18 + $0x1a00] ss:$8 sps:$4 sm:$0xff]  }
 0x35a   : > { %11674 = vmatprep.mubr.bf16.mxu0 %v13087_v45  ;;  %v15931_v45 = vld [vmem:[%s17435_s18 + $0xa14] ss:$8 sps:$4 sm:$0xff]   ;;  %v1116_v40 = vld [vmem:[%s17433_s10 + $0x848] sm:$0xff] }
 0x35b   : > { %10372 = vmatpush1.bf16.msra.mxu1 %v15869_v36  ;;  %v1647_v36 = vsel %vm18907_vm11, %v972_v42, 0 }
 0x35c   : > { %11700 = vmatpush1.bf16.msra.mxu0 %v15872_v54  ;;  %10373 = vmatprep.subr.bf16.mxu1 %v15877_v58  ;;  %v15923_v54 = vld [vmem:[%s17435_s18 + $0xa00] ss:$8 sps:$4 sm:$0xff]   ;;  %v12865_v58 = vcombine.high %v1599_v49, %v1631_v51 }
 0x35d   : > { %11701 = vmatprep.subr.bf16.mxu0 %v15880_v60  ;;  %v12897_v60 = vcombine.high %v1615_v35, %v1647_v36 }
 0x35e   : > { %10347 = vmatmul.mubr.bf16.gmra.mrb[16].mxu1 %v13054_v61  ;;  %v1020_v61 = vld [vmem:[%s17433_s10 + $0x548] sm:$0xff] }
 0x35f   : > { %11675 = vmatmul.mubr.bf16.gmra.mrb[16].mxu0 %v13086_v63  ;;  %10374 = vmatpush1.bf16.msra.mxu1 %v15875_v4  ;;  %v1004_v63 = vld [vmem:[%s17433_s10 + $0x4c8] sm:$0xff]  ;;  %v12864_v4 = vcombine.low %v1599_v49, %v1631_v51 }
 0x360   : > { %11702 = vmatpush1.bf16.msra.mxu0 %v15878_v59  ;;  %10375 = vmatprep.subr.bf16.mxu1 %v15883_v6  ;;  %v1663_v59 = vsel %vm18902_vm10, %v988_v48, 0  ;;  %v12896_v6 = vcombine.low %v1615_v35, %v1647_v36  ;;  %v1148_v49 = vld [vmem:[%s17433_s10 + $0x948] sm:$0xff] }
 0x361   : > { %11703 = vmatprep.subr.bf16.mxu0 %v15886_v7  ;;  %10389 = vmatprep.mubr.bf16.mxu1 %v12801_v1  ;;  %v1695_v7 = vsel %vm18902_vm10, %v1020_v61, 0  ;;  %v1679_v1 = vsel %vm18907_vm11, %v1004_v63, 0  ;;  %v15961_v36 = vld [vmem:[%s17435_s18 + $0xa64] ss:$8 sps:$4 sm:$0xff]   ;;  %v15962_v48 = vld [vmem:[%s17435_s18 + $0x1a60] ss:$8 sps:$4 sm:$0xff]  }
 0x362   : > { %11717 = vmatprep.mubr.bf16.mxu0 %v12833_v8  ;;  %v1711_v8 = vsel %vm18907_vm11, %v1036_v13, 0  ;;  %v15967_v13 = vld [vmem:[%s17435_s18 + $0xa74] ss:$8 sps:$4 sm:$0xff]  }
 0x363   : > { %10376 = vmatpush1.bf16.msra.mxu1 %v15881_v9  ;;  %v15938_v9 = vld [vmem:[%s17435_s18 + $0x1a20] ss:$8 sps:$4 sm:$0xff]  }
 0x364   : > { %11704 = vmatpush1.bf16.msra.mxu0 %v15884_v11  ;;  %10377 = vmatprep.subr.bf16.mxu1 %v15889_v10  ;;  %v15943_v11 = vld [vmem:[%s17435_s18 + $0xa34] ss:$8 sps:$4 sm:$0xff]  }
 0x365   : > { %11705 = vmatprep.subr.bf16.mxu0 %v15892_v12  ;;  %v15946_v10 = vld [vmem:[%s17435_s18 + $0x1a34] ss:$8 sps:$4 sm:$0xff]   ;;  %v1052_v12 = vld [vmem:[%s17433_s10 + $0x648] sm:$0xff] }
 0x367   : > { %10378 = vmatpush1.bf16.msra.mxu1 %v15887_v16  ;;  %v15941_v16 = vld [vmem:[%s17435_s18 + $0xa30] ss:$8 sps:$4 sm:$0xff]  }
 0x368   : > { %11706 = vmatpush1.bf16.msra.mxu0 %v15890_v17  ;;  %10379 = vmatprep.subr.bf16.mxu1 %v15895_v19  ;;  %v15944_v17 = vld [vmem:[%s17435_s18 + $0x1a30] ss:$8 sps:$4 sm:$0xff]   ;;  %v12929_v19 = vcombine.high %v1663_v59, %v1695_v7 }
 0x369   : > { %11707 = vmatprep.subr.bf16.mxu0 %v15898_v20  ;;  %v12961_v20 = vcombine.high %v1679_v1, %v1711_v8 }
 0x36b   : > { %10380 = vmatpush1.bf16.msra.mxu1 %v15893_v21  ;;  %v1084_v21 = vld [vmem:[%s17433_s10 + $0x748] sm:$0xff] }
 0x36c   : > { %11708 = vmatpush1.bf16.msra.mxu0 %v15896_v14  ;;  %10381 = vmatprep.subr.bf16.mxu1 %v15901_v22  ;;  %v15949_v14 = vld [vmem:[%s17435_s18 + $0xa44] ss:$8 sps:$4 sm:$0xff]  }
 0x36d   : > { %11709 = vmatprep.subr.bf16.mxu0 %v15904_v15  ;;  %v1068_v22 = vld [vmem:[%s17433_s10 + $0x6c8] sm:$0xff] }
 0x36e   : > { %v1100_v15 = vld [vmem:[%s17433_s10 + $0x7c8] sm:$0xff] }
 0x36f   : > { %10382 = vmatpush1.bf16.msra.mxu1 %v15899_v23  ;;  %v15952_v23 = vld [vmem:[%s17435_s18 + $0x1a44] ss:$8 sps:$4 sm:$0xff]  }
 0x370   : > { %11710 = vmatpush1.bf16.msra.mxu0 %v15902_v24  ;;  %10383 = vmatprep.subr.bf16.mxu1 %v15907_v25  ;;  %v1192_v24 = vadd.s32 2560, %v17476_v43  ;;  %v1193_v25 = vadd.s32 2688, %v17476_v43 }
 0x371   : > { %11711 = vmatprep.subr.bf16.mxu0 %v15910_v18  ;;  %v15947_v18 = vld [vmem:[%s17435_s18 + $0xa40] ss:$8 sps:$4 sm:$0xff]  }
 0x372   : > { %v1258_v41 = vadd.s32 %v17485_v50, %v1192_v24  ;;  %v1259_v42 = vadd.s32 %v17485_v50, %v1193_v25  ;;  %v15977_v25 = vld [vmem:[%s17435_s18 + $0xa90] ss:$8 sps:$4 sm:$0xff]  }
 0x373   : > { %10384 = vmatpush1.bf16.msra.mxu1 %v15905_v26  ;;  %v12928_v26 = vcombine.low %v1663_v59, %v1695_v7  ;;  %v893_v7 = vld [vmem:[%s17433_s10 + $0x150] sm:$0xff] }
 0x374   : > { %11712 = vmatpush1.bf16.msra.mxu0 %v15908_v28  ;;  %10385 = vmatprep.subr.bf16.mxu1 %v15913_v30  ;;  %v1727_v28 = vsel %vm18902_vm10, %v1052_v12, 0  ;;  %v1224_v30 = vadd.s32 6656, %v17476_v43  ;;  %vm1322_vm12 = vcmp.lt.s32.totalorder %v1258_v41, 68970  ;;  %vm1323_vm13 = vcmp.lt.s32.totalorder %v1259_v42, 68970  ;;  %v16003_v41 = vld [vmem:[%s17435_s18 + $0xad4] ss:$8 sps:$4 sm:$0xff]  }
 0x375   : > { %11713 = vmatprep.subr.bf16.mxu0 %v15916_v31  ;;  %v1225_v31 = vadd.s32 6784, %v17476_v43  ;;  %vm19060_vm0 = vmpackc.low %vm1323_vm13, %vm1322_vm12  ;;  %v16006_v42 = vld [vmem:[%s17435_s18 + $0x1ad4] ss:$8 sps:$4 sm:$0xff]  }
 0x376   : > { %v1290_v51 = vadd.s32 %v17485_v50, %v1224_v30  ;;  %v15983_v30 = vld [vmem:[%s17435_s18 + $0xaa0] ss:$8 sps:$4 sm:$0xff]  }
 0x377   : > { %10386 = vmatpush1.bf16.msra.mxu1 %v15911_v32  ;;  %v12960_v32 = vcombine.low %v1679_v1, %v1711_v8  ;;  %v1291_v35 = vadd.s32 %v17485_v50, %v1225_v31  ;;  %v877_v1 = vld [vmem:[%s17433_s10 + $0xd0] sm:$0xff]  ;;  %v15986_v31 = vld [vmem:[%s17435_s18 + $0x1aa0] ss:$8 sps:$4 sm:$0xff]  }
 0x378   : > { %11714 = vmatpush1.bf16.msra.mxu0 %v15914_v34  ;;  %10387 = vmatprep.subr.bf16.mxu1 %v15919_v62  ;;  %v1759_v34 = vsel %vm18902_vm10, %v1084_v21, 0  ;;  %v1743_v62 = vsel %vm18907_vm11, %v1068_v22, 0  ;;  %vm1354_vm14 = vcmp.lt.s32.totalorder %v1290_v51, 68970  ;;  %v909_v8 = vld [vmem:[%s17433_s10 + $0x1d0] sm:$0xff]  ;;  %v15971_v21 = vld [vmem:[%s17435_s18 + $0xa80] ss:$8 sps:$4 sm:$0xff]  }
 0x379   : > { %11715 = vmatprep.subr.bf16.mxu0 %v15922_v27  ;;  %v1775_v27 = vsel %vm18907_vm11, %v1100_v15, 0  ;;  %vm1355_vm15 = vcmp.lt.s32.totalorder %v1291_v35, 68970  ;;  %v15979_v22 = vld [vmem:[%s17435_s18 + $0xa94] ss:$8 sps:$4 sm:$0xff]   ;;  %v16010_v51 = vld [vmem:[%s17435_s18 + $0x1ae0] ss:$8 sps:$4 sm:$0xff]  }
 0x37a   : > { %vm19065_vm1 = vmpackc.low %vm1355_vm15, %vm1354_vm14  ;;  %v15982_v15 = vld [vmem:[%s17435_s18 + $0x1a94] ss:$8 sps:$4 sm:$0xff]  }
 0x37b   : > { %10388 = vmatpush1.bf16.msra.mxu1 %v15917_v37  ;;  %v15950_v37 = vld [vmem:[%s17435_s18 + $0x1a40] ss:$8 sps:$4 sm:$0xff]   ;;  %v16015_v35 = vld [vmem:[%s17435_s18 + $0xaf4] ss:$8 sps:$4 sm:$0xff]  }
 0x37c   : > { %11716 = vmatpush1.bf16.msra.mxu0 %v15920_v39  ;;  %10440 = vmatprep.subr.bf16.mxu1 %v15925_v33  ;;  %v15955_v39 = vld [vmem:[%s17435_s18 + $0xa54] ss:$8 sps:$4 sm:$0xff]   ;;  %v15953_v33 = vld [vmem:[%s17435_s18 + $0xa50] ss:$8 sps:$4 sm:$0xff]  }
 0x37d   : > { %11768 = vmatprep.subr.bf16.mxu0 %v15928_v44  ;;  %v15956_v44 = vld [vmem:[%s17435_s18 + $0x1a50] ss:$8 sps:$4 sm:$0xff]  }
 0x37e   : > { %10390 = vmatmul.mubr.bf16.vlgmr.msra.gmra.mrb[0].mxu1 %v12800_v46  ;;  %v12993_v46 = vcombine.high %v1727_v28, %v1759_v34 }
 0x37f   : > { %11718 = vmatmul.mubr.bf16.vlgmr.msra.gmra.mrb[0].mxu0 %v12832_v47  ;;  %10441 = vmatpush1.bf16.msra.mxu1 %v15923_v54  ;;  %v13025_v47 = vcombine.high %v1743_v62, %v1775_v27  ;;  %v1132_v54 = vld [vmem:[%s17433_s10 + $0x8c8] sm:$0xff] }
 0x380   : > { %11769 = vmatpush1.bf16.msra.mxu0 %v15926_v55  ;;  %10442 = vmatprep.subr.bf16.mxu1 %v15931_v45  ;;  %v1164_v55 = vld [vmem:[%s17433_s10 + $0x9c8] sm:$0xff]  ;;  %v1807_v61 = vsel %vm18907_vm11, %v1132_v54, 0  ;;  %v16013_v54 = vld [vmem:[%s17435_s18 + $0xaf0] ss:$8 sps:$4 sm:$0xff]  }
 0x381   : > { %11770 = vmatprep.subr.bf16.mxu0 %v15934_v56  ;;  %10399 = vmatprep.mubr.bf16.mxu1 %v12865_v58  ;;  %v15964_v45 = vld [vmem:[%s17435_s18 + $0x1a64] ss:$8 sps:$4 sm:$0xff]   ;;  %v15959_v56 = vld [vmem:[%s17435_s18 + $0xa60] ss:$8 sps:$4 sm:$0xff]   ;;  %v13024_v58 = vcombine.low %v1743_v62, %v1775_v27  ;;  %v1839_v63 = vsel %vm18907_vm11, %v1164_v55, 0 }
 0x382   : > { %11727 = vmatprep.mubr.bf16.mxu0 %v12897_v60  ;;  %v1823_v60 = vsel %vm18902_vm10, %v1148_v49, 0  ;;  %v13089_v59 = vcombine.high %v1807_v61, %v1839_v63  ;;  %v13088_v12 = vcombine.low %v1807_v61, %v1839_v63  ;;  %v15989_v62 = vld [vmem:[%s17435_s18 + $0xab0] ss:$8 sps:$4 sm:$0xff]   ;;  %v16007_v49 = vld [vmem:[%s17435_s18 + $0xae0] ss:$8 sps:$4 sm:$0xff]  }
 0x383   : > { %10443 = vmatpush1.bf16.msra.mxu1 %v15929_v57  ;;  %v12992_v57 = vcombine.low %v1727_v28, %v1759_v34  ;;  %v15988_v28 = vld [vmem:[%s17435_s18 + $0x1aa4] ss:$8 sps:$4 sm:$0xff]   ;;  %v15994_v34 = vld [vmem:[%s17435_s18 + $0x1ab4] ss:$8 sps:$4 sm:$0xff]   ;;  %v15992_v27 = vld [vmem:[%s17435_s18 + $0x1ab0] ss:$8 sps:$4 sm:$0xff]  }
 0x384   : > { %11771 = vmatpush1.bf16.msra.mxu0 %v15932_v5  ;;  %10444 = vmatprep.subr.bf16.mxu1 %v15937_v0  ;;  %v1791_v5 = vsel %vm18902_vm10, %v1116_v40, 0  ;;  %v15998_v40 = vld [vmem:[%s17435_s18 + $0x1ac0] ss:$8 sps:$4 sm:$0xff]   ;;  %v16016_v55 = vld [vmem:[%s17435_s18 + $0x1af0] ss:$8 sps:$4 sm:$0xff]  }
 0x385   : > { %11772 = vmatprep.subr.bf16.mxu0 %v15940_v2  ;;  %v16063_v0 = vld [vmem:[%s17435_s18 + $0xb74] ss:$8 sps:$4 sm:$0xff]   ;;  %v16064_v2 = vld [vmem:[%s17435_s18 + $0x1b70] ss:$8 sps:$4 sm:$0xff]  }
 0x386   : > { %10400 = vmatmul.mubr.bf16.gmra.mrb[4].mxu1 %v12864_v4  ;;  %v13057_v4 = vcombine.high %v1791_v5, %v1823_v60 }
 0x387   : > { %11728 = vmatmul.mubr.bf16.gmra.mrb[4].mxu0 %v12896_v6  ;;  %10445 = vmatpush1.bf16.msra.mxu1 %v15935_v3  ;;  %v15968_v3 = vld [vmem:[%s17435_s18 + $0x1a70] ss:$8 sps:$4 sm:$0xff]  }
 0x388   : > { %11773 = vmatpush1.bf16.msra.mxu0 %v15938_v9  ;;  %10446 = vmatprep.subr.bf16.mxu1 %v15943_v11  ;;  %v861_v6 = vld [vmem:[%s17433_s10 + $0x50] sm:$0xff]  ;;  %v15973_v9 = vld [vmem:[%s17435_s18 + $0xa84] ss:$8 sps:$4 sm:$0xff]  }
 0x389   : > { %11774 = vmatprep.subr.bf16.mxu0 %v15946_v10  ;;  %10409 = vmatprep.mubr.bf16.mxu1 %v12929_v19  ;;  %v15976_v11 = vld [vmem:[%s17435_s18 + $0x1a84] ss:$8 sps:$4 sm:$0xff]   ;;  %v13056_v10 = vcombine.low %v1791_v5, %v1823_v60  ;;  %v19087_v19 = vsel %vm19065_vm1, %v877_v1, 0  ;;  %v16025_v1 = vld [vmem:[%s17435_s18 + $0xb10] ss:$8 sps:$4 sm:$0xff]  }
 0x38a   : > { %11737 = vmatprep.mubr.bf16.mxu0 %v12961_v20  ;;  %v19091_v20 = vsel %vm19065_vm1, %v909_v8, 0  ;;  %v16021_v5 = vld [vmem:[%s17435_s18 + $0xb04] ss:$8 sps:$4 sm:$0xff]   ;;  %v16028_v8 = vld [vmem:[%s17435_s18 + $0x1b10] ss:$8 sps:$4 sm:$0xff]  }
 0x38b   : > { %10447 = vmatpush1.bf16.msra.mxu1 %v15941_v16  ;;  %v19079_v16 = vsel %vm19060_vm0, %v861_v6, 0  ;;  %v12835_v24 = vcombine.high %v19087_v19, %v19091_v20  ;;  %v12834_v61 = vcombine.low %v19087_v19, %v19091_v20  ;;  %v16030_v6 = vld [vmem:[%s17435_s18 + $0x1b14] ss:$8 sps:$4 sm:$0xff]   ;;  %v16036_v19 = vld [vmem:[%s17435_s18 + $0x1b24] ss:$8 sps:$4 sm:$0xff]  }
 0x38c   : > { %11775 = vmatpush1.bf16.msra.mxu0 %v15944_v17  ;;  %10448 = vmatprep.subr.bf16.mxu1 %v15949_v14  ;;  %v19083_v17 = vsel %vm19060_vm0, %v893_v7, 0  ;;  %v15974_v14 = vld [vmem:[%s17435_s18 + $0x1a80] ss:$8 sps:$4 sm:$0xff]   ;;  %v989_v7 = vld [vmem:[%s17433_s10 + $0x450] sm:$0xff] }
 0x38d   : > { %11776 = vmatprep.subr.bf16.mxu0 %v15952_v23  ;;  %v12803_v23 = vcombine.high %v19079_v16, %v19083_v17  ;;  %v12802_v60 = vcombine.low %v19079_v16, %v19083_v17  ;;  %v1037_v16 = vld [vmem:[%s17433_s10 + $0x5d0] sm:$0xff]  ;;  %v16033_v17 = vld [vmem:[%s17435_s18 + $0xb24] ss:$8 sps:$4 sm:$0xff]   ;;  %v16031_v20 = vld [vmem:[%s17435_s18 + $0xb20] ss:$8 sps:$4 sm:$0xff]  }
 0x38e   : > { %10410 = vmatmul.mubr.bf16.gmra.mrb[8].mxu1 %v12928_v26  ;;  %v15985_v26 = vld [vmem:[%s17435_s18 + $0xaa4] ss:$8 sps:$4 sm:$0xff]  }
 0x38f   : > { %11738 = vmatmul.mubr.bf16.gmra.mrb[8].mxu0 %v12960_v32  ;;  %10449 = vmatpush1.bf16.msra.mxu1 %v15947_v18  ;;  %v15980_v18 = vld [vmem:[%s17435_s18 + $0x1a90] ss:$8 sps:$4 sm:$0xff]   ;;  %v15991_v32 = vld [vmem:[%s17435_s18 + $0xab4] ss:$8 sps:$4 sm:$0xff]  }
 0x390   : > { %11777 = vmatpush1.bf16.msra.mxu0 %v15950_v37  ;;  %10450 = vmatprep.subr.bf16.mxu1 %v15955_v39  ;;  %v15997_v37 = vld [vmem:[%s17435_s18 + $0xac4] ss:$8 sps:$4 sm:$0xff]  }
 0x391   : > { %11778 = vmatprep.subr.bf16.mxu0 %v15958_v29  ;;  %10419 = vmatprep.mubr.bf16.mxu1 %v12993_v46  ;;  %v16000_v39 = vld [vmem:[%s17435_s18 + $0x1ac4] ss:$8 sps:$4 sm:$0xff]   ;;  %v15995_v29 = vld [vmem:[%s17435_s18 + $0xac0] ss:$8 sps:$4 sm:$0xff]  }
 0x392   : > { %11747 = vmatprep.mubr.bf16.mxu0 %v13025_v47  ;;  %v16009_v46 = vld [vmem:[%s17435_s18 + $0xae4] ss:$8 sps:$4 sm:$0xff]  }
 0x393   : > { %10451 = vmatpush1.bf16.msra.mxu1 %v15953_v33  ;;  %v16001_v33 = vld [vmem:[%s17435_s18 + $0xad0] ss:$8 sps:$4 sm:$0xff]   ;;  %v16012_v47 = vld [vmem:[%s17435_s18 + $0x1ae4] ss:$8 sps:$4 sm:$0xff]  }
 0x394   : > { %11779 = vmatpush1.bf16.msra.mxu0 %v15956_v44  ;;  %10452 = vmatprep.subr.bf16.mxu1 %v15961_v36  ;;  %v16004_v44 = vld [vmem:[%s17435_s18 + $0x1ad0] ss:$8 sps:$4 sm:$0xff]   ;;  %v16018_v36 = vld [vmem:[%s17435_s18 + $0x1af4] ss:$8 sps:$4 sm:$0xff]  }
 0x395   : > { %11780 = vmatprep.subr.bf16.mxu0 %v15964_v45  ;;  %v925_v45 = vld [vmem:[%s17433_s10 + $0x250] sm:$0xff] }
 0x396   : > { %10420 = vmatmul.mubr.bf16.gmra.mrb[12].mxu1 %v12992_v57  ;;  %v973_v57 = vld [vmem:[%s17433_s10 + $0x3d0] sm:$0xff]  ;;  %v1600_v63 = vsel %vm19060_vm0, %v925_v45, 0  ;;  %v1227_v45 = vadd.s32 7040, %v17476_v43 }
 0x397   : > { %11748 = vmatmul.mubr.bf16.gmra.mrb[12].mxu0 %v13024_v58  ;;  %10453 = vmatpush1.bf16.msra.mxu1 %v15959_v56  ;;  %v957_v56 = vld [vmem:[%s17433_s10 + $0x350] sm:$0xff]  ;;  %v16024_v58 = vld [vmem:[%s17435_s18 + $0x1b04] ss:$8 sps:$4 sm:$0xff]  }
 0x398   : > { %11781 = vmatpush1.bf16.msra.mxu0 %v15962_v48  ;;  %10454 = vmatprep.subr.bf16.mxu1 %v15967_v13  ;;  %v941_v48 = vld [vmem:[%s17433_s10 + $0x2d0] sm:$0xff]  ;;  %v1632_v13 = vsel %vm19060_vm0, %v957_v56, 0 }
 0x399   : > { %11782 = vmatprep.subr.bf16.mxu0 %v15970_v52  ;;  %10429 = vmatprep.mubr.bf16.mxu1 %v13057_v4  ;;  %v1616_v52 = vsel %vm19065_vm1, %v941_v48, 0  ;;  %v16022_v4 = vld [vmem:[%s17435_s18 + $0x1b00] ss:$8 sps:$4 sm:$0xff]  }
 0x39a   : > { %11757 = vmatprep.mubr.bf16.mxu0 %v13089_v59  ;;  %v16027_v59 = vld [vmem:[%s17435_s18 + $0xb14] ss:$8 sps:$4 sm:$0xff]  }
 0x39b   : > { %10455 = vmatpush1.bf16.msra.mxu1 %v15965_v53  ;;  %v1648_v53 = vsel %vm19065_vm1, %v973_v57, 0  ;;  %v16049_v57 = vld [vmem:[%s17435_s18 + $0xb50] ss:$8 sps:$4 sm:$0xff]  }
 0x39c   : > { %11783 = vmatpush1.bf16.msra.mxu0 %v15968_v3  ;;  %10456 = vmatprep.subr.bf16.mxu1 %v15973_v9  ;;  %v16019_v3 = vld [vmem:[%s17435_s18 + $0xb00] ss:$8 sps:$4 sm:$0xff]   ;;  %v12867_v9 = vcombine.high %v1600_v63, %v1632_v13 }
 0x39d   : > { %11784 = vmatprep.subr.bf16.mxu0 %v15976_v11  ;;  %v12899_v11 = vcombine.high %v1616_v52, %v1648_v53 }
 0x39e   : > { %10430 = vmatmul.mubr.bf16.gmra.mrb[16].mxu1 %v13056_v10  ;;  %v1021_v10 = vld [vmem:[%s17433_s10 + $0x550] sm:$0xff] }
 0x39f   : > { %11758 = vmatmul.mubr.bf16.gmra.mrb[16].mxu0 %v13088_v12  ;;  %10457 = vmatpush1.bf16.msra.mxu1 %v15971_v21  ;;  %v1005_v12 = vld [vmem:[%s17433_s10 + $0x4d0] sm:$0xff]  ;;  %v12866_v21 = vcombine.low %v1600_v63, %v1632_v13 }
 0x3a0   : > { %11785 = vmatpush1.bf16.msra.mxu0 %v15974_v14  ;;  %10458 = vmatprep.subr.bf16.mxu1 %v15979_v22  ;;  %v1664_v14 = vsel %vm19060_vm0, %v989_v7, 0  ;;  %v12898_v22 = vcombine.low %v1616_v52, %v1648_v53  ;;  %v1165_v63 = vld [vmem:[%s17433_s10 + $0x9d0] sm:$0xff]  ;;  %v16057_v53 = vld [vmem:[%s17435_s18 + $0xb64] ss:$8 sps:$4 sm:$0xff]  }
 0x3a1   : > { %11786 = vmatprep.subr.bf16.mxu0 %v15982_v15  ;;  %10472 = vmatprep.mubr.bf16.mxu1 %v12803_v23  ;;  %v1696_v15 = vsel %vm19060_vm0, %v1021_v10, 0  ;;  %v1680_v23 = vsel %vm19065_vm1, %v1005_v12, 0  ;;  %v16055_v10 = vld [vmem:[%s17435_s18 + $0xb60] ss:$8 sps:$4 sm:$0xff]  }
 0x3a2   : > { %11800 = vmatprep.mubr.bf16.mxu0 %v12835_v24  ;;  %v1712_v24 = vsel %vm19065_vm1, %v1037_v16, 0  ;;  %v16058_v12 = vld [vmem:[%s17435_s18 + $0x1b60] ss:$8 sps:$4 sm:$0xff]   ;;  %v16066_v16 = vld [vmem:[%s17435_s18 + $0x1b74] ss:$8 sps:$4 sm:$0xff]  }
 0x3a3   : > { %10459 = vmatpush1.bf16.msra.mxu1 %v15977_v25  ;;  %v16034_v25 = vld [vmem:[%s17435_s18 + $0x1b20] ss:$8 sps:$4 sm:$0xff]  }
 0x3a4   : > { %11787 = vmatpush1.bf16.msra.mxu0 %v15980_v18  ;;  %10460 = vmatprep.subr.bf16.mxu1 %v15985_v26  ;;  %v16039_v18 = vld [vmem:[%s17435_s18 + $0xb34] ss:$8 sps:$4 sm:$0xff]  }
 0x3a5   : > { %11788 = vmatprep.subr.bf16.mxu0 %v15988_v28  ;;  %v16042_v26 = vld [vmem:[%s17435_s18 + $0x1b34] ss:$8 sps:$4 sm:$0xff]  }
 0x3a6   : > { %v1053_v28 = vld [vmem:[%s17433_s10 + $0x650] sm:$0xff] }
 0x3a7   : > { %10461 = vmatpush1.bf16.msra.mxu1 %v15983_v30  ;;  %v16037_v30 = vld [vmem:[%s17435_s18 + $0xb30] ss:$8 sps:$4 sm:$0xff]  }
 0x3a8   : > { %11789 = vmatpush1.bf16.msra.mxu0 %v15986_v31  ;;  %10462 = vmatprep.subr.bf16.mxu1 %v15991_v32  ;;  %v16040_v31 = vld [vmem:[%s17435_s18 + $0x1b30] ss:$8 sps:$4 sm:$0xff]   ;;  %v12931_v32 = vcombine.high %v1664_v14, %v1696_v15 }
 0x3a9   : > { %11790 = vmatprep.subr.bf16.mxu0 %v15994_v34  ;;  %v12963_v34 = vcombine.high %v1680_v23, %v1712_v24 }
 0x3ab   : > { %10463 = vmatpush1.bf16.msra.mxu1 %v15989_v62  ;;  %v1085_v62 = vld [vmem:[%s17433_s10 + $0x750] sm:$0xff] }
 0x3ac   : > { %11791 = vmatpush1.bf16.msra.mxu0 %v15992_v27  ;;  %10464 = vmatprep.subr.bf16.mxu1 %v15997_v37  ;;  %v1069_v27 = vld [vmem:[%s17433_s10 + $0x6d0] sm:$0xff] }
 0x3ad   : > { %11792 = vmatprep.subr.bf16.mxu0 %v16000_v39  ;;  %v1101_v37 = vld [vmem:[%s17433_s10 + $0x7d0] sm:$0xff]  ;;  %v16045_v39 = vld [vmem:[%s17435_s18 + $0xb44] ss:$8 sps:$4 sm:$0xff]  }
 0x3af   : > { %10465 = vmatpush1.bf16.msra.mxu1 %v15995_v29  ;;  %v16048_v29 = vld [vmem:[%s17435_s18 + $0x1b44] ss:$8 sps:$4 sm:$0xff]  }
 0x3b0   : > { %11793 = vmatpush1.bf16.msra.mxu0 %v15998_v40  ;;  %10466 = vmatprep.subr.bf16.mxu1 %v16003_v41  ;;  %v16043_v40 = vld [vmem:[%s17435_s18 + $0xb40] ss:$8 sps:$4 sm:$0xff]  }
 0x3b1   : > { %11794 = vmatprep.subr.bf16.mxu0 %v16006_v42  ;;  %v16046_v41 = vld [vmem:[%s17435_s18 + $0x1b40] ss:$8 sps:$4 sm:$0xff]   ;;  %v12930_v42 = vcombine.low %v1664_v14, %v1696_v15  ;;  %v894_v14 = vld [vmem:[%s17433_s10 + $0x158] sm:$0xff] }
 0x3b2   : > { %v878_v15 = vld [vmem:[%s17433_s10 + $0xd8] sm:$0xff] }
 0x3b3   : > { %10467 = vmatpush1.bf16.msra.mxu1 %v16001_v33  ;;  %v1728_v33 = vsel %vm19060_vm0, %v1053_v28, 0 }
 0x3b4   : > { %11795 = vmatpush1.bf16.msra.mxu0 %v16004_v44  ;;  %10468 = vmatprep.subr.bf16.mxu1 %v16009_v46  ;;  %v12962_v44 = vcombine.low %v1680_v23, %v1712_v24  ;;  %v1760_v46 = vsel %vm19060_vm0, %v1085_v62, 0  ;;  %v910_v23 = vld [vmem:[%s17433_s10 + $0x1d8] sm:$0xff]  ;;  %v16067_v62 = vld [vmem:[%s17435_s18 + $0xb80] ss:$8 sps:$4 sm:$0xff]  }
 0x3b5   : > { %11796 = vmatprep.subr.bf16.mxu0 %v16012_v47  ;;  %v1744_v47 = vsel %vm19065_vm1, %v1069_v27, 0  ;;  %v12995_v56 = vcombine.high %v1728_v33, %v1760_v46  ;;  %v16070_v27 = vld [vmem:[%s17435_s18 + $0x1b80] ss:$8 sps:$4 sm:$0xff]   ;;  %v16160_v24 = vld [vmem:[%s17435_s18 + $0x1c70] ss:$8 sps:$4 sm:$0xff]  }
 0x3b7   : > { %10469 = vmatpush1.bf16.msra.mxu1 %v16007_v49  ;;  %v1776_v49 = vsel %vm19065_vm1, %v1101_v37, 0  ;;  %v16075_v37 = vld [vmem:[%s17435_s18 + $0xb94] ss:$8 sps:$4 sm:$0xff]  }
 0x3b8   : > { %11797 = vmatpush1.bf16.msra.mxu0 %v16010_v51  ;;  %10470 = vmatprep.subr.bf16.mxu1 %v16015_v35  ;;  %v16051_v51 = vld [vmem:[%s17435_s18 + $0xb54] ss:$8 sps:$4 sm:$0xff]   ;;  %v1194_v35 = vadd.s32 2816, %v17476_v43  ;;  %v13027_v48 = vcombine.high %v1744_v47, %v1776_v49  ;;  %v13026_v7 = vcombine.low %v1744_v47, %v1776_v49  ;;  %v16082_v47 = vld [vmem:[%s17435_s18 + $0x1ba0] ss:$8 sps:$4 sm:$0xff]  }
 0x3b9   : > { %11798 = vmatprep.subr.bf16.mxu0 %v16018_v36  ;;  %v1195_v36 = vadd.s32 2944, %v17476_v43  ;;  %v16087_v49 = vld [vmem:[%s17435_s18 + $0xbb4] ss:$8 sps:$4 sm:$0xff]  }
 0x3ba   : > { %v1260_v13 = vadd.s32 %v17485_v50, %v1194_v35  ;;  %v16085_v35 = vld [vmem:[%s17435_s18 + $0xbb0] ss:$8 sps:$4 sm:$0xff]  }
 0x3bb   : > { %10471 = vmatpush1.bf16.msra.mxu1 %v16013_v54  ;;  %v16054_v54 = vld [vmem:[%s17435_s18 + $0x1b54] ss:$8 sps:$4 sm:$0xff]   ;;  %v1261_v52 = vadd.s32 %v17485_v50, %v1195_v36  ;;  %v16088_v36 = vld [vmem:[%s17435_s18 + $0x1bb0] ss:$8 sps:$4 sm:$0xff]  }
 0x3bc   : > { %11799 = vmatpush1.bf16.msra.mxu0 %v16016_v55  ;;  %10523 = vmatprep.subr.bf16.mxu1 %v16021_v5  ;;  %v1226_v55 = vadd.s32 6912, %v17476_v43  ;;  %v16052_v5 = vld [vmem:[%s17435_s18 + $0x1b50] ss:$8 sps:$4 sm:$0xff]   ;;  %vm1324_vm2 = vcmp.lt.s32.totalorder %v1260_v13, 68970  ;;  %v16106_v13 = vld [vmem:[%s17435_s18 + $0x1be0] ss:$8 sps:$4 sm:$0xff]  }
 0x3bd   : > { %11851 = vmatprep.subr.bf16.mxu0 %v16024_v58  ;;  %v1117_v58 = vld [vmem:[%s17433_s10 + $0x850] sm:$0xff]  ;;  %vm1325_vm3 = vcmp.lt.s32.totalorder %v1261_v52, 68970 }
 0x3be   : > { %10473 = vmatmul.mubr.bf16.vlgmr.msra.gmra.mrb[0].mxu1 %v12802_v60  ;;  %v1149_v60 = vld [vmem:[%s17433_s10 + $0x950] sm:$0xff]  ;;  %vm19223_vm6 = vmpackc.low %vm1325_vm3, %vm1324_vm2 }
 0x3bf   : > { %11801 = vmatmul.mubr.bf16.vlgmr.msra.gmra.mrb[0].mxu0 %v12834_v61  ;;  %10524 = vmatpush1.bf16.msra.mxu1 %v16019_v3  ;;  %v1133_v61 = vld [vmem:[%s17433_s10 + $0x8d0] sm:$0xff]  ;;  %v16060_v3 = vld [vmem:[%s17435_s18 + $0x1b64] ss:$8 sps:$4 sm:$0xff]  }
 0x3c0   : > { %11852 = vmatpush1.bf16.msra.mxu0 %v16022_v4  ;;  %10525 = vmatprep.subr.bf16.mxu1 %v16027_v59  ;;  %v1292_v4 = vadd.s32 %v17485_v50, %v1226_v55  ;;  %v1293_v59 = vadd.s32 %v17485_v50, %v1227_v45  ;;  %v16096_v55 = vld [vmem:[%s17435_s18 + $0x1bc4] ss:$8 sps:$4 sm:$0xff]   ;;  %v16091_v45 = vld [vmem:[%s17435_s18 + $0xbc0] ss:$8 sps:$4 sm:$0xff]   ;;  %v16111_v52 = vld [vmem:[%s17435_s18 + $0xbf4] ss:$8 sps:$4 sm:$0xff]  }
 0x3c1   : > { %11853 = vmatprep.subr.bf16.mxu0 %v16030_v6  ;;  %10482 = vmatprep.mubr.bf16.mxu1 %v12867_v9  ;;  %v12994_v6 = vcombine.low %v1728_v33, %v1760_v46  ;;  %v1808_v9 = vsel %vm19065_vm1, %v1133_v61, 0  ;;  %v16081_v33 = vld [vmem:[%s17435_s18 + $0xba4] ss:$8 sps:$4 sm:$0xff]   ;;  %v16079_v46 = vld [vmem:[%s17435_s18 + $0xba0] ss:$8 sps:$4 sm:$0xff]  }
 0x3c2   : > { %11810 = vmatprep.mubr.bf16.mxu0 %v12899_v11  ;;  %v1840_v11 = vsel %vm19065_vm1, %v1165_v63, 0  ;;  %vm1356_vm4 = vcmp.lt.s32.totalorder %v1292_v4, 68970  ;;  %vm1357_vm5 = vcmp.lt.s32.totalorder %v1293_v59, 68970  ;;  %v16108_v61 = vld [vmem:[%s17435_s18 + $0x1be4] ss:$8 sps:$4 sm:$0xff]   ;;  %v926_v59 = vld [vmem:[%s17433_s10 + $0x258] sm:$0xff] }
 0x3c3   : > { %10526 = vmatpush1.bf16.msra.mxu1 %v16025_v1  ;;  %v1792_v1 = vsel %vm19060_vm0, %v1117_v58, 0  ;;  %vm19230_vm7 = vmpackc.low %vm1357_vm5, %vm1356_vm4  ;;  %v13090_v28 = vcombine.low %v1808_v9, %v1840_v11  ;;  %v16100_v58 = vld [vmem:[%s17435_s18 + $0x1bd0] ss:$8 sps:$4 sm:$0xff]   ;;  %v16103_v63 = vld [vmem:[%s17435_s18 + $0xbe0] ss:$8 sps:$4 sm:$0xff]  }
 0x3c4   : > { %11854 = vmatpush1.bf16.msra.mxu0 %v16028_v8  ;;  %10527 = vmatprep.subr.bf16.mxu1 %v16033_v17  ;;  %v1824_v8 = vsel %vm19060_vm0, %v1149_v60, 0  ;;  %v16061_v17 = vld [vmem:[%s17435_s18 + $0xb70] ss:$8 sps:$4 sm:$0xff]   ;;  %v16105_v60 = vld [vmem:[%s17435_s18 + $0xbe4] ss:$8 sps:$4 sm:$0xff]  }
 0x3c5   : > { %11855 = vmatprep.subr.bf16.mxu0 %v16036_v19  ;;  %v13059_v19 = vcombine.high %v1792_v1, %v1824_v8  ;;  %v16112_v4 = vld [vmem:[%s17435_s18 + $0x1bf0] ss:$8 sps:$4 sm:$0xff]  }
 0x3c6   : > { %10483 = vmatmul.mubr.bf16.gmra.mrb[4].mxu1 %v12866_v21  ;;  %v862_v21 = vld [vmem:[%s17433_s10 + $0x58] sm:$0xff] }
 0x3c7   : > { %11811 = vmatmul.mubr.bf16.gmra.mrb[4].mxu0 %v12898_v22  ;;  %10528 = vmatpush1.bf16.msra.mxu1 %v16031_v20  ;;  %v13091_v20 = vcombine.high %v1808_v9, %v1840_v11  ;;  %v16120_v9 = vld [vmem:[%s17435_s18 + $0x1c04] ss:$8 sps:$4 sm:$0xff]   ;;  %v16159_v22 = vld [vmem:[%s17435_s18 + $0xc74] ss:$8 sps:$4 sm:$0xff]  }
 0x3c8   : > { %11856 = vmatpush1.bf16.msra.mxu0 %v16034_v25  ;;  %10529 = vmatprep.subr.bf16.mxu1 %v16039_v18  ;;  %v16069_v25 = vld [vmem:[%s17435_s18 + $0xb84] ss:$8 sps:$4 sm:$0xff]  }
 0x3c9   : > { %11857 = vmatprep.subr.bf16.mxu0 %v16042_v26  ;;  %10492 = vmatprep.mubr.bf16.mxu1 %v12931_v32  ;;  %v16072_v18 = vld [vmem:[%s17435_s18 + $0x1b84] ss:$8 sps:$4 sm:$0xff]   ;;  %v13058_v26 = vcombine.low %v1792_v1, %v1824_v8  ;;  %v19246_v32 = vsel %vm19230_vm7, %v878_v15, 0  ;;  %v974_v1 = vld [vmem:[%s17433_s10 + $0x3d8] sm:$0xff] }
 0x3ca   : > { %11820 = vmatprep.mubr.bf16.mxu0 %v12963_v34  ;;  %v19250_v34 = vsel %vm19230_vm7, %v910_v23, 0  ;;  %v16117_v8 = vld [vmem:[%s17435_s18 + $0xc04] ss:$8 sps:$4 sm:$0xff]   ;;  %v16121_v23 = vld [vmem:[%s17435_s18 + $0xc10] ss:$8 sps:$4 sm:$0xff]  }
 0x3cb   : > { %10530 = vmatpush1.bf16.msra.mxu1 %v16037_v30  ;;  %v19238_v30 = vsel %vm19223_vm6, %v862_v21, 0  ;;  %v16126_v21 = vld [vmem:[%s17435_s18 + $0x1c14] ss:$8 sps:$4 sm:$0xff]  }
 0x3cc   : > { %11858 = vmatpush1.bf16.msra.mxu0 %v16040_v31  ;;  %10531 = vmatprep.subr.bf16.mxu1 %v16045_v39  ;;  %v19242_v31 = vsel %vm19223_vm6, %v894_v14, 0  ;;  %v16078_v39 = vld [vmem:[%s17435_s18 + $0x1b94] ss:$8 sps:$4 sm:$0xff]  }
 0x3cd   : > { %11859 = vmatprep.subr.bf16.mxu0 %v16048_v29  ;;  %v12805_v29 = vcombine.high %v19238_v30, %v19242_v31  ;;  %v12804_v11 = vcombine.low %v19238_v30, %v19242_v31  ;;  %v1038_v30 = vld [vmem:[%s17433_s10 + $0x5d8] sm:$0xff]  ;;  %v16129_v31 = vld [vmem:[%s17435_s18 + $0xc24] ss:$8 sps:$4 sm:$0xff]  }
 0x3ce   : > { %10493 = vmatmul.mubr.bf16.gmra.mrb[8].mxu1 %v12930_v42  ;;  %v16076_v42 = vld [vmem:[%s17435_s18 + $0x1b90] ss:$8 sps:$4 sm:$0xff]  }
 0x3cf   : > { %11821 = vmatmul.mubr.bf16.gmra.mrb[8].mxu0 %v12962_v44  ;;  %10532 = vmatpush1.bf16.msra.mxu1 %v16043_v40  ;;  %v12837_v40 = vcombine.high %v19246_v32, %v19250_v34  ;;  %v16084_v44 = vld [vmem:[%s17435_s18 + $0x1ba4] ss:$8 sps:$4 sm:$0xff]  }
 0x3d0   : > { %11860 = vmatpush1.bf16.msra.mxu0 %v16046_v41  ;;  %10533 = vmatprep.subr.bf16.mxu1 %v16051_v51  ;;  %v16073_v41 = vld [vmem:[%s17435_s18 + $0xb90] ss:$8 sps:$4 sm:$0xff]   ;;  %v16090_v51 = vld [vmem:[%s17435_s18 + $0x1bb4] ss:$8 sps:$4 sm:$0xff]  }
 0x3d1   : > { %11861 = vmatprep.subr.bf16.mxu0 %v16054_v54  ;;  %10502 = vmatprep.mubr.bf16.mxu1 %v12995_v56  ;;  %v16093_v54 = vld [vmem:[%s17435_s18 + $0xbc4] ss:$8 sps:$4 sm:$0xff]   ;;  %v16094_v56 = vld [vmem:[%s17435_s18 + $0x1bc0] ss:$8 sps:$4 sm:$0xff]  }
 0x3d2   : > { %11830 = vmatprep.mubr.bf16.mxu0 %v13027_v48  ;;  %v16099_v48 = vld [vmem:[%s17435_s18 + $0xbd4] ss:$8 sps:$4 sm:$0xff]  }
 0x3d3   : > { %10534 = vmatpush1.bf16.msra.mxu1 %v16049_v57  ;;  %v16102_v57 = vld [vmem:[%s17435_s18 + $0x1bd4] ss:$8 sps:$4 sm:$0xff]  }
 0x3d4   : > { %11862 = vmatpush1.bf16.msra.mxu0 %v16052_v5  ;;  %10535 = vmatprep.subr.bf16.mxu1 %v16057_v53  ;;  %v16097_v5 = vld [vmem:[%s17435_s18 + $0xbd0] ss:$8 sps:$4 sm:$0xff]   ;;  %v16114_v53 = vld [vmem:[%s17435_s18 + $0x1bf4] ss:$8 sps:$4 sm:$0xff]  }
 0x3d5   : > { %11863 = vmatprep.subr.bf16.mxu0 %v16060_v3  ;;  %v16109_v3 = vld [vmem:[%s17435_s18 + $0xbf0] ss:$8 sps:$4 sm:$0xff]  }
 0x3d6   : > { %10503 = vmatmul.mubr.bf16.gmra.mrb[12].mxu1 %v12994_v6  ;;  %v958_v6 = vld [vmem:[%s17433_s10 + $0x358] sm:$0xff] }
 0x3d7   : > { %11831 = vmatmul.mubr.bf16.gmra.mrb[12].mxu0 %v13026_v7  ;;  %10536 = vmatpush1.bf16.msra.mxu1 %v16055_v10  ;;  %v942_v7 = vld [vmem:[%s17433_s10 + $0x2d8] sm:$0xff]  ;;  %v12836_v10 = vcombine.low %v19246_v32, %v19250_v34  ;;  %v16132_v32 = vld [vmem:[%s17435_s18 + $0x1c24] ss:$8 sps:$4 sm:$0xff]  }
 0x3d8   : > { %11864 = vmatpush1.bf16.msra.mxu0 %v16058_v12  ;;  %10537 = vmatprep.subr.bf16.mxu1 %v16063_v0  ;;  %v1601_v12 = vsel %vm19223_vm6, %v926_v59, 0  ;;  %v1633_v0 = vsel %vm19223_vm6, %v958_v6, 0  ;;  %v1229_v59 = vadd.s32 7296, %v17476_v43 }
 0x3d9   : > { %11865 = vmatprep.subr.bf16.mxu0 %v16066_v16  ;;  %10512 = vmatprep.mubr.bf16.mxu1 %v13059_v19  ;;  %v1617_v16 = vsel %vm19230_vm7, %v942_v7, 0  ;;  %v16118_v19 = vld [vmem:[%s17435_s18 + $0x1c00] ss:$8 sps:$4 sm:$0xff]   ;;  %v12869_v14 = vcombine.high %v1601_v12, %v1633_v0  ;;  %v12868_v34 = vcombine.low %v1601_v12, %v1633_v0  ;;  %v1166_v12 = vld [vmem:[%s17433_s10 + $0x9d8] sm:$0xff] }
 0x3da   : > { %11840 = vmatprep.mubr.bf16.mxu0 %v13091_v20  ;;  %v16123_v20 = vld [vmem:[%s17435_s18 + $0xc14] ss:$8 sps:$4 sm:$0xff]  }
 0x3db   : > { %10538 = vmatpush1.bf16.msra.mxu1 %v16061_v17  ;;  %v1649_v17 = vsel %vm19230_vm7, %v974_v1, 0  ;;  %v16145_v1 = vld [vmem:[%s17435_s18 + $0xc50] ss:$8 sps:$4 sm:$0xff]  }
 0x3dc   : > { %11866 = vmatpush1.bf16.msra.mxu0 %v16064_v2  ;;  %10539 = vmatprep.subr.bf16.mxu1 %v16069_v25  ;;  %v16115_v2 = vld [vmem:[%s17435_s18 + $0xc00] ss:$8 sps:$4 sm:$0xff]   ;;  %v12901_v15 = vcombine.high %v1617_v16, %v1649_v17  ;;  %v16124_v25 = vld [vmem:[%s17435_s18 + $0x1c10] ss:$8 sps:$4 sm:$0xff]  }
 0x3dd   : > { %11867 = vmatprep.subr.bf16.mxu0 %v16072_v18  ;;  %v990_v18 = vld [vmem:[%s17433_s10 + $0x458] sm:$0xff] }
 0x3de   : > { %10513 = vmatmul.mubr.bf16.gmra.mrb[16].mxu1 %v13058_v26  ;;  %v1022_v26 = vld [vmem:[%s17433_s10 + $0x558] sm:$0xff] }
 0x3df   : > { %11841 = vmatmul.mubr.bf16.gmra.mrb[16].mxu0 %v13090_v28  ;;  %10540 = vmatpush1.bf16.msra.mxu1 %v16067_v62  ;;  %v1006_v28 = vld [vmem:[%s17433_s10 + $0x4d8] sm:$0xff]  ;;  %v12900_v62 = vcombine.low %v1617_v16, %v1649_v17  ;;  %v16153_v17 = vld [vmem:[%s17435_s18 + $0xc64] ss:$8 sps:$4 sm:$0xff]  }
 0x3e0   : > { %11868 = vmatpush1.bf16.msra.mxu0 %v16070_v27  ;;  %10541 = vmatprep.subr.bf16.mxu1 %v16075_v37  ;;  %v1665_v27 = vsel %vm19223_vm6, %v990_v18, 0  ;;  %v1697_v37 = vsel %vm19223_vm6, %v1022_v26, 0  ;;  %v1841_v18 = vsel %vm19230_vm7, %v1166_v12, 0  ;;  %v16151_v26 = vld [vmem:[%s17435_s18 + $0xc60] ss:$8 sps:$4 sm:$0xff]  }
 0x3e1   : > { %11869 = vmatprep.subr.bf16.mxu0 %v16078_v39  ;;  %10555 = vmatprep.mubr.bf16.mxu1 %v12805_v29  ;;  %v1681_v39 = vsel %vm19230_vm7, %v1006_v28, 0  ;;  %v1713_v29 = vsel %vm19230_vm7, %v1038_v30, 0  ;;  %v16154_v28 = vld [vmem:[%s17435_s18 + $0x1c60] ss:$8 sps:$4 sm:$0xff]   ;;  %v16162_v30 = vld [vmem:[%s17435_s18 + $0x1c74] ss:$8 sps:$4 sm:$0xff]  }
 0x3e2   : > { %11883 = vmatprep.mubr.bf16.mxu0 %v12837_v40  ;;  %v16127_v40 = vld [vmem:[%s17435_s18 + $0xc20] ss:$8 sps:$4 sm:$0xff]  }
 0x3e3   : > { %10542 = vmatpush1.bf16.msra.mxu1 %v16073_v41  ;;  %v16130_v41 = vld [vmem:[%s17435_s18 + $0x1c20] ss:$8 sps:$4 sm:$0xff]  }
 0x3e4   : > { %11870 = vmatpush1.bf16.msra.mxu0 %v16076_v42  ;;  %10543 = vmatprep.subr.bf16.mxu1 %v16081_v33  ;;  %v16135_v42 = vld [vmem:[%s17435_s18 + $0xc34] ss:$8 sps:$4 sm:$0xff]   ;;  %v16199_v12 = vld [vmem:[%s17435_s18 + $0xce0] ss:$8 sps:$4 sm:$0xff]  }
 0x3e5   : > { %11871 = vmatprep.subr.bf16.mxu0 %v16084_v44  ;;  %v16138_v33 = vld [vmem:[%s17435_s18 + $0x1c34] ss:$8 sps:$4 sm:$0xff]   ;;  %v12933_v44 = vcombine.high %v1665_v27, %v1697_v37 }
 0x3e7   : > { %10544 = vmatpush1.bf16.msra.mxu1 %v16079_v46  ;;  %v12965_v46 = vcombine.high %v1681_v39, %v1713_v29 }
 0x3e8   : > { %11872 = vmatpush1.bf16.msra.mxu0 %v16082_v47  ;;  %10545 = vmatprep.subr.bf16.mxu1 %v16087_v49  ;;  %v16133_v47 = vld [vmem:[%s17435_s18 + $0xc30] ss:$8 sps:$4 sm:$0xff]  }
 0x3e9   : > { %11873 = vmatprep.subr.bf16.mxu0 %v16090_v51  ;;  %v16136_v49 = vld [vmem:[%s17435_s18 + $0x1c30] ss:$8 sps:$4 sm:$0xff]  }
 0x3ea   : > { %v1054_v51 = vld [vmem:[%s17433_s10 + $0x658] sm:$0xff] }
 0x3eb   : > { %10546 = vmatpush1.bf16.msra.mxu1 %v16085_v35  ;;  %v1086_v35 = vld [vmem:[%s17433_s10 + $0x758] sm:$0xff] }
 0x3ec   : > { %11874 = vmatpush1.bf16.msra.mxu0 %v16088_v36  ;;  %10547 = vmatprep.subr.bf16.mxu1 %v16093_v54  ;;  %v1070_v36 = vld [vmem:[%s17433_s10 + $0x6d8] sm:$0xff] }
 0x3ed   : > { %11875 = vmatprep.subr.bf16.mxu0 %v16096_v55  ;;  %v1102_v54 = vld [vmem:[%s17433_s10 + $0x7d8] sm:$0xff]  ;;  %v16141_v55 = vld [vmem:[%s17435_s18 + $0xc44] ss:$8 sps:$4 sm:$0xff]  }
 0x3ef   : > { %10548 = vmatpush1.bf16.msra.mxu1 %v16091_v45  ;;  %v16144_v45 = vld [vmem:[%s17435_s18 + $0x1c44] ss:$8 sps:$4 sm:$0xff]  }
 0x3f0   : > { %11876 = vmatpush1.bf16.msra.mxu0 %v16094_v56  ;;  %10549 = vmatprep.subr.bf16.mxu1 %v16099_v48  ;;  %v12932_v56 = vcombine.low %v1665_v27, %v1697_v37  ;;  %v12964_v48 = vcombine.low %v1681_v39, %v1713_v29  ;;  %v895_v27 = vld [vmem:[%s17433_s10 + $0x160] sm:$0xff]  ;;  %v16255_v37 = vld [vmem:[%s17435_s18 + $0xd74] ss:$8 sps:$4 sm:$0xff]  }
 0x3f1   : > { %11877 = vmatprep.subr.bf16.mxu0 %v16102_v57  ;;  %v1729_v57 = vsel %vm19223_vm6, %v1054_v51, 0  ;;  %v879_v39 = vld [vmem:[%s17433_s10 + $0xe0] sm:$0xff] }
 0x3f2   : > { %v911_v29 = vld [vmem:[%s17433_s10 + $0x1e0] sm:$0xff] }
 0x3f3   : > { %10550 = vmatpush1.bf16.msra.mxu1 %v16097_v5  ;;  %v1761_v5 = vsel %vm19223_vm6, %v1086_v35, 0  ;;  %v16163_v35 = vld [vmem:[%s17435_s18 + $0xc80] ss:$8 sps:$4 sm:$0xff]  }
 0x3f4   : > { %11878 = vmatpush1.bf16.msra.mxu0 %v16100_v58  ;;  %10551 = vmatprep.subr.bf16.mxu1 %v16105_v60  ;;  %v1745_v58 = vsel %vm19230_vm7, %v1070_v36, 0  ;;  %v1777_v60 = vsel %vm19230_vm7, %v1102_v54, 0  ;;  %v12997_v6 = vcombine.high %v1729_v57, %v1761_v5  ;;  %v16166_v36 = vld [vmem:[%s17435_s18 + $0x1c80] ss:$8 sps:$4 sm:$0xff]   ;;  %v16171_v54 = vld [vmem:[%s17435_s18 + $0xc94] ss:$8 sps:$4 sm:$0xff]  }
 0x3f5   : > { %11879 = vmatprep.subr.bf16.mxu0 %v16108_v61  ;;  %v16139_v61 = vld [vmem:[%s17435_s18 + $0xc40] ss:$8 sps:$4 sm:$0xff]   ;;  %v13029_v7 = vcombine.high %v1745_v58, %v1777_v60 }
 0x3f7   : > { %10552 = vmatpush1.bf16.msra.mxu1 %v16103_v63  ;;  %v16142_v63 = vld [vmem:[%s17435_s18 + $0x1c40] ss:$8 sps:$4 sm:$0xff]  }
 0x3f8   : > { %11880 = vmatpush1.bf16.msra.mxu0 %v16106_v13  ;;  %10553 = vmatprep.subr.bf16.mxu1 %v16111_v52  ;;  %v1196_v13 = vadd.s32 3072, %v17476_v43  ;;  %v1197_v52 = vadd.s32 3200, %v17476_v43 }
 0x3f9   : > { %11881 = vmatprep.subr.bf16.mxu0 %v16114_v53  ;;  %v16147_v53 = vld [vmem:[%s17435_s18 + $0xc54] ss:$8 sps:$4 sm:$0xff]  }
 0x3fa   : > { %v1262_v0 = vadd.s32 %v17485_v50, %v1196_v13  ;;  %v1263_v16 = vadd.s32 %v17485_v50, %v1197_v52  ;;  %v16186_v13 = vld [vmem:[%s17435_s18 + $0x1cb4] ss:$8 sps:$4 sm:$0xff]   ;;  %v16181_v52 = vld [vmem:[%s17435_s18 + $0xcb0] ss:$8 sps:$4 sm:$0xff]  }
 0x3fb   : > { %10554 = vmatpush1.bf16.msra.mxu1 %v16109_v3  ;;  %v16150_v3 = vld [vmem:[%s17435_s18 + $0x1c54] ss:$8 sps:$4 sm:$0xff]  }
 0x3fc   : > { %11882 = vmatpush1.bf16.msra.mxu0 %v16112_v4  ;;  %10606 = vmatprep.subr.bf16.mxu1 %v16117_v8  ;;  %v1228_v4 = vadd.s32 7168, %v17476_v43  ;;  %v16148_v8 = vld [vmem:[%s17435_s18 + $0x1c50] ss:$8 sps:$4 sm:$0xff]   ;;  %vm1326_vm8 = vcmp.lt.s32.totalorder %v1262_v0, 68970  ;;  %vm1327_vm9 = vcmp.lt.s32.totalorder %v1263_v16, 68970 }
 0x3fd   : > { %11934 = vmatprep.subr.bf16.mxu0 %v16120_v9  ;;  %v1118_v9 = vld [vmem:[%s17433_s10 + $0x858] sm:$0xff]  ;;  %vm19382_vm12 = vmpackc.low %vm1327_vm9, %vm1326_vm8  ;;  %v16202_v0 = vld [vmem:[%s17435_s18 + $0x1ce0] ss:$8 sps:$4 sm:$0xff]  }
 0x3fe   : > { %10556 = vmatmul.mubr.bf16.vlgmr.msra.gmra.mrb[0].mxu1 %v12804_v11  ;;  %v1150_v11 = vld [vmem:[%s17433_s10 + $0x958] sm:$0xff] }
 0x3ff   : > { %11884 = vmatmul.mubr.bf16.vlgmr.msra.gmra.mrb[0].mxu0 %v12836_v10  ;;  %10607 = vmatpush1.bf16.msra.mxu1 %v16115_v2  ;;  %v1134_v10 = vld [vmem:[%s17433_s10 + $0x8d8] sm:$0xff]  ;;  %v16156_v2 = vld [vmem:[%s17435_s18 + $0x1c64] ss:$8 sps:$4 sm:$0xff]  }
 0x400   : > { %11935 = vmatpush1.bf16.msra.mxu0 %v16118_v19  ;;  %10608 = vmatprep.subr.bf16.mxu1 %v16123_v20  ;;  %v1294_v19 = vadd.s32 %v17485_v50, %v1228_v4  ;;  %v1295_v20 = vadd.s32 %v17485_v50, %v1229_v59  ;;  %v16192_v4 = vld [vmem:[%s17435_s18 + $0x1cc4] ss:$8 sps:$4 sm:$0xff]   ;;  %v16187_v59 = vld [vmem:[%s17435_s18 + $0xcc0] ss:$8 sps:$4 sm:$0xff]   ;;  %v16207_v16 = vld [vmem:[%s17435_s18 + $0xcf4] ss:$8 sps:$4 sm:$0xff]  }
 0x401   : > { %11936 = vmatprep.subr.bf16.mxu0 %v16126_v21  ;;  %10565 = vmatprep.mubr.bf16.mxu1 %v12869_v14  ;;  %v12996_v21 = vcombine.low %v1729_v57, %v1761_v5  ;;  %v13028_v14 = vcombine.low %v1745_v58, %v1777_v60  ;;  %v16172_v57 = vld [vmem:[%s17435_s18 + $0x1c90] ss:$8 sps:$4 sm:$0xff]   ;;  %v16177_v5 = vld [vmem:[%s17435_s18 + $0xca4] ss:$8 sps:$4 sm:$0xff]   ;;  %v16175_v60 = vld [vmem:[%s17435_s18 + $0xca0] ss:$8 sps:$4 sm:$0xff]  }
 0x402   : > { %11893 = vmatprep.mubr.bf16.mxu0 %v12901_v15  ;;  %v1793_v15 = vsel %vm19223_vm6, %v1118_v9, 0  ;;  %vm1358_vm10 = vcmp.lt.s32.totalorder %v1294_v19, 68970  ;;  %vm1359_vm11 = vcmp.lt.s32.totalorder %v1295_v20, 68970  ;;  %v16180_v58 = vld [vmem:[%s17435_s18 + $0x1ca4] ss:$8 sps:$4 sm:$0xff]  }
 0x403   : > { %10609 = vmatpush1.bf16.msra.mxu1 %v16121_v23  ;;  %v1825_v23 = vsel %vm19223_vm6, %v1150_v11, 0  ;;  %vm19389_vm13 = vmpackc.low %vm1359_vm11, %vm1358_vm10  ;;  %v16196_v9 = vld [vmem:[%s17435_s18 + $0x1cd0] ss:$8 sps:$4 sm:$0xff]   ;;  %v16201_v11 = vld [vmem:[%s17435_s18 + $0xce4] ss:$8 sps:$4 sm:$0xff]  }
 0x404   : > { %11937 = vmatpush1.bf16.msra.mxu0 %v16124_v25  ;;  %10610 = vmatprep.subr.bf16.mxu1 %v16129_v31  ;;  %v1809_v25 = vsel %vm19230_vm7, %v1134_v10, 0  ;;  %v16157_v31 = vld [vmem:[%s17435_s18 + $0xc70] ss:$8 sps:$4 sm:$0xff]   ;;  %v19409_v51 = vsel %vm19389_vm13, %v911_v29, 0  ;;  %v16204_v10 = vld [vmem:[%s17435_s18 + $0x1ce4] ss:$8 sps:$4 sm:$0xff]  }
 0x405   : > { %11938 = vmatprep.subr.bf16.mxu0 %v16132_v32  ;;  %v13061_v32 = vcombine.high %v1793_v15, %v1825_v23  ;;  %v16208_v19 = vld [vmem:[%s17435_s18 + $0x1cf0] ss:$8 sps:$4 sm:$0xff]   ;;  %v927_v20 = vld [vmem:[%s17433_s10 + $0x260] sm:$0xff] }
 0x406   : > { %10566 = vmatmul.mubr.bf16.gmra.mrb[4].mxu1 %v12868_v34  ;;  %v13093_v34 = vcombine.high %v1809_v25, %v1841_v18  ;;  %v16217_v29 = vld [vmem:[%s17435_s18 + $0xd10] ss:$8 sps:$4 sm:$0xff]  }
 0x407   : > { %11894 = vmatmul.mubr.bf16.gmra.mrb[4].mxu0 %v12900_v62  ;;  %10611 = vmatpush1.bf16.msra.mxu1 %v16127_v40  ;;  %v863_v62 = vld [vmem:[%s17433_s10 + $0x60] sm:$0xff]  ;;  %v16256_v40 = vld [vmem:[%s17435_s18 + $0x1d70] ss:$8 sps:$4 sm:$0xff]  }
 0x408   : > { %11939 = vmatpush1.bf16.msra.mxu0 %v16130_v41  ;;  %10612 = vmatprep.subr.bf16.mxu1 %v16135_v42  ;;  %v16165_v41 = vld [vmem:[%s17435_s18 + $0xc84] ss:$8 sps:$4 sm:$0xff]  }
 0x409   : > { %11940 = vmatprep.subr.bf16.mxu0 %v16138_v33  ;;  %10575 = vmatprep.mubr.bf16.mxu1 %v12933_v44  ;;  %v16168_v42 = vld [vmem:[%s17435_s18 + $0x1c84] ss:$8 sps:$4 sm:$0xff]   ;;  %v13060_v33 = vcombine.low %v1793_v15, %v1825_v23  ;;  %v13092_v44 = vcombine.low %v1809_v25, %v1841_v18 }
 0x40a   : > { %11903 = vmatprep.mubr.bf16.mxu0 %v12965_v46  ;;  %v19397_v46 = vsel %vm19382_vm12, %v863_v62, 0  ;;  %v975_v15 = vld [vmem:[%s17433_s10 + $0x3e0] sm:$0xff]  ;;  %v16222_v62 = vld [vmem:[%s17435_s18 + $0x1d14] ss:$8 sps:$4 sm:$0xff]  }
 0x40b   : > { %10613 = vmatpush1.bf16.msra.mxu1 %v16133_v47  ;;  %v19401_v47 = vsel %vm19382_vm12, %v895_v27, 0  ;;  %v16213_v23 = vld [vmem:[%s17435_s18 + $0xd04] ss:$8 sps:$4 sm:$0xff]  }
 0x40c   : > { %11941 = vmatpush1.bf16.msra.mxu0 %v16136_v49  ;;  %10614 = vmatprep.subr.bf16.mxu1 %v16141_v55  ;;  %v19405_v49 = vsel %vm19389_vm13, %v879_v39, 0  ;;  %v16174_v55 = vld [vmem:[%s17435_s18 + $0x1c94] ss:$8 sps:$4 sm:$0xff]   ;;  %v16216_v25 = vld [vmem:[%s17435_s18 + $0x1d04] ss:$8 sps:$4 sm:$0xff]   ;;  %v12806_v18 = vcombine.low %v19397_v46, %v19401_v47 }
 0x40d   : > { %11942 = vmatprep.subr.bf16.mxu0 %v16144_v45  ;;  %v12807_v45 = vcombine.high %v19397_v46, %v19401_v47  ;;  %v1039_v46 = vld [vmem:[%s17433_s10 + $0x5e0] sm:$0xff] }
 0x40e   : > { %10576 = vmatmul.mubr.bf16.gmra.mrb[8].mxu1 %v12932_v56  ;;  %v12839_v56 = vcombine.high %v19405_v49, %v19409_v51  ;;  %v16225_v47 = vld [vmem:[%s17435_s18 + $0xd24] ss:$8 sps:$4 sm:$0xff]  }
 0x40f   : > { %11904 = vmatmul.mubr.bf16.gmra.mrb[8].mxu0 %v12964_v48  ;;  %10615 = vmatpush1.bf16.msra.mxu1 %v16139_v61  ;;  %v16169_v48 = vld [vmem:[%s17435_s18 + $0xc90] ss:$8 sps:$4 sm:$0xff]   ;;  %v16178_v61 = vld [vmem:[%s17435_s18 + $0x1ca0] ss:$8 sps:$4 sm:$0xff]  }
 0x410   : > { %11943 = vmatpush1.bf16.msra.mxu0 %v16142_v63  ;;  %10616 = vmatprep.subr.bf16.mxu1 %v16147_v53  ;;  %v16183_v63 = vld [vmem:[%s17435_s18 + $0xcb4] ss:$8 sps:$4 sm:$0xff]   ;;  %v16184_v53 = vld [vmem:[%s17435_s18 + $0x1cb0] ss:$8 sps:$4 sm:$0xff]  }
 0x411   : > { %11944 = vmatprep.subr.bf16.mxu0 %v16150_v3  ;;  %10585 = vmatprep.mubr.bf16.mxu1 %v12997_v6  ;;  %v16189_v3 = vld [vmem:[%s17435_s18 + $0xcc4] ss:$8 sps:$4 sm:$0xff]   ;;  %v16190_v6 = vld [vmem:[%s17435_s18 + $0x1cc0] ss:$8 sps:$4 sm:$0xff]  }
 0x412   : > { %11913 = vmatprep.mubr.bf16.mxu0 %v13029_v7  ;;  %v16195_v7 = vld [vmem:[%s17435_s18 + $0xcd4] ss:$8 sps:$4 sm:$0xff]  }
 0x413   : > { %10617 = vmatpush1.bf16.msra.mxu1 %v16145_v1  ;;  %v16198_v1 = vld [vmem:[%s17435_s18 + $0x1cd4] ss:$8 sps:$4 sm:$0xff]  }
 0x414   : > { %11945 = vmatpush1.bf16.msra.mxu0 %v16148_v8  ;;  %10618 = vmatprep.subr.bf16.mxu1 %v16153_v17  ;;  %v16193_v8 = vld [vmem:[%s17435_s18 + $0xcd0] ss:$8 sps:$4 sm:$0xff]   ;;  %v16210_v17 = vld [vmem:[%s17435_s18 + $0x1cf4] ss:$8 sps:$4 sm:$0xff]  }
 0x415   : > { %11946 = vmatprep.subr.bf16.mxu0 %v16156_v2  ;;  %v16205_v2 = vld [vmem:[%s17435_s18 + $0xcf0] ss:$8 sps:$4 sm:$0xff]  }
 0x416   : > { %10586 = vmatmul.mubr.bf16.gmra.mrb[12].mxu1 %v12996_v21  ;;  %v959_v21 = vld [vmem:[%s17433_s10 + $0x360] sm:$0xff] }
 0x417   : > { %11914 = vmatmul.mubr.bf16.gmra.mrb[12].mxu0 %v13028_v14  ;;  %10619 = vmatpush1.bf16.msra.mxu1 %v16151_v26  ;;  %v943_v14 = vld [vmem:[%s17433_s10 + $0x2e0] sm:$0xff]  ;;  %v12838_v26 = vcombine.low %v19405_v49, %v19409_v51 }
 0x418   : > { %11947 = vmatpush1.bf16.msra.mxu0 %v16154_v28  ;;  %10620 = vmatprep.subr.bf16.mxu1 %v16159_v22  ;;  %v1602_v28 = vsel %vm19382_vm12, %v927_v20, 0  ;;  %v1634_v22 = vsel %vm19382_vm12, %v959_v21, 0  ;;  %v16228_v49 = vld [vmem:[%s17435_s18 + $0x1d24] ss:$8 sps:$4 sm:$0xff]   ;;  %v1231_v20 = vadd.s32 7552, %v17476_v43 }
 0x419   : > { %11948 = vmatprep.subr.bf16.mxu0 %v16162_v30  ;;  %10595 = vmatprep.mubr.bf16.mxu1 %v13061_v32  ;;  %v1618_v30 = vsel %vm19389_vm13, %v943_v14, 0  ;;  %v16214_v32 = vld [vmem:[%s17435_s18 + $0x1d00] ss:$8 sps:$4 sm:$0xff]   ;;  %v12871_v27 = vcombine.high %v1602_v28, %v1634_v22  ;;  %v12870_v51 = vcombine.low %v1602_v28, %v1634_v22 }
 0x41a   : > { %11923 = vmatprep.mubr.bf16.mxu0 %v13093_v34  ;;  %v16219_v34 = vld [vmem:[%s17435_s18 + $0xd14] ss:$8 sps:$4 sm:$0xff]   ;;  %v1167_v28 = vld [vmem:[%s17433_s10 + $0x9e0] sm:$0xff] }
 0x41b   : > { %10621 = vmatpush1.bf16.msra.mxu1 %v16157_v31  ;;  %v1650_v31 = vsel %vm19389_vm13, %v975_v15, 0  ;;  %v16241_v15 = vld [vmem:[%s17435_s18 + $0xd50] ss:$8 sps:$4 sm:$0xff]  }
 0x41c   : > { %11949 = vmatpush1.bf16.msra.mxu0 %v16160_v24  ;;  %10622 = vmatprep.subr.bf16.mxu1 %v16165_v41  ;;  %v16211_v24 = vld [vmem:[%s17435_s18 + $0xd00] ss:$8 sps:$4 sm:$0xff]   ;;  %v12903_v39 = vcombine.high %v1618_v30, %v1650_v31  ;;  %v16220_v41 = vld [vmem:[%s17435_s18 + $0x1d10] ss:$8 sps:$4 sm:$0xff]  }
 0x41d   : > { %11950 = vmatprep.subr.bf16.mxu0 %v16168_v42  ;;  %v991_v42 = vld [vmem:[%s17433_s10 + $0x460] sm:$0xff] }
 0x41e   : > { %10596 = vmatmul.mubr.bf16.gmra.mrb[16].mxu1 %v13060_v33  ;;  %v1023_v33 = vld [vmem:[%s17433_s10 + $0x560] sm:$0xff] }
 0x41f   : > { %11924 = vmatmul.mubr.bf16.gmra.mrb[16].mxu0 %v13092_v44  ;;  %10623 = vmatpush1.bf16.msra.mxu1 %v16163_v35  ;;  %v1007_v44 = vld [vmem:[%s17433_s10 + $0x4e0] sm:$0xff]  ;;  %v12902_v35 = vcombine.low %v1618_v30, %v1650_v31 }
 0x420   : > { %11951 = vmatpush1.bf16.msra.mxu0 %v16166_v36  ;;  %10624 = vmatprep.subr.bf16.mxu1 %v16171_v54  ;;  %v1666_v36 = vsel %vm19382_vm12, %v991_v42, 0  ;;  %v1698_v54 = vsel %vm19382_vm12, %v1023_v33, 0  ;;  %v16249_v31 = vld [vmem:[%s17435_s18 + $0xd64] ss:$8 sps:$4 sm:$0xff]   ;;  %v1842_v42 = vsel %vm19389_vm13, %v1167_v28, 0 }
 0x421   : > { %11952 = vmatprep.subr.bf16.mxu0 %v16174_v55  ;;  %10638 = vmatprep.mubr.bf16.mxu1 %v12807_v45  ;;  %v1682_v55 = vsel %vm19389_vm13, %v1007_v44, 0  ;;  %v1714_v45 = vsel %vm19389_vm13, %v1039_v46, 0  ;;  %v16247_v33 = vld [vmem:[%s17435_s18 + $0xd60] ss:$8 sps:$4 sm:$0xff]   ;;  %v16258_v46 = vld [vmem:[%s17435_s18 + $0x1d74] ss:$8 sps:$4 sm:$0xff]  }
 0x422   : > { %11966 = vmatprep.mubr.bf16.mxu0 %v12839_v56  ;;  %v16223_v56 = vld [vmem:[%s17435_s18 + $0xd20] ss:$8 sps:$4 sm:$0xff]  }
 0x423   : > { %10625 = vmatpush1.bf16.msra.mxu1 %v16169_v48  ;;  %v16226_v48 = vld [vmem:[%s17435_s18 + $0x1d20] ss:$8 sps:$4 sm:$0xff]  }
 0x424   : > { %11953 = vmatpush1.bf16.msra.mxu0 %v16172_v57  ;;  %10626 = vmatprep.subr.bf16.mxu1 %v16177_v5  ;;  %v16231_v57 = vld [vmem:[%s17435_s18 + $0xd34] ss:$8 sps:$4 sm:$0xff]   ;;  %v16250_v44 = vld [vmem:[%s17435_s18 + $0x1d60] ss:$8 sps:$4 sm:$0xff]  }
 0x425   : > { %11954 = vmatprep.subr.bf16.mxu0 %v16180_v58  ;;  %v16234_v5 = vld [vmem:[%s17435_s18 + $0x1d34] ss:$8 sps:$4 sm:$0xff]   ;;  %v12935_v58 = vcombine.high %v1666_v36, %v1698_v54  ;;  %v16295_v28 = vld [vmem:[%s17435_s18 + $0xde0] ss:$8 sps:$4 sm:$0xff]  }
 0x427   : > { %10627 = vmatpush1.bf16.msra.mxu1 %v16175_v60  ;;  %v12967_v60 = vcombine.high %v1682_v55, %v1714_v45 }
 0x428   : > { %11955 = vmatpush1.bf16.msra.mxu0 %v16178_v61  ;;  %10628 = vmatprep.subr.bf16.mxu1 %v16183_v63  ;;  %v16229_v61 = vld [vmem:[%s17435_s18 + $0xd30] ss:$8 sps:$4 sm:$0xff]  }
 0x429   : > { %11956 = vmatprep.subr.bf16.mxu0 %v16186_v13  ;;  %v16232_v63 = vld [vmem:[%s17435_s18 + $0x1d30] ss:$8 sps:$4 sm:$0xff]   ;;  %v1055_v13 = vld [vmem:[%s17433_s10 + $0x660] sm:$0xff] }
 0x42b   : > { %10629 = vmatpush1.bf16.msra.mxu1 %v16181_v52  ;;  %v1087_v52 = vld [vmem:[%s17433_s10 + $0x760] sm:$0xff] }
 0x42c   : > { %11957 = vmatpush1.bf16.msra.mxu0 %v16184_v53  ;;  %10630 = vmatprep.subr.bf16.mxu1 %v16189_v3  ;;  %v1071_v53 = vld [vmem:[%s17433_s10 + $0x6e0] sm:$0xff] }
 0x42d   : > { %11958 = vmatprep.subr.bf16.mxu0 %v16192_v4  ;;  %v1103_v3 = vld [vmem:[%s17433_s10 + $0x7e0] sm:$0xff] }
 0x42e   : > { %v16237_v4 = vld [vmem:[%s17435_s18 + $0xd44] ss:$8 sps:$4 sm:$0xff]  }
 0x42f   : > { %10631 = vmatpush1.bf16.msra.mxu1 %v16187_v59  ;;  %v16240_v59 = vld [vmem:[%s17435_s18 + $0x1d44] ss:$8 sps:$4 sm:$0xff]  }
 0x430   : > { %11959 = vmatpush1.bf16.msra.mxu0 %v16190_v6  ;;  %10632 = vmatprep.subr.bf16.mxu1 %v16195_v7  ;;  %v12934_v6 = vcombine.low %v1666_v36, %v1698_v54  ;;  %v12966_v7 = vcombine.low %v1682_v55, %v1714_v45  ;;  %v896_v36 = vld [vmem:[%s17433_s10 + $0x168] sm:$0xff]  ;;  %v16351_v54 = vld [vmem:[%s17435_s18 + $0xe74] ss:$8 sps:$4 sm:$0xff]  }
 0x431   : > { %11960 = vmatprep.subr.bf16.mxu0 %v16198_v1  ;;  %v1730_v1 = vsel %vm19382_vm12, %v1055_v13, 0  ;;  %v880_v55 = vld [vmem:[%s17433_s10 + $0xe8] sm:$0xff] }
 0x432   : > { %v912_v45 = vld [vmem:[%s17433_s10 + $0x1e8] sm:$0xff] }
 0x433   : > { %10633 = vmatpush1.bf16.msra.mxu1 %v16193_v8  ;;  %v1762_v8 = vsel %vm19382_vm12, %v1087_v52, 0  ;;  %v16259_v52 = vld [vmem:[%s17435_s18 + $0xd80] ss:$8 sps:$4 sm:$0xff]  }
 0x434   : > { %11961 = vmatpush1.bf16.msra.mxu0 %v16196_v9  ;;  %10634 = vmatprep.subr.bf16.mxu1 %v16201_v11  ;;  %v1746_v9 = vsel %vm19389_vm13, %v1071_v53, 0  ;;  %v1778_v11 = vsel %vm19389_vm13, %v1103_v3, 0  ;;  %v12999_v21 = vcombine.high %v1730_v1, %v1762_v8  ;;  %v16262_v53 = vld [vmem:[%s17435_s18 + $0x1d80] ss:$8 sps:$4 sm:$0xff]   ;;  %v16267_v3 = vld [vmem:[%s17435_s18 + $0xd94] ss:$8 sps:$4 sm:$0xff]  }
 0x435   : > { %11962 = vmatprep.subr.bf16.mxu0 %v16204_v10  ;;  %v16235_v10 = vld [vmem:[%s17435_s18 + $0xd40] ss:$8 sps:$4 sm:$0xff]   ;;  %v13031_v14 = vcombine.high %v1746_v9, %v1778_v11 }
 0x437   : > { %10635 = vmatpush1.bf16.msra.mxu1 %v16199_v12  ;;  %v16238_v12 = vld [vmem:[%s17435_s18 + $0x1d40] ss:$8 sps:$4 sm:$0xff]  }
 0x438   : > { %11963 = vmatpush1.bf16.msra.mxu0 %v16202_v0  ;;  %10636 = vmatprep.subr.bf16.mxu1 %v16207_v16  ;;  %v1198_v0 = vadd.s32 3328, %v17476_v43  ;;  %v1199_v16 = vadd.s32 3456, %v17476_v43 }
 0x439   : > { %11964 = vmatprep.subr.bf16.mxu0 %v16210_v17  ;;  %v16243_v17 = vld [vmem:[%s17435_s18 + $0xd54] ss:$8 sps:$4 sm:$0xff]  }
 0x43a   : > { %v1264_v22 = vadd.s32 %v17485_v50, %v1198_v0  ;;  %v1265_v30 = vadd.s32 %v17485_v50, %v1199_v16  ;;  %v16282_v0 = vld [vmem:[%s17435_s18 + $0x1db4] ss:$8 sps:$4 sm:$0xff]   ;;  %v16277_v16 = vld [vmem:[%s17435_s18 + $0xdb0] ss:$8 sps:$4 sm:$0xff]  }
 0x43b   : > { %10637 = vmatpush1.bf16.msra.mxu1 %v16205_v2  ;;  %v16246_v2 = vld [vmem:[%s17435_s18 + $0x1d54] ss:$8 sps:$4 sm:$0xff]  }
 0x43c   : > { %11965 = vmatpush1.bf16.msra.mxu0 %v16208_v19  ;;  %10689 = vmatprep.subr.bf16.mxu1 %v16213_v23  ;;  %v1230_v19 = vadd.s32 7424, %v17476_v43  ;;  %v16244_v23 = vld [vmem:[%s17435_s18 + $0x1d50] ss:$8 sps:$4 sm:$0xff]   ;;  %vm1328_vm14 = vcmp.lt.s32.totalorder %v1264_v22, 68970  ;;  %vm1329_vm15 = vcmp.lt.s32.totalorder %v1265_v30, 68970 }
 0x43d   : > { %12017 = vmatprep.subr.bf16.mxu0 %v16216_v25  ;;  %v1119_v25 = vld [vmem:[%s17433_s10 + $0x860] sm:$0xff]  ;;  %vm19541_vm2 = vmpackc.low %vm1329_vm15, %vm1328_vm14  ;;  %v16303_v30 = vld [vmem:[%s17435_s18 + $0xdf4] ss:$8 sps:$4 sm:$0xff]  }
 0x43e   : > { %10639 = vmatmul.mubr.bf16.vlgmr.msra.gmra.mrb[0].mxu1 %v12806_v18  ;;  %v1151_v18 = vld [vmem:[%s17433_s10 + $0x960] sm:$0xff] }
 0x43f   : > { %11967 = vmatmul.mubr.bf16.vlgmr.msra.gmra.mrb[0].mxu0 %v12838_v26  ;;  %10690 = vmatpush1.bf16.msra.mxu1 %v16211_v24  ;;  %v1135_v26 = vld [vmem:[%s17433_s10 + $0x8e0] sm:$0xff] }
 0x440   : > { %12018 = vmatpush1.bf16.msra.mxu0 %v16214_v32  ;;  %10691 = vmatprep.subr.bf16.mxu1 %v16219_v34  ;;  %v16252_v24 = vld [vmem:[%s17435_s18 + $0x1d64] ss:$8 sps:$4 sm:$0xff]   ;;  %v1296_v32 = vadd.s32 %v17485_v50, %v1230_v19  ;;  %v1297_v34 = vadd.s32 %v17485_v50, %v1231_v20  ;;  %v16283_v20 = vld [vmem:[%s17435_s18 + $0xdc0] ss:$8 sps:$4 sm:$0xff]  }
 0x441   : > { %12019 = vmatprep.subr.bf16.mxu0 %v16222_v62  ;;  %10648 = vmatprep.mubr.bf16.mxu1 %v12871_v27  ;;  %v12998_v62 = vcombine.low %v1730_v1, %v1762_v8  ;;  %v13030_v27 = vcombine.low %v1746_v9, %v1778_v11  ;;  %v16268_v1 = vld [vmem:[%s17435_s18 + $0x1d90] ss:$8 sps:$4 sm:$0xff]   ;;  %v16273_v8 = vld [vmem:[%s17435_s18 + $0xda4] ss:$8 sps:$4 sm:$0xff]   ;;  %v16271_v11 = vld [vmem:[%s17435_s18 + $0xda0] ss:$8 sps:$4 sm:$0xff]  }
 0x442   : > { %11976 = vmatprep.mubr.bf16.mxu0 %v12903_v39  ;;  %v1794_v39 = vsel %vm19382_vm12, %v1119_v25, 0  ;;  %vm1360_vm0 = vcmp.lt.s32.totalorder %v1296_v32, 68970  ;;  %vm1361_vm1 = vcmp.lt.s32.totalorder %v1297_v34, 68970  ;;  %v16276_v9 = vld [vmem:[%s17435_s18 + $0x1da4] ss:$8 sps:$4 sm:$0xff]  }
 0x443   : > { %10692 = vmatpush1.bf16.msra.mxu1 %v16217_v29  ;;  %v1826_v29 = vsel %vm19382_vm12, %v1151_v18, 0  ;;  %vm19548_vm3 = vmpackc.low %vm1361_vm1, %vm1360_vm0  ;;  %v16288_v19 = vld [vmem:[%s17435_s18 + $0x1dc4] ss:$8 sps:$4 sm:$0xff]   ;;  %v16292_v25 = vld [vmem:[%s17435_s18 + $0x1dd0] ss:$8 sps:$4 sm:$0xff]  }
 0x444   : > { %12020 = vmatpush1.bf16.msra.mxu0 %v16220_v41  ;;  %10693 = vmatprep.subr.bf16.mxu1 %v16225_v47  ;;  %v1810_v41 = vsel %vm19389_vm13, %v1135_v26, 0  ;;  %v16253_v47 = vld [vmem:[%s17435_s18 + $0xd70] ss:$8 sps:$4 sm:$0xff]   ;;  %v19568_v13 = vsel %vm19548_vm3, %v912_v45, 0  ;;  %v16297_v18 = vld [vmem:[%s17435_s18 + $0xde4] ss:$8 sps:$4 sm:$0xff]  }
 0x445   : > { %12021 = vmatprep.subr.bf16.mxu0 %v16228_v49  ;;  %v13063_v49 = vcombine.high %v1794_v39, %v1826_v29  ;;  %v16300_v26 = vld [vmem:[%s17435_s18 + $0x1de4] ss:$8 sps:$4 sm:$0xff]   ;;  %v16298_v22 = vld [vmem:[%s17435_s18 + $0x1de0] ss:$8 sps:$4 sm:$0xff]   ;;  %v16304_v32 = vld [vmem:[%s17435_s18 + $0x1df0] ss:$8 sps:$4 sm:$0xff]  }
 0x446   : > { %10649 = vmatmul.mubr.bf16.gmra.mrb[4].mxu1 %v12870_v51  ;;  %v13095_v51 = vcombine.high %v1810_v41, %v1842_v42  ;;  %v928_v34 = vld [vmem:[%s17433_s10 + $0x268] sm:$0xff]  ;;  %v16313_v45 = vld [vmem:[%s17435_s18 + $0xe10] ss:$8 sps:$4 sm:$0xff]  }
 0x447   : > { %11977 = vmatmul.mubr.bf16.gmra.mrb[4].mxu0 %v12902_v35  ;;  %10694 = vmatpush1.bf16.msra.mxu1 %v16223_v56  ;;  %v864_v35 = vld [vmem:[%s17433_s10 + $0x68] sm:$0xff]  ;;  %v16352_v56 = vld [vmem:[%s17435_s18 + $0x1e70] ss:$8 sps:$4 sm:$0xff]  }
 0x448   : > { %12022 = vmatpush1.bf16.msra.mxu0 %v16226_v48  ;;  %10695 = vmatprep.subr.bf16.mxu1 %v16231_v57  ;;  %v16261_v48 = vld [vmem:[%s17435_s18 + $0xd84] ss:$8 sps:$4 sm:$0xff]  }
 0x449   : > { %12023 = vmatprep.subr.bf16.mxu0 %v16234_v5  ;;  %10658 = vmatprep.mubr.bf16.mxu1 %v12935_v58  ;;  %v16264_v57 = vld [vmem:[%s17435_s18 + $0x1d84] ss:$8 sps:$4 sm:$0xff]   ;;  %v13062_v5 = vcombine.low %v1794_v39, %v1826_v29  ;;  %v13094_v58 = vcombine.low %v1810_v41, %v1842_v42 }
 0x44a   : > { %11986 = vmatprep.mubr.bf16.mxu0 %v12967_v60  ;;  %v19556_v60 = vsel %vm19541_vm2, %v864_v35, 0  ;;  %v976_v39 = vld [vmem:[%s17433_s10 + $0x3e8] sm:$0xff]  ;;  %v16318_v35 = vld [vmem:[%s17435_s18 + $0x1e14] ss:$8 sps:$4 sm:$0xff]  }
 0x44b   : > { %10696 = vmatpush1.bf16.msra.mxu1 %v16229_v61  ;;  %v19560_v61 = vsel %vm19541_vm2, %v896_v36, 0  ;;  %v16309_v29 = vld [vmem:[%s17435_s18 + $0xe04] ss:$8 sps:$4 sm:$0xff]  }
 0x44c   : > { %12024 = vmatpush1.bf16.msra.mxu0 %v16232_v63  ;;  %10697 = vmatprep.subr.bf16.mxu1 %v16237_v4  ;;  %v19564_v63 = vsel %vm19548_vm3, %v880_v55, 0  ;;  %v16270_v4 = vld [vmem:[%s17435_s18 + $0x1d94] ss:$8 sps:$4 sm:$0xff]   ;;  %v16312_v41 = vld [vmem:[%s17435_s18 + $0x1e04] ss:$8 sps:$4 sm:$0xff]   ;;  %v12808_v42 = vcombine.low %v19556_v60, %v19560_v61 }
 0x44d   : > { %12025 = vmatprep.subr.bf16.mxu0 %v16240_v59  ;;  %v12809_v59 = vcombine.high %v19556_v60, %v19560_v61  ;;  %v1040_v60 = vld [vmem:[%s17433_s10 + $0x5e8] sm:$0xff] }
 0x44e   : > { %10659 = vmatmul.mubr.bf16.gmra.mrb[8].mxu1 %v12934_v6  ;;  %v12841_v6 = vcombine.high %v19564_v63, %v19568_v13  ;;  %v16321_v61 = vld [vmem:[%s17435_s18 + $0xe24] ss:$8 sps:$4 sm:$0xff]  }
 0x44f   : > { %11987 = vmatmul.mubr.bf16.gmra.mrb[8].mxu0 %v12966_v7  ;;  %10698 = vmatpush1.bf16.msra.mxu1 %v16235_v10  ;;  %v16265_v7 = vld [vmem:[%s17435_s18 + $0xd90] ss:$8 sps:$4 sm:$0xff]   ;;  %v16274_v10 = vld [vmem:[%s17435_s18 + $0x1da0] ss:$8 sps:$4 sm:$0xff]  }
 0x450   : > { %12026 = vmatpush1.bf16.msra.mxu0 %v16238_v12  ;;  %10699 = vmatprep.subr.bf16.mxu1 %v16243_v17  ;;  %v16279_v12 = vld [vmem:[%s17435_s18 + $0xdb4] ss:$8 sps:$4 sm:$0xff]   ;;  %v16280_v17 = vld [vmem:[%s17435_s18 + $0x1db0] ss:$8 sps:$4 sm:$0xff]  }
 0x451   : > { %12027 = vmatprep.subr.bf16.mxu0 %v16246_v2  ;;  %10668 = vmatprep.mubr.bf16.mxu1 %v12999_v21  ;;  %v16285_v2 = vld [vmem:[%s17435_s18 + $0xdc4] ss:$8 sps:$4 sm:$0xff]   ;;  %v16286_v21 = vld [vmem:[%s17435_s18 + $0x1dc0] ss:$8 sps:$4 sm:$0xff]  }
 0x452   : > { %11996 = vmatprep.mubr.bf16.mxu0 %v13031_v14  ;;  %v16291_v14 = vld [vmem:[%s17435_s18 + $0xdd4] ss:$8 sps:$4 sm:$0xff]  }
 0x453   : > { %10700 = vmatpush1.bf16.msra.mxu1 %v16241_v15  ;;  %v16294_v15 = vld [vmem:[%s17435_s18 + $0x1dd4] ss:$8 sps:$4 sm:$0xff]  }
 0x454   : > { %12028 = vmatpush1.bf16.msra.mxu0 %v16244_v23  ;;  %10701 = vmatprep.subr.bf16.mxu1 %v16249_v31  ;;  %v16289_v23 = vld [vmem:[%s17435_s18 + $0xdd0] ss:$8 sps:$4 sm:$0xff]   ;;  %v16306_v31 = vld [vmem:[%s17435_s18 + $0x1df4] ss:$8 sps:$4 sm:$0xff]  }
 0x455   : > { %12029 = vmatprep.subr.bf16.mxu0 %v16252_v24  ;;  %v16301_v24 = vld [vmem:[%s17435_s18 + $0xdf0] ss:$8 sps:$4 sm:$0xff]  }
 0x456   : > { %10669 = vmatmul.mubr.bf16.gmra.mrb[12].mxu1 %v12998_v62  ;;  %v960_v62 = vld [vmem:[%s17433_s10 + $0x368] sm:$0xff] }
 0x457   : > { %11997 = vmatmul.mubr.bf16.gmra.mrb[12].mxu0 %v13030_v27  ;;  %10702 = vmatpush1.bf16.msra.mxu1 %v16247_v33  ;;  %v944_v27 = vld [vmem:[%s17433_s10 + $0x2e8] sm:$0xff]  ;;  %v12840_v33 = vcombine.low %v19564_v63, %v19568_v13 }
 0x458   : > { %12030 = vmatpush1.bf16.msra.mxu0 %v16250_v44  ;;  %10703 = vmatprep.subr.bf16.mxu1 %v16255_v37  ;;  %v1603_v44 = vsel %vm19541_vm2, %v928_v34, 0  ;;  %v1635_v37 = vsel %vm19541_vm2, %v960_v62, 0  ;;  %v16324_v63 = vld [vmem:[%s17435_s18 + $0x1e24] ss:$8 sps:$4 sm:$0xff]   ;;  %v1233_v34 = vadd.s32 7808, %v17476_v43 }
 0x459   : > { %12031 = vmatprep.subr.bf16.mxu0 %v16258_v46  ;;  %10678 = vmatprep.mubr.bf16.mxu1 %v13063_v49  ;;  %v1619_v46 = vsel %vm19548_vm3, %v944_v27, 0  ;;  %v16310_v49 = vld [vmem:[%s17435_s18 + $0x1e00] ss:$8 sps:$4 sm:$0xff]   ;;  %v12873_v36 = vcombine.high %v1603_v44, %v1635_v37  ;;  %v12872_v13 = vcombine.low %v1603_v44, %v1635_v37 }
 0x45a   : > { %12006 = vmatprep.mubr.bf16.mxu0 %v13095_v51  ;;  %v16315_v51 = vld [vmem:[%s17435_s18 + $0xe14] ss:$8 sps:$4 sm:$0xff]   ;;  %v1168_v44 = vld [vmem:[%s17433_s10 + $0x9e8] sm:$0xff] }
 0x45b   : > { %10704 = vmatpush1.bf16.msra.mxu1 %v16253_v47  ;;  %v1651_v47 = vsel %vm19548_vm3, %v976_v39, 0  ;;  %v16337_v39 = vld [vmem:[%s17435_s18 + $0xe50] ss:$8 sps:$4 sm:$0xff]  }
 0x45c   : > { %12032 = vmatpush1.bf16.msra.mxu0 %v16256_v40  ;;  %10705 = vmatprep.subr.bf16.mxu1 %v16261_v48  ;;  %v16307_v40 = vld [vmem:[%s17435_s18 + $0xe00] ss:$8 sps:$4 sm:$0xff]   ;;  %v12905_v55 = vcombine.high %v1619_v46, %v1651_v47  ;;  %v16316_v48 = vld [vmem:[%s17435_s18 + $0x1e10] ss:$8 sps:$4 sm:$0xff]  }
 0x45d   : > { %12033 = vmatprep.subr.bf16.mxu0 %v16264_v57  ;;  %v992_v57 = vld [vmem:[%s17433_s10 + $0x468] sm:$0xff] }
 0x45e   : > { %10679 = vmatmul.mubr.bf16.gmra.mrb[16].mxu1 %v13062_v5  ;;  %v1024_v5 = vld [vmem:[%s17433_s10 + $0x568] sm:$0xff] }
 0x45f   : > { %12007 = vmatmul.mubr.bf16.gmra.mrb[16].mxu0 %v13094_v58  ;;  %10706 = vmatpush1.bf16.msra.mxu1 %v16259_v52  ;;  %v1008_v58 = vld [vmem:[%s17433_s10 + $0x4e8] sm:$0xff]  ;;  %v12904_v52 = vcombine.low %v1619_v46, %v1651_v47 }
 0x460   : > { %12034 = vmatpush1.bf16.msra.mxu0 %v16262_v53  ;;  %10707 = vmatprep.subr.bf16.mxu1 %v16267_v3  ;;  %v1667_v53 = vsel %vm19541_vm2, %v992_v57, 0  ;;  %v1699_v3 = vsel %vm19541_vm2, %v1024_v5, 0  ;;  %v16345_v47 = vld [vmem:[%s17435_s18 + $0xe64] ss:$8 sps:$4 sm:$0xff]   ;;  %v1843_v57 = vsel %vm19548_vm3, %v1168_v44, 0 }
 0x461   : > { %12035 = vmatprep.subr.bf16.mxu0 %v16270_v4  ;;  %10721 = vmatprep.mubr.bf16.mxu1 %v12809_v59  ;;  %v1683_v4 = vsel %vm19548_vm3, %v1008_v58, 0  ;;  %v1715_v59 = vsel %vm19548_vm3, %v1040_v60, 0  ;;  %v16343_v5 = vld [vmem:[%s17435_s18 + $0xe60] ss:$8 sps:$4 sm:$0xff]   ;;  %v16354_v60 = vld [vmem:[%s17435_s18 + $0x1e74] ss:$8 sps:$4 sm:$0xff]  }
 0x462   : > { %12049 = vmatprep.mubr.bf16.mxu0 %v12841_v6  ;;  %v16319_v6 = vld [vmem:[%s17435_s18 + $0xe20] ss:$8 sps:$4 sm:$0xff]  }
 0x463   : > { %10708 = vmatpush1.bf16.msra.mxu1 %v16265_v7  ;;  %v16322_v7 = vld [vmem:[%s17435_s18 + $0x1e20] ss:$8 sps:$4 sm:$0xff]  }
 0x464   : > { %12036 = vmatpush1.bf16.msra.mxu0 %v16268_v1  ;;  %10709 = vmatprep.subr.bf16.mxu1 %v16273_v8  ;;  %v16327_v1 = vld [vmem:[%s17435_s18 + $0xe34] ss:$8 sps:$4 sm:$0xff]   ;;  %v16346_v58 = vld [vmem:[%s17435_s18 + $0x1e60] ss:$8 sps:$4 sm:$0xff]  }
 0x465   : > { %12037 = vmatprep.subr.bf16.mxu0 %v16276_v9  ;;  %v16330_v8 = vld [vmem:[%s17435_s18 + $0x1e34] ss:$8 sps:$4 sm:$0xff]   ;;  %v12937_v9 = vcombine.high %v1667_v53, %v1699_v3  ;;  %v16391_v44 = vld [vmem:[%s17435_s18 + $0xee0] ss:$8 sps:$4 sm:$0xff]  }
 0x467   : > { %10710 = vmatpush1.bf16.msra.mxu1 %v16271_v11  ;;  %v12969_v11 = vcombine.high %v1683_v4, %v1715_v59 }
 0x468   : > { %12038 = vmatpush1.bf16.msra.mxu0 %v16274_v10  ;;  %10711 = vmatprep.subr.bf16.mxu1 %v16279_v12  ;;  %v16325_v10 = vld [vmem:[%s17435_s18 + $0xe30] ss:$8 sps:$4 sm:$0xff]  }
 0x469   : > { %12039 = vmatprep.subr.bf16.mxu0 %v16282_v0  ;;  %v16328_v12 = vld [vmem:[%s17435_s18 + $0x1e30] ss:$8 sps:$4 sm:$0xff]   ;;  %v1056_v0 = vld [vmem:[%s17433_s10 + $0x668] sm:$0xff] }
 0x46b   : > { %10712 = vmatpush1.bf16.msra.mxu1 %v16277_v16  ;;  %v1088_v16 = vld [vmem:[%s17433_s10 + $0x768] sm:$0xff] }
 0x46c   : > { %12040 = vmatpush1.bf16.msra.mxu0 %v16280_v17  ;;  %10713 = vmatprep.subr.bf16.mxu1 %v16285_v2  ;;  %v1072_v17 = vld [vmem:[%s17433_s10 + $0x6e8] sm:$0xff] }
 0x46d   : > { %12041 = vmatprep.subr.bf16.mxu0 %v16288_v19  ;;  %v1104_v2 = vld [vmem:[%s17433_s10 + $0x7e8] sm:$0xff] }
 0x46e   : > { %v16333_v19 = vld [vmem:[%s17435_s18 + $0xe44] ss:$8 sps:$4 sm:$0xff]  }
 0x46f   : > { %10714 = vmatpush1.bf16.msra.mxu1 %v16283_v20  ;;  %v16336_v20 = vld [vmem:[%s17435_s18 + $0x1e44] ss:$8 sps:$4 sm:$0xff]  }
 0x470   : > { %12042 = vmatpush1.bf16.msra.mxu0 %v16286_v21  ;;  %10715 = vmatprep.subr.bf16.mxu1 %v16291_v14  ;;  %v12936_v21 = vcombine.low %v1667_v53, %v1699_v3  ;;  %v12968_v14 = vcombine.low %v1683_v4, %v1715_v59  ;;  %v897_v53 = vld [vmem:[%s17433_s10 + $0x170] sm:$0xff] }
 0x471   : > { %12043 = vmatprep.subr.bf16.mxu0 %v16294_v15  ;;  %v1731_v15 = vsel %vm19541_vm2, %v1056_v0, 0  ;;  %v881_v4 = vld [vmem:[%s17433_s10 + $0xf0] sm:$0xff] }
 0x472   : > { %v913_v59 = vld [vmem:[%s17433_s10 + $0x1f0] sm:$0xff] }
 0x473   : > { %10716 = vmatpush1.bf16.msra.mxu1 %v16289_v23  ;;  %v1763_v23 = vsel %vm19541_vm2, %v1088_v16, 0  ;;  %v16355_v16 = vld [vmem:[%s17435_s18 + $0xe80] ss:$8 sps:$4 sm:$0xff]   ;;  %v16447_v3 = vld [vmem:[%s17435_s18 + $0xf74] ss:$8 sps:$4 sm:$0xff]  }
 0x474   : > { %12044 = vmatpush1.bf16.msra.mxu0 %v16292_v25  ;;  %10717 = vmatprep.subr.bf16.mxu1 %v16297_v18  ;;  %v1747_v25 = vsel %vm19548_vm3, %v1072_v17, 0  ;;  %v1779_v18 = vsel %vm19548_vm3, %v1104_v2, 0  ;;  %v13001_v62 = vcombine.high %v1731_v15, %v1763_v23  ;;  %v16358_v17 = vld [vmem:[%s17435_s18 + $0x1e80] ss:$8 sps:$4 sm:$0xff]   ;;  %v16363_v2 = vld [vmem:[%s17435_s18 + $0xe94] ss:$8 sps:$4 sm:$0xff]  }
 0x475   : > { %12045 = vmatprep.subr.bf16.mxu0 %v16300_v26  ;;  %v16331_v26 = vld [vmem:[%s17435_s18 + $0xe40] ss:$8 sps:$4 sm:$0xff]   ;;  %v13033_v27 = vcombine.high %v1747_v25, %v1779_v18 }
 0x477   : > { %10718 = vmatpush1.bf16.msra.mxu1 %v16295_v28  ;;  %v16334_v28 = vld [vmem:[%s17435_s18 + $0x1e40] ss:$8 sps:$4 sm:$0xff]  }
 0x478   : > { %12046 = vmatpush1.bf16.msra.mxu0 %v16298_v22  ;;  %10719 = vmatprep.subr.bf16.mxu1 %v16303_v30  ;;  %v1200_v22 = vadd.s32 3584, %v17476_v43  ;;  %v1201_v30 = vadd.s32 3712, %v17476_v43 }
 0x479   : > { %12047 = vmatprep.subr.bf16.mxu0 %v16306_v31  ;;  %v16339_v31 = vld [vmem:[%s17435_s18 + $0xe54] ss:$8 sps:$4 sm:$0xff]  }
 0x47a   : > { %v1266_v37 = vadd.s32 %v17485_v50, %v1200_v22  ;;  %v1267_v46 = vadd.s32 %v17485_v50, %v1201_v30  ;;  %v16378_v22 = vld [vmem:[%s17435_s18 + $0x1eb4] ss:$8 sps:$4 sm:$0xff]   ;;  %v16373_v30 = vld [vmem:[%s17435_s18 + $0xeb0] ss:$8 sps:$4 sm:$0xff]  }
 0x47b   : > { %10720 = vmatpush1.bf16.msra.mxu1 %v16301_v24  ;;  %v16342_v24 = vld [vmem:[%s17435_s18 + $0x1e54] ss:$8 sps:$4 sm:$0xff]  }
 0x47c   : > { %12048 = vmatpush1.bf16.msra.mxu0 %v16304_v32  ;;  %10772 = vmatprep.subr.bf16.mxu1 %v16309_v29  ;;  %v1232_v32 = vadd.s32 7680, %v17476_v43  ;;  %v16340_v29 = vld [vmem:[%s17435_s18 + $0x1e50] ss:$8 sps:$4 sm:$0xff]   ;;  %vm1330_vm4 = vcmp.lt.s32.totalorder %v1266_v37, 68970  ;;  %vm1331_vm5 = vcmp.lt.s32.totalorder %v1267_v46, 68970 }
 0x47d   : > { %12100 = vmatprep.subr.bf16.mxu0 %v16312_v41  ;;  %v1120_v41 = vld [vmem:[%s17433_s10 + $0x868] sm:$0xff]  ;;  %vm19700_vm8 = vmpackc.low %vm1331_vm5, %vm1330_vm4  ;;  %v16399_v46 = vld [vmem:[%s17435_s18 + $0xef4] ss:$8 sps:$4 sm:$0xff]  }
 0x47e   : > { %10722 = vmatmul.mubr.bf16.vlgmr.msra.gmra.mrb[0].mxu1 %v12808_v42  ;;  %v1152_v42 = vld [vmem:[%s17433_s10 + $0x968] sm:$0xff] }
 0x47f   : > { %12050 = vmatmul.mubr.bf16.vlgmr.msra.gmra.mrb[0].mxu0 %v12840_v33  ;;  %10773 = vmatpush1.bf16.msra.mxu1 %v16307_v40  ;;  %v1136_v33 = vld [vmem:[%s17433_s10 + $0x8e8] sm:$0xff] }
 0x480   : > { %12101 = vmatpush1.bf16.msra.mxu0 %v16310_v49  ;;  %10774 = vmatprep.subr.bf16.mxu1 %v16315_v51  ;;  %v16348_v40 = vld [vmem:[%s17435_s18 + $0x1e64] ss:$8 sps:$4 sm:$0xff]   ;;  %v1298_v49 = vadd.s32 %v17485_v50, %v1232_v32  ;;  %v1299_v51 = vadd.s32 %v17485_v50, %v1233_v34  ;;  %v16379_v34 = vld [vmem:[%s17435_s18 + $0xec0] ss:$8 sps:$4 sm:$0xff]  }
 0x481   : > { %12102 = vmatprep.subr.bf16.mxu0 %v16318_v35  ;;  %10731 = vmatprep.mubr.bf16.mxu1 %v12873_v36  ;;  %v13000_v35 = vcombine.low %v1731_v15, %v1763_v23  ;;  %v13032_v36 = vcombine.low %v1747_v25, %v1779_v18  ;;  %v16364_v15 = vld [vmem:[%s17435_s18 + $0x1e90] ss:$8 sps:$4 sm:$0xff]   ;;  %v16369_v23 = vld [vmem:[%s17435_s18 + $0xea4] ss:$8 sps:$4 sm:$0xff]   ;;  %v16367_v18 = vld [vmem:[%s17435_s18 + $0xea0] ss:$8 sps:$4 sm:$0xff]  }
 0x482   : > { %12059 = vmatprep.mubr.bf16.mxu0 %v12905_v55  ;;  %v1795_v55 = vsel %vm19541_vm2, %v1120_v41, 0  ;;  %vm1362_vm6 = vcmp.lt.s32.totalorder %v1298_v49, 68970  ;;  %vm1363_vm7 = vcmp.lt.s32.totalorder %v1299_v51, 68970  ;;  %v16372_v25 = vld [vmem:[%s17435_s18 + $0x1ea4] ss:$8 sps:$4 sm:$0xff]   ;;  %v929_v51 = vld [vmem:[%s17433_s10 + $0x270] sm:$0xff] }
 0x483   : > { %10775 = vmatpush1.bf16.msra.mxu1 %v16313_v45  ;;  %v1827_v45 = vsel %vm19541_vm2, %v1152_v42, 0  ;;  %vm19707_vm9 = vmpackc.low %vm1363_vm7, %vm1362_vm6  ;;  %v16384_v32 = vld [vmem:[%s17435_s18 + $0x1ec4] ss:$8 sps:$4 sm:$0xff]   ;;  %v16388_v41 = vld [vmem:[%s17435_s18 + $0x1ed0] ss:$8 sps:$4 sm:$0xff]  }
 0x484   : > { %12103 = vmatpush1.bf16.msra.mxu0 %v16316_v48  ;;  %10776 = vmatprep.subr.bf16.mxu1 %v16321_v61  ;;  %v1811_v48 = vsel %vm19548_vm3, %v1136_v33, 0  ;;  %v16349_v61 = vld [vmem:[%s17435_s18 + $0xe70] ss:$8 sps:$4 sm:$0xff]   ;;  %v19727_v0 = vsel %vm19707_vm9, %v913_v59, 0  ;;  %v16393_v42 = vld [vmem:[%s17435_s18 + $0xee4] ss:$8 sps:$4 sm:$0xff]  }
 0x485   : > { %12104 = vmatprep.subr.bf16.mxu0 %v16324_v63  ;;  %v13065_v63 = vcombine.high %v1795_v55, %v1827_v45  ;;  %v16396_v33 = vld [vmem:[%s17435_s18 + $0x1ee4] ss:$8 sps:$4 sm:$0xff]   ;;  %v16394_v37 = vld [vmem:[%s17435_s18 + $0x1ee0] ss:$8 sps:$4 sm:$0xff]   ;;  %v16400_v49 = vld [vmem:[%s17435_s18 + $0x1ef0] ss:$8 sps:$4 sm:$0xff]  }
 0x486   : > { %10732 = vmatmul.mubr.bf16.gmra.mrb[4].mxu1 %v12872_v13  ;;  %v13097_v13 = vcombine.high %v1811_v48, %v1843_v57  ;;  %v16409_v59 = vld [vmem:[%s17435_s18 + $0xf10] ss:$8 sps:$4 sm:$0xff]  }
 0x487   : > { %12060 = vmatmul.mubr.bf16.gmra.mrb[4].mxu0 %v12904_v52  ;;  %10777 = vmatpush1.bf16.msra.mxu1 %v16319_v6  ;;  %v865_v52 = vld [vmem:[%s17433_s10 + $0x70] sm:$0xff] }
 0x488   : > { %12105 = vmatpush1.bf16.msra.mxu0 %v16322_v7  ;;  %10778 = vmatprep.subr.bf16.mxu1 %v16327_v1  ;;  %v16357_v7 = vld [vmem:[%s17435_s18 + $0xe84] ss:$8 sps:$4 sm:$0xff]   ;;  %v16448_v6 = vld [vmem:[%s17435_s18 + $0x1f70] ss:$8 sps:$4 sm:$0xff]  }
 0x489   : > { %12106 = vmatprep.subr.bf16.mxu0 %v16330_v8  ;;  %10741 = vmatprep.mubr.bf16.mxu1 %v12937_v9  ;;  %v16360_v1 = vld [vmem:[%s17435_s18 + $0x1e84] ss:$8 sps:$4 sm:$0xff]   ;;  %v13064_v8 = vcombine.low %v1795_v55, %v1827_v45  ;;  %v13096_v9 = vcombine.low %v1811_v48, %v1843_v57  ;;  %v977_v55 = vld [vmem:[%s17433_s10 + $0x3f0] sm:$0xff] }
 0x48a   : > { %12069 = vmatprep.mubr.bf16.mxu0 %v12969_v11  ;;  %v19715_v11 = vsel %vm19700_vm8, %v865_v52, 0  ;;  %v16405_v45 = vld [vmem:[%s17435_s18 + $0xf04] ss:$8 sps:$4 sm:$0xff]   ;;  %v16414_v52 = vld [vmem:[%s17435_s18 + $0x1f14] ss:$8 sps:$4 sm:$0xff]  }
 0x48b   : > { %10779 = vmatpush1.bf16.msra.mxu1 %v16325_v10  ;;  %v19719_v10 = vsel %vm19700_vm8, %v897_v53, 0  ;;  %v16408_v48 = vld [vmem:[%s17435_s18 + $0x1f04] ss:$8 sps:$4 sm:$0xff]  }
 0x48c   : > { %12107 = vmatpush1.bf16.msra.mxu0 %v16328_v12  ;;  %10780 = vmatprep.subr.bf16.mxu1 %v16333_v19  ;;  %v19723_v12 = vsel %vm19707_vm9, %v881_v4, 0  ;;  %v16366_v19 = vld [vmem:[%s17435_s18 + $0x1e94] ss:$8 sps:$4 sm:$0xff]   ;;  %v12810_v57 = vcombine.low %v19715_v11, %v19719_v10 }
 0x48d   : > { %12108 = vmatprep.subr.bf16.mxu0 %v16336_v20  ;;  %v12811_v20 = vcombine.high %v19715_v11, %v19719_v10  ;;  %v1041_v11 = vld [vmem:[%s17433_s10 + $0x5f0] sm:$0xff]  ;;  %v16417_v10 = vld [vmem:[%s17435_s18 + $0xf24] ss:$8 sps:$4 sm:$0xff]  }
 0x48e   : > { %10742 = vmatmul.mubr.bf16.gmra.mrb[8].mxu1 %v12936_v21  ;;  %v12843_v21 = vcombine.high %v19723_v12, %v19727_v0 }
 0x48f   : > { %12070 = vmatmul.mubr.bf16.gmra.mrb[8].mxu0 %v12968_v14  ;;  %10781 = vmatpush1.bf16.msra.mxu1 %v16331_v26  ;;  %v16361_v14 = vld [vmem:[%s17435_s18 + $0xe90] ss:$8 sps:$4 sm:$0xff]   ;;  %v16370_v26 = vld [vmem:[%s17435_s18 + $0x1ea0] ss:$8 sps:$4 sm:$0xff]  }
 0x490   : > { %12109 = vmatpush1.bf16.msra.mxu0 %v16334_v28  ;;  %10782 = vmatprep.subr.bf16.mxu1 %v16339_v31  ;;  %v16375_v28 = vld [vmem:[%s17435_s18 + $0xeb4] ss:$8 sps:$4 sm:$0xff]   ;;  %v16376_v31 = vld [vmem:[%s17435_s18 + $0x1eb0] ss:$8 sps:$4 sm:$0xff]  }
 0x491   : > { %12110 = vmatprep.subr.bf16.mxu0 %v16342_v24  ;;  %10751 = vmatprep.mubr.bf16.mxu1 %v13001_v62  ;;  %v16381_v24 = vld [vmem:[%s17435_s18 + $0xec4] ss:$8 sps:$4 sm:$0xff]   ;;  %v16382_v62 = vld [vmem:[%s17435_s18 + $0x1ec0] ss:$8 sps:$4 sm:$0xff]  }
 0x492   : > { %12079 = vmatprep.mubr.bf16.mxu0 %v13033_v27  ;;  %v16387_v27 = vld [vmem:[%s17435_s18 + $0xed4] ss:$8 sps:$4 sm:$0xff]  }
 0x493   : > { %10783 = vmatpush1.bf16.msra.mxu1 %v16337_v39  ;;  %v16390_v39 = vld [vmem:[%s17435_s18 + $0x1ed4] ss:$8 sps:$4 sm:$0xff]  }
 0x494   : > { %12111 = vmatpush1.bf16.msra.mxu0 %v16340_v29  ;;  %10784 = vmatprep.subr.bf16.mxu1 %v16345_v47  ;;  %v16385_v29 = vld [vmem:[%s17435_s18 + $0xed0] ss:$8 sps:$4 sm:$0xff]   ;;  %v16402_v47 = vld [vmem:[%s17435_s18 + $0x1ef4] ss:$8 sps:$4 sm:$0xff]  }
 0x495   : > { %12112 = vmatprep.subr.bf16.mxu0 %v16348_v40  ;;  %v16397_v40 = vld [vmem:[%s17435_s18 + $0xef0] ss:$8 sps:$4 sm:$0xff]  }
 0x496   : > { %10752 = vmatmul.mubr.bf16.gmra.mrb[12].mxu1 %v13000_v35  ;;  %v961_v35 = vld [vmem:[%s17433_s10 + $0x370] sm:$0xff] }
 0x497   : > { %12080 = vmatmul.mubr.bf16.gmra.mrb[12].mxu0 %v13032_v36  ;;  %10785 = vmatpush1.bf16.msra.mxu1 %v16343_v5  ;;  %v945_v36 = vld [vmem:[%s17433_s10 + $0x2f0] sm:$0xff]  ;;  %v12842_v5 = vcombine.low %v19723_v12, %v19727_v0  ;;  %v16420_v12 = vld [vmem:[%s17435_s18 + $0x1f24] ss:$8 sps:$4 sm:$0xff]  }
 0x498   : > { %12113 = vmatpush1.bf16.msra.mxu0 %v16346_v58  ;;  %10786 = vmatprep.subr.bf16.mxu1 %v16351_v54  ;;  %v1604_v58 = vsel %vm19700_vm8, %v929_v51, 0  ;;  %v1636_v54 = vsel %vm19700_vm8, %v961_v35, 0  ;;  %v1235_v51 = vadd.s32 8064, %v17476_v43 }
 0x499   : > { %12114 = vmatprep.subr.bf16.mxu0 %v16354_v60  ;;  %10761 = vmatprep.mubr.bf16.mxu1 %v13065_v63  ;;  %v1620_v60 = vsel %vm19707_vm9, %v945_v36, 0  ;;  %v16406_v63 = vld [vmem:[%s17435_s18 + $0x1f00] ss:$8 sps:$4 sm:$0xff]   ;;  %v12875_v53 = vcombine.high %v1604_v58, %v1636_v54  ;;  %v12874_v0 = vcombine.low %v1604_v58, %v1636_v54  ;;  %v1169_v58 = vld [vmem:[%s17433_s10 + $0x9f0] sm:$0xff] }
 0x49a   : > { %12089 = vmatprep.mubr.bf16.mxu0 %v13097_v13  ;;  %v16411_v13 = vld [vmem:[%s17435_s18 + $0xf14] ss:$8 sps:$4 sm:$0xff]  }
 0x49b   : > { %10787 = vmatpush1.bf16.msra.mxu1 %v16349_v61  ;;  %v1652_v61 = vsel %vm19707_vm9, %v977_v55, 0  ;;  %v16433_v55 = vld [vmem:[%s17435_s18 + $0xf50] ss:$8 sps:$4 sm:$0xff]  }
 0x49c   : > { %12115 = vmatpush1.bf16.msra.mxu0 %v16352_v56  ;;  %10788 = vmatprep.subr.bf16.mxu1 %v16357_v7  ;;  %v16403_v56 = vld [vmem:[%s17435_s18 + $0xf00] ss:$8 sps:$4 sm:$0xff]   ;;  %v12907_v4 = vcombine.high %v1620_v60, %v1652_v61  ;;  %v16412_v7 = vld [vmem:[%s17435_s18 + $0x1f10] ss:$8 sps:$4 sm:$0xff]  }
 0x49d   : > { %12116 = vmatprep.subr.bf16.mxu0 %v16360_v1  ;;  %v993_v1 = vld [vmem:[%s17433_s10 + $0x470] sm:$0xff] }
 0x49e   : > { %10762 = vmatmul.mubr.bf16.gmra.mrb[16].mxu1 %v13064_v8  ;;  %v1025_v8 = vld [vmem:[%s17433_s10 + $0x570] sm:$0xff] }
 0x49f   : > { %12090 = vmatmul.mubr.bf16.gmra.mrb[16].mxu0 %v13096_v9  ;;  %10789 = vmatpush1.bf16.msra.mxu1 %v16355_v16  ;;  %v1009_v9 = vld [vmem:[%s17433_s10 + $0x4f0] sm:$0xff]  ;;  %v12906_v16 = vcombine.low %v1620_v60, %v1652_v61  ;;  %v16444_v61 = vld [vmem:[%s17435_s18 + $0x1f64] ss:$8 sps:$4 sm:$0xff]  }
 0x4a0   : > { %12117 = vmatpush1.bf16.msra.mxu0 %v16358_v17  ;;  %10790 = vmatprep.subr.bf16.mxu1 %v16363_v2  ;;  %v1668_v17 = vsel %vm19700_vm8, %v993_v1, 0  ;;  %v1700_v2 = vsel %vm19700_vm8, %v1025_v8, 0  ;;  %v16442_v1 = vld [vmem:[%s17435_s18 + $0x1f60] ss:$8 sps:$4 sm:$0xff]   ;;  %v16450_v8 = vld [vmem:[%s17435_s18 + $0x1f74] ss:$8 sps:$4 sm:$0xff]  }
 0x4a1   : > { %12118 = vmatprep.subr.bf16.mxu0 %v16366_v19  ;;  %10804 = vmatprep.mubr.bf16.mxu1 %v12811_v20  ;;  %v1684_v19 = vsel %vm19707_vm9, %v1009_v9, 0  ;;  %v1716_v20 = vsel %vm19707_vm9, %v1041_v11, 0  ;;  %v16445_v9 = vld [vmem:[%s17435_s18 + $0xf70] ss:$8 sps:$4 sm:$0xff]  }
 0x4a2   : > { %12132 = vmatprep.mubr.bf16.mxu0 %v12843_v21  ;;  %v16415_v21 = vld [vmem:[%s17435_s18 + $0xf20] ss:$8 sps:$4 sm:$0xff]  }
 0x4a3   : > { %10791 = vmatpush1.bf16.msra.mxu1 %v16361_v14  ;;  %v16418_v14 = vld [vmem:[%s17435_s18 + $0x1f20] ss:$8 sps:$4 sm:$0xff]  }
 0x4a4   : > { %12119 = vmatpush1.bf16.msra.mxu0 %v16364_v15  ;;  %10792 = vmatprep.subr.bf16.mxu1 %v16369_v23  ;;  %v16423_v15 = vld [vmem:[%s17435_s18 + $0xf34] ss:$8 sps:$4 sm:$0xff]  }
 0x4a5   : > { %12120 = vmatprep.subr.bf16.mxu0 %v16372_v25  ;;  %v16426_v23 = vld [vmem:[%s17435_s18 + $0x1f34] ss:$8 sps:$4 sm:$0xff]   ;;  %v12939_v25 = vcombine.high %v1668_v17, %v1700_v2 }
 0x4a7   : > { %10793 = vmatpush1.bf16.msra.mxu1 %v16367_v18  ;;  %v12971_v18 = vcombine.high %v1684_v19, %v1716_v20 }
 0x4a8   : > { %12121 = vmatpush1.bf16.msra.mxu0 %v16370_v26  ;;  %10794 = vmatprep.subr.bf16.mxu1 %v16375_v28  ;;  %v16421_v26 = vld [vmem:[%s17435_s18 + $0xf30] ss:$8 sps:$4 sm:$0xff]  }
 0x4a9   : > { %12122 = vmatprep.subr.bf16.mxu0 %v16378_v22  ;;  %v16424_v28 = vld [vmem:[%s17435_s18 + $0x1f30] ss:$8 sps:$4 sm:$0xff]  }
 0x4aa   : > { %v1057_v22 = vld [vmem:[%s17433_s10 + $0x670] sm:$0xff] }
 0x4ab   : > { %10795 = vmatpush1.bf16.msra.mxu1 %v16373_v30  ;;  %v1089_v30 = vld [vmem:[%s17433_s10 + $0x770] sm:$0xff] }
 0x4ac   : > { %12123 = vmatpush1.bf16.msra.mxu0 %v16376_v31  ;;  %10796 = vmatprep.subr.bf16.mxu1 %v16381_v24  ;;  %v1073_v31 = vld [vmem:[%s17433_s10 + $0x6f0] sm:$0xff] }
 0x4ad   : > { %12124 = vmatprep.subr.bf16.mxu0 %v16384_v32  ;;  %v1105_v24 = vld [vmem:[%s17433_s10 + $0x7f0] sm:$0xff]  ;;  %v16429_v32 = vld [vmem:[%s17435_s18 + $0xf44] ss:$8 sps:$4 sm:$0xff]  }
 0x4af   : > { %10797 = vmatpush1.bf16.msra.mxu1 %v16379_v34  ;;  %v16432_v34 = vld [vmem:[%s17435_s18 + $0x1f44] ss:$8 sps:$4 sm:$0xff]  }
 0x4b0   : > { %12125 = vmatpush1.bf16.msra.mxu0 %v16382_v62  ;;  %10798 = vmatprep.subr.bf16.mxu1 %v16387_v27  ;;  %v12938_v62 = vcombine.low %v1668_v17, %v1700_v2  ;;  %v12970_v27 = vcombine.low %v1684_v19, %v1716_v20  ;;  %v882_v17 = vld [vmem:[%s17433_s10 + $0xf8] sm:$0xff]  ;;  %v16453_v20 = vld [vmem:[%s17435_s18 + $0xf84] ss:$8 sps:$4 sm:$0xff]  }
 0x4b1   : > { %12126 = vmatprep.subr.bf16.mxu0 %v16390_v39  ;;  %v1732_v39 = vsel %vm19700_vm8, %v1057_v22, 0  ;;  %v914_v2 = vld [vmem:[%s17433_s10 + $0x1f8] sm:$0xff]  ;;  %v16454_v22 = vld [vmem:[%s17435_s18 + $0x1f80] ss:$8 sps:$4 sm:$0xff]  }
 0x4b3   : > { %10799 = vmatpush1.bf16.msra.mxu1 %v16385_v29  ;;  %v1764_v29 = vsel %vm19700_vm8, %v1089_v30, 0  ;;  %v16459_v30 = vld [vmem:[%s17435_s18 + $0xf94] ss:$8 sps:$4 sm:$0xff]  }
 0x4b4   : > { %12127 = vmatpush1.bf16.msra.mxu0 %v16388_v41  ;;  %10800 = vmatprep.subr.bf16.mxu1 %v16393_v42  ;;  %v1748_v41 = vsel %vm19707_vm9, %v1073_v31, 0  ;;  %v1780_v42 = vsel %vm19707_vm9, %v1105_v24, 0  ;;  %v13003_v35 = vcombine.high %v1732_v39, %v1764_v29  ;;  %v16462_v31 = vld [vmem:[%s17435_s18 + $0x1f94] ss:$8 sps:$4 sm:$0xff]  }
 0x4b5   : > { %12128 = vmatprep.subr.bf16.mxu0 %v16396_v33  ;;  %v16427_v33 = vld [vmem:[%s17435_s18 + $0xf40] ss:$8 sps:$4 sm:$0xff]   ;;  %v13035_v36 = vcombine.high %v1748_v41, %v1780_v42 }
 0x4b7   : > { %10801 = vmatpush1.bf16.msra.mxu1 %v16391_v44  ;;  %v16430_v44 = vld [vmem:[%s17435_s18 + $0x1f40] ss:$8 sps:$4 sm:$0xff]  }
 0x4b8   : > { %12129 = vmatpush1.bf16.msra.mxu0 %v16394_v37  ;;  %10802 = vmatprep.subr.bf16.mxu1 %v16399_v46  ;;  %v1202_v37 = vadd.s32 3840, %v17476_v43  ;;  %v1203_v46 = vadd.s32 3968, %v17476_v43 }
 0x4b9   : > { %12130 = vmatprep.subr.bf16.mxu0 %v16402_v47  ;;  %v16435_v47 = vld [vmem:[%s17435_s18 + $0xf54] ss:$8 sps:$4 sm:$0xff]  }
 0x4ba   : > { %v1268_v54 = vadd.s32 %v17485_v50, %v1202_v37  ;;  %v1269_v60 = vadd.s32 %v17485_v50, %v1203_v46  ;;  %v16472_v37 = vld [vmem:[%s17435_s18 + $0x1fb0] ss:$8 sps:$4 sm:$0xff]   ;;  %v16477_v46 = vld [vmem:[%s17435_s18 + $0xfc4] ss:$8 sps:$4 sm:$0xff]  }
 0x4bb   : > { %10803 = vmatpush1.bf16.msra.mxu1 %v16397_v40  ;;  %v16438_v40 = vld [vmem:[%s17435_s18 + $0x1f54] ss:$8 sps:$4 sm:$0xff]  }
 0x4bc   : > { %12131 = vmatpush1.bf16.msra.mxu0 %v16400_v49  ;;  %10855 = vmatprep.subr.bf16.mxu1 %v16405_v45  ;;  %v1234_v49 = vadd.s32 7936, %v17476_v43  ;;  %v16436_v45 = vld [vmem:[%s17435_s18 + $0x1f50] ss:$8 sps:$4 sm:$0xff]   ;;  %v16441_v43 = vld [vmem:[%s17435_s18 + $0xf64] ss:$8 sps:$4 sm:$0xff]   ;;  %vm1332_vm10 = vcmp.lt.s32.totalorder %v1268_v54, 68970 }
 0x4bd   : > { %12183 = vmatprep.subr.bf16.mxu0 %v16408_v48  ;;  %v1121_v48 = vld [vmem:[%s17433_s10 + $0x870] sm:$0xff]  ;;  %vm1333_vm11 = vcmp.lt.s32.totalorder %v1269_v60, 68970  ;;  %v930_v60 = vld [vmem:[%s17433_s10 + $0x278] sm:$0xff] }
 0x4be   : > { %10805 = vmatmul.mubr.bf16.vlgmr.msra.gmra.mrb[0].mxu1 %v12810_v57  ;;  %v1153_v57 = vld [vmem:[%s17433_s10 + $0x970] sm:$0xff]  ;;  %vm19859_vm14 = vmpackc.low %vm1333_vm11, %vm1332_vm10 }
 0x4bf   : > { %12133 = vmatmul.mubr.bf16.vlgmr.msra.gmra.mrb[0].mxu0 %v12842_v5  ;;  %10856 = vmatpush1.bf16.msra.mxu1 %v16403_v56  ;;  %v1137_v5 = vld [vmem:[%s17433_s10 + $0x8f0] sm:$0xff]  ;;  %v1300_v56 = vadd.s32 %v17485_v50, %v1234_v49  ;;  %v16478_v49 = vld [vmem:[%s17435_s18 + $0x1fc0] ss:$8 sps:$4 sm:$0xff]  }
 0x4c0   : > { %12184 = vmatpush1.bf16.msra.mxu0 %v16406_v63  ;;  %10857 = vmatprep.subr.bf16.mxu1 %v16411_v13  ;;  %v1301_v63 = vadd.s32 %v17485_v50, %v1235_v51  ;;  %v13002_v13 = vcombine.low %v1732_v39, %v1764_v29  ;;  %v1844_v50 = vsel %vm19707_vm9, %v1169_v58, 0  ;;  %v16468_v39 = vld [vmem:[%s17435_s18 + $0x1fa4] ss:$8 sps:$4 sm:$0xff]   ;;  %v16463_v29 = vld [vmem:[%s17435_s18 + $0xfa0] ss:$8 sps:$4 sm:$0xff]  }
 0x4c1   : > { %12185 = vmatprep.subr.bf16.mxu0 %v16414_v52  ;;  %10814 = vmatprep.mubr.bf16.mxu1 %v12875_v53  ;;  %v13034_v52 = vcombine.low %v1748_v41, %v1780_v42  ;;  %v1796_v53 = vsel %vm19700_vm8, %v1121_v48, 0  ;;  %vm1364_vm12 = vcmp.lt.s32.totalorder %v1300_v56, 68970  ;;  %v16466_v41 = vld [vmem:[%s17435_s18 + $0x1fa0] ss:$8 sps:$4 sm:$0xff]   ;;  %v16471_v42 = vld [vmem:[%s17435_s18 + $0xfb4] ss:$8 sps:$4 sm:$0xff]  }
 0x4c2   : > { %12142 = vmatprep.mubr.bf16.mxu0 %v12907_v4  ;;  %v1828_v4 = vsel %vm19700_vm8, %v1153_v57, 0  ;;  %vm1365_vm13 = vcmp.lt.s32.totalorder %v1301_v63, 68970  ;;  %v16483_v51 = vld [vmem:[%s17435_s18 + $0xfd4] ss:$8 sps:$4 sm:$0xff]   ;;  %v16492_v48 = vld [vmem:[%s17435_s18 + $0x1fe4] ss:$8 sps:$4 sm:$0xff]  }
 0x4c3   : > { %10858 = vmatpush1.bf16.msra.mxu1 %v16409_v59  ;;  %v1812_v59 = vsel %vm19707_vm9, %v1137_v5, 0  ;;  %v13067_v11 = vcombine.high %v1796_v53, %v1828_v4  ;;  %vm19866_vm15 = vmpackc.low %vm1365_vm13, %vm1364_vm12  ;;  %v16487_v57 = vld [vmem:[%s17435_s18 + $0xfe0] ss:$8 sps:$4 sm:$0xff]   ;;  %v16495_v58 = vld [vmem:[%s17435_s18 + $0xff4] ss:$8 sps:$4 sm:$0xff]  }
 0x4c4   : > { %12186 = vmatpush1.bf16.msra.mxu0 %v16412_v7  ;;  %10859 = vmatprep.subr.bf16.mxu1 %v16417_v10  ;;  %v16439_v7 = vld [vmem:[%s17435_s18 + $0xf60] ss:$8 sps:$4 sm:$0xff]   ;;  %v13099_v10 = vcombine.high %v1812_v59, %v1844_v50  ;;  %v16498_v54 = vld [vmem:[%s17435_s18 + $0x1ff4] ss:$8 sps:$4 sm:$0xff]   ;;  %v16493_v63 = vld [vmem:[%s17435_s18 + $0xff0] ss:$8 sps:$4 sm:$0xff]  }
 0x4c5   : > { %12187 = vmatprep.subr.bf16.mxu0 %v16420_v12  ;;  %v866_v12 = vld [vmem:[%s17433_s10 + $0x78] sm:$0xff]  ;;  %v16490_v5 = vld [vmem:[%s17435_s18 + $0x1fe0] ss:$8 sps:$4 sm:$0xff]  }
 0x4c6   : > { %10815 = vmatmul.mubr.bf16.gmra.mrb[4].mxu1 %v12874_v0  ;;  %v898_v0 = vld [vmem:[%s17433_s10 + $0x178] sm:$0xff] }
 0x4c7   : > { %12143 = vmatmul.mubr.bf16.gmra.mrb[4].mxu0 %v12906_v16  ;;  %10860 = vmatpush1.bf16.msra.mxu1 %v16415_v21  ;;  %v16456_v21 = vld [vmem:[%s17435_s18 + $0x1f84] ss:$8 sps:$4 sm:$0xff]   ;;  %v978_v56 = vld [vmem:[%s17433_s10 + $0x3f8] sm:$0xff] }
 0x4c8   : > { %12188 = vmatpush1.bf16.msra.mxu0 %v16418_v14  ;;  %10861 = vmatprep.subr.bf16.mxu1 %v16423_v15  ;;  %v13066_v14 = vcombine.low %v1796_v53, %v1828_v4  ;;  %v13098_v15 = vcombine.low %v1812_v59, %v1844_v50  ;;  %v1653_v59 = vsel %vm19866_vm15, %v978_v56, 0  ;;  %v1849_v56 = vld [vmem:[#allocation2 + $0x18] sm:$0xff] }
 0x4c9   : > { %12189 = vmatprep.subr.bf16.mxu0 %v16426_v23  ;;  %10824 = vmatprep.mubr.bf16.mxu1 %v12939_v25  ;;  %v19874_v23 = vsel %vm19859_vm14, %v866_v12, 0  ;;  %v19878_v25 = vsel %vm19859_vm14, %v898_v0, 0 }
 0x4ca   : > { %12152 = vmatprep.mubr.bf16.mxu0 %v12971_v18  ;;  %v19882_v18 = vsel %vm19866_vm15, %v882_v17, 0  ;;  %v12813_v24 = vcombine.high %v19874_v23, %v19878_v25  ;;  %v12812_v50 = vcombine.low %v19874_v23, %v19878_v25  ;;  %v1090_v23 = vld [vmem:[%s17433_s10 + $0x778] sm:$0xff] }
 0x4cb   : > { %10862 = vmatpush1.bf16.msra.mxu1 %v16421_v26  ;;  %v19886_v26 = vsel %vm19866_vm15, %v914_v2, 0  ;;  %v1074_v25 = vld [vmem:[%s17433_s10 + $0x6f8] sm:$0xff] }
 0x4cc   : > { %12190 = vmatpush1.bf16.msra.mxu0 %v16424_v28  ;;  %10863 = vmatprep.subr.bf16.mxu1 %v16429_v32  ;;  %v16451_v28 = vld [vmem:[%s17435_s18 + $0xf80] ss:$8 sps:$4 sm:$0xff]   ;;  %v12845_v32 = vcombine.high %v19882_v18, %v19886_v26 }
 0x4cd   : > { %12191 = vmatprep.subr.bf16.mxu0 %v16432_v34  ;;  %v16457_v34 = vld [vmem:[%s17435_s18 + $0xf90] ss:$8 sps:$4 sm:$0xff]  }
 0x4ce   : > { %10825 = vmatmul.mubr.bf16.gmra.mrb[8].mxu1 %v12938_v62  ;;  %v16460_v62 = vld [vmem:[%s17435_s18 + $0x1f90] ss:$8 sps:$4 sm:$0xff]  }
 0x4cf   : > { %12153 = vmatmul.mubr.bf16.gmra.mrb[8].mxu0 %v12970_v27  ;;  %10864 = vmatpush1.bf16.msra.mxu1 %v16427_v33  ;;  %v16465_v27 = vld [vmem:[%s17435_s18 + $0xfa4] ss:$8 sps:$4 sm:$0xff]   ;;  %v16474_v33 = vld [vmem:[%s17435_s18 + $0x1fb4] ss:$8 sps:$4 sm:$0xff]  }
 0x4d0   : > { %12192 = vmatpush1.bf16.msra.mxu0 %v16430_v44  ;;  %10865 = vmatprep.subr.bf16.mxu1 %v16435_v47  ;;  %v16469_v44 = vld [vmem:[%s17435_s18 + $0xfb0] ss:$8 sps:$4 sm:$0xff]   ;;  %v16480_v47 = vld [vmem:[%s17435_s18 + $0x1fc4] ss:$8 sps:$4 sm:$0xff]  }
 0x4d1   : > { %12193 = vmatprep.subr.bf16.mxu0 %v16438_v40  ;;  %10834 = vmatprep.mubr.bf16.mxu1 %v13003_v35  ;;  %v16475_v40 = vld [vmem:[%s17435_s18 + $0xfc0] ss:$8 sps:$4 sm:$0xff]   ;;  %v16486_v35 = vld [vmem:[%s17435_s18 + $0x1fd4] ss:$8 sps:$4 sm:$0xff]  }
 0x4d2   : > { %12162 = vmatprep.mubr.bf16.mxu0 %v13035_v36  ;;  %v16481_v36 = vld [vmem:[%s17435_s18 + $0xfd0] ss:$8 sps:$4 sm:$0xff]  }
 0x4d3   : > { %10866 = vmatpush1.bf16.msra.mxu1 %v16433_v55  ;;  %v16484_v55 = vld [vmem:[%s17435_s18 + $0x1fd0] ss:$8 sps:$4 sm:$0xff]  }
 0x4d4   : > { %12194 = vmatpush1.bf16.msra.mxu0 %v16436_v45  ;;  %10867 = vmatprep.subr.bf16.mxu1 %v16441_v43  ;;  %v16489_v45 = vld [vmem:[%s17435_s18 + $0xfe4] ss:$8 sps:$4 sm:$0xff]   ;;  %v962_v43 = vld [vmem:[%s17433_s10 + $0x378] sm:$0xff] }
 0x4d5   : > { %12195 = vmatprep.subr.bf16.mxu0 %v16444_v61  ;;  %v946_v61 = vld [vmem:[%s17433_s10 + $0x2f8] sm:$0xff]  ;;  %v1637_v53 = vsel %vm19859_vm14, %v962_v43, 0 }
 0x4d6   : > { %10835 = vmatmul.mubr.bf16.gmra.mrb[12].mxu1 %v13002_v13  ;;  %v16496_v13 = vld [vmem:[%s17435_s18 + $0x1ff0] ss:$8 sps:$4 sm:$0xff]   ;;  %v1621_v4 = vsel %vm19866_vm15, %v946_v61, 0 }
 0x4d7   : > { %12163 = vmatmul.mubr.bf16.gmra.mrb[12].mxu0 %v13034_v52  ;;  %10868 = vmatpush1.bf16.msra.mxu1 %v16439_v7  ;;  %v1605_v52 = vsel %vm19859_vm14, %v930_v60, 0  ;;  %v12844_v7 = vcombine.low %v19882_v18, %v19886_v26  ;;  %v1106_v18 = vld [vmem:[%s17433_s10 + $0x7f8] sm:$0xff] }
 0x4d8   : > { %12196 = vmatpush1.bf16.msra.mxu0 %v16442_v1  ;;  %10869 = vmatprep.subr.bf16.mxu1 %v16447_v3  ;;  %v12877_v1 = vcombine.high %v1605_v52, %v1637_v53  ;;  %v12909_v3 = vcombine.high %v1621_v4, %v1653_v59  ;;  %v12876_v2 = vcombine.low %v1605_v52, %v1637_v53 }
 0x4d9   : > { %12197 = vmatprep.subr.bf16.mxu0 %v16450_v8  ;;  %10844 = vmatprep.mubr.bf16.mxu1 %v13067_v11  ;;  %v994_v8 = vld [vmem:[%s17433_s10 + $0x478] sm:$0xff] }
 0x4da   : > { %12172 = vmatprep.mubr.bf16.mxu0 %v13099_v10  ;;  %v1042_v11 = vld [vmem:[%s17433_s10 + $0x5f8] sm:$0xff]  ;;  %v1669_v10 = vsel %vm19859_vm14, %v994_v8, 0  ;;  %v1851_v8 = vld [vmem:[#allocation2 + $0x28] sm:$0xff] }
 0x4db   : > { %10870 = vmatpush1.bf16.msra.mxu1 %v16445_v9  ;;  %v1026_v9 = vld [vmem:[%s17433_s10 + $0x578] sm:$0xff]  ;;  %v1717_v17 = vsel %vm19866_vm15, %v1042_v11, 0 }
 0x4dc   : > { %12198 = vmatpush1.bf16.msra.mxu0 %v16448_v6  ;;  %10871 = vmatprep.subr.bf16.mxu1 %v16453_v20  ;;  %v1010_v6 = vld [vmem:[%s17433_s10 + $0x4f8] sm:$0xff]  ;;  %v1701_v12 = vsel %vm19859_vm14, %v1026_v9, 0  ;;  %v12908_v20 = vcombine.low %v1621_v4, %v1653_v59 }
 0x4dd   : > { %12199 = vmatprep.subr.bf16.mxu0 %v16456_v21  ;;  %v1685_v0 = vsel %vm19866_vm15, %v1010_v6, 0  ;;  %v12941_v21 = vcombine.high %v1669_v10, %v1701_v12 }
 0x4de   : > { %10845 = vmatmul.mubr.bf16.gmra.mrb[16].mxu1 %v13066_v14  ;;  %v12973_v14 = vcombine.high %v1685_v0, %v1717_v17 }
 0x4df   : > { %12173 = vmatmul.mubr.bf16.gmra.mrb[16].mxu0 %v13098_v15  ;;  %10872 = vmatpush1.bf16.msra.mxu1 %v16451_v28  ;;  %v1058_v15 = vld [vmem:[%s17433_s10 + $0x678] sm:$0xff]  ;;  %v1765_v28 = vsel %vm19859_vm14, %v1090_v23, 0 }
 0x4e0   : > { %12200 = vmatpush1.bf16.msra.mxu0 %v16454_v22  ;;  %10873 = vmatprep.subr.bf16.mxu1 %v16459_v30  ;;  %v1733_v26 = vsel %vm19859_vm14, %v1058_v15, 0  ;;  %v1749_v22 = vsel %vm19866_vm15, %v1074_v25, 0  ;;  %v1781_v30 = vsel %vm19866_vm15, %v1106_v18, 0 }
 0x4e1   : > { %12201 = vmatprep.subr.bf16.mxu0 %v16462_v31  ;;  %10887 = vmatprep.mubr.bf16.mxu1 %v12813_v24  ;;  %v12940_v31 = vcombine.low %v1669_v10, %v1701_v12  ;;  %v12972_v24 = vcombine.low %v1685_v0, %v1717_v17  ;;  %v1852_v10 = vld [vmem:[#allocation2 + $0x30] sm:$0xff] }
 0x4e2   : > { %12215 = vmatprep.mubr.bf16.mxu0 %v12845_v32  ;;  %v13005_v32 = vcombine.high %v1733_v26, %v1765_v28 }
 0x4e3   : > { %10874 = vmatpush1.bf16.msra.mxu1 %v16457_v34  ;;  %v13037_v34 = vcombine.high %v1749_v22, %v1781_v30 }
 0x4e4   : > { %12202 = vmatpush1.bf16.msra.mxu0 %v16460_v62  ;;  %10875 = vmatprep.subr.bf16.mxu1 %v16465_v27  ;;  %v1122_v62 = vld [vmem:[%s17433_s10 + $0x878] sm:$0xff] }
 0x4e5   : > { %12203 = vmatprep.subr.bf16.mxu0 %v16468_v39  ;;  %v1154_v27 = vld [vmem:[%s17433_s10 + $0x978] sm:$0xff] }
 0x4e6   : > { %v1138_v39 = vld [vmem:[%s17433_s10 + $0x8f8] sm:$0xff] }
 0x4e7   : > { %10876 = vmatpush1.bf16.msra.mxu1 %v16463_v29  ;;  %v1170_v29 = vld [vmem:[%s17433_s10 + $0x9f8] sm:$0xff] }
 0x4e8   : > { %12204 = vmatpush1.bf16.msra.mxu0 %v16466_v41  ;;  %10877 = vmatprep.subr.bf16.mxu1 %v16471_v42  ;;  %v1797_v41 = vsel %vm19859_vm14, %v1122_v62, 0  ;;  %v1829_v42 = vsel %vm19859_vm14, %v1154_v27, 0  ;;  %v1856_v62 = vld [vmem:[#allocation2 + $0x50] sm:$0xff] }
 0x4e9   : > { %12205 = vmatprep.subr.bf16.mxu0 %v16474_v33  ;;  %v1813_v33 = vsel %vm19866_vm15, %v1138_v39, 0 }
 0x4eb   : > { %10878 = vmatpush1.bf16.msra.mxu1 %v16469_v44  ;;  %v1845_v44 = vsel %vm19866_vm15, %v1170_v29, 0 }
 0x4ec   : > { %12206 = vmatpush1.bf16.msra.mxu0 %v16472_v37  ;;  %10879 = vmatprep.subr.bf16.mxu1 %v16477_v46  ;;  %v13004_v37 = vcombine.low %v1733_v26, %v1765_v28  ;;  %v13036_v46 = vcombine.low %v1749_v22, %v1781_v30  ;;  %v1854_v26 = vld [vmem:[#allocation2 + $0x40] sm:$0xff] }
 0x4ed   : > { %12207 = vmatprep.subr.bf16.mxu0 %v16480_v47  ;;  %v13069_v47 = vcombine.high %v1797_v41, %v1829_v42 }
 0x4ef   : > { %10880 = vmatpush1.bf16.msra.mxu1 %v16475_v40  ;;  %v13101_v40 = vcombine.high %v1813_v33, %v1845_v44 }
 0x4f0   : > { %12208 = vmatpush1.bf16.msra.mxu0 %v16478_v49  ;;  %10881 = vmatprep.subr.bf16.mxu1 %v16483_v51  ;;  %v13068_v49 = vcombine.low %v1797_v41, %v1829_v42  ;;  %v13100_v51 = vcombine.low %v1813_v33, %v1845_v44  ;;  %v1857_v42 = vld [vmem:[#allocation2 + $0x58] sm:$0xff] }
 0x4f1   : > { %12209 = vmatprep.subr.bf16.mxu0 %v16486_v35  ;;  %v1846_v35 = vld [vmem:[#allocation2] sm:$0xff] }
 0x4f3   : > { %10882 = vmatpush1.bf16.msra.mxu1 %v16481_v36 }
 0x4f4   : > { %12210 = vmatpush1.bf16.msra.mxu0 %v16484_v55  ;;  %10883 = vmatprep.subr.bf16.mxu1 %v16489_v45 }
 0x4f5   : > { %12211 = vmatprep.subr.bf16.mxu0 %v16492_v48  ;;  %v1847_v48 = vld [vmem:[#allocation2 + $0x8] sm:$0xff] }
 0x4f7   : > { %10884 = vmatpush1.bf16.msra.mxu1 %v16487_v57 }
 0x4f8   : > { %12212 = vmatpush1.bf16.msra.mxu0 %v16490_v5  ;;  %10885 = vmatprep.subr.bf16.mxu1 %v16495_v58  ;;  %v1848_v58 = vld [vmem:[#allocation2 + $0x10] sm:$0xff] }
 0x4f9   : > { %12213 = vmatprep.subr.bf16.mxu0 %v16498_v54 }
 0x4fb   : > { %10886 = vmatpush1.bf16.msra.mxu1 %v16493_v63 }
 0x4fc   : > { %12214 = vmatpush1.bf16.msra.mxu0 %v16496_v13 }
 0x4fe   : > { %10888 = vmatmul.mubr.bf16.vlgmr.msra.gmra.mrb[0].mxu1 %v12812_v50  ;;  %v1850_v50 = vld [vmem:[#allocation2 + $0x20] sm:$0xff] }
 0x4ff   : > { %12216 = vmatmul.mubr.bf16.vlgmr.msra.gmra.mrb[0].mxu0 %v12844_v7  ;;  %10897 = vmatprep.mubr.bf16.mxu1 %v12877_v1 }
 0x500   : > { %12225 = vmatprep.mubr.bf16.mxu0 %v12909_v3 }
 0x506   : > { %10898 = vmatmul.mubr.bf16.gmra.mrb[4].mxu1 %v12876_v2 }
 0x507   : > { %12226 = vmatmul.mubr.bf16.gmra.mrb[4].mxu0 %v12908_v20  ;;  %10907 = vmatprep.mubr.bf16.mxu1 %v12941_v21  ;;  %v1853_v20 = vld [vmem:[#allocation2 + $0x38] sm:$0xff] }
 0x508   : > { %12235 = vmatprep.mubr.bf16.mxu0 %v12973_v14 }
 0x50e   : > { %10908 = vmatmul.mubr.bf16.gmra.mrb[8].mxu1 %v12940_v31  ;;  %v1855_v31 = vld [vmem:[#allocation2 + $0x48] sm:$0xff] }
 0x50f   : > { %12236 = vmatmul.mubr.bf16.gmra.mrb[8].mxu0 %v12972_v24  ;;  %10917 = vmatprep.mubr.bf16.mxu1 %v13005_v32 }
 0x510   : > { %12245 = vmatprep.mubr.bf16.mxu0 %v13037_v34 }
 0x516   : > { %10918 = vmatmul.mubr.bf16.gmra.mrb[12].mxu1 %v13004_v37 }
 0x517   : > { %12246 = vmatmul.mubr.bf16.gmra.mrb[12].mxu0 %v13036_v46  ;;  %10927 = vmatprep.mubr.bf16.mxu1 %v13069_v47 }
 0x518   : > { %12255 = vmatprep.mubr.bf16.mxu0 %v13101_v40 }
 0x51e   : > { %10928 = vmatmul.mubr.bf16.gmra.mrb[16].mxu1 %v13068_v49  ;;  %v1858_v49 = vld [vmem:[#allocation2 + $0x60] sm:$0xff] }
 0x51f   : > { %12256 = vmatmul.mubr.bf16.gmra.mrb[16].mxu0 %v13100_v51 }
 0x5d1   : > { %v10889_v16 = vpop.f32.mrb[0].mxu1 }
 0x5d2   : > { %v12217_v36 = vpop.f32.mrb[0].mxu0  ;;  %v10891_v45 = vpop.f32.mrb[1].mxu1 }
 0x5d3   : > { %v14158_v55 = vadd.f32 %v12217_v36, %v10889_v16  ;;  %v12219_v19 = vpop.f32.mrb[1].mxu0  ;;  %v10893_v5 = vpop.f32.mrb[2].mxu1  ;;  %v1859_v36 = vld [vmem:[#allocation2 + $0x68] sm:$0xff] }
 0x5d4   : > { %v14159_v57 = vadd.f32 %v12219_v19, %v10891_v45  ;;  %v12221_v54 = vpop.f32.mrb[2].mxu0  ;;  %v10895_v61 = vpop.f32.mrb[3].mxu1  ;;  %v1860_v19 = vld [vmem:[#allocation2 + $0x70] sm:$0xff] }
 0x5d5   : > { %v12266_v60 = vadd.f32 %v14158_v55, %v1846_v35  ;;  %v14160_v43 = vadd.f32 %v12221_v54, %v10893_v5  ;;  %v12223_v63 = vpop.f32.mrb[3].mxu0 }
 0x5d6   : > { %v12267_v13 = vadd.f32 %v14159_v57, %v1847_v48  ;;  %v14161_v52 = vadd.f32 %v12223_v63, %v10895_v61 }
 0x5d7   : > { %12286 = vst [vmem:[#allocation2] sm:$0xff] %v12266_v60  ;;  %v12268_v53 = vadd.f32 %v14160_v43, %v1848_v58  ;;  %v1861_v60 = vld [vmem:[#allocation2 + $0x78] sm:$0xff] }
 0x5d8   : > { %12287 = vst [vmem:[#allocation2 + $0x8] sm:$0xff] %v12267_v13  ;;  %v12269_v4 = vadd.f32 %v14161_v52, %v1849_v56 }
 0x5d9   : > { %12288 = vst [vmem:[#allocation2 + $0x10] sm:$0xff] %v12268_v53  ;;  %v10899_v59 = vpop.f32.mrb[4].mxu1  ;;  %v1862_v53 = vld [vmem:[#allocation2 + $0x80] sm:$0xff] }
 0x5da   : > { %12289 = vst [vmem:[#allocation2 + $0x18] sm:$0xff] %v12269_v4  ;;  %v12227_v7 = vpop.f32.mrb[4].mxu0  ;;  %v10901_v3 = vpop.f32.mrb[5].mxu1 }
 0x5db   : > { %v14162_v1 = vadd.f32 %v12227_v7, %v10899_v59  ;;  %v12229_v9 = vpop.f32.mrb[5].mxu0  ;;  %v10903_v11 = vpop.f32.mrb[6].mxu1  ;;  %v1863_v7 = vld [vmem:[#allocation2 + $0x88] sm:$0xff] }
 0x5dc   : > { %v14163_v6 = vadd.f32 %v12229_v9, %v10901_v3  ;;  %v12231_v12 = vpop.f32.mrb[6].mxu0  ;;  %v10905_v2 = vpop.f32.mrb[7].mxu1  ;;  %v1864_v9 = vld [vmem:[#allocation2 + $0x90] sm:$0xff] }
 0x5dd   : > { %v12270_v0 = vadd.f32 %v14162_v1, %v1850_v50  ;;  %v14164_v17 = vadd.f32 %v12231_v12, %v10903_v11  ;;  %v12233_v21 = vpop.f32.mrb[7].mxu0 }
 0x5de   : > { %v12271_v14 = vadd.f32 %v14163_v6, %v1851_v8  ;;  %v14165_v15 = vadd.f32 %v12233_v21, %v10905_v2 }
 0x5df   : > { %12290 = vst [vmem:[#allocation2 + $0x20] sm:$0xff] %v12270_v0  ;;  %v12272_v23 = vadd.f32 %v14164_v17, %v1852_v10  ;;  %v1865_v0 = vld [vmem:[#allocation2 + $0x98] sm:$0xff] }
 0x5e0   : > { %12291 = vst [vmem:[#allocation2 + $0x28] sm:$0xff] %v12271_v14  ;;  %v12273_v25 = vadd.f32 %v14165_v15, %v1853_v20  ;;  %v12333_v15 = vshrl.u32 (!%p14126_p7), %v1171_v38, 7 }
 0x5e1   : > { %12292 = vst [vmem:[#allocation2 + $0x30] sm:$0xff] %v12272_v23  ;;  %v10909_v18 = vpop.f32.mrb[8].mxu1  ;;  %v12330_v23 = vld [vmem:[%s20093_s2] sm:$0x3] (!%p14126_p7) }
 0x5e2   : > { %12293 = vst [vmem:[#allocation2 + $0x38] sm:$0xff] %v12273_v25  ;;  %v12237_v28 = vpop.f32.mrb[8].mxu0  ;;  %v10911_v30 = vpop.f32.mrb[9].mxu1  ;;  %v12310_v25 = vld [vmem:[#allocation2] sm:$0xff] (!%p14126_p7) }
 0x5e3   : > { %v14166_v22 = vadd.f32 %v12237_v28, %v10909_v18  ;;  %v12239_v24 = vpop.f32.mrb[9].mxu0  ;;  %v10913_v34 = vpop.f32.mrb[10].mxu1  ;;  %v12334_v18 = vsub.s32 (!%p14126_p7), 0, %v12333_v15  ;;  %v12311_v28 = vld [vmem:[#allocation2 + $0x8] sm:$0xff] (!%p14126_p7) }
 0x5e4   : > { %v14167_v32 = vadd.f32 %v12239_v24, %v10911_v30  ;;  %v12241_v27 = vpop.f32.mrb[10].mxu0  ;;  %v10915_v41 = vpop.f32.mrb[11].mxu1  ;;  %v12313_v30 = vld [vmem:[#allocation2 + $0x18] sm:$0xff] (!%p14126_p7) }
 0x5e5   : > { %v12274_v39 = vadd.f32 %v14166_v22, %v1854_v26  ;;  %v14168_v29 = vadd.f32 %v12241_v27, %v10913_v34  ;;  %v12243_v33 = vpop.f32.mrb[11].mxu0  ;;  %v12338_v26 = vsub.s32 (!%p14126_p7), 1, %v12333_v15  ;;  %v12312_v22 = vld [vmem:[#allocation2 + $0x10] sm:$0xff] (!%p14126_p7) }
 0x5e6   : > { %v12275_v44 = vadd.f32 %v14167_v32, %v1855_v31  ;;  %v14169_v37 = vadd.f32 %v12243_v33, %v10915_v41  ;;  %v19979_v31 = vrot.slane (!%p14126_p7), %v12330_v23, %v12334_v18  ;;  %v12314_v32 = vld [vmem:[#allocation2 + $0x20] sm:$0xff] (!%p14126_p7) }
 0x5e7   : > { %12294 = vst [vmem:[#allocation2 + $0x40] sm:$0xff] %v12274_v39  ;;  %v12276_v46 = vadd.f32 %v14168_v29, %v1856_v62  ;;  %v19981_v24 = vrot.slane (!%p14126_p7), %v12330_v23, %v12338_v26  ;;  %v12315_v34 = vld [vmem:[#allocation2 + $0x28] sm:$0xff] (!%p14126_p7) }
 0x5e8   : > { %12295 = vst [vmem:[#allocation2 + $0x48] sm:$0xff] %v12275_v44  ;;  %v12277_v47 = vadd.f32 %v14169_v37, %v1857_v42  ;;  %v12316_v62 = vld [vmem:[#allocation2 + $0x30] sm:$0xff] (!%p14126_p7)  ;;  %v12342_v38 = vadd.f32 (!%p14126_p7), %v19979_v31, %v12310_v25  ;;  %v12344_v29 = vadd.f32 (!%p14126_p7), %v19979_v31, %v12312_v22  ;;  %v12346_v42 = vadd.f32 (!%p14126_p7), %v19979_v31, %v12314_v32 }
 0x5e9   : > { %12296 = vst [vmem:[#allocation2 + $0x50] sm:$0xff] %v12276_v46  ;;  %v10919_v40 = vpop.f32.mrb[12].mxu1  ;;  %v12317_v27 = vld [vmem:[#allocation2 + $0x38] sm:$0xff] (!%p14126_p7)  ;;  %v12343_v39 = vadd.f32 (!%p14126_p7), %v19981_v24, %v12311_v28  ;;  %v12345_v41 = vadd.f32 (!%p14126_p7), %v19981_v24, %v12313_v30  ;;  %v12347_v33 = vadd.f32 (!%p14126_p7), %v19981_v24, %v12315_v34  ;;  %v12348_v46 = vadd.f32 (!%p14126_p7), %v19979_v31, %v12316_v62 }
 0x5ea   : > { %12297 = vst [vmem:[#allocation2 + $0x58] sm:$0xff] %v12277_v47  ;;  %v12247_v51 = vpop.f32.mrb[12].mxu0  ;;  %v10921_v35 = vpop.f32.mrb[13].mxu1  ;;  %v12382_v44 = vmul.f32 (!%p14126_p7), 0.70710677, %v12342_v38  ;;  %v12349_v47 = vadd.f32 (!%p14126_p7), %v19981_v24, %v12317_v27 }
 0x5eb   : > { %v14170_v16 = vadd.f32 %v12247_v51, %v10919_v40  ;;  %v12249_v55 = vpop.f32.mrb[13].mxu0  ;;  %v10923_v48 = vpop.f32.mrb[14].mxu1  ;;  %v12383_v37 = vmul.f32 (!%p14126_p7), 0.70710677, %v12343_v39  ;;  %v12384_v40 = vmul.f32 (!%p14126_p7), 0.70710677, %v12344_v29 }
 0x5ec   : > { %v14171_v45 = vadd.f32 %v12249_v55, %v10921_v35  ;;  %v12251_v57 = vpop.f32.mrb[14].mxu0  ;;  %v10925_v54 = vpop.f32.mrb[15].mxu1  ;;  %16499 = verf.f32 (!%p14126_p7), %v12382_v44  ;;  %v12369_v15 = vmul.f32 (!%p14126_p7), 0.5, %v12349_v47 }
 0x5ed   : > { %v12278_v5 = vadd.f32 %v14170_v16, %v1858_v49  ;;  %v14172_v58 = vadd.f32 %v12251_v57, %v10923_v48  ;;  %v12253_v43 = vpop.f32.mrb[15].mxu0  ;;  %v12385_v49 = vmul.f32 (!%p14126_p7), 0.70710677, %v12345_v41  ;;  %v12386_v16 = vmul.f32 (!%p14126_p7), 0.70710677, %v12346_v42 }
 0x5ee   : > { %v12279_v61 = vadd.f32 %v14171_v45, %v1859_v36  ;;  %v14173_v56 = vadd.f32 %v12253_v43, %v10925_v54  ;;  %v12318_v51 = vld [vmem:[#allocation2 + $0x40] sm:$0xff] (!%p14126_p7)  ;;  %16501 = verf.f32 (!%p14126_p7), %v12383_v37  ;;  %v12387_v45 = vmul.f32 (!%p14126_p7), 0.70710677, %v12347_v33 }
 0x5ef   : > { %12298 = vst [vmem:[#allocation2 + $0x60] sm:$0xff] %v12278_v5  ;;  %v12280_v63 = vadd.f32 %v14172_v58, %v1860_v19  ;;  %v12319_v35 = vld [vmem:[#allocation2 + $0x48] sm:$0xff] (!%p14126_p7)  ;;  %16503 = verf.f32 (!%p14126_p7), %v12384_v40  ;;  %v12388_v19 = vmul.f32 (!%p14126_p7), 0.70710677, %v12348_v46  ;;  %v12389_v57 = vmul.f32 (!%p14126_p7), 0.70710677, %v12349_v47 }
 0x5f0   : > { %12299 = vst [vmem:[#allocation2 + $0x68] sm:$0xff] %v12279_v61  ;;  %v12281_v13 = vadd.f32 %v14173_v56, %v1861_v60  ;;  %v12320_v36 = vld [vmem:[#allocation2 + $0x50] sm:$0xff] (!%p14126_p7)  ;;  %v12350_v5 = vadd.f32 (!%p14126_p7), %v19979_v31, %v12318_v51  ;;  %16505 = verf.f32 (!%p14126_p7), %v12385_v49  ;;  %v12351_v58 = vadd.f32 (!%p14126_p7), %v19981_v24, %v12319_v35 }
 0x5f1   : > { %12300 = vst [vmem:[#allocation2 + $0x70] sm:$0xff] %v12280_v63  ;;  %v10929_v52 = vpop.f32.mrb[16].mxu1  ;;  %v12321_v55 = vld [vmem:[#allocation2 + $0x58] sm:$0xff] (!%p14126_p7)  ;;  %v19994_v54 = vadd.f32 (!%p14126_p7), %v19979_v31, %v12320_v36  ;;  %v12362_v43 = vmul.f32 (!%p14126_p7), 0.5, %v12342_v38  ;;  %16507 = verf.f32 (!%p14126_p7), %v12386_v16 }
 0x5f2   : > { %12301 = vst [vmem:[#allocation2 + $0x78] sm:$0xff] %v12281_v13  ;;  %v12257_v4 = vpop.f32.mrb[16].mxu0  ;;  %v10931_v50 = vpop.f32.mrb[17].mxu1  ;;  %v19997_v60 = vadd.f32 (!%p14126_p7), %v19981_v24, %v12321_v55  ;;  %v12390_v61 = vmul.f32 (!%p14126_p7), 0.70710677, %v12350_v5  ;;  %16509 = verf.f32 (!%p14126_p7), %v12387_v45  ;;  %v12370_v26 = vmul.f32 (!%p14126_p7), 0.5, %v12350_v5 }
 0x5f3   : > { %v14174_v59 = vadd.f32 %v12257_v4, %v10929_v52  ;;  %v12259_v1 = vpop.f32.mrb[17].mxu0  ;;  %v10933_v8 = vpop.f32.mrb[18].mxu1  ;;  %v12363_v52 = vmul.f32 (!%p14126_p7), 0.5, %v12343_v39  ;;  %v12391_v4 = vmul.f32 (!%p14126_p7), 0.70710677, %v12351_v58  ;;  %16511 = verf.f32 (!%p14126_p7), %v12388_v19 }
 0x5f4   : > { %v14175_v3 = vadd.f32 %v12259_v1, %v10931_v50  ;;  %v12261_v6 = vpop.f32.mrb[18].mxu0  ;;  %v10935_v12 = vpop.f32.mrb[19].mxu1  ;;  %12309 = sbr.rel (%p14126_p7) target bundleno = 1560 (0x618), region = 110  ;;  %v12366_v1 = vmul.f32 (!%p14126_p7), 0.5, %v12346_v42  ;;  %16513 = verf.f32 (!%p14126_p7), %v12389_v57  ;;  %v12371_v34 = vmul.f32 (!%p14126_p7), 0.5, %v12351_v58 }
 0x5f5   : > { %v12282_v11 = vadd.f32 %v14174_v59, %v1862_v53  ;;  %v14176_v10 = vadd.f32 %v12261_v6, %v10933_v8  ;;  %v12263_v17 = vpop.f32.mrb[19].mxu0  ;;  %v12364_v53 = vmul.f32 (!%p14126_p7), 0.5, %v12344_v29  ;;  %16515 = verf.f32 (!%p14126_p7), %v12390_v61 }
 0x5f6   : > { %v12283_v2 = vadd.f32 %v14175_v3, %v1863_v7  ;;  %v14177_v20 = vadd.f32 %v12263_v17, %v10935_v12  ;;  %v12322_v48 = vld [vmem:[#allocation2 + $0x60] sm:$0xff] (!%p14126_p7)  ;;  %v12365_v7 = vmul.f32 (!%p14126_p7), 0.5, %v12345_v41  ;;  %v12392_v3 = vmul.f32 (!%p14126_p7), 0.70710677, %v19994_v54 }
 0x5f7   : > { %12302 = vst [vmem:[#allocation2 + $0x80] sm:$0xff] %v12282_v11  ;;  %v12284_v21 = vadd.f32 %v14176_v10, %v1864_v9  ;;  %v12323_v56 = vld [vmem:[#allocation2 + $0x68] sm:$0xff] (!%p14126_p7)  ;;  %v20000_v63 = vadd.f32 (!%p14126_p7), %v19979_v31, %v12322_v48  ;;  %v12393_v9 = vmul.f32 (!%p14126_p7), 0.70710677, %v19997_v60  ;;  %v12367_v17 = vmul.f32 (!%p14126_p7), 0.5, %v12347_v33 }
 0x5f8   : > { %12303 = vst [vmem:[#allocation2 + $0x88] sm:$0xff] %v12283_v2  ;;  %v12285_v14 = vadd.f32 %v14177_v20, %v1865_v0  ;;  %v12324_v13 = vld [vmem:[#allocation2 + $0x70] sm:$0xff] (!%p14126_p7)  ;;  %v20005_v6 = vadd.f32 (!%p14126_p7), %v19981_v24, %v12323_v56  ;;  %16517 = verf.f32 (!%p14126_p7), %v12391_v4  ;;  %v12372_v19 = vmul.f32 (!%p14126_p7), 0.5, %v19994_v54 }
 0x5f9   : > { %12304 = vst [vmem:[#allocation2 + $0x90] sm:$0xff] %v12284_v21  ;;  %v12325_v59 = vld [vmem:[#allocation2 + $0x78] sm:$0xff] (!%p14126_p7)  ;;  %v12394_v11 = vmul.f32 (!%p14126_p7), 0.70710677, %v20000_v63  ;;  %v20009_v10 = vadd.f32 (!%p14126_p7), %v19979_v31, %v12324_v13  ;;  %v16500_v21 = vpop.eup (!%p14126_p7), %16499  ;;  %16519 = verf.f32 (!%p14126_p7), %v12392_v3  ;;  %v12373_v58 = vmul.f32 (!%p14126_p7), 0.5, %v19997_v60 }
 0x5fa   : > { %12305 = vst [vmem:[#allocation2 + $0x98] sm:$0xff] %v12285_v14  ;;  %v20012_v12 = vadd.f32 (!%p14126_p7), %v19981_v24, %v12325_v59  ;;  %v12395_v2 = vmul.f32 (!%p14126_p7), 0.70710677, %v20005_v6  ;;  %v12368_v14 = vmul.f32 (!%p14126_p7), 0.5, %v12348_v46  ;;  %v16502_v25 = vpop.eup (!%p14126_p7), %16501  ;;  %v12422_v18 = vadd.f32 (!%p14126_p7), 1.0, %v16500_v21 }
 0x5fb   : > { %v12396_v23 = vmul.f32 0.70710677, %v20009_v10  ;;  %16521 = verf.f32 %v12393_v9  ;;  %v16504_v30 = vpop.eup %16503  ;;  %v12423_v32 = vadd.f32 1.0, %v16502_v25  ;;  %v12375_v3 = vmul.f32 0.5, %v20005_v6 }
 0x5fc   : > { %v12397_v28 = vmul.f32 0.70710677, %v20012_v12  ;;  %16523 = verf.f32 %v12394_v11  ;;  %v16506_v38 = vpop.eup %16505  ;;  %v12442_v39 = vmul.f32 %v12422_v18, %v12362_v43  ;;  %v12424_v29 = vadd.f32 1.0, %v16504_v30 }
 0x5fd   : > { %16525 = verf.f32 %v12395_v2  ;;  %v16508_v42 = vpop.eup %16507  ;;  %v12443_v33 = vmul.f32 %v12423_v32, %v12363_v52  ;;  %v12425_v44 = vadd.f32 1.0, %v16506_v38  ;;  %v12377_v18 = vmul.f32 0.5, %v20012_v12 }
 0x5fe   : > { %v12326_v50 = vld [vmem:[#allocation2 + $0x80] sm:$0xff]  ;;  %16527 = verf.f32 %v12396_v23  ;;  %v16510_v46 = vpop.eup %16509  ;;  %v12444_v47 = vmul.f32 %v12424_v29, %v12364_v53  ;;  %v12426_v40 = vadd.f32 1.0, %v16508_v42 }
 0x5ff   : > { %v12327_v8 = vld [vmem:[#allocation2 + $0x88] sm:$0xff]  ;;  %v20015_v0 = vadd.f32 %v19979_v31, %v12326_v50  ;;  %16529 = verf.f32 %v12397_v28  ;;  %v16512_v51 = vpop.eup %16511  ;;  %v14148_v16 = vpack.c.bf16 %v12443_v33, %v12442_v39  ;;  %v12445_v35 = vmul.f32 %v12425_v44, %v12365_v7 }
 0x600   : > { %v20019_v20 = vadd.f32 %v19981_v24, %v12327_v8  ;;  %v12328_v22 = vld [vmem:[#allocation2 + $0x90] sm:$0xff]  ;;  %v12427_v36 = vadd.f32 1.0, %v16510_v46  ;;  %v16514_v55 = vpop.eup %16513  ;;  %v12446_v45 = vmul.f32 %v12426_v40, %v12366_v1  ;;  %v12428_v48 = vadd.f32 1.0, %v16512_v51 }
 0x601   : > { %v12398_v62 = vmul.f32 0.70710677, %v20015_v0  ;;  %v12329_v27 = vld [vmem:[#allocation2 + $0x98] sm:$0xff]  ;;  %v20026_v37 = vadd.f32 %v19979_v31, %v12328_v22  ;;  %v16516_v31 = vpop.eup %16515  ;;  %12522 = vst [vmem:[%s20094_s3] sm:$0xff] %v14148_v16  ;;  %v14149_v57 = vpack.c.bf16 %v12445_v35, %v12444_v47  ;;  %v12374_v50 = vmul.f32 0.5, %v20000_v63 }
 0x602   : > { %v12399_v41 = vmul.f32 0.70710677, %v20019_v20  ;;  %v20029_v49 = vadd.f32 %v19981_v24, %v12329_v27  ;;  %v12447_v5 = vmul.f32 %v12427_v36, %v12367_v17  ;;  %v12429_v24 = vadd.f32 1.0, %v16514_v55  ;;  %v16518_v43 = vpop.eup %16517 }
 0x603   : > { %16531 = verf.f32 %v12398_v62  ;;  %v12448_v61 = vmul.f32 %v12428_v48, %v12368_v14  ;;  %v12430_v56 = vadd.f32 1.0, %v16516_v31  ;;  %v12400_v13 = vmul.f32 0.70710677, %v20026_v37  ;;  %v16520_v53 = vpop.eup %16519  ;;  %12523 = vst [vmem:[%s20094_s3 + $0x8] sm:$0xff] %v14149_v57 }
 0x604   : > { %16533 = verf.f32 %v12399_v41  ;;  %v12401_v52 = vmul.f32 0.70710677, %v20029_v49  ;;  %v14150_v54 = vpack.c.bf16 %v12447_v5, %v12446_v45  ;;  %v12449_v4 = vmul.f32 %v12429_v24, %v12369_v15 }
 0x605   : > { %v12431_v59 = vadd.f32 1.0, %v16518_v43  ;;  %v16522_v7 = vpop.eup %16521  ;;  %v12450_v1 = vmul.f32 %v12430_v56, %v12370_v26  ;;  %v12432_v60 = vadd.f32 1.0, %v16520_v53  ;;  %16535 = verf.f32 %v12400_v13 }
 0x606   : > { %v16524_v8 = vpop.eup %16523  ;;  %12524 = vst [vmem:[%s20094_s3 + $0x10] sm:$0xff] %v14150_v54  ;;  %v14151_v9 = vpack.c.bf16 %v12449_v4, %v12448_v61  ;;  %v12433_v17 = vadd.f32 1.0, %v16522_v7  ;;  %16537 = verf.f32 %v12401_v52  ;;  %v12376_v63 = vmul.f32 0.5, %v20009_v10 }
 0x607   : > { %v12451_v11 = vmul.f32 %v12431_v59, %v12371_v34  ;;  %v16526_v2 = vpop.eup %16525  ;;  %v12452_v21 = vmul.f32 %v12432_v60, %v12372_v19  ;;  %v12434_v14 = vadd.f32 1.0, %v16524_v8  ;;  %v12378_v30 = vmul.f32 0.5, %v20015_v0 }
 0x608   : > { %v16528_v15 = vpop.eup %16527  ;;  %12525 = vst [vmem:[%s20094_s3 + $0x18] sm:$0xff] %v14151_v9  ;;  %v12453_v23 = vmul.f32 %v12433_v17, %v12373_v58  ;;  %v12435_v25 = vadd.f32 1.0, %v16526_v2  ;;  %v12379_v27 = vmul.f32 0.5, %v20019_v20  ;;  %v12380_v46 = vmul.f32 0.5, %v20026_v37 }
 0x609   : > { %v14152_v6 = vpack.c.bf16 %v12451_v11, %v12450_v1  ;;  %v16530_v26 = vpop.eup %16529  ;;  %v12454_v28 = vmul.f32 %v12434_v14, %v12374_v50  ;;  %v12436_v22 = vadd.f32 1.0, %v16528_v15  ;;  %v12381_v47 = vmul.f32 0.5, %v20029_v49 }
 0x60a   : > { %v14153_v10 = vpack.c.bf16 %v12453_v23, %v12452_v21  ;;  %v12455_v34 = vmul.f32 %v12435_v25, %v12375_v3  ;;  %v12437_v62 = vadd.f32 1.0, %v16530_v26 }
 0x60b   : > { %12526 = vst [vmem:[%s20094_s3 + $0x20] sm:$0xff] %v14152_v6  ;;  %v12456_v39 = vmul.f32 %v12436_v22, %v12376_v63 }
 0x60c   : > { %12527 = vst [vmem:[%s20094_s3 + $0x28] sm:$0xff] %v14153_v10  ;;  %v14154_v12 = vpack.c.bf16 %v12455_v34, %v12454_v28  ;;  %v12457_v41 = vmul.f32 %v12437_v62, %v12377_v18 }
 0x60d   : > { %v16532_v32 = vpop.eup %16531 }
 0x60e   : > { %v16534_v38 = vpop.eup %16533  ;;  %v12438_v29 = vadd.f32 1.0, %v16532_v32  ;;  %12528 = vst [vmem:[%s20094_s3 + $0x30] sm:$0xff] %v14154_v12  ;;  %v14155_v33 = vpack.c.bf16 %v12457_v41, %v12456_v39 }
 0x60f   : > { %v12439_v0 = vadd.f32 1.0, %v16534_v38  ;;  %v16536_v20 = vpop.eup %16535 }
 0x610   : > { %v12458_v42 = vmul.f32 %v12438_v29, %v12378_v30  ;;  %v16538_v40 = vpop.eup %16537  ;;  %12529 = vst [vmem:[%s20094_s3 + $0x38] sm:$0xff] %v14155_v33  ;;  %v12440_v16 = vadd.f32 1.0, %v16536_v20 }
 0x611   : > { %v12459_v44 = vmul.f32 %v12439_v0, %v12379_v27  ;;  %v12441_v35 = vadd.f32 1.0, %v16538_v40 }
 0x612   : > { %v12460_v36 = vmul.f32 %v12440_v16, %v12380_v46 }
 0x613   : > { %v14156_v51 = vpack.c.bf16 %v12459_v44, %v12458_v42  ;;  %v12461_v55 = vmul.f32 %v12441_v35, %v12381_v47 }
 0x615   : > { %12530 = vst [vmem:[%s20094_s3 + $0x40] sm:$0xff] %v14156_v51  ;;  %v14157_v45 = vpack.c.bf16 %v12461_v55, %v12460_v36 }
 0x617   : > { %12531 = vst [vmem:[%s20094_s3 + $0x48] sm:$0xff] %v14157_v45 }
 0x618 PF: > { %s16_s17 = sadd.s32 1, %s16683_s17   ;;  %s20181_s21 = sld [smem:[#allocation7_spill]] }
 0x619   : > { %p13_p8 = scmp.ge.s32.totalorder %s16_s17, 11   ;;  %s20182_s12 = smov %s16667_s13 }
 0x61a   : > { %s20183_s13 = smov %s16671_s14  ;;  %s20184_s14 = smov %s16823_s24 }
 0x61b   : > { %s20185_s15 = smov %s16679_s16  ;;  %15 = sbr.rel (!%p13_p8) target bundleno = 6 (0x6), region = 219 }
 0x61e   : > { %s20186_s16 = smov %s20181_s21 }
 0x622   :  { %12565 = vsyncpa [#allocation5], 1 }
 0x623   :  { %12567 = vsyncpa [#allocation5 + $0x1], 1 }

// kernel: forward.3
= control target key start
LH: loop header
LB: loop body
LE: loop exit
PB: predicated region body
PF: predicated region fallthrough
CT: control target
= control target key end

     0   :  { %vm2516_vm0 = vmmov 1   ;;  %s3339_s1 = inlined_call_operand.vmem [shape: bf16[1792,256], index: 1, kind: input, shape index: {}]   ;;  %s3340_s0 = inlined_call_operand.vmem [shape: bf16[10,1710], index: 0, kind: input, shape index: {}]   ;;  %s3341_s2 = inlined_call_operand.vmem [shape: f32[1,256], index: 2, kind: input, shape index: {}]   ;;  %s3342_s3 = inlined_call_operand.vmem [shape: f32[10,256], index: 3, kind: output, shape index: {}]  }
   0x1   :  { %v2172_v0 = vld [vmem:[%s3339_s1 + $0x4] ss:$8 sps:$4 sm:$0xff]   ;;  %v2176_v2 = vld [vmem:[%s3339_s1] ss:$8 sps:$4 sm:$0xff]   ;;  %v2178_v4 = vld [vmem:[%s3339_s1 + $0x14] ss:$8 sps:$4 sm:$0xff]  }
   0x2   :  { %v2174_v1 = vld [vmem:[%s3339_s1 + $0x304] ss:$8 sps:$4 sm:$0xff]   ;;  %1549 = vmatprep.subr.bf16.mxu1 %v2172_v0  ;;  %v2177_v3 = vld [vmem:[%s3339_s1 + $0x300] ss:$8 sps:$4 sm:$0xff]   ;;  %v2180_v5 = vld [vmem:[%s3339_s1 + $0x314] ss:$8 sps:$4 sm:$0xff]  }
   0x3   :  { %1678 = vmatprep.subr.bf16.mxu0 %v2174_v1  ;;  %1550 = vmatpush1.bf16.msra.mxu1 %v2176_v2  ;;  %v2182_v6 = vld [vmem:[%s3339_s1 + $0x10] ss:$8 sps:$4 sm:$0xff]   ;;  %v2184_v8 = vld [vmem:[%s3339_s1 + $0x24] ss:$8 sps:$4 sm:$0xff]   ;;  %v2188_v10 = vld [vmem:[%s3339_s1 + $0x20] ss:$8 sps:$4 sm:$0xff]  }
   0x4   :  { %1679 = vmatpush1.bf16.msra.mxu0 %v2177_v3  ;;  %1551 = vmatprep.subr.bf16.mxu1 %v2178_v4  ;;  %v2183_v7 = vld [vmem:[%s3339_s1 + $0x310] ss:$8 sps:$4 sm:$0xff]   ;;  %v2186_v9 = vld [vmem:[%s3339_s1 + $0x324] ss:$8 sps:$4 sm:$0xff]   ;;  %v2189_v11 = vld [vmem:[%s3339_s1 + $0x320] ss:$8 sps:$4 sm:$0xff]  }
   0x5   :  { %1680 = vmatprep.subr.bf16.mxu0 %v2180_v5  ;;  %v2190_v12 = vld [vmem:[%s3339_s1 + $0x34] ss:$8 sps:$4 sm:$0xff]   ;;  %v2194_v14 = vld [vmem:[%s3339_s1 + $0x30] ss:$8 sps:$4 sm:$0xff]   ;;  %v2196_v16 = vld [vmem:[%s3339_s1 + $0x44] ss:$8 sps:$4 sm:$0xff]  }
   0x6   :  { %v2192_v13 = vld [vmem:[%s3339_s1 + $0x334] ss:$8 sps:$4 sm:$0xff]   ;;  %v2195_v15 = vld [vmem:[%s3339_s1 + $0x330] ss:$8 sps:$4 sm:$0xff]   ;;  %v2198_v17 = vld [vmem:[%s3339_s1 + $0x344] ss:$8 sps:$4 sm:$0xff]  }
   0x7   :  { %1552 = vmatpush1.bf16.msra.mxu1 %v2182_v6  ;;  %v2200_v18 = vld [vmem:[%s3339_s1 + $0x40] ss:$8 sps:$4 sm:$0xff]   ;;  %v2202_v20 = vld [vmem:[%s3339_s1 + $0x54] ss:$8 sps:$4 sm:$0xff]   ;;  %v2206_v22 = vld [vmem:[%s3339_s1 + $0x50] ss:$8 sps:$4 sm:$0xff]  }
   0x8   :  { %1681 = vmatpush1.bf16.msra.mxu0 %v2183_v7  ;;  %1553 = vmatprep.subr.bf16.mxu1 %v2184_v8  ;;  %v2201_v19 = vld [vmem:[%s3339_s1 + $0x340] ss:$8 sps:$4 sm:$0xff]   ;;  %v2204_v21 = vld [vmem:[%s3339_s1 + $0x354] ss:$8 sps:$4 sm:$0xff]   ;;  %v2207_v23 = vld [vmem:[%s3339_s1 + $0x350] ss:$8 sps:$4 sm:$0xff]  }
   0x9   :  { %1682 = vmatprep.subr.bf16.mxu0 %v2186_v9  ;;  %v2208_v24 = vld [vmem:[%s3339_s1 + $0x64] ss:$8 sps:$4 sm:$0xff]   ;;  %v2212_v26 = vld [vmem:[%s3339_s1 + $0x60] ss:$8 sps:$4 sm:$0xff]   ;;  %v2214_v28 = vld [vmem:[%s3339_s1 + $0x74] ss:$8 sps:$4 sm:$0xff]  }
   0xa   :  { %v2210_v25 = vld [vmem:[%s3339_s1 + $0x364] ss:$8 sps:$4 sm:$0xff]   ;;  %v2213_v27 = vld [vmem:[%s3339_s1 + $0x360] ss:$8 sps:$4 sm:$0xff]   ;;  %v2216_v29 = vld [vmem:[%s3339_s1 + $0x374] ss:$8 sps:$4 sm:$0xff]  }
   0xb   :  { %1554 = vmatpush1.bf16.msra.mxu1 %v2188_v10  ;;  %v2218_v30 = vld [vmem:[%s3339_s1 + $0x70] ss:$8 sps:$4 sm:$0xff]   ;;  %v2220_v32 = vld [vmem:[%s3339_s1 + $0x84] ss:$8 sps:$4 sm:$0xff]   ;;  %v2224_v34 = vld [vmem:[%s3339_s1 + $0x80] ss:$8 sps:$4 sm:$0xff]  }
   0xc   :  { %1683 = vmatpush1.bf16.msra.mxu0 %v2189_v11  ;;  %1555 = vmatprep.subr.bf16.mxu1 %v2190_v12  ;;  %v2219_v31 = vld [vmem:[%s3339_s1 + $0x370] ss:$8 sps:$4 sm:$0xff]   ;;  %v2222_v33 = vld [vmem:[%s3339_s1 + $0x384] ss:$8 sps:$4 sm:$0xff]   ;;  %v2225_v35 = vld [vmem:[%s3339_s1 + $0x380] ss:$8 sps:$4 sm:$0xff]  }
   0xd   :  { %1684 = vmatprep.subr.bf16.mxu0 %v2192_v13  ;;  %v2226_v36 = vld [vmem:[%s3339_s1 + $0x94] ss:$8 sps:$4 sm:$0xff]   ;;  %v2230_v38 = vld [vmem:[%s3339_s1 + $0x90] ss:$8 sps:$4 sm:$0xff]   ;;  %v2232_v40 = vld [vmem:[%s3339_s1 + $0xa4] ss:$8 sps:$4 sm:$0xff]  }
   0xe   :  { %v2228_v37 = vld [vmem:[%s3339_s1 + $0x394] ss:$8 sps:$4 sm:$0xff]   ;;  %v2231_v39 = vld [vmem:[%s3339_s1 + $0x390] ss:$8 sps:$4 sm:$0xff]   ;;  %v2234_v41 = vld [vmem:[%s3339_s1 + $0x3a4] ss:$8 sps:$4 sm:$0xff]  }
   0xf   :  { %1556 = vmatpush1.bf16.msra.mxu1 %v2194_v14  ;;  %v2236_v42 = vld [vmem:[%s3339_s1 + $0xa0] ss:$8 sps:$4 sm:$0xff]   ;;  %v2238_v44 = vld [vmem:[%s3339_s1 + $0xb4] ss:$8 sps:$4 sm:$0xff]   ;;  %v2242_v46 = vld [vmem:[%s3339_s1 + $0xb0] ss:$8 sps:$4 sm:$0xff]  }
  0x10   :  { %1685 = vmatpush1.bf16.msra.mxu0 %v2195_v15  ;;  %1557 = vmatprep.subr.bf16.mxu1 %v2196_v16  ;;  %v2237_v43 = vld [vmem:[%s3339_s1 + $0x3a0] ss:$8 sps:$4 sm:$0xff]   ;;  %v2240_v45 = vld [vmem:[%s3339_s1 + $0x3b4] ss:$8 sps:$4 sm:$0xff]   ;;  %v2243_v47 = vld [vmem:[%s3339_s1 + $0x3b0] ss:$8 sps:$4 sm:$0xff]  }
  0x11   :  { %1686 = vmatprep.subr.bf16.mxu0 %v2198_v17  ;;  %v23_v48 = vld [vmem:[%s3340_s0] sm:$0xff]  ;;  %v30_v49 = vld [vmem:[%s3340_s0 + $0x38] sm:$0xff]  ;;  %vm2689_vm1 = vmpackc.low %vm2516_vm0, %vm2516_vm0 }
  0x12   :  { %v2244_v51 = vld [vmem:[%s3339_s1 + $0xc4] ss:$8 sps:$4 sm:$0xff]   ;;  %v117_v52 = vsel %vm2689_vm1, %v23_v48, 0  ;;  %v124_v53 = vsel %vm2689_vm1, %v30_v49, 0  ;;  %v26_v54 = vld [vmem:[%s3340_s0 + $0x18] sm:$0xff]  ;;  %v33_v57 = vld [vmem:[%s3340_s0 + $0x50] sm:$0xff] }
  0x13   :  { %1558 = vmatpush1.bf16.msra.mxu1 %v2200_v18  ;;  %v2246_v55 = vld [vmem:[%s3339_s1 + $0x3c4] ss:$8 sps:$4 sm:$0xff]   ;;  %v1910_v56 = vcombine.high %v117_v52, %v124_v53  ;;  %v120_v58 = vsel %vm2689_vm1, %v26_v54, 0  ;;  %v127_v59 = vsel %vm2689_vm1, %v33_v57, 0  ;;  %v2248_v60 = vld [vmem:[%s3339_s1 + $0xc0] ss:$8 sps:$4 sm:$0xff]   ;;  %v1909_v13 = vcombine.low %v117_v52, %v124_v53 }
  0x14   :  { %1687 = vmatpush1.bf16.msra.mxu0 %v2201_v19  ;;  %1559 = vmatprep.subr.bf16.mxu1 %v2202_v20  ;;  %v1916_v61 = vcombine.high %v120_v58, %v127_v59  ;;  %v2249_v62 = vld [vmem:[%s3339_s1 + $0x3c0] ss:$8 sps:$4 sm:$0xff]   ;;  %v2250_v63 = vld [vmem:[%s3339_s1 + $0xd4] ss:$8 sps:$4 sm:$0xff]   ;;  %v2254_v1 = vld [vmem:[%s3339_s1 + $0xd0] ss:$8 sps:$4 sm:$0xff]   ;;  %v1915_v15 = vcombine.low %v120_v58, %v127_v59 }
  0x15   :  { %1688 = vmatprep.subr.bf16.mxu0 %v2204_v21  ;;  %1581 = vmatprep.mubr.bf16.mxu1 %v1910_v56  ;;  %v2252_v0 = vld [vmem:[%s3339_s1 + $0x3d4] ss:$8 sps:$4 sm:$0xff]   ;;  %v2255_v2 = vld [vmem:[%s3339_s1 + $0x3d0] ss:$8 sps:$4 sm:$0xff]   ;;  %v2256_v3 = vld [vmem:[%s3339_s1 + $0xe4] ss:$8 sps:$4 sm:$0xff]  }
  0x16   :  { %1710 = vmatprep.mubr.bf16.mxu0 %v1916_v61  ;;  %v2258_v4 = vld [vmem:[%s3339_s1 + $0x3e4] ss:$8 sps:$4 sm:$0xff]   ;;  %v2260_v5 = vld [vmem:[%s3339_s1 + $0xe0] ss:$8 sps:$4 sm:$0xff]   ;;  %v2262_v7 = vld [vmem:[%s3339_s1 + $0xf4] ss:$8 sps:$4 sm:$0xff]  }
  0x17   :  { %1560 = vmatpush1.bf16.msra.mxu1 %v2206_v22  ;;  %v2261_v6 = vld [vmem:[%s3339_s1 + $0x3e0] ss:$8 sps:$4 sm:$0xff]   ;;  %v2264_v8 = vld [vmem:[%s3339_s1 + $0x3f4] ss:$8 sps:$4 sm:$0xff]   ;;  %v2266_v9 = vld [vmem:[%s3339_s1 + $0xf0] ss:$8 sps:$4 sm:$0xff]  }
  0x18   :  { %1689 = vmatpush1.bf16.msra.mxu0 %v2207_v23  ;;  %1561 = vmatprep.subr.bf16.mxu1 %v2208_v24  ;;  %v2267_v10 = vld [vmem:[%s3339_s1 + $0x3f0] ss:$8 sps:$4 sm:$0xff]   ;;  %v2270_v11 = vld [vmem:[%s3339_s1 + $0x104] ss:$8 sps:$4 sm:$0xff]   ;;  %v2268_v14 = vld [vmem:[%s3339_s1 + $0x100] ss:$8 sps:$4 sm:$0xff]  }
  0x19   :  { %1690 = vmatprep.subr.bf16.mxu0 %v2210_v25  ;;  %v2273_v12 = vld [vmem:[%s3339_s1 + $0x404] ss:$8 sps:$4 sm:$0xff]   ;;  %v2271_v16 = vld [vmem:[%s3339_s1 + $0x400] ss:$8 sps:$4 sm:$0xff]   ;;  %v2276_v17 = vld [vmem:[%s3339_s1 + $0x114] ss:$8 sps:$4 sm:$0xff]  }
  0x1a   :  { %v2279_v18 = vld [vmem:[%s3339_s1 + $0x414] ss:$8 sps:$4 sm:$0xff]   ;;  %v2274_v19 = vld [vmem:[%s3339_s1 + $0x110] ss:$8 sps:$4 sm:$0xff]   ;;  %v2282_v21 = vld [vmem:[%s3339_s1 + $0x124] ss:$8 sps:$4 sm:$0xff]  }
  0x1b   :  { %1562 = vmatpush1.bf16.msra.mxu1 %v2212_v26  ;;  %v2277_v20 = vld [vmem:[%s3339_s1 + $0x410] ss:$8 sps:$4 sm:$0xff]   ;;  %v2285_v22 = vld [vmem:[%s3339_s1 + $0x424] ss:$8 sps:$4 sm:$0xff]   ;;  %v2280_v23 = vld [vmem:[%s3339_s1 + $0x120] ss:$8 sps:$4 sm:$0xff]  }
  0x1c   :  { %1691 = vmatpush1.bf16.msra.mxu0 %v2213_v27  ;;  %1563 = vmatprep.subr.bf16.mxu1 %v2214_v28  ;;  %v2283_v24 = vld [vmem:[%s3339_s1 + $0x420] ss:$8 sps:$4 sm:$0xff]   ;;  %v2288_v25 = vld [vmem:[%s3339_s1 + $0x134] ss:$8 sps:$4 sm:$0xff]   ;;  %v2286_v27 = vld [vmem:[%s3339_s1 + $0x130] ss:$8 sps:$4 sm:$0xff]  }
  0x1d   :  { %1692 = vmatprep.subr.bf16.mxu0 %v2216_v29  ;;  %v2291_v26 = vld [vmem:[%s3339_s1 + $0x434] ss:$8 sps:$4 sm:$0xff]   ;;  %v2289_v28 = vld [vmem:[%s3339_s1 + $0x430] ss:$8 sps:$4 sm:$0xff]   ;;  %v2294_v29 = vld [vmem:[%s3339_s1 + $0x144] ss:$8 sps:$4 sm:$0xff]  }
  0x1e   :  { %v34_v49 = vld [vmem:[%s3340_s0 + $0x58] sm:$0xff]  ;;  %v2318_v56 = vld [vmem:[%s3339_s1 + $0x184] ss:$8 sps:$4 sm:$0xff]   ;;  %v2316_v58 = vld [vmem:[%s3339_s1 + $0x180] ss:$8 sps:$4 sm:$0xff]  }
  0x1f   :  { %1564 = vmatpush1.bf16.msra.mxu1 %v2218_v30  ;;  %v2297_v30 = vld [vmem:[%s3339_s1 + $0x444] ss:$8 sps:$4 sm:$0xff]   ;;  %v2873_v52 = vsel %vm2689_vm1, %v34_v49, 0  ;;  %v2310_v53 = vld [vmem:[%s3339_s1 + $0x170] ss:$8 sps:$4 sm:$0xff]  }
  0x20   :  { %1693 = vmatpush1.bf16.msra.mxu0 %v2219_v31  ;;  %1565 = vmatprep.subr.bf16.mxu1 %v2220_v32  ;;  %v2292_v31 = vld [vmem:[%s3339_s1 + $0x140] ss:$8 sps:$4 sm:$0xff]   ;;  %v2321_v57 = vld [vmem:[%s3339_s1 + $0x484] ss:$8 sps:$4 sm:$0xff]   ;;  %v2327_v61 = vld [vmem:[%s3339_s1 + $0x494] ss:$8 sps:$4 sm:$0xff]  }
  0x21   :  { %1694 = vmatprep.subr.bf16.mxu0 %v2222_v33  ;;  %v2295_v32 = vld [vmem:[%s3339_s1 + $0x440] ss:$8 sps:$4 sm:$0xff]   ;;  %v2300_v33 = vld [vmem:[%s3339_s1 + $0x154] ss:$8 sps:$4 sm:$0xff]   ;;  %v2382_v49 = vld [vmem:[%s3339_s1 + $0x230] ss:$8 sps:$4 sm:$0xff]  }
  0x22   :  { %v2319_v59 = vld [vmem:[%s3339_s1 + $0x480] ss:$8 sps:$4 sm:$0xff]   ;;  %v2384_v50 = vld [vmem:[%s3339_s1 + $0x234] ss:$8 sps:$4 sm:$0xff]  }
  0x23   :  { %1566 = vmatpush1.bf16.msra.mxu1 %v2224_v34  ;;  %v2303_v34 = vld [vmem:[%s3339_s1 + $0x454] ss:$8 sps:$4 sm:$0xff]  }
  0x24   :  { %1695 = vmatpush1.bf16.msra.mxu0 %v2225_v35  ;;  %1567 = vmatprep.subr.bf16.mxu1 %v2226_v36  ;;  %v2298_v35 = vld [vmem:[%s3339_s1 + $0x150] ss:$8 sps:$4 sm:$0xff]  }
  0x25   :  { %1696 = vmatprep.subr.bf16.mxu0 %v2228_v37  ;;  %v2301_v36 = vld [vmem:[%s3339_s1 + $0x450] ss:$8 sps:$4 sm:$0xff]   ;;  %v2306_v37 = vld [vmem:[%s3339_s1 + $0x164] ss:$8 sps:$4 sm:$0xff]  }
  0x27   :  { %1568 = vmatpush1.bf16.msra.mxu1 %v2230_v38  ;;  %v2309_v38 = vld [vmem:[%s3339_s1 + $0x464] ss:$8 sps:$4 sm:$0xff]  }
  0x28   :  { %1697 = vmatpush1.bf16.msra.mxu0 %v2231_v39  ;;  %1569 = vmatprep.subr.bf16.mxu1 %v2232_v40  ;;  %v2304_v39 = vld [vmem:[%s3339_s1 + $0x160] ss:$8 sps:$4 sm:$0xff]  }
  0x29   :  { %1698 = vmatprep.subr.bf16.mxu0 %v2234_v41  ;;  %v2307_v40 = vld [vmem:[%s3339_s1 + $0x460] ss:$8 sps:$4 sm:$0xff]  }
  0x2a   :  { %v24_v41 = vld [vmem:[%s3340_s0 + $0x8] sm:$0xff] }
  0x2b   :  { %1570 = vmatpush1.bf16.msra.mxu1 %v2236_v42  ;;  %v31_v42 = vld [vmem:[%s3340_s0 + $0x40] sm:$0xff] }
  0x2c   :  { %1699 = vmatpush1.bf16.msra.mxu0 %v2237_v43  ;;  %1571 = vmatprep.subr.bf16.mxu1 %v2238_v44  ;;  %v2312_v43 = vld [vmem:[%s3339_s1 + $0x174] ss:$8 sps:$4 sm:$0xff]   ;;  %v2850_v44 = vsel %vm2689_vm1, %v24_v41, 0  ;;  %v2378_v41 = vld [vmem:[%s3339_s1 + $0x224] ss:$8 sps:$4 sm:$0xff]  }
  0x2d   :  { %1700 = vmatprep.subr.bf16.mxu0 %v2240_v45  ;;  %v2854_v45 = vsel %vm2689_vm1, %v31_v42, 0  ;;  %v2381_v42 = vld [vmem:[%s3339_s1 + $0x524] ss:$8 sps:$4 sm:$0xff]  }
  0x2e   :  { %v1912_v48 = vcombine.high %v2850_v44, %v2854_v45 }
  0x2f   :  { %1572 = vmatpush1.bf16.msra.mxu1 %v2242_v46  ;;  %v27_v46 = vld [vmem:[%s3340_s0 + $0x20] sm:$0xff] }
  0x30   :  { %1701 = vmatpush1.bf16.msra.mxu0 %v2243_v47  ;;  %1573 = vmatprep.subr.bf16.mxu1 %v2244_v51  ;;  %v2315_v47 = vld [vmem:[%s3339_s1 + $0x474] ss:$8 sps:$4 sm:$0xff]   ;;  %v2869_v51 = vsel %vm2689_vm1, %v27_v46, 0  ;;  %v2376_v46 = vld [vmem:[%s3339_s1 + $0x220] ss:$8 sps:$4 sm:$0xff]  }
  0x31   :  { %1702 = vmatprep.subr.bf16.mxu0 %v2246_v55  ;;  %v1918_v54 = vcombine.high %v2869_v51, %v2873_v52  ;;  %v2313_v55 = vld [vmem:[%s3339_s1 + $0x470] ss:$8 sps:$4 sm:$0xff]  }
  0x33   :  { %1574 = vmatpush1.bf16.msra.mxu1 %v2248_v60  ;;  %v2324_v60 = vld [vmem:[%s3339_s1 + $0x194] ss:$8 sps:$4 sm:$0xff]  }
  0x34   :  { %1703 = vmatpush1.bf16.msra.mxu0 %v2249_v62  ;;  %1575 = vmatprep.subr.bf16.mxu1 %v2250_v63  ;;  %v2322_v62 = vld [vmem:[%s3339_s1 + $0x190] ss:$8 sps:$4 sm:$0xff]  }
  0x35   :  { %1704 = vmatprep.subr.bf16.mxu0 %v2252_v0  ;;  %v2325_v63 = vld [vmem:[%s3339_s1 + $0x490] ss:$8 sps:$4 sm:$0xff]   ;;  %v2330_v0 = vld [vmem:[%s3339_s1 + $0x1a4] ss:$8 sps:$4 sm:$0xff]  }
  0x37   :  { %1576 = vmatpush1.bf16.msra.mxu1 %v2254_v1  ;;  %v2333_v1 = vld [vmem:[%s3339_s1 + $0x4a4] ss:$8 sps:$4 sm:$0xff]  }
  0x38   :  { %1705 = vmatpush1.bf16.msra.mxu0 %v2255_v2  ;;  %1577 = vmatprep.subr.bf16.mxu1 %v2256_v3  ;;  %v2328_v2 = vld [vmem:[%s3339_s1 + $0x1a0] ss:$8 sps:$4 sm:$0xff]  }
  0x39   :  { %1706 = vmatprep.subr.bf16.mxu0 %v2258_v4  ;;  %v2331_v3 = vld [vmem:[%s3339_s1 + $0x4a0] ss:$8 sps:$4 sm:$0xff]   ;;  %v2336_v4 = vld [vmem:[%s3339_s1 + $0x1b4] ss:$8 sps:$4 sm:$0xff]  }
  0x3b   :  { %1578 = vmatpush1.bf16.msra.mxu1 %v2260_v5  ;;  %v2339_v5 = vld [vmem:[%s3339_s1 + $0x4b4] ss:$8 sps:$4 sm:$0xff]  }
  0x3c   :  { %1707 = vmatpush1.bf16.msra.mxu0 %v2261_v6  ;;  %1579 = vmatprep.subr.bf16.mxu1 %v2262_v7  ;;  %v2334_v6 = vld [vmem:[%s3339_s1 + $0x1b0] ss:$8 sps:$4 sm:$0xff]  }
  0x3d   :  { %1708 = vmatprep.subr.bf16.mxu0 %v2264_v8  ;;  %v2337_v7 = vld [vmem:[%s3339_s1 + $0x4b0] ss:$8 sps:$4 sm:$0xff]   ;;  %v2342_v8 = vld [vmem:[%s3339_s1 + $0x1c4] ss:$8 sps:$4 sm:$0xff]  }
  0x3f   :  { %1580 = vmatpush1.bf16.msra.mxu1 %v2266_v9  ;;  %v2345_v9 = vld [vmem:[%s3339_s1 + $0x4c4] ss:$8 sps:$4 sm:$0xff]  }
  0x40   :  { %1709 = vmatpush1.bf16.msra.mxu0 %v2267_v10  ;;  %1592 = vmatprep.subr.bf16.mxu1 %v2270_v11  ;;  %v2340_v10 = vld [vmem:[%s3339_s1 + $0x1c0] ss:$8 sps:$4 sm:$0xff]  }
  0x41   :  { %1721 = vmatprep.subr.bf16.mxu0 %v2273_v12  ;;  %v2343_v11 = vld [vmem:[%s3339_s1 + $0x4c0] ss:$8 sps:$4 sm:$0xff]   ;;  %v2348_v12 = vld [vmem:[%s3339_s1 + $0x1d4] ss:$8 sps:$4 sm:$0xff]  }
  0x42   :  { %1582 = vmatmul.mubr.bf16.vlgmr.msra.gmra.mrb[0].mxu1 %v1909_v13  ;;  %v2351_v13 = vld [vmem:[%s3339_s1 + $0x4d4] ss:$8 sps:$4 sm:$0xff]  }
  0x43   :  { %1711 = vmatmul.mubr.bf16.vlgmr.msra.gmra.mrb[0].mxu0 %v1915_v15  ;;  %1593 = vmatpush1.bf16.msra.mxu1 %v2268_v14  ;;  %v2346_v14 = vld [vmem:[%s3339_s1 + $0x1d0] ss:$8 sps:$4 sm:$0xff]  }
  0x44   :  { %1722 = vmatpush1.bf16.msra.mxu0 %v2271_v16  ;;  %1594 = vmatprep.subr.bf16.mxu1 %v2276_v17  ;;  %v2349_v15 = vld [vmem:[%s3339_s1 + $0x4d0] ss:$8 sps:$4 sm:$0xff]   ;;  %v2354_v16 = vld [vmem:[%s3339_s1 + $0x1e4] ss:$8 sps:$4 sm:$0xff]  }
  0x45   :  { %1723 = vmatprep.subr.bf16.mxu0 %v2279_v18  ;;  %1624 = vmatprep.mubr.bf16.mxu1 %v1912_v48  ;;  %v2357_v17 = vld [vmem:[%s3339_s1 + $0x4e4] ss:$8 sps:$4 sm:$0xff]   ;;  %v2352_v18 = vld [vmem:[%s3339_s1 + $0x1e0] ss:$8 sps:$4 sm:$0xff]   ;;  %v2387_v48 = vld [vmem:[%s3339_s1 + $0x534] ss:$8 sps:$4 sm:$0xff]  }
  0x46   :  { %1753 = vmatprep.mubr.bf16.mxu0 %v1918_v54  ;;  %v2388_v54 = vld [vmem:[%s3339_s1 + $0x240] ss:$8 sps:$4 sm:$0xff]  }
  0x47   :  { %1595 = vmatpush1.bf16.msra.mxu1 %v2274_v19  ;;  %v2355_v19 = vld [vmem:[%s3339_s1 + $0x4e0] ss:$8 sps:$4 sm:$0xff]  }
  0x48   :  { %1724 = vmatpush1.bf16.msra.mxu0 %v2277_v20  ;;  %1596 = vmatprep.subr.bf16.mxu1 %v2282_v21  ;;  %v2360_v20 = vld [vmem:[%s3339_s1 + $0x1f4] ss:$8 sps:$4 sm:$0xff]  }
  0x49   :  { %1725 = vmatprep.subr.bf16.mxu0 %v2285_v22  ;;  %v2363_v21 = vld [vmem:[%s3339_s1 + $0x4f4] ss:$8 sps:$4 sm:$0xff]   ;;  %v2358_v22 = vld [vmem:[%s3339_s1 + $0x1f0] ss:$8 sps:$4 sm:$0xff]  }
  0x4b   :  { %1597 = vmatpush1.bf16.msra.mxu1 %v2280_v23  ;;  %v2361_v23 = vld [vmem:[%s3339_s1 + $0x4f0] ss:$8 sps:$4 sm:$0xff]  }
  0x4c   :  { %1726 = vmatpush1.bf16.msra.mxu0 %v2283_v24  ;;  %1598 = vmatprep.subr.bf16.mxu1 %v2288_v25  ;;  %v2366_v24 = vld [vmem:[%s3339_s1 + $0x204] ss:$8 sps:$4 sm:$0xff]  }
  0x4d   :  { %1727 = vmatprep.subr.bf16.mxu0 %v2291_v26  ;;  %v2369_v25 = vld [vmem:[%s3339_s1 + $0x504] ss:$8 sps:$4 sm:$0xff]   ;;  %v1911_v26 = vcombine.low %v2850_v44, %v2854_v45 }
  0x4f   :  { %1599 = vmatpush1.bf16.msra.mxu1 %v2286_v27  ;;  %v2364_v27 = vld [vmem:[%s3339_s1 + $0x200] ss:$8 sps:$4 sm:$0xff]  }
  0x50   :  { %1728 = vmatpush1.bf16.msra.mxu0 %v2289_v28  ;;  %1600 = vmatprep.subr.bf16.mxu1 %v2294_v29  ;;  %v1917_v28 = vcombine.low %v2869_v51, %v2873_v52  ;;  %v2367_v29 = vld [vmem:[%s3339_s1 + $0x500] ss:$8 sps:$4 sm:$0xff]   ;;  %v2385_v51 = vld [vmem:[%s3339_s1 + $0x530] ss:$8 sps:$4 sm:$0xff]   ;;  %v2390_v52 = vld [vmem:[%s3339_s1 + $0x244] ss:$8 sps:$4 sm:$0xff]  }
  0x51   :  { %1729 = vmatprep.subr.bf16.mxu0 %v2297_v30  ;;  %v2372_v30 = vld [vmem:[%s3339_s1 + $0x214] ss:$8 sps:$4 sm:$0xff]  }
  0x53   :  { %1601 = vmatpush1.bf16.msra.mxu1 %v2292_v31  ;;  %v2375_v31 = vld [vmem:[%s3339_s1 + $0x514] ss:$8 sps:$4 sm:$0xff]  }
  0x54   :  { %1730 = vmatpush1.bf16.msra.mxu0 %v2295_v32  ;;  %1602 = vmatprep.subr.bf16.mxu1 %v2300_v33  ;;  %v2370_v32 = vld [vmem:[%s3339_s1 + $0x210] ss:$8 sps:$4 sm:$0xff]  }
  0x55   :  { %1731 = vmatprep.subr.bf16.mxu0 %v2303_v34  ;;  %v2373_v33 = vld [vmem:[%s3339_s1 + $0x510] ss:$8 sps:$4 sm:$0xff]  }
  0x56   :  { %v25_v34 = vld [vmem:[%s3340_s0 + $0x10] sm:$0xff] }
  0x57   :  { %1603 = vmatpush1.bf16.msra.mxu1 %v2298_v35  ;;  %v32_v35 = vld [vmem:[%s3340_s0 + $0x48] sm:$0xff] }
  0x58   :  { %1732 = vmatpush1.bf16.msra.mxu0 %v2301_v36  ;;  %1604 = vmatprep.subr.bf16.mxu1 %v2306_v37  ;;  %v28_v36 = vld [vmem:[%s3340_s0 + $0x28] sm:$0xff]  ;;  %v3018_v37 = vsel %vm2689_vm1, %v25_v34, 0 }
  0x59   :  { %1733 = vmatprep.subr.bf16.mxu0 %v2309_v38  ;;  %v3022_v38 = vsel %vm2689_vm1, %v32_v35, 0  ;;  %v2451_v34 = vld [vmem:[%s3339_s1 + $0x5e0] ss:$8 sps:$4 sm:$0xff]   ;;  %v2456_v35 = vld [vmem:[%s3339_s1 + $0x2f4] ss:$8 sps:$4 sm:$0xff]  }
  0x5b   :  { %1605 = vmatpush1.bf16.msra.mxu1 %v2304_v39  ;;  %v35_v39 = vld [vmem:[%s3340_s0 + $0x60] sm:$0xff] }
  0x5c   :  { %1734 = vmatpush1.bf16.msra.mxu0 %v2307_v40  ;;  %1606 = vmatprep.subr.bf16.mxu1 %v2312_v43  ;;  %v3029_v40 = vsel %vm2689_vm1, %v28_v36, 0  ;;  %v1914_v43 = vcombine.high %v3018_v37, %v3022_v38  ;;  %v3041_v44 = vsel %vm2689_vm1, %v35_v39, 0  ;;  %v2459_v36 = vld [vmem:[%s3339_s1 + $0x5f4] ss:$8 sps:$4 sm:$0xff]  }
  0x5d   :  { %1735 = vmatprep.subr.bf16.mxu0 %v2315_v47  ;;  %v1920_v45 = vcombine.high %v3029_v40, %v3041_v44  ;;  %v2379_v47 = vld [vmem:[%s3339_s1 + $0x520] ss:$8 sps:$4 sm:$0xff]   ;;  %v29_v39 = vld [vmem:[%s3340_s0 + $0x30] sm:$0xff] }
  0x5f   :  { %1607 = vmatpush1.bf16.msra.mxu1 %v2310_v53  ;;  %v2393_v53 = vld [vmem:[%s3339_s1 + $0x544] ss:$8 sps:$4 sm:$0xff]  }
  0x60   :  { %1736 = vmatpush1.bf16.msra.mxu0 %v2313_v55  ;;  %1608 = vmatprep.subr.bf16.mxu1 %v2318_v56  ;;  %v2391_v55 = vld [vmem:[%s3339_s1 + $0x540] ss:$8 sps:$4 sm:$0xff]   ;;  %v2396_v56 = vld [vmem:[%s3339_s1 + $0x254] ss:$8 sps:$4 sm:$0xff]  }
  0x61   :  { %1737 = vmatprep.subr.bf16.mxu0 %v2321_v57  ;;  %v2399_v57 = vld [vmem:[%s3339_s1 + $0x554] ss:$8 sps:$4 sm:$0xff]  }
  0x63   :  { %1609 = vmatpush1.bf16.msra.mxu1 %v2316_v58  ;;  %v2394_v58 = vld [vmem:[%s3339_s1 + $0x250] ss:$8 sps:$4 sm:$0xff]  }
  0x64   :  { %1738 = vmatpush1.bf16.msra.mxu0 %v2319_v59  ;;  %1610 = vmatprep.subr.bf16.mxu1 %v2324_v60  ;;  %v2397_v59 = vld [vmem:[%s3339_s1 + $0x550] ss:$8 sps:$4 sm:$0xff]   ;;  %v2402_v60 = vld [vmem:[%s3339_s1 + $0x264] ss:$8 sps:$4 sm:$0xff]  }
  0x65   :  { %1739 = vmatprep.subr.bf16.mxu0 %v2327_v61  ;;  %v2405_v61 = vld [vmem:[%s3339_s1 + $0x564] ss:$8 sps:$4 sm:$0xff]  }
  0x67   :  { %1611 = vmatpush1.bf16.msra.mxu1 %v2322_v62  ;;  %v2400_v62 = vld [vmem:[%s3339_s1 + $0x260] ss:$8 sps:$4 sm:$0xff]  }
  0x68   :  { %1740 = vmatpush1.bf16.msra.mxu0 %v2325_v63  ;;  %1612 = vmatprep.subr.bf16.mxu1 %v2330_v0  ;;  %v2403_v63 = vld [vmem:[%s3339_s1 + $0x560] ss:$8 sps:$4 sm:$0xff]   ;;  %v2408_v0 = vld [vmem:[%s3339_s1 + $0x274] ss:$8 sps:$4 sm:$0xff]  }
  0x69   :  { %1741 = vmatprep.subr.bf16.mxu0 %v2333_v1  ;;  %v2411_v1 = vld [vmem:[%s3339_s1 + $0x574] ss:$8 sps:$4 sm:$0xff]  }
  0x6b   :  { %1613 = vmatpush1.bf16.msra.mxu1 %v2328_v2  ;;  %v2406_v2 = vld [vmem:[%s3339_s1 + $0x270] ss:$8 sps:$4 sm:$0xff]  }
  0x6c   :  { %1742 = vmatpush1.bf16.msra.mxu0 %v2331_v3  ;;  %1614 = vmatprep.subr.bf16.mxu1 %v2336_v4  ;;  %v2409_v3 = vld [vmem:[%s3339_s1 + $0x570] ss:$8 sps:$4 sm:$0xff]   ;;  %v2414_v4 = vld [vmem:[%s3339_s1 + $0x284] ss:$8 sps:$4 sm:$0xff]  }
  0x6d   :  { %1743 = vmatprep.subr.bf16.mxu0 %v2339_v5  ;;  %v2417_v5 = vld [vmem:[%s3339_s1 + $0x584] ss:$8 sps:$4 sm:$0xff]  }
  0x6f   :  { %1615 = vmatpush1.bf16.msra.mxu1 %v2334_v6  ;;  %v2412_v6 = vld [vmem:[%s3339_s1 + $0x280] ss:$8 sps:$4 sm:$0xff]  }
  0x70   :  { %1744 = vmatpush1.bf16.msra.mxu0 %v2337_v7  ;;  %1616 = vmatprep.subr.bf16.mxu1 %v2342_v8  ;;  %v2415_v7 = vld [vmem:[%s3339_s1 + $0x580] ss:$8 sps:$4 sm:$0xff]   ;;  %v2420_v8 = vld [vmem:[%s3339_s1 + $0x294] ss:$8 sps:$4 sm:$0xff]  }
  0x71   :  { %1745 = vmatprep.subr.bf16.mxu0 %v2345_v9  ;;  %v2423_v9 = vld [vmem:[%s3339_s1 + $0x594] ss:$8 sps:$4 sm:$0xff]  }
  0x73   :  { %1617 = vmatpush1.bf16.msra.mxu1 %v2340_v10  ;;  %v2418_v10 = vld [vmem:[%s3339_s1 + $0x290] ss:$8 sps:$4 sm:$0xff]  }
  0x74   :  { %1746 = vmatpush1.bf16.msra.mxu0 %v2343_v11  ;;  %1618 = vmatprep.subr.bf16.mxu1 %v2348_v12  ;;  %v2421_v11 = vld [vmem:[%s3339_s1 + $0x590] ss:$8 sps:$4 sm:$0xff]   ;;  %v2426_v12 = vld [vmem:[%s3339_s1 + $0x2a4] ss:$8 sps:$4 sm:$0xff]  }
  0x75   :  { %1747 = vmatprep.subr.bf16.mxu0 %v2351_v13  ;;  %v2429_v13 = vld [vmem:[%s3339_s1 + $0x5a4] ss:$8 sps:$4 sm:$0xff]  }
  0x77   :  { %1619 = vmatpush1.bf16.msra.mxu1 %v2346_v14  ;;  %v2424_v14 = vld [vmem:[%s3339_s1 + $0x2a0] ss:$8 sps:$4 sm:$0xff]  }
  0x78   :  { %1748 = vmatpush1.bf16.msra.mxu0 %v2349_v15  ;;  %1620 = vmatprep.subr.bf16.mxu1 %v2354_v16  ;;  %v2427_v15 = vld [vmem:[%s3339_s1 + $0x5a0] ss:$8 sps:$4 sm:$0xff]   ;;  %v2432_v16 = vld [vmem:[%s3339_s1 + $0x2b4] ss:$8 sps:$4 sm:$0xff]  }
  0x79   :  { %1749 = vmatprep.subr.bf16.mxu0 %v2357_v17  ;;  %v2435_v17 = vld [vmem:[%s3339_s1 + $0x5b4] ss:$8 sps:$4 sm:$0xff]  }
  0x7b   :  { %1621 = vmatpush1.bf16.msra.mxu1 %v2352_v18  ;;  %v37_v18 = vlaneseq }
  0x7c   :  { %1750 = vmatpush1.bf16.msra.mxu0 %v2355_v19  ;;  %1622 = vmatprep.subr.bf16.mxu1 %v2360_v20  ;;  %v2430_v19 = vld [vmem:[%s3339_s1 + $0x2b0] ss:$8 sps:$4 sm:$0xff]  }
  0x7d   :  { %1751 = vmatprep.subr.bf16.mxu0 %v2363_v21  ;;  %v2433_v20 = vld [vmem:[%s3339_s1 + $0x5b0] ss:$8 sps:$4 sm:$0xff]   ;;  %v2438_v21 = vld [vmem:[%s3339_s1 + $0x2c4] ss:$8 sps:$4 sm:$0xff]  }
  0x7f   :  { %1623 = vmatpush1.bf16.msra.mxu1 %v2358_v22  ;;  %v2441_v22 = vld [vmem:[%s3339_s1 + $0x5c4] ss:$8 sps:$4 sm:$0xff]  }
  0x80   :  { %1752 = vmatpush1.bf16.msra.mxu0 %v2361_v23  ;;  %1635 = vmatprep.subr.bf16.mxu1 %v2366_v24  ;;  %v38_v23 = vand.u32 127, %v37_v18  ;;  %v2436_v24 = vld [vmem:[%s3339_s1 + $0x2c0] ss:$8 sps:$4 sm:$0xff]  }
  0x81   :  { %1764 = vmatprep.subr.bf16.mxu0 %v2369_v25  ;;  %v2439_v25 = vld [vmem:[%s3339_s1 + $0x5c0] ss:$8 sps:$4 sm:$0xff]  }
  0x82   :  { %1625 = vmatmul.mubr.bf16.vlgmr.msra.gmra.mrb[0].mxu1 %v1911_v26  ;;  %v2444_v26 = vld [vmem:[%s3339_s1 + $0x2d4] ss:$8 sps:$4 sm:$0xff]  }
  0x83   :  { %1754 = vmatmul.mubr.bf16.vlgmr.msra.gmra.mrb[0].mxu0 %v1917_v28  ;;  %1636 = vmatpush1.bf16.msra.mxu1 %v2364_v27  ;;  %v2447_v27 = vld [vmem:[%s3339_s1 + $0x5d4] ss:$8 sps:$4 sm:$0xff]   ;;  %v51_v28 = vadd.s32 1664, %v38_v23 }
  0x84   :  { %1765 = vmatpush1.bf16.msra.mxu0 %v2367_v29  ;;  %1637 = vmatprep.subr.bf16.mxu1 %v2372_v30  ;;  %v2442_v29 = vld [vmem:[%s3339_s1 + $0x2d0] ss:$8 sps:$4 sm:$0xff]  }
  0x85   :  { %1766 = vmatprep.subr.bf16.mxu0 %v2375_v31  ;;  %1667 = vmatprep.mubr.bf16.mxu1 %v1914_v43  ;;  %v2445_v30 = vld [vmem:[%s3339_s1 + $0x5d0] ss:$8 sps:$4 sm:$0xff]   ;;  %v2450_v31 = vld [vmem:[%s3339_s1 + $0x2e4] ss:$8 sps:$4 sm:$0xff]   ;;  %vm81_vm2 = vcmp.lt.s32.totalorder %v51_v28, 1710 }
  0x86   :  { %1796 = vmatprep.mubr.bf16.mxu0 %v1920_v45  ;;  %vm116_vm3 = vmpackc.low %vm81_vm2, %vm2516_vm0  ;;  %v2457_v43 = vld [vmem:[%s3339_s1 + $0x5f0] ss:$8 sps:$4 sm:$0xff]   ;;  %v2462_v45 = vld [vmem:[%s3339_s1 + $0x604] ss:$8 sps:$4 sm:$0xff]  }
  0x87   :  { %1638 = vmatpush1.bf16.msra.mxu1 %v2370_v32  ;;  %v2453_v32 = vld [vmem:[%s3339_s1 + $0x5e4] ss:$8 sps:$4 sm:$0xff]  }
  0x88   :  { %1767 = vmatpush1.bf16.msra.mxu0 %v2373_v33  ;;  %1639 = vmatprep.subr.bf16.mxu1 %v2378_v41  ;;  %v2448_v33 = vld [vmem:[%s3339_s1 + $0x2e0] ss:$8 sps:$4 sm:$0xff]  }
  0x89   :  { %1768 = vmatprep.subr.bf16.mxu0 %v2381_v42  ;;  %v36_v41 = vld [vmem:[%s3340_s0 + $0x68] sm:$0xff]  ;;  %v2454_v42 = vld [vmem:[%s3339_s1 + $0x2f0] ss:$8 sps:$4 sm:$0xff]  }
  0x8b   :  { %1640 = vmatpush1.bf16.msra.mxu1 %v2376_v46  ;;  %v3218_v46 = vsel %vm116_vm3, %v29_v39, 0 }
  0x8c   :  { %1769 = vmatpush1.bf16.msra.mxu0 %v2379_v47  ;;  %1641 = vmatprep.subr.bf16.mxu1 %v2384_v50  ;;  %v3220_v47 = vsel %vm116_vm3, %v36_v41, 0  ;;  %v1913_v50 = vcombine.low %v3018_v37, %v3022_v38  ;;  %v2463_v37 = vld [vmem:[%s3339_s1 + $0x610] ss:$8 sps:$4 sm:$0xff]   ;;  %v2468_v38 = vld [vmem:[%s3339_s1 + $0x624] ss:$8 sps:$4 sm:$0xff]  }
  0x8d   :  { %1770 = vmatprep.subr.bf16.mxu0 %v2387_v48  ;;  %v1919_v48 = vcombine.low %v3029_v40, %v3041_v44  ;;  %v2466_v40 = vld [vmem:[%s3339_s1 + $0x620] ss:$8 sps:$4 sm:$0xff]   ;;  %v2471_v44 = vld [vmem:[%s3339_s1 + $0x634] ss:$8 sps:$4 sm:$0xff]  }
  0x8f   :  { %1642 = vmatpush1.bf16.msra.mxu1 %v2382_v49  ;;  %v2460_v49 = vld [vmem:[%s3339_s1 + $0x600] ss:$8 sps:$4 sm:$0xff]  }
  0x90   :  { %1771 = vmatpush1.bf16.msra.mxu0 %v2385_v51  ;;  %1643 = vmatprep.subr.bf16.mxu1 %v2390_v52  ;;  %v1922_v51 = vcombine.high %v3218_v46, %v3220_v47  ;;  %v2465_v52 = vld [vmem:[%s3339_s1 + $0x614] ss:$8 sps:$4 sm:$0xff]  }
  0x91   :  { %1772 = vmatprep.subr.bf16.mxu0 %v2393_v53  ;;  %v2469_v53 = vld [vmem:[%s3339_s1 + $0x630] ss:$8 sps:$4 sm:$0xff]  }
  0x93   :  { %1644 = vmatpush1.bf16.msra.mxu1 %v2388_v54  ;;  %v2474_v54 = vld [vmem:[%s3339_s1 + $0x644] ss:$8 sps:$4 sm:$0xff]  }
  0x94   :  { %1773 = vmatpush1.bf16.msra.mxu0 %v2391_v55  ;;  %1645 = vmatprep.subr.bf16.mxu1 %v2396_v56  ;;  %v2472_v55 = vld [vmem:[%s3339_s1 + $0x640] ss:$8 sps:$4 sm:$0xff]   ;;  %v2477_v56 = vld [vmem:[%s3339_s1 + $0x654] ss:$8 sps:$4 sm:$0xff]  }
  0x95   :  { %1774 = vmatprep.subr.bf16.mxu0 %v2399_v57  ;;  %v2475_v57 = vld [vmem:[%s3339_s1 + $0x650] ss:$8 sps:$4 sm:$0xff]  }
  0x97   :  { %1646 = vmatpush1.bf16.msra.mxu1 %v2394_v58  ;;  %v2480_v58 = vld [vmem:[%s3339_s1 + $0x664] ss:$8 sps:$4 sm:$0xff]  }
  0x98   :  { %1775 = vmatpush1.bf16.msra.mxu0 %v2397_v59  ;;  %1647 = vmatprep.subr.bf16.mxu1 %v2402_v60  ;;  %v2478_v59 = vld [vmem:[%s3339_s1 + $0x660] ss:$8 sps:$4 sm:$0xff]   ;;  %v2483_v60 = vld [vmem:[%s3339_s1 + $0x674] ss:$8 sps:$4 sm:$0xff]  }
  0x99   :  { %1776 = vmatprep.subr.bf16.mxu0 %v2405_v61  ;;  %v2481_v61 = vld [vmem:[%s3339_s1 + $0x670] ss:$8 sps:$4 sm:$0xff]  }
  0x9b   :  { %1648 = vmatpush1.bf16.msra.mxu1 %v2400_v62  ;;  %v2486_v62 = vld [vmem:[%s3339_s1 + $0x684] ss:$8 sps:$4 sm:$0xff]  }
  0x9c   :  { %1777 = vmatpush1.bf16.msra.mxu0 %v2403_v63  ;;  %1649 = vmatprep.subr.bf16.mxu1 %v2408_v0  ;;  %v2484_v63 = vld [vmem:[%s3339_s1 + $0x680] ss:$8 sps:$4 sm:$0xff]   ;;  %v2489_v0 = vld [vmem:[%s3339_s1 + $0x694] ss:$8 sps:$4 sm:$0xff]  }
  0x9d   :  { %1778 = vmatprep.subr.bf16.mxu0 %v2411_v1  ;;  %v2487_v1 = vld [vmem:[%s3339_s1 + $0x690] ss:$8 sps:$4 sm:$0xff]  }
  0x9f   :  { %1650 = vmatpush1.bf16.msra.mxu1 %v2406_v2  ;;  %v2492_v2 = vld [vmem:[%s3339_s1 + $0x6a4] ss:$8 sps:$4 sm:$0xff]  }
  0xa0   :  { %1779 = vmatpush1.bf16.msra.mxu0 %v2409_v3  ;;  %1651 = vmatprep.subr.bf16.mxu1 %v2414_v4  ;;  %v2490_v3 = vld [vmem:[%s3339_s1 + $0x6a0] ss:$8 sps:$4 sm:$0xff]   ;;  %v2495_v4 = vld [vmem:[%s3339_s1 + $0x6b4] ss:$8 sps:$4 sm:$0xff]  }
  0xa1   :  { %1780 = vmatprep.subr.bf16.mxu0 %v2417_v5  ;;  %v2493_v5 = vld [vmem:[%s3339_s1 + $0x6b0] ss:$8 sps:$4 sm:$0xff]  }
  0xa3   :  { %1652 = vmatpush1.bf16.msra.mxu1 %v2412_v6  ;;  %v2498_v6 = vld [vmem:[%s3339_s1 + $0x6c4] ss:$8 sps:$4 sm:$0xff]  }
  0xa4   :  { %1781 = vmatpush1.bf16.msra.mxu0 %v2415_v7  ;;  %1653 = vmatprep.subr.bf16.mxu1 %v2420_v8  ;;  %v2496_v7 = vld [vmem:[%s3339_s1 + $0x6c0] ss:$8 sps:$4 sm:$0xff]   ;;  %v2501_v8 = vld [vmem:[%s3339_s1 + $0x6d4] ss:$8 sps:$4 sm:$0xff]  }
  0xa5   :  { %1782 = vmatprep.subr.bf16.mxu0 %v2423_v9  ;;  %v2499_v9 = vld [vmem:[%s3339_s1 + $0x6d0] ss:$8 sps:$4 sm:$0xff]  }
  0xa7   :  { %1654 = vmatpush1.bf16.msra.mxu1 %v2418_v10  ;;  %v2504_v10 = vld [vmem:[%s3339_s1 + $0x6e4] ss:$8 sps:$4 sm:$0xff]  }
  0xa8   :  { %1783 = vmatpush1.bf16.msra.mxu0 %v2421_v11  ;;  %1655 = vmatprep.subr.bf16.mxu1 %v2426_v12  ;;  %v2502_v11 = vld [vmem:[%s3339_s1 + $0x6e0] ss:$8 sps:$4 sm:$0xff]   ;;  %v2507_v12 = vld [vmem:[%s3339_s1 + $0x6f4] ss:$8 sps:$4 sm:$0xff]  }
  0xa9   :  { %1784 = vmatprep.subr.bf16.mxu0 %v2429_v13  ;;  %v2505_v13 = vld [vmem:[%s3339_s1 + $0x6f0] ss:$8 sps:$4 sm:$0xff]  }
  0xab   :  { %1656 = vmatpush1.bf16.msra.mxu1 %v2424_v14  ;;  %v1921_v14 = vcombine.low %v3218_v46, %v3220_v47 }
  0xac   :  { %1785 = vmatpush1.bf16.msra.mxu0 %v2427_v15  ;;  %1657 = vmatprep.subr.bf16.mxu1 %v2432_v16 }
  0xad   :  { %1786 = vmatprep.subr.bf16.mxu0 %v2435_v17 }
  0xaf   :  { %1658 = vmatpush1.bf16.msra.mxu1 %v2430_v19 }
  0xb0   :  { %1787 = vmatpush1.bf16.msra.mxu0 %v2433_v20  ;;  %1659 = vmatprep.subr.bf16.mxu1 %v2438_v21  ;;  %v1868_v20 = vshrl.u32 %v37_v18, 7 }
  0xb1   :  { %1788 = vmatprep.subr.bf16.mxu0 %v2441_v22  ;;  %v1865_v22 = vld [vmem:[%s3341_s2] sm:$0x3] }
  0xb2   :  { %v1869_v21 = vsub.s32 0, %v1868_v20  ;;  %v1873_v23 = vsub.s32 1, %v1868_v20 }
  0xb3   :  { %1660 = vmatpush1.bf16.msra.mxu1 %v2436_v24 }
  0xb4   :  { %1789 = vmatpush1.bf16.msra.mxu0 %v2439_v25  ;;  %1661 = vmatprep.subr.bf16.mxu1 %v2444_v26  ;;  %v1870_v24 = vrot.slane %v1865_v22, %v1869_v21  ;;  %v1874_v26 = vrot.slane %v1865_v22, %v1873_v23 }
  0xb5   :  { %1790 = vmatprep.subr.bf16.mxu0 %v2447_v27 }
  0xb7   :  { %1662 = vmatpush1.bf16.msra.mxu1 %v2442_v29 }
  0xb8   :  { %1791 = vmatpush1.bf16.msra.mxu0 %v2445_v30  ;;  %1663 = vmatprep.subr.bf16.mxu1 %v2450_v31 }
  0xb9   :  { %1792 = vmatprep.subr.bf16.mxu0 %v2453_v32 }
  0xbb   :  { %1664 = vmatpush1.bf16.msra.mxu1 %v2448_v33 }
  0xbc   :  { %1793 = vmatpush1.bf16.msra.mxu0 %v2451_v34  ;;  %1665 = vmatprep.subr.bf16.mxu1 %v2456_v35 }
  0xbd   :  { %1794 = vmatprep.subr.bf16.mxu0 %v2459_v36 }
  0xbf   :  { %1666 = vmatpush1.bf16.msra.mxu1 %v2454_v42 }
  0xc0   :  { %1795 = vmatpush1.bf16.msra.mxu0 %v2457_v43 }
  0xc1   :  { %1807 = vmatprep.subr.bf16.mxu0 %v2462_v45 }
  0xc2   :  { %1668 = vmatmul.mubr.bf16.vlgmr.msra.gmra.mrb[0].mxu1 %v1913_v50 }
  0xc3   :  { %1797 = vmatmul.mubr.bf16.vlgmr.msra.gmra.mrb[0].mxu0 %v1919_v48 }
  0xc4   :  { %1808 = vmatpush1.bf16.msra.mxu0 %v2460_v49  ;;  %1839 = vmatprep.mubr.bf16.mxu0 %v1922_v51 }
  0xc5   :  { %1809 = vmatprep.subr.bf16.mxu0 %v2465_v52 }
  0xc8   :  { %1810 = vmatpush1.bf16.msra.mxu0 %v2463_v37 }
  0xc9   :  { %1811 = vmatprep.subr.bf16.mxu0 %v2468_v38 }
  0xcc   :  { %1812 = vmatpush1.bf16.msra.mxu0 %v2466_v40 }
  0xcd   :  { %1813 = vmatprep.subr.bf16.mxu0 %v2471_v44 }
  0xd0   :  { %1814 = vmatpush1.bf16.msra.mxu0 %v2469_v53 }
  0xd1   :  { %1815 = vmatprep.subr.bf16.mxu0 %v2474_v54 }
  0xd4   :  { %1816 = vmatpush1.bf16.msra.mxu0 %v2472_v55 }
  0xd5   :  { %1817 = vmatprep.subr.bf16.mxu0 %v2477_v56 }
  0xd8   :  { %1818 = vmatpush1.bf16.msra.mxu0 %v2475_v57 }
  0xd9   :  { %1819 = vmatprep.subr.bf16.mxu0 %v2480_v58 }
  0xdc   :  { %1820 = vmatpush1.bf16.msra.mxu0 %v2478_v59 }
  0xdd   :  { %1821 = vmatprep.subr.bf16.mxu0 %v2483_v60 }
  0xe0   :  { %1822 = vmatpush1.bf16.msra.mxu0 %v2481_v61 }
  0xe1   :  { %1823 = vmatprep.subr.bf16.mxu0 %v2486_v62 }
  0xe4   :  { %1824 = vmatpush1.bf16.msra.mxu0 %v2484_v63 }
  0xe5   :  { %1825 = vmatprep.subr.bf16.mxu0 %v2489_v0 }
  0xe8   :  { %1826 = vmatpush1.bf16.msra.mxu0 %v2487_v1 }
  0xe9   :  { %1827 = vmatprep.subr.bf16.mxu0 %v2492_v2 }
  0xec   :  { %1828 = vmatpush1.bf16.msra.mxu0 %v2490_v3 }
  0xed   :  { %1829 = vmatprep.subr.bf16.mxu0 %v2495_v4 }
  0xf0   :  { %1830 = vmatpush1.bf16.msra.mxu0 %v2493_v5 }
  0xf1   :  { %1831 = vmatprep.subr.bf16.mxu0 %v2498_v6 }
  0xf4   :  { %1832 = vmatpush1.bf16.msra.mxu0 %v2496_v7 }
  0xf5   :  { %1833 = vmatprep.subr.bf16.mxu0 %v2501_v8 }
  0xf8   :  { %1834 = vmatpush1.bf16.msra.mxu0 %v2499_v9 }
  0xf9   :  { %1835 = vmatprep.subr.bf16.mxu0 %v2504_v10 }
  0xfc   :  { %1836 = vmatpush1.bf16.msra.mxu0 %v2502_v11 }
  0xfd   :  { %1837 = vmatprep.subr.bf16.mxu0 %v2507_v12 }
 0x100   :  { %1838 = vmatpush1.bf16.msra.mxu0 %v2505_v13 }
 0x103   :  { %1840 = vmatmul.mubr.bf16.vlgmr.msra.gmra.mrb[0].mxu0 %v1921_v14 }
 0x195   :  { %v1669_v15 = vpop.f32.mrb[0].mxu1 }
 0x196   :  { %v1671_v16 = vpop.f32.mrb[1].mxu1 }
 0x197   :  { %v1673_v17 = vpop.f32.mrb[2].mxu1 }
 0x198   :  { %v1675_v19 = vpop.f32.mrb[3].mxu1 }
 0x1d6   :  { %v1841_v25 = vpop.f32.mrb[0].mxu0 }
 0x1d7   :  { %v2147_v27 = vadd.f32 %v1841_v25, %v1669_v15  ;;  %v1843_v28 = vpop.f32.mrb[1].mxu0 }
 0x1d8   :  { %v2148_v29 = vadd.f32 %v1843_v28, %v1671_v16  ;;  %v1845_v30 = vpop.f32.mrb[2].mxu0 }
 0x1d9   :  { %v1877_v31 = vadd.f32 %v2147_v27, %v1870_v24  ;;  %v2149_v32 = vadd.f32 %v1845_v30, %v1673_v17  ;;  %v1847_v33 = vpop.f32.mrb[3].mxu0 }
 0x1da   :  { %v1878_v34 = vadd.f32 %v2148_v29, %v1874_v26  ;;  %v2150_v35 = vadd.f32 %v1847_v33, %v1675_v19 }
 0x1db   :  { %v1885_v36 = vmul.f32 0.70710677, %v1877_v31  ;;  %v1879_v18 = vadd.f32 %v2149_v32, %v1870_v24  ;;  %v1881_v47 = vmul.f32 0.5, %v1877_v31 }
 0x1dc   :  { %v1886_v39 = vmul.f32 0.70710677, %v1878_v34  ;;  %v1880_v41 = vadd.f32 %v2150_v35, %v1874_v26  ;;  %v1882_v49 = vmul.f32 0.5, %v1878_v34 }
 0x1dd   :  { %2508 = verf.f32 %v1885_v36  ;;  %v1887_v42 = vmul.f32 0.70710677, %v1879_v18  ;;  %v1883_v38 = vmul.f32 0.5, %v1879_v18 }
 0x1de   :  { %2510 = verf.f32 %v1886_v39  ;;  %v1888_v43 = vmul.f32 0.70710677, %v1880_v41  ;;  %v1884_v53 = vmul.f32 0.5, %v1880_v41 }
 0x1df   :  { %2512 = verf.f32 %v1887_v42 }
 0x1e0   :  { %2514 = verf.f32 %v1888_v43 }
 0x1e7   :  { %v2509_v45 = vpop.eup %2508 }
 0x1e8   :  { %v2511_v46 = vpop.eup %2510  ;;  %v1893_v50 = vadd.f32 1.0, %v2509_v45 }
 0x1e9   :  { %v2513_v48 = vpop.eup %2512  ;;  %v1894_v51 = vadd.f32 1.0, %v2511_v46 }
 0x1ea   :  { %v2515_v52 = vpop.eup %2514  ;;  %v1897_v37 = vmul.f32 %v1893_v50, %v1881_v47  ;;  %v1895_v40 = vadd.f32 1.0, %v2513_v48 }
 0x1eb   :  { %v1898_v44 = vmul.f32 %v1894_v51, %v1882_v49  ;;  %v1896_v54 = vadd.f32 1.0, %v2515_v52 }
 0x1ec   :  { %1901 = vst [vmem:[%s3342_s3] sm:$0xff] %v1897_v37  ;;  %v1899_v55 = vmul.f32 %v1895_v40, %v1883_v38 }
 0x1ed   :  { %1902 = vst [vmem:[%s3342_s3 + $0x8] sm:$0xff] %v1898_v44  ;;  %v1900_v56 = vmul.f32 %v1896_v54, %v1884_v53 }
 0x1ee   :  { %1903 = vst [vmem:[%s3342_s3 + $0x10] sm:$0xff] %v1899_v55 }
 0x1ef   :  { %1904 = vst [vmem:[%s3342_s3 + $0x18] sm:$0xff] %v1900_v56 }

</bundles_post_ra>
